<compile_context>
chip_gen: v5e
topology: v5e:2x2
jax: 0.10.0
libtpu: 0.0.40
codegen_flags: <defaults>
</compile_context>

<pallas_src>
from functools import partial
import math

import jax
import jax.numpy as jnp
from jax.experimental import pallas as pl
from jax.experimental.pallas import tpu as pltpu


# ----------------------------- tap ordering -------------------------------- #
def _dx_order(m, n):
    """kw taps with the n center columns first (nonzero for every kernel row),
    outer columns after (nonzero only for the n center kernel rows)."""
    off = (m - n) // 2
    center = list(range(off, off + n))
    outer = [d for d in range(m) if d < off or d >= off + n]
    return tuple(center + outer)


# ----------------------------- Pallas kernel ------------------------------- #
def _plk_conv_kernel(xp_ref, w_ref, b_ref, o_ref, cols_ref, acc_ref,
                     *, m, n, W, strip_h, dx_order):
    """One (batch, H-strip) tile per grid step.

    xp_ref   : (1, Hp, Wp, C) bf16     whole padded image of this batch element
                                       (block index depends only on batch -> stays
                                       VMEM-resident across the strip axis)
    w_ref    : (m, m*C, C)    bf16     per-kernel-row flattened weights, K axis ordered
                                       [center kw taps | outer kw taps] x Cin
    b_ref    : (1, C)         f32      fused bias (b_mn + b_nm + b_nn)
    o_ref    : (1, strip_h, W, C)      output strip
    cols_ref : (strip_h+m-1, W, m*C)   bf16 VMEM scratch — kw-im2col slab for this strip
    acc_ref  : (strip_h*W, C) f32      VMEM scratch accumulator
    """
    C = o_ref.shape[3]
    rows = strip_h + m - 1
    off = (m - n) // 2

    r0 = pl.multiple_of(pl.program_id(1) * strip_h, strip_h)

    # Build the kw-im2col slab once per strip (m shifted window copies). Only the
    # sublane (kw) offset and the lane destination change; every kernel row below
    # re-reads this slab with leading-dim-only slices (no relayout).
    for j, dx in enumerate(dx_order):
        cols_ref[:, :, j * C:(j + 1) * C] = xp_ref[0, pl.ds(r0, rows), dx:dx + W, :]

    # Accumulator initialized with the fused bias (saves the epilogue add).
    acc_ref[...] = jnp.broadcast_to(b_ref[...], (strip_h * W, C))

    # One MXU matmul per kernel row; K = (#active kw taps) * C.
    # Rows outside the center band only see the n center kw taps (structural sparsity
    # of the (m x n) U (n x m) cross) -> K shrinks from m*C to n*C via a prefix slice.
    for dy in range(m):
        kk = (m if off <= dy < off + n else n) * C
        patch = cols_ref[dy:dy + strip_h, :, :kk].reshape(strip_h * W, kk)
        acc_ref[...] += jnp.dot(patch, w_ref[dy, :kk, :],
                                preferred_element_type=jnp.float32)

    o_ref[0] = acc_ref[...].reshape(strip_h, W, C).astype(o_ref.dtype)


# ------------------------- strip-height selection --------------------------- #
def _pick_strip_h(H, W, dim, m, budget_bytes=6 << 20):
    """Largest divisor of H whose strip-dependent VMEM footprint fits the budget.

    Bigger strips amortize the (m-1)-row halo recopy of the im2col slab and the
    per-grid-step overhead, and enlarge the matmul M dim."""
    for s in range(H, 0, -1):
        if H % s:
            continue
        rows = s + m - 1
        need = (rows * W * m * dim * 2      # bf16 im2col slab
                + s * W * dim * 4           # f32 accumulator
                + 2 * s * W * dim * 4)      # double-buffered output block
        if need <= budget_bytes or s == 1:
            return s
    return 1


# ------------------------------- wrapper ------------------------------------ #
def rect_sparse_plk_conv2d(x_nchw, w_rows, b_comb, *, m, n, dim, strip_h=None):
    """Forward pass of RectSparsePLKConv2d (eval semantics).

    x_nchw : (N, C_total, H, W) float32, PyTorch layout.
    w_rows : (m, m*dim, dim) per-kernel-row flattened combined weight (build_row_weights).
    b_comb : (dim,) fused bias.
    """
    N, C_total, H, W = x_nchw.shape
    assert C_total >= dim
    assert m % 2 == 1 and n % 2 == 1, "odd kernels required for exact 'same' padding"
    pad = m // 2
    if strip_h is None or H % strip_h != 0:
        strip_h = _pick_strip_h(H, W, dim, m)
    n_strips = H // strip_h
    rows = strip_h + m - 1
    Hp, Wpad = H + 2 * pad, W + 2 * pad

    # --- boundary glue (layout plumbing only; see TODO at top) -----------------
    x1 = jnp.transpose(x_nchw[:, :dim], (0, 2, 3, 1)).astype(jnp.bfloat16)   # (N,H,W,dim)
    xp = jnp.pad(x1, ((0, 0), (pad, pad), (pad, pad), (0, 0)))               # (N,Hp,Wp,dim)
    w_bf = w_rows.astype(jnp.bfloat16)
    b2 = b_comb.reshape(1, dim).astype(jnp.float32)

    # VMEM footprint estimate -> compiler scoped-vmem limit (clamped for v7x's 64 MiB).
    vmem_est = (2 * Hp * Wpad * dim * 2          # double-buffered padded-input block
                + 2 * m * m * dim * dim * 2      # weight block
                + 2 * strip_h * W * dim * 4      # double-buffered output block
                + rows * W * m * dim * 2         # im2col slab scratch
                + strip_h * W * dim * 4)         # accumulator scratch
    vmem_limit = min(96 << 20, max(32 << 20, 2 * vmem_est))

    kernel = partial(_plk_conv_kernel, m=m, n=n, W=W, strip_h=strip_h,
                     dx_order=_dx_order(m, n))

    y1 = pl.pallas_call(
        kernel,
        out_shape=jax.ShapeDtypeStruct((N, H, W, dim), x_nchw.dtype),
        grid=(N, n_strips),
        in_specs=[
            pl.BlockSpec((1, Hp, Wpad, dim), lambda b, s: (b, 0, 0, 0)),
            pl.BlockSpec((m, m * dim, dim), lambda b, s: (0, 0, 0)),
            pl.BlockSpec((1, dim), lambda b, s: (0, 0)),
        ],
        out_specs=pl.BlockSpec((1, strip_h, W, dim), lambda b, s: (b, s, 0, 0)),
        scratch_shapes=[
            pltpu.VMEM((rows, W, m * dim), jnp.bfloat16),   # kw-im2col slab
            pltpu.VMEM((strip_h * W, dim), jnp.float32),    # accumulator
        ],
        compiler_params=pltpu.CompilerParams(
            dimension_semantics=("parallel", "parallel"),
            vmem_limit_bytes=vmem_limit),
    )(xp, w_bf, b2)

    y1_nchw = jnp.transpose(y1, (0, 3, 1, 2)).astype(x_nchw.dtype)
    # identity path for the remaining channels (== eval-mode in-place assign + return x)
    return jnp.concatenate([y1_nchw, x_nchw[:, dim:]], axis=1)


# --------------------------- parameter construction ------------------------ #
def _trunc_normal(key, shape, std=0.02):
    return std * jax.random.truncated_normal(key, -2.0, 2.0, shape, jnp.float32)


def make_params(key, dim, kernel_size):
    """Deterministic synthetic init matching the module's parameter shapes."""
    m = kernel_size
    n = kernel_size // 3
    k1, k2, k3, k4, k5, k6 = jax.random.split(key, 6)
    # PyTorch Conv2d weight layout: (Cout, Cin, kh, kw)
    w_mn = _trunc_normal(k1, (dim, dim, m, n))
    w_nm = _trunc_normal(k2, (dim, dim, n, m))
    w_nn = _trunc_normal(k3, (dim, dim, n, n))

    def bias(k, fan_in):
        bound = 1.0 / math.sqrt(fan_in)
        return jax.random.uniform(k, (dim,), jnp.float32, -bound, bound)

    b_mn = bias(k4, dim * m * n)
    b_nm = bias(k5, dim * n * m)
    b_nn = bias(k6, dim * n * n)
    return (w_mn, b_mn), (w_nm, b_nm), (w_nn, b_nn)


def build_row_weights(w_mn, w_nm, w_nn, *, m, n, dim):
    """Combine the three convs into per-kernel-row flattened (m*C, C) slabs.

    Row dy's K axis is laid out as [kw taps in _dx_order] x [input channels], matching
    the in-kernel im2col slab. Only the first n*dim K entries are nonzero for rows
    outside the center band (the structural sparsity the kernel exploits).
    """
    off = (m - n) // 2
    Wc = jnp.zeros((m, m, dim, dim), jnp.float32)                     # (kh, kw, Cin, Cout)
    Wc = Wc.at[:, off:off + n].add(jnp.transpose(w_mn, (2, 3, 1, 0)))            # (m,n)
    Wc = Wc.at[off:off + n, :].add(jnp.transpose(w_nm, (2, 3, 1, 0)))            # (n,m)
    Wc = Wc.at[off:off + n, off:off + n].add(jnp.transpose(w_nn, (2, 3, 1, 0)))  # (n,n)
    order = jnp.array(_dx_order(m, n), dtype=jnp.int32)
    return Wc[:, order].reshape(m, m * dim, dim)


# ------------------------------- reference --------------------------------- #
def _torch_like_conv(x_nchw, w_oihw, b, pad_hw):
    y = jax.lax.conv_general_dilated(
        x_nchw, w_oihw, window_strides=(1, 1),
        padding=((pad_hw[0], pad_hw[0]), (pad_hw[1], pad_hw[1])),
        dimension_numbers=("NCHW", "OIHW", "NCHW"))
    return y + b[None, :, None, None]


def reference_forward(x_nchw, params, *, m, n, dim):
    (w_mn, b_mn), (w_nm, b_nm), (w_nn, b_nn) = params
    x1 = x_nchw[:, :dim]
    y1 = (_torch_like_conv(x1, w_mn, b_mn, (m // 2, n // 2))
          + _torch_like_conv(x1, w_nm, b_nm, (n // 2, m // 2))
          + _torch_like_conv(x1, w_nn, b_nn, (n // 2, n // 2)))
    return jnp.concatenate([y1, x_nchw[:, dim:]], axis=1)


# ---------------------------------- main ------------------------------------ #
if __name__ == "__main__":
    # small, module-consistent shapes
    dim = 4             # channels that are convolved (self.idx)
    kernel_size = 9     # m = 9, n = 9 // 3 = 3 (both odd -> exact "same" padding)
    m, n = kernel_size, kernel_size // 3
    N, C_total, H, Wd = 2, 6, 16, 16   # extra 2 channels pass through unchanged

    key = jax.random.PRNGKey(0)
    kparam, kx = jax.random.split(key)
    params = make_params(kparam, dim, kernel_size)
    (w_mn, b_mn), (w_nm, b_nm), (w_nn, b_nn) = params

    w_rows = build_row_weights(w_mn, w_nm, w_nn, m=m, n=n, dim=dim)
    b_comb = b_mn + b_nm + b_nn

    x = jax.random.normal(kx, (N, C_total, H, Wd), jnp.float32)

    fwd = jax.jit(partial(rect_sparse_plk_conv2d, m=m, n=n, dim=dim))
    out = fwd(x, w_rows, b_comb)
    out = jax.block_until_ready(out)

    ref = reference_forward(x, params, m=m, n=n, dim=dim)
    assert out.shape == (N, C_total, H, Wd)
    # bf16 activations/weights (f32 accumulation) vs f32 reference -> loosened tolerance
    assert bool(jnp.allclose(out, ref, atol=3e-2, rtol=3e-2)), "mismatch vs reference conv"

    print("KERNEL_OK")
</pallas_src>

<mosaic_0001>
module attributes {stable_mosaic.version = 11 : i64} {
  func.func @_plk_conv_kernel(%arg0: i32, %arg1: i32, %arg2: memref<1x24x24x4xbf16, #tpu.memory_space<vmem>>, %arg3: memref<9x36x4xbf16, #tpu.memory_space<vmem>>, %arg4: memref<1x4xf32, #tpu.memory_space<vmem>>, %arg5: memref<1x16x16x4xf32, #tpu.memory_space<vmem>>, %arg6: memref<24x16x36xbf16, #tpu.memory_space<vmem>>, %arg7: memref<256x4xf32, #tpu.memory_space<vmem>>) attributes {dimension_semantics = [#tpu.dimension_semantics<parallel>, #tpu.dimension_semantics<parallel>], iteration_bounds = array<i64: 2, 1>, scalar_prefetch = 0 : i64, scratch_operands = 2 : i64, tpu.core_type = #tpu.core_type<tc>, window_params = [{transform_indices = @transform_0, window_bounds = array<i64: 1, 24, 24, 4>}, {pipeline_mode = #tpu.pipeline_mode<synchronous>, transform_indices = @transform_1, window_bounds = array<i64: 9, 36, 4>}, {pipeline_mode = #tpu.pipeline_mode<synchronous>, transform_indices = @transform_2, window_bounds = array<i64: 1, 4>}, {transform_indices = @transform_3, window_bounds = array<i64: 1, 16, 16, 4>}]} {
    %c16_i32 = arith.constant 16 : i32
    %0 = arith.muli %arg1, %c16_i32 : i32
    %1 = tpu.assume_multiple %0, 16 : i32
    %c0 = arith.constant 0 : index
    %2 = arith.index_cast %1 : i32 to index
    %c3 = arith.constant 3 : index
    %c0_0 = arith.constant 0 : index
    %3 = vector.load %arg2[%c0, %2, %c3, %c0_0] : memref<1x24x24x4xbf16, #tpu.memory_space<vmem>>, vector<1x24x16x4xbf16>
    %4 = vector.shape_cast %3 : vector<1x24x16x4xbf16> to vector<24x16x4xbf16>
    %c0_1 = arith.constant 0 : index
    %c0_2 = arith.constant 0 : index
    %c0_3 = arith.constant 0 : index
    %5 = vector.load %arg6[%c0_1, %c0_2, %c0_3] : memref<24x16x36xbf16, #tpu.memory_space<vmem>>, vector<24x16x4xbf16>
    tpu.vector_store %arg6[%c0_1, %c0_2, %c0_3], %4 {strides = array<i32>} : memref<24x16x36xbf16, #tpu.memory_space<vmem>>, vector<24x16x4xbf16>,
    %c0_4 = arith.constant 0 : index
    %6 = arith.index_cast %1 : i32 to index
    %c4 = arith.constant 4 : index
    %c0_5 = arith.constant 0 : index
    %7 = vector.load %arg2[%c0_4, %6, %c4, %c0_5] : memref<1x24x24x4xbf16, #tpu.memory_space<vmem>>, vector<1x24x16x4xbf16>
    %8 = vector.shape_cast %7 : vector<1x24x16x4xbf16> to vector<24x16x4xbf16>
    %c0_6 = arith.constant 0 : index
    %c0_7 = arith.constant 0 : index
    %c4_8 = arith.constant 4 : index
    %9 = vector.load %arg6[%c0_6, %c0_7, %c4_8] : memref<24x16x36xbf16, #tpu.memory_space<vmem>>, vector<24x16x4xbf16>
    tpu.vector_store %arg6[%c0_6, %c0_7, %c4_8], %8 {strides = array<i32>} : memref<24x16x36xbf16, #tpu.memory_space<vmem>>, vector<24x16x4xbf16>,
    %c0_9 = arith.constant 0 : index
    %10 = arith.index_cast %1 : i32 to index
    %c5 = arith.constant 5 : index
    %c0_10 = arith.constant 0 : index
    %11 = vector.load %arg2[%c0_9, %10, %c5, %c0_10] : memref<1x24x24x4xbf16, #tpu.memory_space<vmem>>, vector<1x24x16x4xbf16>
    %12 = vector.shape_cast %11 : vector<1x24x16x4xbf16> to vector<24x16x4xbf16>
    %c0_11 = arith.constant 0 : index
    %c0_12 = arith.constant 0 : index
    %c8 = arith.constant 8 : index
    %13 = vector.load %arg6[%c0_11, %c0_12, %c8] : memref<24x16x36xbf16, #tpu.memory_space<vmem>>, vector<24x16x4xbf16>
    tpu.vector_store %arg6[%c0_11, %c0_12, %c8], %12 {strides = array<i32>} : memref<24x16x36xbf16, #tpu.memory_space<vmem>>, vector<24x16x4xbf16>,
    %c0_13 = arith.constant 0 : index
    %14 = arith.index_cast %1 : i32 to index
    %c0_14 = arith.constant 0 : index
    %c0_15 = arith.constant 0 : index
    %15 = vector.load %arg2[%c0_13, %14, %c0_14, %c0_15] : memref<1x24x24x4xbf16, #tpu.memory_space<vmem>>, vector<1x24x16x4xbf16>
    %16 = vector.shape_cast %15 : vector<1x24x16x4xbf16> to vector<24x16x4xbf16>
    %c0_16 = arith.constant 0 : index
    %c0_17 = arith.constant 0 : index
    %c12 = arith.constant 12 : index
    %17 = vector.load %arg6[%c0_16, %c0_17, %c12] : memref<24x16x36xbf16, #tpu.memory_space<vmem>>, vector<24x16x4xbf16>
    tpu.vector_store %arg6[%c0_16, %c0_17, %c12], %16 {strides = array<i32>} : memref<24x16x36xbf16, #tpu.memory_space<vmem>>, vector<24x16x4xbf16>,
    %c0_18 = arith.constant 0 : index
    %18 = arith.index_cast %1 : i32 to index
    %c1 = arith.constant 1 : index
    %c0_19 = arith.constant 0 : index
    %19 = vector.load %arg2[%c0_18, %18, %c1, %c0_19] : memref<1x24x24x4xbf16, #tpu.memory_space<vmem>>, vector<1x24x16x4xbf16>
    %20 = vector.shape_cast %19 : vector<1x24x16x4xbf16> to vector<24x16x4xbf16>
    %c0_20 = arith.constant 0 : index
    %c0_21 = arith.constant 0 : index
    %c16 = arith.constant 16 : index
    %21 = vector.load %arg6[%c0_20, %c0_21, %c16] : memref<24x16x36xbf16, #tpu.memory_space<vmem>>, vector<24x16x4xbf16>
    tpu.vector_store %arg6[%c0_20, %c0_21, %c16], %20 {strides = array<i32>} : memref<24x16x36xbf16, #tpu.memory_space<vmem>>, vector<24x16x4xbf16>,
    %c0_22 = arith.constant 0 : index
    %22 = arith.index_cast %1 : i32 to index
    %c2 = arith.constant 2 : index
    %c0_23 = arith.constant 0 : index
    %23 = vector.load %arg2[%c0_22, %22, %c2, %c0_23] : memref<1x24x24x4xbf16, #tpu.memory_space<vmem>>, vector<1x24x16x4xbf16>
    %24 = vector.shape_cast %23 : vector<1x24x16x4xbf16> to vector<24x16x4xbf16>
    %c0_24 = arith.constant 0 : index
    %c0_25 = arith.constant 0 : index
    %c20 = arith.constant 20 : index
    %25 = vector.load %arg6[%c0_24, %c0_25, %c20] : memref<24x16x36xbf16, #tpu.memory_space<vmem>>, vector<24x16x4xbf16>
    tpu.vector_store %arg6[%c0_24, %c0_25, %c20], %24 {strides = array<i32>} : memref<24x16x36xbf16, #tpu.memory_space<vmem>>, vector<24x16x4xbf16>,
    %c0_26 = arith.constant 0 : index
    %26 = arith.index_cast %1 : i32 to index
    %c6 = arith.constant 6 : index
    %c0_27 = arith.constant 0 : index
    %27 = vector.load %arg2[%c0_26, %26, %c6, %c0_27] : memref<1x24x24x4xbf16, #tpu.memory_space<vmem>>, vector<1x24x16x4xbf16>
    %28 = vector.shape_cast %27 : vector<1x24x16x4xbf16> to vector<24x16x4xbf16>
    %c0_28 = arith.constant 0 : index
    %c0_29 = arith.constant 0 : index
    %c24 = arith.constant 24 : index
    %29 = vector.load %arg6[%c0_28, %c0_29, %c24] : memref<24x16x36xbf16, #tpu.memory_space<vmem>>, vector<24x16x4xbf16>
    tpu.vector_store %arg6[%c0_28, %c0_29, %c24], %28 {strides = array<i32>} : memref<24x16x36xbf16, #tpu.memory_space<vmem>>, vector<24x16x4xbf16>,
    %c0_30 = arith.constant 0 : index
    %30 = arith.index_cast %1 : i32 to index
    %c7 = arith.constant 7 : index
    %c0_31 = arith.constant 0 : index
    %31 = vector.load %arg2[%c0_30, %30, %c7, %c0_31] : memref<1x24x24x4xbf16, #tpu.memory_space<vmem>>, vector<1x24x16x4xbf16>
    %32 = vector.shape_cast %31 : vector<1x24x16x4xbf16> to vector<24x16x4xbf16>
    %c0_32 = arith.constant 0 : index
    %c0_33 = arith.constant 0 : index
    %c28 = arith.constant 28 : index
    %33 = vector.load %arg6[%c0_32, %c0_33, %c28] : memref<24x16x36xbf16, #tpu.memory_space<vmem>>, vector<24x16x4xbf16>
    tpu.vector_store %arg6[%c0_32, %c0_33, %c28], %32 {strides = array<i32>} : memref<24x16x36xbf16, #tpu.memory_space<vmem>>, vector<24x16x4xbf16>,
    %c0_34 = arith.constant 0 : index
    %34 = arith.index_cast %1 : i32 to index
    %c8_35 = arith.constant 8 : index
    %c0_36 = arith.constant 0 : index
    %35 = vector.load %arg2[%c0_34, %34, %c8_35, %c0_36] : memref<1x24x24x4xbf16, #tpu.memory_space<vmem>>, vector<1x24x16x4xbf16>
    %36 = vector.shape_cast %35 : vector<1x24x16x4xbf16> to vector<24x16x4xbf16>
    %c0_37 = arith.constant 0 : index
    %c0_38 = arith.constant 0 : index
    %c32 = arith.constant 32 : index
    %37 = vector.load %arg6[%c0_37, %c0_38, %c32] : memref<24x16x36xbf16, #tpu.memory_space<vmem>>, vector<24x16x4xbf16>
    tpu.vector_store %arg6[%c0_37, %c0_38, %c32], %36 {strides = array<i32>} : memref<24x16x36xbf16, #tpu.memory_space<vmem>>, vector<24x16x4xbf16>,
    %c0_39 = arith.constant 0 : index
    %c0_40 = arith.constant 0 : index
    %38 = vector.load %arg4[%c0_39, %c0_40] : memref<1x4xf32, #tpu.memory_space<vmem>>, vector<1x4xf32>
    %39 = vector.shape_cast %38 : vector<1x4xf32> to vector<1x4xf32>
    %40 = vector.broadcast %39 : vector<1x4xf32> to vector<256x4xf32>
    %c0_41 = arith.constant 0 : index
    %c0_42 = arith.constant 0 : index
    %41 = vector.load %arg7[%c0_41, %c0_42] : memref<256x4xf32, #tpu.memory_space<vmem>>, vector<256x4xf32>
    tpu.vector_store %arg7[%c0_41, %c0_42], %40 {strides = array<i32>} : memref<256x4xf32, #tpu.memory_space<vmem>>, vector<256x4xf32>,
    %c0_43 = arith.constant 0 : index
    %c0_44 = arith.constant 0 : index
    %c0_45 = arith.constant 0 : index
    %42 = vector.load %arg6[%c0_43, %c0_44, %c0_45] : memref<24x16x36xbf16, #tpu.memory_space<vmem>>, vector<16x16x12xbf16>
    %43 = vector.shape_cast %42 : vector<16x16x12xbf16> to vector<256x12xbf16>
    %c0_46 = arith.constant 0 : index
    %c0_47 = arith.constant 0 : index
    %44 = vector.load %arg7[%c0_46, %c0_47] : memref<256x4xf32, #tpu.memory_space<vmem>>, vector<256x4xf32>
    %c0_48 = arith.constant 0 : index
    %c0_49 = arith.constant 0 : index
    %c0_50 = arith.constant 0 : index
    %45 = vector.load %arg3[%c0_48, %c0_49, %c0_50] : memref<9x36x4xbf16, #tpu.memory_space<vmem>>, vector<1x12x4xbf16>
    %46 = vector.shape_cast %45 : vector<1x12x4xbf16> to vector<12x4xbf16>
    %cst = arith.constant dense<0.000000e+00> : vector<256x4xf32>
    %47 = tpu.matmul %43, %46, %cst {dimension_numbers = #tpu.dot_dimension_numbers<[1], [0], [0], [1], [0, 0, 1, 1], [], []>} : vector<256x12xbf16>, vector<12x4xbf16>, vector<256x4xf32> -> vector<256x4xf32>
    %48 = arith.addf %44, %47 : vector<256x4xf32>
    %c0_51 = arith.constant 0 : index
    %c0_52 = arith.constant 0 : index
    %49 = vector.load %arg7[%c0_51, %c0_52] : memref<256x4xf32, #tpu.memory_space<vmem>>, vector<256x4xf32>
    tpu.vector_store %arg7[%c0_51, %c0_52], %48 {strides = array<i32>} : memref<256x4xf32, #tpu.memory_space<vmem>>, vector<256x4xf32>,
    %c1_53 = arith.constant 1 : index
    %c0_54 = arith.constant 0 : index
    %c0_55 = arith.constant 0 : index
    %50 = vector.load %arg6[%c1_53, %c0_54, %c0_55] : memref<24x16x36xbf16, #tpu.memory_space<vmem>>, vector<16x16x12xbf16>
    %51 = vector.shape_cast %50 : vector<16x16x12xbf16> to vector<256x12xbf16>
    %c0_56 = arith.constant 0 : index
    %c0_57 = arith.constant 0 : index
    %52 = vector.load %arg7[%c0_56, %c0_57] : memref<256x4xf32, #tpu.memory_space<vmem>>, vector<256x4xf32>
    %c1_58 = arith.constant 1 : index
    %c0_59 = arith.constant 0 : index
    %c0_60 = arith.constant 0 : index
    %53 = vector.load %arg3[%c1_58, %c0_59, %c0_60] : memref<9x36x4xbf16, #tpu.memory_space<vmem>>, vector<1x12x4xbf16>
    %54 = vector.shape_cast %53 : vector<1x12x4xbf16> to vector<12x4xbf16>
    %cst_61 = arith.constant dense<0.000000e+00> : vector<256x4xf32>
    %55 = tpu.matmul %51, %54, %cst_61 {dimension_numbers = #tpu.dot_dimension_numbers<[1], [0], [0], [1], [0, 0, 1, 1], [], []>} : vector<256x12xbf16>, vector<12x4xbf16>, vector<256x4xf32> -> vector<256x4xf32>
    %56 = arith.addf %52, %55 : vector<256x4xf32>
    %c0_62 = arith.constant 0 : index
    %c0_63 = arith.constant 0 : index
    %57 = vector.load %arg7[%c0_62, %c0_63] : memref<256x4xf32, #tpu.memory_space<vmem>>, vector<256x4xf32>
    tpu.vector_store %arg7[%c0_62, %c0_63], %56 {strides = array<i32>} : memref<256x4xf32, #tpu.memory_space<vmem>>, vector<256x4xf32>,
    %c2_64 = arith.constant 2 : index
    %c0_65 = arith.constant 0 : index
    %c0_66 = arith.constant 0 : index
    %58 = vector.load %arg6[%c2_64, %c0_65, %c0_66] : memref<24x16x36xbf16, #tpu.memory_space<vmem>>, vector<16x16x12xbf16>
    %59 = vector.shape_cast %58 : vector<16x16x12xbf16> to vector<256x12xbf16>
    %c0_67 = arith.constant 0 : index
    %c0_68 = arith.constant 0 : index
    %60 = vector.load %arg7[%c0_67, %c0_68] : memref<256x4xf32, #tpu.memory_space<vmem>>, vector<256x4xf32>
    %c2_69 = arith.constant 2 : index
    %c0_70 = arith.constant 0 : index
    %c0_71 = arith.constant 0 : index
    %61 = vector.load %arg3[%c2_69, %c0_70, %c0_71] : memref<9x36x4xbf16, #tpu.memory_space<vmem>>, vector<1x12x4xbf16>
    %62 = vector.shape_cast %61 : vector<1x12x4xbf16> to vector<12x4xbf16>
    %cst_72 = arith.constant dense<0.000000e+00> : vector<256x4xf32>
    %63 = tpu.matmul %59, %62, %cst_72 {dimension_numbers = #tpu.dot_dimension_numbers<[1], [0], [0], [1], [0, 0, 1, 1], [], []>} : vector<256x12xbf16>, vector<12x4xbf16>, vector<256x4xf32> -> vector<256x4xf32>
    %64 = arith.addf %60, %63 : vector<256x4xf32>
    %c0_73 = arith.constant 0 : index
    %c0_74 = arith.constant 0 : index
    %65 = vector.load %arg7[%c0_73, %c0_74] : memref<256x4xf32, #tpu.memory_space<vmem>>, vector<256x4xf32>
    tpu.vector_store %arg7[%c0_73, %c0_74], %64 {strides = array<i32>} : memref<256x4xf32, #tpu.memory_space<vmem>>, vector<256x4xf32>,
    %c3_75 = arith.constant 3 : index
    %c0_76 = arith.constant 0 : index
    %c0_77 = arith.constant 0 : index
    %66 = vector.load %arg6[%c3_75, %c0_76, %c0_77] : memref<24x16x36xbf16, #tpu.memory_space<vmem>>, vector<16x16x36xbf16>
    %67 = vector.shape_cast %66 : vector<16x16x36xbf16> to vector<256x36xbf16>
    %c0_78 = arith.constant 0 : index
    %c0_79 = arith.constant 0 : index
    %68 = vector.load %arg7[%c0_78, %c0_79] : memref<256x4xf32, #tpu.memory_space<vmem>>, vector<256x4xf32>
    %c3_80 = arith.constant 3 : index
    %c0_81 = arith.constant 0 : index
    %c0_82 = arith.constant 0 : index
    %69 = vector.load %arg3[%c3_80, %c0_81, %c0_82] : memref<9x36x4xbf16, #tpu.memory_space<vmem>>, vector<1x36x4xbf16>
    %70 = vector.shape_cast %69 : vector<1x36x4xbf16> to vector<36x4xbf16>
    %cst_83 = arith.constant dense<0.000000e+00> : vector<256x4xf32>
    %71 = tpu.matmul %67, %70, %cst_83 {dimension_numbers = #tpu.dot_dimension_numbers<[1], [0], [0], [1], [0, 0, 1, 1], [], []>} : vector<256x36xbf16>, vector<36x4xbf16>, vector<256x4xf32> -> vector<256x4xf32>
    %72 = arith.addf %68, %71 : vector<256x4xf32>
    %c0_84 = arith.constant 0 : index
    %c0_85 = arith.constant 0 : index
    %73 = vector.load %arg7[%c0_84, %c0_85] : memref<256x4xf32, #tpu.memory_space<vmem>>, vector<256x4xf32>
    tpu.vector_store %arg7[%c0_84, %c0_85], %72 {strides = array<i32>} : memref<256x4xf32, #tpu.memory_space<vmem>>, vector<256x4xf32>,
    %c4_86 = arith.constant 4 : index
    %c0_87 = arith.constant 0 : index
    %c0_88 = arith.constant 0 : index
    %74 = vector.load %arg6[%c4_86, %c0_87, %c0_88] : memref<24x16x36xbf16, #tpu.memory_space<vmem>>, vector<16x16x36xbf16>
    %75 = vector.shape_cast %74 : vector<16x16x36xbf16> to vector<256x36xbf16>
    %c0_89 = arith.constant 0 : index
    %c0_90 = arith.constant 0 : index
    %76 = vector.load %arg7[%c0_89, %c0_90] : memref<256x4xf32, #tpu.memory_space<vmem>>, vector<256x4xf32>
    %c4_91 = arith.constant 4 : index
    %c0_92 = arith.constant 0 : index
    %c0_93 = arith.constant 0 : index
    %77 = vector.load %arg3[%c4_91, %c0_92, %c0_93] : memref<9x36x4xbf16, #tpu.memory_space<vmem>>, vector<1x36x4xbf16>
    %78 = vector.shape_cast %77 : vector<1x36x4xbf16> to vector<36x4xbf16>
    %cst_94 = arith.constant dense<0.000000e+00> : vector<256x4xf32>
    %79 = tpu.matmul %75, %78, %cst_94 {dimension_numbers = #tpu.dot_dimension_numbers<[1], [0], [0], [1], [0, 0, 1, 1], [], []>} : vector<256x36xbf16>, vector<36x4xbf16>, vector<256x4xf32> -> vector<256x4xf32>
    %80 = arith.addf %76, %79 : vector<256x4xf32>
    %c0_95 = arith.constant 0 : index
    %c0_96 = arith.constant 0 : index
    %81 = vector.load %arg7[%c0_95, %c0_96] : memref<256x4xf32, #tpu.memory_space<vmem>>, vector<256x4xf32>
    tpu.vector_store %arg7[%c0_95, %c0_96], %80 {strides = array<i32>} : memref<256x4xf32, #tpu.memory_space<vmem>>, vector<256x4xf32>,
    %c5_97 = arith.constant 5 : index
    %c0_98 = arith.constant 0 : index
    %c0_99 = arith.constant 0 : index
    %82 = vector.load %arg6[%c5_97, %c0_98, %c0_99] : memref<24x16x36xbf16, #tpu.memory_space<vmem>>, vector<16x16x36xbf16>
    %83 = vector.shape_cast %82 : vector<16x16x36xbf16> to vector<256x36xbf16>
    %c0_100 = arith.constant 0 : index
    %c0_101 = arith.constant 0 : index
    %84 = vector.load %arg7[%c0_100, %c0_101] : memref<256x4xf32, #tpu.memory_space<vmem>>, vector<256x4xf32>
    %c5_102 = arith.constant 5 : index
    %c0_103 = arith.constant 0 : index
    %c0_104 = arith.constant 0 : index
    %85 = vector.load %arg3[%c5_102, %c0_103, %c0_104] : memref<9x36x4xbf16, #tpu.memory_space<vmem>>, vector<1x36x4xbf16>
    %86 = vector.shape_cast %85 : vector<1x36x4xbf16> to vector<36x4xbf16>
    %cst_105 = arith.constant dense<0.000000e+00> : vector<256x4xf32>
    %87 = tpu.matmul %83, %86, %cst_105 {dimension_numbers = #tpu.dot_dimension_numbers<[1], [0], [0], [1], [0, 0, 1, 1], [], []>} : vector<256x36xbf16>, vector<36x4xbf16>, vector<256x4xf32> -> vector<256x4xf32>
    %88 = arith.addf %84, %87 : vector<256x4xf32>
    %c0_106 = arith.constant 0 : index
    %c0_107 = arith.constant 0 : index
    %89 = vector.load %arg7[%c0_106, %c0_107] : memref<256x4xf32, #tpu.memory_space<vmem>>, vector<256x4xf32>
    tpu.vector_store %arg7[%c0_106, %c0_107], %88 {strides = array<i32>} : memref<256x4xf32, #tpu.memory_space<vmem>>, vector<256x4xf32>,
    %c6_108 = arith.constant 6 : index
    %c0_109 = arith.constant 0 : index
    %c0_110 = arith.constant 0 : index
    %90 = vector.load %arg6[%c6_108, %c0_109, %c0_110] : memref<24x16x36xbf16, #tpu.memory_space<vmem>>, vector<16x16x12xbf16>
    %91 = vector.shape_cast %90 : vector<16x16x12xbf16> to vector<256x12xbf16>
    %c0_111 = arith.constant 0 : index
    %c0_112 = arith.constant 0 : index
    %92 = vector.load %arg7[%c0_111, %c0_112] : memref<256x4xf32, #tpu.memory_space<vmem>>, vector<256x4xf32>
    %c6_113 = arith.constant 6 : index
    %c0_114 = arith.constant 0 : index
    %c0_115 = arith.constant 0 : index
    %93 = vector.load %arg3[%c6_113, %c0_114, %c0_115] : memref<9x36x4xbf16, #tpu.memory_space<vmem>>, vector<1x12x4xbf16>
    %94 = vector.shape_cast %93 : vector<1x12x4xbf16> to vector<12x4xbf16>
    %cst_116 = arith.constant dense<0.000000e+00> : vector<256x4xf32>
    %95 = tpu.matmul %91, %94, %cst_116 {dimension_numbers = #tpu.dot_dimension_numbers<[1], [0], [0], [1], [0, 0, 1, 1], [], []>} : vector<256x12xbf16>, vector<12x4xbf16>, vector<256x4xf32> -> vector<256x4xf32>
    %96 = arith.addf %92, %95 : vector<256x4xf32>
    %c0_117 = arith.constant 0 : index
    %c0_118 = arith.constant 0 : index
    %97 = vector.load %arg7[%c0_117, %c0_118] : memref<256x4xf32, #tpu.memory_space<vmem>>, vector<256x4xf32>
    tpu.vector_store %arg7[%c0_117, %c0_118], %96 {strides = array<i32>} : memref<256x4xf32, #tpu.memory_space<vmem>>, vector<256x4xf32>,
    %c7_119 = arith.constant 7 : index
    %c0_120 = arith.constant 0 : index
    %c0_121 = arith.constant 0 : index
    %98 = vector.load %arg6[%c7_119, %c0_120, %c0_121] : memref<24x16x36xbf16, #tpu.memory_space<vmem>>, vector<16x16x12xbf16>
    %99 = vector.shape_cast %98 : vector<16x16x12xbf16> to vector<256x12xbf16>
    %c0_122 = arith.constant 0 : index
    %c0_123 = arith.constant 0 : index
    %100 = vector.load %arg7[%c0_122, %c0_123] : memref<256x4xf32, #tpu.memory_space<vmem>>, vector<256x4xf32>
    %c7_124 = arith.constant 7 : index
    %c0_125 = arith.constant 0 : index
    %c0_126 = arith.constant 0 : index
    %101 = vector.load %arg3[%c7_124, %c0_125, %c0_126] : memref<9x36x4xbf16, #tpu.memory_space<vmem>>, vector<1x12x4xbf16>
    %102 = vector.shape_cast %101 : vector<1x12x4xbf16> to vector<12x4xbf16>
    %cst_127 = arith.constant dense<0.000000e+00> : vector<256x4xf32>
    %103 = tpu.matmul %99, %102, %cst_127 {dimension_numbers = #tpu.dot_dimension_numbers<[1], [0], [0], [1], [0, 0, 1, 1], [], []>} : vector<256x12xbf16>, vector<12x4xbf16>, vector<256x4xf32> -> vector<256x4xf32>
    %104 = arith.addf %100, %103 : vector<256x4xf32>
    %c0_128 = arith.constant 0 : index
    %c0_129 = arith.constant 0 : index
    %105 = vector.load %arg7[%c0_128, %c0_129] : memref<256x4xf32, #tpu.memory_space<vmem>>, vector<256x4xf32>
    tpu.vector_store %arg7[%c0_128, %c0_129], %104 {strides = array<i32>} : memref<256x4xf32, #tpu.memory_space<vmem>>, vector<256x4xf32>,
    %c8_130 = arith.constant 8 : index
    %c0_131 = arith.constant 0 : index
    %c0_132 = arith.constant 0 : index
    %106 = vector.load %arg6[%c8_130, %c0_131, %c0_132] : memref<24x16x36xbf16, #tpu.memory_space<vmem>>, vector<16x16x12xbf16>
    %107 = vector.shape_cast %106 : vector<16x16x12xbf16> to vector<256x12xbf16>
    %c0_133 = arith.constant 0 : index
    %c0_134 = arith.constant 0 : index
    %108 = vector.load %arg7[%c0_133, %c0_134] : memref<256x4xf32, #tpu.memory_space<vmem>>, vector<256x4xf32>
    %c8_135 = arith.constant 8 : index
    %c0_136 = arith.constant 0 : index
    %c0_137 = arith.constant 0 : index
    %109 = vector.load %arg3[%c8_135, %c0_136, %c0_137] : memref<9x36x4xbf16, #tpu.memory_space<vmem>>, vector<1x12x4xbf16>
    %110 = vector.shape_cast %109 : vector<1x12x4xbf16> to vector<12x4xbf16>
    %cst_138 = arith.constant dense<0.000000e+00> : vector<256x4xf32>
    %111 = tpu.matmul %107, %110, %cst_138 {dimension_numbers = #tpu.dot_dimension_numbers<[1], [0], [0], [1], [0, 0, 1, 1], [], []>} : vector<256x12xbf16>, vector<12x4xbf16>, vector<256x4xf32> -> vector<256x4xf32>
    %112 = arith.addf %108, %111 : vector<256x4xf32>
    %c0_139 = arith.constant 0 : index
    %c0_140 = arith.constant 0 : index
    %113 = vector.load %arg7[%c0_139, %c0_140] : memref<256x4xf32, #tpu.memory_space<vmem>>, vector<256x4xf32>
    tpu.vector_store %arg7[%c0_139, %c0_140], %112 {strides = array<i32>} : memref<256x4xf32, #tpu.memory_space<vmem>>, vector<256x4xf32>,
    %c0_141 = arith.constant 0 : index
    %c0_142 = arith.constant 0 : index
    %114 = vector.load %arg7[%c0_141, %c0_142] : memref<256x4xf32, #tpu.memory_space<vmem>>, vector<256x4xf32>
    %115 = vector.shape_cast %114 : vector<256x4xf32> to vector<16x16x4xf32>
    %c0_143 = arith.constant 0 : index
    %c0_144 = arith.constant 0 : index
    %c0_145 = arith.constant 0 : index
    %c0_146 = arith.constant 0 : index
    %116 = vector.load %arg5[%c0_143, %c0_144, %c0_145, %c0_146] : memref<1x16x16x4xf32, #tpu.memory_space<vmem>>, vector<1x16x16x4xf32>
    %117 = vector.shape_cast %116 : vector<1x16x16x4xf32> to vector<16x16x4xf32>
    %118 = vector.shape_cast %115 : vector<16x16x4xf32> to vector<1x16x16x4xf32>
    tpu.vector_store %arg5[%c0_143, %c0_144, %c0_145, %c0_146], %118 {strides = array<i32>} : memref<1x16x16x4xf32, #tpu.memory_space<vmem>>, vector<1x16x16x4xf32>,
    return
  }
  func.func @transform_0(%arg0: i32, %arg1: i32) -> (i32, i32, i32, i32) {
    %c0_i32 = arith.constant 0 : i32
    %c0_i32_0 = arith.constant 0 : i32
    %c0_i32_1 = arith.constant 0 : i32
    %c0_i32_2 = arith.constant 0 : i32
    return %arg0, %c0_i32, %c0_i32_0, %c0_i32_1 : i32, i32, i32, i32
  }
  func.func @transform_1(%arg0: i32, %arg1: i32) -> (i32, i32, i32) {
    %c0_i32 = arith.constant 0 : i32
    %c0_i32_0 = arith.constant 0 : i32
    %c0_i32_1 = arith.constant 0 : i32
    %c0_i32_2 = arith.constant 0 : i32
    return %c0_i32, %c0_i32_0, %c0_i32_1 : i32, i32, i32
  }
  func.func @transform_2(%arg0: i32, %arg1: i32) -> (i32, i32) {
    %c0_i32 = arith.constant 0 : i32
    %c0_i32_0 = arith.constant 0 : i32
    %c0_i32_1 = arith.constant 0 : i32
    return %c0_i32, %c0_i32_0 : i32, i32
  }
  func.func @transform_3(%arg0: i32, %arg1: i32) -> (i32, i32, i32, i32) {
    %c0_i32 = arith.constant 0 : i32
    %c0_i32_0 = arith.constant 0 : i32
    %c0_i32_1 = arith.constant 0 : i32
    return %arg0, %arg1, %c0_i32, %c0_i32_0 : i32, i32, i32, i32
  }
}

</mosaic_0001>

<bundles_post_ra>
// kernel: rect_sparse_plk_conv2d.1
= control target key start
LH: loop header
LB: loop body
LE: loop exit
PB: predicated region body
PF: predicated region fallthrough
CT: control target
= control target key end

     0   :  { %s10316_s12 = smov 0   ;;  %s10318_s13 = smov 0   ;;  %s13769_s0 = inlined_call_operand.vmem [shape: bf16[2,24,24,4], index: 0, kind: input, shape index: {}]   ;;  %s13770_s1 = inlined_call_operand.vmem [shape: bf16[9,36,4], index: 1, kind: input, shape index: {}]   ;;  %s13771_s2 = inlined_call_operand.vmem [shape: f32[1,4], index: 2, kind: input, shape index: {}]   ;;  %s13772_s3 = inlined_call_operand.vmem [shape: f32[2,16,16,4], index: 3, kind: output, shape index: {}]  }
   0x1   :  { %s10320_s14 = smov 0  }
   0x2 LB: > { %s25_s15 = sadd.s32 1, %s10282_s13  ;;  %p9175_p0 = scmp.ge.s32.totalorder %s10286_s14, 1  ;;  %s10286_s14 = sphi %s10320_s14, %s13_s14   ;;  %s10282_s13 = sphi %s10318_s13, %s13788_s13   ;;  %s10278_s12 = sphi %s10316_s12, %s13787_s12  }
   0x3   : > { %p27_p1 = scmp.ge.s32.totalorder %s25_s15, 2  ;;  %p151_p2 = scmp.lt.s32.totalorder %s10286_s14, 3 }
   0x5   : > { %s13790_s15 = smov (%p27_p1, %s25_s15), 0  ;;  %p152_p3 = pnand %p9175_p0, %p151_p2 }
   0x6   : > { %p180_p4 = scmp.lt.s32.totalorder (!%p152_p3), %s10278_s12, 1  ;;  %s10288_s20 = smov (!%p152_p3), 4  }
   0x7   : > { %155 = sbr.rel (%p152_p3) target bundleno = 1621 (0x655), region = 32  ;;  %s10289_s21 = smov (!%p152_p3), 8  }
   0x8   : > { %s10290_s22 = smov (!%p152_p3), 12   ;;  %s10291_s23 = smov (!%p152_p3), 20  }
   0x9   : > { %s10292_s24 = smov (!%p152_p3), 16   ;;  %s10293_s25 = smov (!%p152_p3), 24  }
   0xa   : > { %s10294_s26 = smov (!%p152_p3), 28   ;;  %s10295_s27 = smov (!%p152_p3), 32  }
   0xc   : > { %s13792_s12 = smov (!%p180_p4, %s10278_s12), 1  ;;  %vm1189_vm0 = vcmask 1041408   ;;  %vm1190_vm1 = vcmask 1045508   ;;  %vm273_vm3 = vsmask.f32 2304  ;;  %vm996_vm6 = vcmask 27648  }
   0xd   : > { %s10230_s16 = smul.u32 288, %s13792_s12  ;;  %vm10343_vm2 = vmor %vm1189_vm0, %vm1190_vm1  ;;  %vm274_vm4 = vsmask.f32 6416  ;;  %vm1504_vm7 = vcmask 60448   ;;  %vm1625_vm8 = vsmask.f32 1280 }
   0xe   : > { %vm10563_vm5 = vmor %vm273_vm3, %vm274_vm4  ;;  %vm1626_vm9 = vsmask.f32 5392  ;;  %vm2444_vm11 = vcmask 93248   ;;  %vm3770_vm12 = vcmask 1042432   ;;  %vm3771_vm13 = vcmask 1046532  }
   0xf   : > { %s10340_s19 = scalar_lea.vmem %s13769_s0, %s10230_s16  ;;  %vm10661_vm10 = vmor %vm1625_vm8, %vm1626_vm9  ;;  %vm2854_vm14 = vsmask.f32 3328  ;;  %vm2855_vm1 = vsmask.f32 7440  ;;  %vm4278_vm3 = vcmask 1040384   ;;  %vm4279_vm4 = vcmask 1044484  }
  0x10   : > { %v1048_v1 = vld [vmem:[%s10340_s19 + $0xc] sm:$0xc]  ;;  %v1049_v2 = vld [vmem:[%s10340_s19 + $0x10] sm:$0xf]  ;;  %v1045_v3 = vld [vmem:[%s10340_s19] sm:$0xc] }
  0x11   : > { %v9180_v4 = vrot.slane %v1048_v1, 10  ;;  %v1201_v5 = vrot.slane %v1049_v2, 6  ;;  %v1046_v6 = vld [vmem:[%s10340_s19 + $0x4] sm:$0xf]  ;;  %v9179_v7 = vrot.slane %v1045_v3, 10  ;;  %vm11444_vm15 = vmor %vm3770_vm12, %vm3771_vm13  ;;  %vm2733_vm9 = vcmask 126048  }
  0x12   : > { %v1194_v8 = vrot.slane %v1046_v6, 6  ;;  %v1050_v9 = vld [vmem:[%s10340_s19 + $0x14] sm:$0x3]  ;;  %v1047_v11 = vld [vmem:[%s10340_s19 + $0x8] sm:$0x3]  ;;  %vm5964_vm12 = vcmask 1045504  }
  0x13   : > { %v1202_v10 = vsel %vm10343_vm2, %v9180_v4, %v1201_v5  ;;  %v1203_v13 = vrot.slane %v1201_v5, 4  ;;  %v1204_v14 = vrot.slane %v1050_v9, 6  ;;  %v1051_v15 = vld [vmem:[%s10340_s19 + $0x18] sm:$0xc]  ;;  %v1052_v16 = vld [vmem:[%s10340_s19 + $0x1c] sm:$0xf] }
  0x14   : > { %1364 = vrot.lane.b32.xlu1 %v1202_v10, %s10288_s20  ;;  %v1195_v12 = vsel %vm10343_vm2, %v9179_v7, %v1194_v8  ;;  %v1196_v17 = vrot.slane %v1194_v8, 4  ;;  %v1197_v18 = vrot.slane %v1047_v11, 6  ;;  %v1055_v19 = vld [vmem:[%s10340_s19 + $0x28] sm:$0xf]  ;;  %v9181_v20 = vrot.slane %v1051_v15, 10 }
  0x15   : > { %1360 = vrot.lane.b32.xlu0 %v1195_v12, %s10288_s20  ;;  %v1208_v21 = vrot.slane %v1052_v16, 6  ;;  %v1053_v23 = vld [vmem:[%s10340_s19 + $0x20] sm:$0x3]  ;;  %v1205_v24 = vsel %vm10343_vm2, %v1203_v13, %v1204_v14  ;;  %v1215_v25 = vrot.slane %v1055_v19, 6  ;;  %v1056_v27 = vld [vmem:[%s10340_s19 + $0x2c] sm:$0x3] }
  0x16   : > { %v1198_v26 = vsel %vm10343_vm2, %v1196_v17, %v1197_v18  ;;  %v1211_v29 = vrot.slane %v1053_v23, 6  ;;  %v1054_v30 = vld [vmem:[%s10340_s19 + $0x24] sm:$0xc]  ;;  %v1218_v32 = vrot.slane %v1056_v27, 6  ;;  %v1058_v35 = vld [vmem:[%s10340_s19 + $0x34] sm:$0xf] }
  0x17   : > { %v1209_v22 = vsel %vm10343_vm2, %v9181_v20, %v1208_v21  ;;  %v1210_v28 = vrot.slane %v1208_v21, 4  ;;  %v1217_v31 = vrot.slane %v1215_v25, 4  ;;  %v9182_v33 = vrot.slane %v1054_v30, 10  ;;  %v1057_v36 = vld [vmem:[%s10340_s19 + $0x30] sm:$0xc] }
  0x18   : > { %1368 = vrot.lane.b32.xlu2 %v1209_v22, %s10288_s20  ;;  %v1060_v39 = vld [vmem:[%s10340_s19 + $0x3c] sm:$0xc]  ;;  %v1061_v40 = vld [vmem:[%s10340_s19 + $0x40] sm:$0xf]  ;;  %v1222_v41 = vrot.slane %v1058_v35, 6  ;;  %v9183_v42 = vrot.slane %v1057_v36, 10 }
  0x19   : > { %v1212_v34 = vsel %vm10343_vm2, %v1210_v28, %v1211_v29  ;;  %v1219_v37 = vsel %vm10343_vm2, %v1217_v31, %v1218_v32  ;;  %v1216_v38 = vsel %vm10343_vm2, %v9182_v33, %v1215_v25  ;;  %v1059_v43 = vld [vmem:[%s10340_s19 + $0x38] sm:$0x3]  ;;  %v9184_v44 = vrot.slane %v1060_v39, 10  ;;  %v1064_v48 = vld [vmem:[%s10340_s19 + $0x4c] sm:$0xf] }
  0x1a   : > { %v1229_v45 = vrot.slane %v1061_v40, 6  ;;  %v1224_v46 = vrot.slane %v1222_v41, 4  ;;  %v1225_v47 = vrot.slane %v1059_v43, 6  ;;  %v1223_v49 = vsel %vm10343_vm2, %v9183_v42, %v1222_v41  ;;  %v1062_v50 = vld [vmem:[%s10340_s19 + $0x44] sm:$0x3] }
  0x1b   : > { %v1236_v52 = vrot.slane %v1064_v48, 6  ;;  %v1065_v54 = vld [vmem:[%s10340_s19 + $0x50] sm:$0x3]  ;;  %v1232_v56 = vrot.slane %v1062_v50, 6  ;;  %v1063_v57 = vld [vmem:[%s10340_s19 + $0x48] sm:$0xc] }
  0x1c   : > { %1366 = vrot.lane.b32.xlu1 %v1205_v24, %s10288_s20  ;;  %v1230_v51 = vsel %vm10343_vm2, %v9184_v44, %v1229_v45  ;;  %v1226_v53 = vsel %vm10343_vm2, %v1224_v46, %v1225_v47  ;;  %v1231_v55 = vrot.slane %v1229_v45, 4  ;;  %v1239_v59 = vrot.slane %v1065_v54, 6  ;;  %v1067_v62 = vld [vmem:[%s10340_s19 + $0x58] sm:$0xf]  ;;  %v1066_v63 = vld [vmem:[%s10340_s19 + $0x54] sm:$0xc] }
  0x1d   : > { %1362 = vrot.lane.b32.xlu0 %v1198_v26, %s10288_s20  ;;  %v1238_v58 = vrot.slane %v1236_v52, 4  ;;  %v9185_v60 = vrot.slane %v1063_v57, 10  ;;  %v1069_v3 = vld [vmem:[%s10340_s19 + $0x60] sm:$0xc]  ;;  %v1070_v4 = vld [vmem:[%s10340_s19 + $0x64] sm:$0xf] }
  0x1e   : > { %v1233_v61 = vsel %vm10343_vm2, %v1231_v55, %v1232_v56  ;;  %v1243_v5 = vrot.slane %v1067_v62, 6  ;;  %v9186_v6 = vrot.slane %v1066_v63, 10  ;;  %v1068_v7 = vld [vmem:[%s10340_s19 + $0x5c] sm:$0x3]  ;;  %v9187_v8 = vrot.slane %v1069_v3, 10 }
  0x1f   : > { %v1240_v1 = vsel %vm10343_vm2, %v1238_v58, %v1239_v59  ;;  %v1237_v2 = vsel %vm10343_vm2, %v9185_v60, %v1236_v52  ;;  %v1250_v9 = vrot.slane %v1070_v4, 6  ;;  %v1246_v11 = vrot.slane %v1068_v7, 6  ;;  %v1073_v12 = vld [vmem:[%s10340_s19 + $0x70] sm:$0xf]  ;;  %v1071_v14 = vld [vmem:[%s10340_s19 + $0x68] sm:$0x3] }
  0x20   : > { %1370 = vrot.lane.b32.xlu2 %v1212_v34, %s10288_s20  ;;  %v1245_v10 = vrot.slane %v1243_v5, 4  ;;  %v1244_v13 = vsel %vm10343_vm2, %v9186_v6, %v1243_v5  ;;  %v1257_v16 = vrot.slane %v1073_v12, 6  ;;  %v1074_v18 = vld [vmem:[%s10340_s19 + $0x74] sm:$0x3]  ;;  %v1253_v20 = vrot.slane %v1071_v14, 6 }
  0x21   : > { %v1251_v15 = vsel %vm10343_vm2, %v9187_v8, %v1250_v9  ;;  %v1252_v19 = vrot.slane %v1250_v9, 4  ;;  %v1072_v21 = vld [vmem:[%s10340_s19 + $0x6c] sm:$0xc]  ;;  %v1260_v23 = vrot.slane %v1074_v18, 6  ;;  %v1076_v26 = vld [vmem:[%s10340_s19 + $0x7c] sm:$0xf] }
  0x22   : > { %v1247_v17 = vsel %vm10343_vm2, %v1245_v10, %v1246_v11  ;;  %v1259_v22 = vrot.slane %v1257_v16, 4  ;;  %v9188_v24 = vrot.slane %v1072_v21, 10  ;;  %v1075_v27 = vld [vmem:[%s10340_s19 + $0x78] sm:$0xc]  ;;  %v1078_v30 = vld [vmem:[%s10340_s19 + $0x84] sm:$0xc] }
  0x23   : > { %v1254_v25 = vsel %vm10343_vm2, %v1252_v19, %v1253_v20  ;;  %v1079_v31 = vld [vmem:[%s10340_s19 + $0x88] sm:$0xf]  ;;  %v1264_v32 = vrot.slane %v1076_v26, 6  ;;  %v9189_v33 = vrot.slane %v1075_v27, 10  ;;  %v1077_v34 = vld [vmem:[%s10340_s19 + $0x80] sm:$0x3] }
  0x24   : > { %1374 = vrot.lane.b32.xlu1 %v1219_v37, %s10288_s20  ;;  %v1261_v28 = vsel %vm10343_vm2, %v1259_v22, %v1260_v23  ;;  %v1258_v29 = vsel %vm10343_vm2, %v9188_v24, %v1257_v16  ;;  %v9190_v35 = vrot.slane %v1078_v30, 10  ;;  %v1271_v36 = vrot.slane %v1079_v31, 6  ;;  %v1082_v39 = vld [vmem:[%s10340_s19 + $0x94] sm:$0xf]  ;;  %v1080_v41 = vld [vmem:[%s10340_s19 + $0x8c] sm:$0x3] }
  0x25   : > { %1372 = vrot.lane.b32.xlu0 %v1216_v38, %s10288_s20  ;;  %v1266_v37 = vrot.slane %v1264_v32, 4  ;;  %v1267_v38 = vrot.slane %v1077_v34, 6  ;;  %v1265_v40 = vsel %vm10343_vm2, %v9189_v33, %v1264_v32  ;;  %v1278_v43 = vrot.slane %v1082_v39, 6  ;;  %v1083_v45 = vld [vmem:[%s10340_s19 + $0x98] sm:$0x3] }
  0x26   : > { %v1272_v42 = vsel %vm10343_vm2, %v9190_v35, %v1271_v36  ;;  %v1273_v46 = vrot.slane %v1271_v36, 4  ;;  %v1274_v47 = vrot.slane %v1080_v41, 6  ;;  %v1081_v48 = vld [vmem:[%s10340_s19 + $0x90] sm:$0xc]  ;;  %v1281_v50 = vrot.slane %v1083_v45, 6 }
  0x27   : > { %v1268_v44 = vsel %vm10343_vm2, %v1266_v37, %v1267_v38  ;;  %v9191_v52 = vrot.slane %v1081_v48, 10  ;;  %v1091_v54 = vld [vmem:[%s10340_s19 + $0xb8] sm:$0xf]  ;;  %v1087_v55 = vld [vmem:[%s10340_s19 + $0xa8] sm:$0xc]  ;;  %vm4593_vm13 = vcmask 224448  }
  0x28   : > { %1376 = vrot.lane.b32.xlu2 %v1223_v49, %s10288_s20  ;;  %v1280_v49 = vrot.slane %v1278_v43, 4  ;;  %v1084_v56 = vld [vmem:[%s10340_s19 + $0x9c] sm:$0xc]  ;;  %v1088_v57 = vld [vmem:[%s10340_s19 + $0xac] sm:$0xf] }
  0x29   : > { %v1086_v60 = vld [vmem:[%s10340_s19 + $0xa4] sm:$0x3]  ;;  %v1279_v63 = vsel %vm10343_vm2, %v9191_v52, %v1278_v43  ;;  %v9192_v3 = vrot.slane %v1084_v56, 10  ;;  %v1090_v4 = vld [vmem:[%s10340_s19 + $0xb4] sm:$0xc]  ;;  %v1292_v7 = vrot.slane %v1088_v57, 6 }
  0x2a   : > { %v1282_v59 = vsel %vm10343_vm2, %v1280_v49, %v1281_v50  ;;  %v10467_v62 = vld [vmem:[%s10340_s19 + $0xc4] sm:$0xf]  ;;  %v1096_v5 = vld [vmem:[%s10340_s19 + $0xcc] sm:$0xc]  ;;  %v1100_v6 = vld [vmem:[%s10340_s19 + $0xdc] sm:$0xf] }
  0x2b   : > { %v1288_v9 = vrot.slane %v1086_v60, 6  ;;  %v1306_v10 = vrot.slane %v10467_v62, 6  ;;  %v1095_v14 = vld [vmem:[%s10340_s19 + $0xc8] sm:$0x3]  ;;  %v1320_v18 = vrot.slane %v1100_v6, 6  ;;  %v1294_v32 = vrot.slane %v1292_v7, 4 }
  0x2c   : > { %1380 = vrot.lane.b32.xlu1 %v1230_v51, %s10288_s20  ;;  %v1085_v51 = vld [vmem:[%s10340_s19 + $0xa0] sm:$0xf]  ;;  %v1089_v19 = vld [vmem:[%s10340_s19 + $0xb0] sm:$0x3]  ;;  %v10485_v21 = vld [vmem:[%s10340_s19 + $0xe8] sm:$0xf] }
  0x2d   : > { %1378 = vrot.lane.b32.xlu0 %v1226_v53, %s10288_s20  ;;  %v1275_v53 = vsel %vm10343_vm2, %v1273_v46, %v1274_v47  ;;  %v1285_v58 = vrot.slane %v1085_v51, 6  ;;  %v1101_v20 = vld [vmem:[%s10340_s19 + $0xe0] sm:$0x3]  ;;  %v1308_v23 = vrot.slane %v1306_v10, 4  ;;  %v1309_v24 = vrot.slane %v1095_v14, 6 }
  0x2e   : > { %v1327_v26 = vrot.slane %v10485_v21, 6  ;;  %v1105_v30 = vld [vmem:[%s10340_s19 + $0xf0] sm:$0xc]  ;;  %v10497_v31 = vld [vmem:[%s10340_s19 + $0xf4] sm:$0xf]  ;;  %v1295_v33 = vrot.slane %v1089_v19, 6 }
  0x2f   : > { %v1287_v8 = vrot.slane %v1285_v58, 4  ;;  %v1286_v16 = vsel %vm10343_vm2, %v9192_v3, %v1285_v58  ;;  %v1322_v34 = vrot.slane %v1320_v18, 4  ;;  %v1323_v35 = vrot.slane %v1101_v20, 6  ;;  %v1104_v36 = vld [vmem:[%s10340_s19 + $0xec] sm:$0x3] }
  0x30   : > { %1382 = vrot.lane.b32.xlu2 %v1233_v61, %s10288_s20  ;;  %v1299_v61 = vrot.slane %v1091_v54, 6  ;;  %v9199_v41 = vrot.slane %v1105_v30, 10  ;;  %v1329_v43 = vrot.slane %v1327_v26, 4  ;;  %v10515_v45 = vsel %vm10343_vm2, %v1308_v23, %v1309_v24  ;;  %v1098_v47 = vld [vmem:[%s10340_s19 + $0xd4] sm:$0x3] }
  0x31   : > { %v1330_v46 = vrot.slane %v1104_v36, 6  ;;  %v10519_v49 = vld [vmem:[%s10340_s19 + $0x100] sm:$0xf]  ;;  %v1296_v50 = vsel %vm10343_vm2, %v1294_v32, %v1295_v33  ;;  %v10525_v51 = vsel %vm10343_vm2, %v1322_v34, %v1323_v35  ;;  %v1316_v52 = vrot.slane %v1098_v47, 6  ;;  %v204_v60 = vld [vmem:[%s10340_s19 + $0xc] sm:$0xe] }
  0x32   : > { %v1301_v11 = vrot.slane %v1299_v61, 4  ;;  %v1341_v54 = vrot.slane %v10519_v49, 6  ;;  %v305_v3 = vshrl.u32 %v204_v60, 16  ;;  %v10573_v36 = vld [vmem:[%s10340_s19 + $0x10c] sm:$0xf] }
  0x33   : > { %v1102_v47 = vld [vmem:[%s10340_s19 + $0xe4] sm:$0xc] }
  0x34   : > { %1386 = vrot.lane.b32.xlu1 %v1240_v1, %s10288_s20  ;;  %v9193_v1 = vrot.slane %v1087_v55, 10  ;;  %v207_v55 = vld [vmem:[%s10340_s19 + $0x18] sm:$0xe] }
  0x35   : > { %1384 = vrot.lane.b32.xlu0 %v1237_v2, %s10288_s20  ;;  %v1092_v2 = vld [vmem:[%s10340_s19 + $0xbc] sm:$0x3]  ;;  %v333_v58 = vshrl.u32 %v207_v55, 16 }
  0x36   : > { %v1302_v12 = vrot.slane %v1092_v2, 6  ;;  %v1293_v27 = vsel %vm10343_vm2, %v9193_v1, %v1292_v7  ;;  %v208_v1 = vld [vmem:[%s10340_s19 + $0x1c] sm:$0xf]  ;;  %v205_v2 = vld [vmem:[%s10340_s19 + $0x10] sm:$0xf] }
  0x37   : > { %v342_v6 = vshrl.u32 %v208_v1, 16  ;;  %v345_v7 = vshll.u32 %v208_v1, 16 }
  0x38   : > { %1388 = vrot.lane.b32.xlu2 %v1244_v13, %s10288_s20  ;;  %v1097_v13 = vld [vmem:[%s10340_s19 + $0xd0] sm:$0xf]  ;;  %v1303_v37 = vsel %vm10343_vm2, %v1301_v11, %v1302_v12  ;;  %v307_v11 = vrot.slane %v305_v3, 5  ;;  %v308_v12 = vshll.u32 %v204_v60, 16 }
  0x39   : > { %v1313_v22 = vrot.slane %v1097_v13, 6  ;;  %v201_v13 = vld [vmem:[%s10340_s19] sm:$0xe] }
  0x3a   : > { %v310_v20 = vrot.slane %v308_v12, 6  ;;  %v277_v30 = vshrl.u32 %v201_v13, 16  ;;  %v280_v33 = vshll.u32 %v201_v13, 16  ;;  %v1554_v12 = vld [vmem:[%s10340_s19 + $0x4] sm:$0xf] }
  0x3b   : > { %v1315_v48 = vrot.slane %v1313_v22, 4 }
  0x3c   : > { %1392 = vrot.lane.b32.xlu1 %v1251_v15, %s10288_s20  ;;  %v9194_v15 = vrot.slane %v1090_v4, 10  ;;  %v335_v4 = vrot.slane %v333_v58, 5 }
  0x3d   : > { %1390 = vrot.lane.b32.xlu0 %v1247_v17, %s10288_s20  ;;  %v9196_v17 = vrot.slane %v1096_v5, 10 }
  0x3e   : > { %v1300_v38 = vsel %vm10343_vm2, %v9194_v15, %v1299_v61  ;;  %v344_v15 = vrot.slane %v342_v6, 5 }
  0x40   : > { %1394 = vrot.lane.b32.xlu2 %v1254_v25, %s10288_s20  ;;  %v1099_v25 = vld [vmem:[%s10340_s19 + $0xd8] sm:$0xc] }
  0x41   : > { %v9197_v39 = vrot.slane %v1099_v25, 10 }
  0x43   : > { %v10532_v56 = vsel %vm10343_vm2, %v9197_v39, %v1320_v18  ;;  %v202_v18 = vld [vmem:[%s10340_s19 + $0x4] sm:$0xf]  ;;  %v279_v39 = vrot.slane %v277_v30, 5 }
  0x44   : > { %1398 = vrot.lane.b32.xlu1 %v1261_v28, %s10288_s20  ;;  %v1289_v28 = vsel %vm10343_vm2, %v1287_v8, %v1288_v9  ;;  %v10548_v8 = vsel %vm10343_vm2, %v1329_v43, %v1330_v46  ;;  %v10552_v9 = vsel %vm10343_vm2, %v1315_v48, %v1316_v52  ;;  %v286_v34 = vshrl.u32 %v202_v18, 16  ;;  %v1114_v52 = vld [vmem:[%s10340_s19 + $0x114] sm:$0xc] }
  0x45   : > { %1396 = vrot.lane.b32.xlu0 %v1258_v29, %s10288_s20  ;;  %v1093_v29 = vld [vmem:[%s10340_s19 + $0xc0] sm:$0xc]  ;;  %v289_v35 = vshll.u32 %v202_v18, 16 }
  0x46   : > { %v288_v43 = vrot.slane %v286_v34, 5 }
  0x47   : > { %v291_v46 = vrot.slane %v289_v35, 6 }
  0x48   : > { %1400 = vrot.lane.b32.xlu2 %v1265_v40, %s10288_s20  ;;  %v9195_v40 = vrot.slane %v1093_v29, 10  ;;  %v317_v29 = vshll.u32 %v205_v2, 16 }
  0x49   : > { %v10591_v58 = vor.u32 %v291_v46, %v288_v43 }
  0x4a   : > { %v1307_v61 = vsel %vm10343_vm2, %v9195_v40, %v1306_v10  ;;  %v1108_v10 = vld [vmem:[%s10340_s19 + $0xfc] sm:$0xc]  ;;  %v1348_v40 = vrot.slane %v10573_v36, 6 }
  0x4b   : > { %v216_v36 = vld [vmem:[%s10340_s19 + $0x3c] sm:$0xe] }
  0x4c   : > { %1404 = vrot.lane.b32.xlu1 %v1272_v42, %s10288_s20  ;;  %v1334_v42 = vrot.slane %v10497_v31, 6 }
  0x4d   : > { %1402 = vrot.lane.b32.xlu0 %v1268_v44, %s10288_s20  ;;  %v10511_v44 = vsel %vm10343_vm2, %v9196_v17, %v1313_v22  ;;  %v314_v17 = vshrl.u32 %v205_v2, 16  ;;  %v9200_v22 = vrot.slane %v1108_v10, 10 }
  0x4e   : > { %v10541_v62 = vsel %vm10343_vm2, %v9199_v41, %v1334_v42  ;;  %v282_v41 = vrot.slane %v280_v33, 6 }
  0x4f   : > { %v10581_v48 = vsel %vm10343_vm2, %v9200_v22, %v1341_v54 }
  0x50   : > { %1406 = vrot.lane.b32.xlu2 %v1275_v53, %s10288_s20  ;;  %v1110_v53 = vld [vmem:[%s10340_s19 + $0x104] sm:$0x3] }
  0x51   : > { %v1344_v57 = vrot.slane %v1110_v53, 6  ;;  %v10587_v53 = vld [vmem:[%s10340_s19 + $0x118] sm:$0xf] }
  0x52   : > { %v1355_v60 = vrot.slane %v10587_v53, 6 }
  0x54   : > { %1410 = vrot.lane.b32.xlu1 %v1282_v59, %s10288_s20  ;;  %v336_v59 = vshll.u32 %v207_v55, 16  ;;  %v1350_v55 = vrot.slane %v1348_v40, 4 }
  0x55   : > { %1408 = vrot.lane.b32.xlu0 %v1279_v63, %s10288_s20  ;;  %v1343_v63 = vrot.slane %v1341_v54, 4  ;;  %v209_v54 = vld [vmem:[%s10340_s19 + $0x20] sm:$0x3] }
  0x56   : > { %v338_v5 = vrot.slane %v336_v59, 6  ;;  %v9202_v59 = vrot.slane %v1114_v52, 10  ;;  %v352_v3 = vshrl.u32 %v209_v54, 16  ;;  %v355_v6 = vshll.u32 %v209_v54, 16 }
  0x57   : > { %v10560_v19 = vsel %vm10343_vm2, %v1343_v63, %v1344_v57  ;;  %v283_v57 = vor.u32 %v282_v41, %v279_v39 }
  0x58   : > { %1412 = vrot.lane.b32.xlu2 %v1286_v16, %s10288_s20  ;;  %v339_v14 = vor.u32 %v338_v5, %v335_v4  ;;  %v347_v16 = vrot.slane %v345_v7, 6  ;;  %v206_v4 = vld [vmem:[%s10340_s19 + $0x14] sm:$0x3]  ;;  %v203_v5 = vld [vmem:[%s10340_s19 + $0x8] sm:$0x3]  ;;  %v10616_v21 = vsel %vm10343_vm2, %v9202_v59, %v1355_v60  ;;  %v354_v10 = vrot.slane %v352_v3, 5 }
  0x59   : > { %v299_v22 = vshll.u32 %v203_v5, 16 }
  0x5a   : > { %v340_v24 = vrot.slane %v339_v14, 4  ;;  %v10567_v25 = vor.u32 %v347_v16, %v344_v15  ;;  %v357_v14 = vrot.slane %v355_v6, 6  ;;  %v327_v15 = vshll.u32 %v206_v4, 16 }
  0x5b   : > { %v294_v16 = vrot.slane %v10591_v58, 4 }
  0x5c   : > { %1416 = vrot.lane.b32.xlu1 %v1293_v27, %s10288_s20  ;;  %v311_v27 = vor.u32 %v310_v20, %v307_v11  ;;  %v349_v32 = vsel %vm10563_vm5, %v340_v24, %v10567_v25  ;;  %v296_v20 = vshrl.u32 %v203_v5, 16  ;;  %v1336_v24 = vrot.slane %v1334_v42, 4 }
  0x5d   : > { %1414 = vrot.lane.b32.xlu0 %v1289_v28, %s10288_s20  ;;  %v316_v28 = vrot.slane %v314_v17, 5  ;;  %1001 = vst.msk [vmem:[#allocation2 + $0x10] sm:$0xf] %vm996_vm6, %v349_v32  ;;  %v1555_v17 = vld [vmem:[%s10340_s19 + $0x8] sm:$0x7]  ;;  %v301_v32 = vrot.slane %v299_v22, 6 }
  0x5e   : > { %v298_v30 = vrot.slane %v296_v20, 5  ;;  %v1648_v43 = vshrl.u32 %v1555_v17, 16  ;;  %v1651_v46 = vshll.u32 %v1555_v17, 16  ;;  %v210_v17 = vld [vmem:[%s10340_s19 + $0x24] sm:$0xe] }
  0x60   : > { %1418 = vrot.lane.b32.xlu2 %v1296_v50, %s10288_s20  ;;  %v9198_v50 = vrot.slane %v1102_v47, 10  ;;  %v302_v39 = vor.u32 %v301_v32, %v298_v30  ;;  %v214_v47 = vld [vmem:[%s10340_s19 + $0x34] sm:$0xf] }
  0x61   : > { %v398_v5 = vshrl.u32 %v214_v47, 16 }
  0x62   : > { %v10605_v1 = vsel %vm10343_vm2, %v9198_v50, %v1327_v26  ;;  %v350_v26 = vrot.slane %v10567_v25, 4  ;;  %v358_v25 = vor.u32 %v357_v14, %v354_v10 }
  0x64   : > { %1422 = vrot.lane.b32.xlu1 %v1303_v37, %s10288_s20  ;;  %v312_v37 = vrot.slane %v311_v27, 4  ;;  %v329_v27 = vrot.slane %v327_v15, 6  ;;  %v359_v31 = vsel %vm10563_vm5, %v350_v26, %v358_v25  ;;  %v211_v26 = vld [vmem:[%s10340_s19 + $0x28] sm:$0xf] }
  0x65   : > { %1420 = vrot.lane.b32.xlu0 %v1300_v38, %s10288_s20  ;;  %v319_v38 = vrot.slane %v317_v29, 6  ;;  %v1638_v29 = vshrl.u32 %v1554_v12, 16  ;;  %1002 = vst.msk [vmem:[#allocation2 + $0x14] sm:$0xf] %vm996_vm6, %v359_v31  ;;  %v373_v15 = vshll.u32 %v211_v26, 16  ;;  %v361_v31 = vshrl.u32 %v210_v17, 16 }
  0x66   : > { %v1111_v25 = vld [vmem:[%s10340_s19 + $0x108] sm:$0xc] }
  0x67   : > { %v10583_v49 = vor.u32 %v319_v38, %v316_v28  ;;  %v1107_v28 = vld [vmem:[%s10340_s19 + $0xf8] sm:$0x3]  ;;  %v1640_v35 = vrot.slane %v1638_v29, 6  ;;  %v1553_v38 = vld [vmem:[%s10340_s19] sm:$0xc]  ;;  %v375_v29 = vrot.slane %v373_v15, 6 }
  0x68   : > { %1424 = vrot.lane.b32.xlu2 %v1307_v61, %s10288_s20  ;;  %v1113_v61 = vld [vmem:[%s10340_s19 + $0x110] sm:$0x3]  ;;  %v1337_v33 = vrot.slane %v1107_v28, 6  ;;  %v1632_v52 = vshll.u32 %v1553_v38, 16 }
  0x69   : > { %v321_v63 = vsel %vm10563_vm5, %v312_v37, %v10583_v49  ;;  %v1351_v2 = vrot.slane %v1113_v61, 6  ;;  %v322_v11 = vrot.slane %v10583_v49, 4  ;;  %v1641_v37 = vshll.u32 %v1554_v12, 16 }
  0x6a   : > { %999 = vst.msk [vmem:[#allocation2 + $0x8] sm:$0xf] %vm996_vm6, %v321_v63  ;;  %v10645_v41 = vsel %vm10343_vm2, %v1336_v24, %v1337_v33  ;;  %v1634_v54 = vrot.slane %v1632_v52, 7  ;;  %v370_v12 = vshrl.u32 %v211_v26, 16 }
  0x6b   : > { %v10621_v7 = vsel %vm10343_vm2, %v1350_v55, %v1351_v2  ;;  %v1643_v50 = vrot.slane %v1641_v37, 7  ;;  %v303_v55 = vsel %vm10563_vm5, %v294_v16, %v302_v39  ;;  %v1557_v39 = vld [vmem:[%s10340_s19 + $0x10] sm:$0xf]  ;;  %v2499_v2 = vld [vmem:[%s10340_s19 + $0x24] sm:$0xf] }
  0x6c   : > { %1428 = vrot.lane.b32.xlu1 %v10511_v44, %s10288_s20  ;;  %v284_v44 = vrot.slane %v283_v57, 4  ;;  %v1650_v57 = vrot.slane %v1648_v43, 6  ;;  %998 = vst.msk [vmem:[#allocation2 + $0x4] sm:$0xf] %vm996_vm6, %v303_v55  ;;  %v372_v24 = vrot.slane %v370_v12, 5 }
  0x6d   : > { %1426 = vrot.lane.b32.xlu0 %v10515_v45, %s10288_s20  ;;  %v324_v45 = vshrl.u32 %v206_v4, 16 }
  0x6e   : > { %v293_v13 = vsel %vm10563_vm5, %v284_v44, %v10591_v58  ;;  %v1653_v58 = vrot.slane %v1651_v46, 7  ;;  %v401_v44 = vshll.u32 %v214_v47, 16 }
  0x6f   : > { %997 = vst.msk [vmem:[#allocation2] sm:$0xf] %vm996_vm6, %v293_v13  ;;  %v326_v18 = vrot.slane %v324_v45, 5  ;;  %v212_v45 = vld [vmem:[%s10340_s19 + $0x2c] sm:$0x3]  ;;  %v400_v13 = vrot.slane %v398_v5, 5 }
  0x70   : > { %1430 = vrot.lane.b32.xlu2 %v10552_v9, %s10288_s20  ;;  %v213_v9 = vld [vmem:[%s10340_s19 + $0x30] sm:$0xe]  ;;  %v1654_v3 = vor.u32 %v1653_v58, %v1650_v57  ;;  %v403_v14 = vrot.slane %v401_v44, 6  ;;  %v380_v16 = vshrl.u32 %v212_v45, 16  ;;  %v383_v32 = vshll.u32 %v212_v45, 16 }
  0x71   : > { %v330_v42 = vor.u32 %v329_v27, %v326_v18  ;;  %v389_v59 = vshrl.u32 %v213_v9, 16  ;;  %v392_v63 = vshll.u32 %v213_v9, 16  ;;  %v1559_v27 = vld [vmem:[%s10340_s19 + $0x18] sm:$0xc]  ;;  %v217_v57 = vld [vmem:[%s10340_s19 + $0x40] sm:$0xf] }
  0x72   : > { %v1369_v34 = vpop.permute.xlu2 %1368  ;;  %v10682_v28 = vor.u32 %v403_v14, %v400_v13  ;;  %v382_v30 = vrot.slane %v380_v16, 5  ;;  %v385_v37 = vrot.slane %v383_v32, 6  ;;  %v1685_v9 = vshrl.u32 %v1559_v27, 16 }
  0x73   : > { %1509 = vst.msk [vmem:[#allocation2 + $0x10] sm:$0xf] %vm1504_vm7, %v1369_v34  ;;  %v331_v49 = vsel %vm10563_vm5, %v322_v11, %v330_v42  ;;  %v391_v4 = vrot.slane %v389_v59, 5  ;;  %v394_v11 = vrot.slane %v392_v63, 6  ;;  %v1560_v42 = vld [vmem:[%s10340_s19 + $0x1c] sm:$0xf] }
  0x74   : > { %1434 = vrot.lane.b32.xlu1 %v10525_v51, %s10288_s20  ;;  %v1629_v51 = vshrl.u32 %v1553_v38, 16  ;;  %1000 = vst.msk [vmem:[#allocation2 + $0xc] sm:$0xf] %vm996_vm6, %v331_v49  ;;  %v9201_v38 = vrot.slane %v1111_v25, 10  ;;  %v1688_v47 = vshll.u32 %v1559_v27, 16  ;;  %v1687_v55 = vrot.slane %v1685_v9, 6 }
  0x75   : > { %1432 = vrot.lane.b32.xlu0 %v10532_v56, %s10288_s20  ;;  %v10657_v56 = vor.u32 %v1643_v50, %v1640_v35  ;;  %v376_v35 = vor.u32 %v375_v29, %v372_v24  ;;  %v1558_v49 = vld [vmem:[%s10340_s19 + $0x14] sm:$0x7]  ;;  %v218_v63 = vld [vmem:[%s10340_s19 + $0x44] sm:$0x3]  ;;  %v1669_v5 = vshll.u32 %v1557_v39, 16  ;;  %v429_v25 = vshll.u32 %v217_v57, 16 }
  0x76   : > { %v1631_v61 = vrot.slane %v1629_v51, 6  ;;  %v386_v51 = vor.u32 %v385_v37, %v382_v30  ;;  %v1349_v52 = vsel %vm10343_vm2, %v9201_v38, %v1348_v40  ;;  %v1690_v59 = vrot.slane %v1688_v47, 7  ;;  %v1116_v29 = vld [vmem:[%s10340_s19 + $0x11c] sm:$0x3] }
  0x77   : > { %v1646_v6 = vrot.slane %v10657_v56, 4  ;;  %v378_v50 = vrot.slane %v376_v35, 4  ;;  %v1676_v44 = vshrl.u32 %v1558_v49, 16  ;;  %v1671_v45 = vrot.slane %v1669_v5, 7  ;;  %v222_v5 = vld [vmem:[%s10340_s19 + $0x54] sm:$0xe] }
  0x78   : > { %1436 = vrot.lane.b32.xlu2 %v10605_v1, %s10288_s20  ;;  %v1635_v10 = vor.u32 %v1634_v54, %v1631_v61  ;;  %v395_v1 = vor.u32 %v394_v11, %v391_v4  ;;  %v1694_v61 = vshrl.u32 %v1560_v42, 16  ;;  %v1697_v54 = vshll.u32 %v1560_v42, 16 }
  0x79   : > { %v10673_v20 = vsel %vm10661_vm10, %v1646_v6, %v1654_v3  ;;  %v387_v3 = vsel %vm10563_vm5, %v378_v50, %v386_v51  ;;  %v1666_v4 = vshrl.u32 %v1557_v39, 16  ;;  %v1691_v6 = vor.u32 %v1690_v59, %v1687_v55  ;;  %v1564_v51 = vld [vmem:[%s10340_s19 + $0x2c] sm:$0x7] }
  0x7a   : > { %v1371_v18 = vpop.permute.xlu2 %1370  ;;  %v10675_v22 = vrot.slane %v1635_v10, 4  ;;  %v396_v34 = vrot.slane %v395_v1, 4  ;;  %1004 = vst.msk [vmem:[#allocation2 + $0x1c] sm:$0xf] %vm996_vm6, %v387_v3  ;;  %v1696_v10 = vrot.slane %v1694_v61, 6  ;;  %v1678_v12 = vrot.slane %v1676_v44, 6 }
  0x7b   : > { %1510 = vst.msk [vmem:[#allocation2 + $0x14] sm:$0xf] %vm1504_vm7, %v1371_v18  ;;  %v1668_v11 = vrot.slane %v1666_v4, 6  ;;  %v1679_v13 = vshll.u32 %v1558_v49, 16  ;;  %v10716_v15 = vrot.slane %v1691_v6, 4  ;;  %v436_v27 = vshrl.u32 %v218_v63, 16 }
  0x7c   : > { %1440 = vrot.lane.b32.xlu1 %v10541_v62, %s10288_s20  ;;  %v1645_v33 = vsel %vm10661_vm10, %v10675_v22, %v10657_v56  ;;  %v364_v62 = vshll.u32 %v210_v17, 16  ;;  %v405_v43 = vsel %vm10563_vm5, %v396_v34, %v10682_v28  ;;  %v426_v17 = vshrl.u32 %v217_v57, 16  ;;  %v215_v18 = vld [vmem:[%s10340_s19 + $0x38] sm:$0x3] }
  0x7d   : > { %1438 = vrot.lane.b32.xlu0 %v10548_v8, %s10288_s20  ;;  %v363_v8 = vrot.slane %v361_v31, 5  ;;  %1005 = vst.msk [vmem:[#allocation2 + $0x20] sm:$0xf] %vm996_vm6, %v405_v43  ;;  %v10722_v1 = vor.u32 %v1671_v45, %v1668_v11  ;;  %v1681_v24 = vrot.slane %v1679_v13, 7  ;;  %v439_v34 = vshll.u32 %v218_v63, 16 }
  0x7e   : > { %v366_v46 = vrot.slane %v364_v62, 6  ;;  %v428_v32 = vrot.slane %v426_v17, 5  ;;  %v417_v31 = vshrl.u32 %v216_v36, 16  ;;  %v438_v37 = vrot.slane %v436_v27, 5  ;;  %v1562_v63 = vld [vmem:[%s10340_s19 + $0x24] sm:$0xc] }
  0x7f   : > { %v1674_v62 = vrot.slane %v10722_v1, 4  ;;  %v1682_v42 = vor.u32 %v1681_v24, %v1678_v12  ;;  %v441_v38 = vrot.slane %v439_v34, 6  ;;  %v420_v39 = vshll.u32 %v216_v36, 16 }
  0x80   : > { %1442 = vrot.lane.b32.xlu2 %v10645_v41, %s10288_s20  ;;  %v367_v58 = vor.u32 %v366_v46, %v363_v8  ;;  %v1699_v41 = vrot.slane %v1697_v54, 7  ;;  %v419_v9 = vrot.slane %v417_v31, 5  ;;  %v406_v43 = vrot.slane %v10682_v28, 4  ;;  %v1563_v8 = vld [vmem:[%s10340_s19 + $0x28] sm:$0xf] }
  0x81   : > { %v10737_v46 = vsel %vm10661_vm10, %v1674_v62, %v1682_v42  ;;  %v408_v49 = vshrl.u32 %v215_v18, 16  ;;  %v411_v50 = vshll.u32 %v215_v18, 16  ;;  %v442_v55 = vor.u32 %v441_v38, %v438_v37  ;;  %v219_v62 = vld [vmem:[%s10340_s19 + $0x48] sm:$0xe] }
  0x82   : > { %v1377_v26 = vpop.permute.xlu2 %1376  ;;  %v368_v40 = vrot.slane %v367_v58, 4  ;;  %v10718_v16 = vor.u32 %v1699_v41, %v1696_v10  ;;  %v422_v57 = vrot.slane %v420_v39, 6  ;;  %v1358_v58 = vrot.slane %v1116_v29, 6  ;;  %v223_v10 = vld [vmem:[%s10340_s19 + $0x58] sm:$0xf] }
  0x83   : > { %1513 = vst.msk [vmem:[#allocation2 + $0x20] sm:$0xf] %vm1504_vm7, %v1377_v26  ;;  %v410_v59 = vrot.slane %v408_v49, 5  ;;  %v413_v61 = vrot.slane %v411_v50, 6  ;;  %v1722_v54 = vshrl.u32 %v1563_v8, 16  ;;  %v1725_v53 = vshll.u32 %v1563_v8, 16 }
  0x84   : > { %1446 = vrot.lane.b32.xlu1 %v10560_v19, %s10288_s20  ;;  %v377_v14 = vsel %vm10563_vm5, %v368_v40, %v376_v35  ;;  %v1701_v30 = vsel %vm10661_vm10, %v10716_v15, %v10718_v16  ;;  %v431_v35 = vrot.slane %v429_v25, 6  ;;  %v423_v3 = vor.u32 %v422_v57, %v419_v9  ;;  %v220_v41 = vld [vmem:[%s10340_s19 + $0x4c] sm:$0xf]  ;;  %v221_v29 = vld [vmem:[%s10340_s19 + $0x50] sm:$0x3] }
  0x85   : > { %1444 = vrot.lane.b32.xlu0 %v10581_v48, %s10288_s20  ;;  %1003 = vst.msk [vmem:[#allocation2 + $0x18] sm:$0xf] %vm996_vm6, %v377_v14  ;;  %v414_v26 = vor.u32 %v413_v61, %v410_v59  ;;  %v1724_v40 = vrot.slane %v1722_v54, 6  ;;  %v1735_v6 = vshll.u32 %v1564_v51, 16  ;;  %v1727_v0 = vrot.slane %v1725_v53, 7 }
  0x86   : > { %v1365_v19 = vpop.permute.xlu1 %1364  ;;  %v432_v47 = vor.u32 %v431_v35, %v428_v32  ;;  %v424_v11 = vrot.slane %v423_v3, 4  ;;  %v1713_v12 = vshrl.u32 %v1562_v63, 16  ;;  %v1716_v17 = vshll.u32 %v1562_v63, 16  ;;  %v1569_v61 = vld [vmem:[%s10340_s19 + $0x40] sm:$0xf] }
  0x87   : > { %1507 = vst.msk [vmem:[#allocation2 + $0x8] sm:$0xf] %vm1504_vm7, %v1365_v19  ;;  %v1361_v48 = vpop.permute.xlu0 %1360  ;;  %v415_v13 = vsel %vm10563_vm5, %v406_v43, %v414_v26  ;;  %v1737_v14 = vrot.slane %v1735_v6, 7  ;;  %v473_v18 = vshrl.u32 %v222_v5, 16  ;;  %v10762_v24 = vor.u32 %v1727_v0, %v1724_v40  ;;  %v1567_v6 = vld [vmem:[%s10340_s19 + $0x38] sm:$0x7] }
  0x88   : > { %1505 = vst.msk [vmem:[#allocation2] sm:$0xf] %vm1504_vm7, %v1361_v48  ;;  %1448 = vrot.lane.b32.xlu2 %v1349_v52, %s10288_s20  ;;  %v1357_v52 = vrot.slane %v1355_v60, 4  ;;  %v434_v28 = vrot.slane %v432_v47, 4  ;;  %v1732_v60 = vshrl.u32 %v1564_v51, 16  ;;  %v433_v19 = vsel %vm10563_vm5, %v424_v11, %v432_v47 }
  0x89   : > { %v1715_v25 = vrot.slane %v1713_v12, 6  ;;  %v476_v27 = vshll.u32 %v222_v5, 16  ;;  %v1718_v32 = vrot.slane %v1716_v17, 7  ;;  %v475_v34 = vrot.slane %v473_v18, 5  ;;  %1007 = vst.msk [vmem:[#allocation2 + $0x28] sm:$0xf] %vm996_vm6, %v433_v19 }
  0x8a   : > { %v1359_v4 = vsel %vm10343_vm2, %v1357_v52, %v1358_v58  ;;  %v1383_v36 = vpop.permute.xlu2 %1382  ;;  %v1734_v45 = vrot.slane %v1732_v60, 6  ;;  %v482_v31 = vshrl.u32 %v223_v10, 16  ;;  %v1730_v42 = vrot.slane %v10762_v24, 4  ;;  %1006 = vst.msk [vmem:[#allocation2 + $0x24] sm:$0xf] %vm996_vm6, %v415_v13  ;;  %vm11456_vm2 = vmor %vm2854_vm14, %vm2855_vm1 }
  0x8b   : > { %v478_v35 = vrot.slane %v476_v27, 6  ;;  %v485_v37 = vshll.u32 %v223_v10, 16  ;;  %v454_v38 = vshrl.u32 %v220_v41, 16  ;;  %v1719_v9 = vor.u32 %v1718_v32, %v1715_v25  ;;  %v1556_v51 = vld [vmem:[%s10340_s19 + $0xc] sm:$0xc] }
  0x8c   : > { %1452 = vrot.lane.b32.xlu1 %v10616_v21, %s10288_s20  ;;  %v443_v21 = vsel %vm10563_vm5, %v434_v28, %v442_v55  ;;  %v1738_v48 = vor.u32 %v1737_v14, %v1734_v45  ;;  %v484_v39 = vrot.slane %v482_v31, 5  ;;  %v457_v43 = vshll.u32 %v220_v41, 16  ;;  %v1568_v55 = vld [vmem:[%s10340_s19 + $0x3c] sm:$0xc]  ;;  %v226_v25 = vld [vmem:[%s10340_s19 + $0x64] sm:$0xf] }
  0x8d   : > { %1450 = vrot.lane.b32.xlu0 %v10621_v7, %s10288_s20  ;;  %1008 = vst.msk [vmem:[#allocation2 + $0x2c] sm:$0xf] %vm996_vm6, %v443_v21  ;;  %v464_v8 = vshrl.u32 %v221_v29, 16  ;;  %v479_v49 = vor.u32 %v478_v35, %v475_v34  ;;  %v456_v50 = vrot.slane %v454_v38, 5  ;;  %v10784_v52 = vrot.slane %v1719_v9, 4 }
  0x8e   : > { %v1367_v44 = vpop.permute.xlu1 %1366  ;;  %1516 = vst.msk [vmem:[#allocation2 + $0x2c] sm:$0xf] %vm1504_vm7, %v1383_v36  ;;  %v10780_v47 = vsel %vm10661_vm10, %v1730_v42, %v1738_v48  ;;  %v459_v58 = vrot.slane %v457_v43, 6  ;;  %v467_v59 = vshll.u32 %v221_v29, 16  ;;  %v445_v54 = vshrl.u32 %v219_v62, 16 }
  0x8f   : > { %1508 = vst.msk [vmem:[#allocation2 + $0xc] sm:$0xf] %vm1504_vm7, %v1367_v44  ;;  %v1363_v7 = vpop.permute.xlu0 %1362  ;;  %v466_v28 = vrot.slane %v464_v8, 5  ;;  %v480_v22 = vrot.slane %v479_v49, 4  ;;  %v448_v63 = vshll.u32 %v219_v62, 16  ;;  %v1729_v3 = vsel %vm10661_vm10, %v10784_v52, %v10762_v24 }
  0x90   : > { %1506 = vst.msk [vmem:[#allocation2 + $0x4] sm:$0xf] %vm1504_vm7, %v1363_v7  ;;  %1454 = vrot.lane.b32.xlu2 %v1359_v4, %s10288_s20  ;;  %v460_v53 = vor.u32 %v459_v58, %v456_v50  ;;  %v469_v60 = vrot.slane %v467_v59, 6  ;;  %v1657_v5 = vshrl.u32 %v1556_v51, 16  ;;  %v1566_v44 = vld [vmem:[%s10340_s19 + $0x34] sm:$0xf] }
  0x91   : > { %v447_v21 = vrot.slane %v445_v54, 5  ;;  %v450_v26 = vrot.slane %v448_v63, 6  ;;  %v1660_v40 = vshll.u32 %v1556_v51, 16  ;;  %v1769_v11 = vshrl.u32 %v1568_v55, 16  ;;  %v227_v42 = vld [vmem:[%s10340_s19 + $0x68] sm:$0x3] }
  0x92   : > { %v1389_v4 = vpop.permute.xlu2 %1388  ;;  %v462_v10 = vrot.slane %v460_v53, 4  ;;  %v470_v41 = vor.u32 %v469_v60, %v466_v28  ;;  %v1659_v7 = vrot.slane %v1657_v5, 6  ;;  %v1772_v12 = vshll.u32 %v1568_v55, 16 }
  0x93   : > { %v451_v0 = vor.u32 %v450_v26, %v447_v21  ;;  %v1662_v45 = vrot.slane %v1660_v40, 7  ;;  %v1778_v13 = vshrl.u32 %v1569_v61, 16  ;;  %v1771_v17 = vrot.slane %v1769_v11, 6  ;;  %v1572_v40 = vld [vmem:[%s10340_s19 + $0x4c] sm:$0xf] }
  0x94   : > { %2302 = vrot.lane.b32.xlu1 %v10673_v20, %s10289_s21  ;;  %v487_v20 = vrot.slane %v485_v37, 6  ;;  %v471_v14 = vsel %vm10563_vm5, %v462_v10, %v470_v41  ;;  %v1781_v18 = vshll.u32 %v1569_v61, 16  ;;  %v1750_v19 = vshrl.u32 %v1566_v44, 16 }
  0x95   : > { %2300 = vrot.lane.b32.xlu0 %v1645_v33, %s10289_s21  ;;  %1010 = vst.msk [vmem:[#allocation2 + $0x34] sm:$0xf] %vm996_vm6, %v471_v14  ;;  %v452_v27 = vrot.slane %v451_v0, 4  ;;  %v1663_v29 = vor.u32 %v1662_v45, %v1659_v7  ;;  %v1774_v48 = vrot.slane %v1772_v12, 7  ;;  %v1780_v32 = vrot.slane %v1778_v13, 6 }
  0x96   : > { %v1375_v57 = vpop.permute.xlu1 %1374  ;;  %v10788_v33 = vor.u32 %v487_v20, %v484_v39  ;;  %v1752_v34 = vrot.slane %v1750_v19, 6  ;;  %v1753_v31 = vshll.u32 %v1566_v44, 16  ;;  %v1760_v62 = vshrl.u32 %v1567_v6, 16  ;;  %v225_v39 = vld [vmem:[%s10340_s19 + $0x60] sm:$0xe] }
  0x97   : > { %1512 = vst.msk [vmem:[#allocation2 + $0x1c] sm:$0xf] %vm1504_vm7, %v1375_v57  ;;  %v1373_v56 = vpop.permute.xlu0 %1372  ;;  %v461_v37 = vsel %vm10563_vm5, %v452_v27, %v460_v53  ;;  %v1775_v38 = vor.u32 %v1774_v48, %v1771_v17  ;;  %v1763_v9 = vshll.u32 %v1567_v6, 16  ;;  %v510_v20 = vshrl.u32 %v226_v25, 16  ;;  %v1561_v44 = vld [vmem:[%s10340_s19 + $0x20] sm:$0x7] }
  0x98   : > { %1511 = vst.msk [vmem:[#allocation2 + $0x18] sm:$0xf] %vm1504_vm7, %v1373_v56  ;;  %v489_v36 = vsel %vm10563_vm5, %v480_v22, %v10788_v33  ;;  %v1755_v8 = vrot.slane %v1753_v31, 7  ;;  %v1762_v49 = vrot.slane %v1760_v62, 6  ;;  %v513_v57 = vshll.u32 %v226_v25, 16 }
  0x99   : > { %1011 = vst.msk [vmem:[#allocation2 + $0x38] sm:$0xf] %vm996_vm6, %v489_v36  ;;  %v1776_v51 = vrot.slane %v1775_v38, 4  ;;  %v1765_v55 = vrot.slane %v1763_v9, 7  ;;  %v512_v28 = vrot.slane %v510_v20, 5  ;;  %v520_v59 = vshrl.u32 %v227_v42, 16 }
  0x9a   : > { %1519 = vst.msk [vmem:[#allocation2 + $0x38] sm:$0xf] %vm1504_vm7, %v1389_v4  ;;  %v10827_v58 = vor.u32 %v1755_v8, %v1752_v34  ;;  %v523_v61 = vshll.u32 %v227_v42, 16  ;;  %v224_v56 = vld [vmem:[%s10340_s19 + $0x5c] sm:$0x3]  ;;  %v515_v63 = vrot.slane %v513_v57, 6  ;;  %v1395_v13 = vpop.permute.xlu2 %1394 }
  0x9b   : > { %1009 = vst.msk [vmem:[#allocation2 + $0x30] sm:$0xf] %vm996_vm6, %v461_v37  ;;  %v1766_v54 = vor.u32 %v1765_v55, %v1762_v49  ;;  %v522_v53 = vrot.slane %v520_v59, 5  ;;  %v504_v5 = vshll.u32 %v225_v39, 16  ;;  %v490_v26 = vrot.slane %v10788_v33, 4 }
  0x9c   : > { %2308 = vrot.lane.b32.xlu1 %v1701_v30, %s10289_s21  ;;  %v1783_v30 = vrot.slane %v1781_v18, 7  ;;  %v1758_v4 = vrot.slane %v10827_v58, 4  ;;  %v525_v60 = vrot.slane %v523_v61, 6  ;;  %v516_v36 = vor.u32 %v515_v63, %v512_v28  ;;  %v1573_v0 = vld [vmem:[%s10340_s19 + $0x50] sm:$0x7] }
  0x9d   : > { %2306 = vrot.lane.b32.xlu0 %v10737_v46, %s10289_s21  ;;  %v1664_v46 = vrot.slane %v1663_v29, 4  ;;  %v506_v7 = vrot.slane %v504_v5, 6  ;;  %v495_v11 = vshll.u32 %v224_v56, 16  ;;  %v1571_v45 = vld [vmem:[%s10340_s19 + $0x48] sm:$0xc]  ;;  %v1702_v33 = vrot.slane %v10718_v16, 4 }
  0x9e   : > { %v1381_v15 = vpop.permute.xlu1 %1380  ;;  %v10820_v43 = vor.u32 %v1783_v30, %v1780_v32  ;;  %v1767_v10 = vsel %vm10661_vm10, %v1758_v4, %v1766_v54  ;;  %v526_v41 = vor.u32 %v525_v60, %v522_v53  ;;  %v518_v52 = vrot.slane %v516_v36, 4  ;;  %v231_v25 = vld [vmem:[%s10340_s19 + $0x78] sm:$0xe]  ;;  %v229_v8 = vld [vmem:[%s10340_s19 + $0x70] sm:$0xf] }
  0x9f   : > { %1515 = vst.msk [vmem:[#allocation2 + $0x28] sm:$0xf] %vm1504_vm7, %v1381_v15  ;;  %v1379_v35 = vpop.permute.xlu0 %1378  ;;  %v1673_v50 = vsel %vm10661_vm10, %v1664_v46, %v10722_v1  ;;  %v501_v1 = vshrl.u32 %v225_v39, 16  ;;  %v1704_v12 = vshrl.u32 %v1561_v44, 16  ;;  %v497_v17 = vrot.slane %v495_v11, 6 }
  0xa0   : > { %1514 = vst.msk [vmem:[#allocation2 + $0x24] sm:$0xf] %vm1504_vm7, %v1379_v35  ;;  %2304 = vrot.lane.b32.xlu2 %v1673_v50, %s10289_s21  ;;  %v1785_v22 = vsel %vm10661_vm10, %v1776_v51, %v10820_v43  ;;  %v1707_v18 = vshll.u32 %v1561_v44, 16  ;;  %v1806_v19 = vshrl.u32 %v1572_v40, 16  ;;  %v527_v27 = vsel %vm10563_vm5, %v518_v52, %v526_v41  ;;  %v232_v15 = vld [vmem:[%s10340_s19 + $0x7c] sm:$0xf] }
  0xa1   : > { %v503_v21 = vrot.slane %v501_v1, 5  ;;  %v1706_v29 = vrot.slane %v1704_v12, 6  ;;  %v1809_v48 = vshll.u32 %v1572_v40, 16  ;;  %v1816_v32 = vshrl.u32 %v1573_v0, 16  ;;  %1014 = vst.msk [vmem:[#allocation2 + $0x44] sm:$0xf] %vm996_vm6, %v527_v27 }
  0xa2   : > { %v1709_v34 = vrot.slane %v1707_v18, 7  ;;  %v1808_v31 = vrot.slane %v1806_v19, 6  ;;  %1522 = vst.msk [vmem:[#allocation2 + $0x44] sm:$0xf] %vm1504_vm7, %v1395_v13  ;;  %v1819_v35 = vshll.u32 %v1573_v0, 16  ;;  %v1797_v37 = vshrl.u32 %v1571_v45, 16 }
  0xa3   : > { %v507_v14 = vor.u32 %v506_v7, %v503_v21  ;;  %v1811_v62 = vrot.slane %v1809_v48, 7  ;;  %v1818_v42 = vrot.slane %v1816_v32, 6  ;;  %v1800_v39 = vshll.u32 %v1571_v45, 16  ;;  %v230_v49 = vld [vmem:[%s10340_s19 + $0x74] sm:$0x3] }
  0xa4   : > { %2314 = vrot.lane.b32.xlu1 %v10780_v47, %s10289_s21  ;;  %v492_v47 = vshrl.u32 %v224_v56, 16  ;;  %v1710_v9 = vor.u32 %v1709_v34, %v1706_v29  ;;  %v1821_v50 = vrot.slane %v1819_v35, 7  ;;  %v1799_v51 = vrot.slane %v1797_v37, 6  ;;  %v1565_v11 = vld [vmem:[%s10340_s19 + $0x30] sm:$0xc] }
  0xa5   : > { %2312 = vrot.lane.b32.xlu0 %v1729_v3, %s10289_s21  ;;  %v508_v16 = vrot.slane %v507_v14, 4  ;;  %v1812_v20 = vor.u32 %v1811_v62, %v1808_v31  ;;  %v557_v55 = vshrl.u32 %v231_v25, 16  ;;  %v1802_v59 = vrot.slane %v1800_v39, 7  ;;  %v1578_v29 = vld [vmem:[%s10340_s19 + $0x64] sm:$0xf] }
  0xa6   : > { %v1387_v6 = vpop.permute.xlu1 %1386  ;;  %v494_v3 = vrot.slane %v492_v47, 5  ;;  %v1711_v28 = vsel %vm10661_vm10, %v1702_v33, %v1710_v9  ;;  %v560_v61 = vshll.u32 %v231_v25, 16  ;;  %v566_v56 = vshrl.u32 %v232_v15, 16  ;;  %v1576_v34 = vld [vmem:[%s10340_s19 + $0x5c] sm:$0x7] }
  0xa7   : > { %1518 = vst.msk [vmem:[#allocation2 + $0x34] sm:$0xf] %vm1504_vm7, %v1387_v6  ;;  %v1385_v24 = vpop.permute.xlu0 %1384  ;;  %v517_v46 = vsel %vm10563_vm5, %v508_v16, %v516_v36  ;;  %v1814_v63 = vrot.slane %v1812_v20, 4  ;;  %v1822_v1 = vor.u32 %v1821_v50, %v1818_v42  ;;  %v559_v4 = vrot.slane %v557_v55, 5  ;;  %v236_v55 = vld [vmem:[%s10340_s19 + $0x8c] sm:$0x3] }
  0xa8   : > { %1517 = vst.msk [vmem:[#allocation2 + $0x30] sm:$0xf] %vm1504_vm7, %v1385_v24  ;;  %v498_v30 = vor.u32 %v497_v17, %v494_v3  ;;  %2310 = vrot.lane.b32.xlu2 %v1711_v28, %s10289_s21  ;;  %v569_v53 = vshll.u32 %v232_v15, 16  ;;  %v1803_v60 = vor.u32 %v1802_v59, %v1799_v51  ;;  %v562_v5 = vrot.slane %v560_v61, 6  ;;  %v1577_v3 = vld [vmem:[%s10340_s19 + $0x60] sm:$0xc]  ;;  %v1401_v17 = vpop.permute.xlu2 %1400 }
  0xa9   : > { %1013 = vst.msk [vmem:[#allocation2 + $0x40] sm:$0xf] %vm996_vm6, %v517_v46  ;;  %v568_v44 = vrot.slane %v566_v56, 5  ;;  %v538_v36 = vshrl.u32 %v229_v8, 16  ;;  %v1823_v21 = vsel %vm10661_vm10, %v1814_v63, %v1822_v1  ;;  %v541_v47 = vshll.u32 %v229_v8, 16 }
  0xaa   : > { %v499_v38 = vsel %vm10563_vm5, %v490_v26, %v498_v30  ;;  %v571_v26 = vrot.slane %v569_v53, 6  ;;  %v548_v40 = vshrl.u32 %v230_v49, 16  ;;  %v1804_v6 = vrot.slane %v1803_v60, 4  ;;  %v1575_v30 = vld [vmem:[%s10340_s19 + $0x58] sm:$0xf] }
  0xab   : > { %1012 = vst.msk [vmem:[#allocation2 + $0x3c] sm:$0xf] %vm996_vm6, %v499_v38  ;;  %v540_v41 = vrot.slane %v538_v36, 5  ;;  %v551_v7 = vshll.u32 %v230_v49, 16  ;;  %v543_v45 = vrot.slane %v541_v47, 6  ;;  %v1741_v25 = vshrl.u32 %v1565_v11, 16 }
  0xac   : > { %2320 = vrot.lane.b32.xlu1 %v1785_v22, %s10289_s21  ;;  %v228_v22 = vld [vmem:[%s10340_s19 + $0x6c] sm:$0xe]  ;;  %v10877_v0 = vor.u32 %v571_v26, %v568_v44  ;;  %v550_v24 = vrot.slane %v548_v40, 5  ;;  %v1813_v33 = vsel %vm10661_vm10, %v1804_v6, %v1812_v20  ;;  %v1744_v27 = vshll.u32 %v1565_v11, 16  ;;  %v235_v51 = vld [vmem:[%s10340_s19 + $0x88] sm:$0xf] }
  0xad   : > { %2318 = vrot.lane.b32.xlu0 %v1767_v10, %s10289_s21  ;;  %v563_v10 = vor.u32 %v562_v5, %v559_v4  ;;  %v529_v52 = vshrl.u32 %v228_v22, 16  ;;  %v553_v13 = vrot.slane %v551_v7, 6  ;;  %v532_v14 = vshll.u32 %v228_v22, 16  ;;  %v234_v44 = vld [vmem:[%s10340_s19 + $0x84] sm:$0xe] }
  0xae   : > { %v1393_v57 = vpop.permute.xlu1 %1392  ;;  %v544_v18 = vor.u32 %v543_v45, %v540_v41  ;;  %v1853_v16 = vshrl.u32 %v1577_v3, 16  ;;  %v1743_v62 = vrot.slane %v1741_v25, 6  ;;  %v1746_v42 = vrot.slane %v1744_v27, 7 }
  0xaf   : > { %1521 = vst.msk [vmem:[#allocation2 + $0x40] sm:$0xf] %vm1504_vm7, %v1393_v57  ;;  %v1391_v54 = vpop.permute.xlu0 %1390  ;;  %v564_v12 = vrot.slane %v563_v10, 4  ;;  %v531_v19 = vrot.slane %v529_v52, 5  ;;  %v554_v32 = vor.u32 %v553_v13, %v550_v24  ;;  %v534_v15 = vrot.slane %v532_v14, 6 }
  0xb0   : > { %1520 = vst.msk [vmem:[#allocation2 + $0x3c] sm:$0xf] %vm1504_vm7, %v1391_v54  ;;  %v546_v31 = vrot.slane %v544_v18, 4  ;;  %v1856_v35 = vshll.u32 %v1577_v3, 16  ;;  %v1855_v38 = vrot.slane %v1853_v16, 6  ;;  %v1862_v9 = vshrl.u32 %v1578_v29, 16 }
  0xb1   : > { %v573_v48 = vsel %vm10563_vm5, %v564_v12, %v10877_v0  ;;  %v535_v46 = vor.u32 %v534_v15, %v531_v19  ;;  %v1865_v39 = vshll.u32 %v1578_v29, 16  ;;  %v1747_v49 = vor.u32 %v1746_v42, %v1743_v62  ;;  %v233_v24 = vld [vmem:[%s10340_s19 + $0x80] sm:$0x3]  ;;  %v1570_v13 = vld [vmem:[%s10340_s19 + $0x44] sm:$0x7] }
  0xb2   : > { %1017 = vst.msk [vmem:[#allocation2 + $0x50] sm:$0xf] %vm996_vm6, %v573_v48  ;;  %v555_v8 = vsel %vm10563_vm5, %v546_v31, %v554_v32  ;;  %v1858_v20 = vrot.slane %v1856_v35, 7  ;;  %v1834_v50 = vshrl.u32 %v1575_v30, 16  ;;  %v1864_v28 = vrot.slane %v1862_v9, 6 }
  0xb3   : > { %1525 = vst.msk [vmem:[#allocation2 + $0x50] sm:$0xf] %vm1504_vm7, %v1401_v17  ;;  %v536_v57 = vrot.slane %v535_v46, 4  ;;  %v1867_v59 = vrot.slane %v1865_v39, 7  ;;  %v1837_v61 = vshll.u32 %v1575_v30, 16  ;;  %v1748_v22 = vrot.slane %v1747_v49, 4 }
  0xb4   : > { %2326 = vrot.lane.b32.xlu1 %v1823_v21, %s10289_s21  ;;  %1016 = vst.msk [vmem:[#allocation2 + $0x4c] sm:$0xf] %vm996_vm6, %v555_v8  ;;  %v1859_v54 = vor.u32 %v1858_v20, %v1855_v38  ;;  %v1836_v63 = vrot.slane %v1834_v50, 6  ;;  %v1844_v1 = vshrl.u32 %v1576_v34, 16  ;;  %v1847_v5 = vshll.u32 %v1576_v34, 16 }
  0xb5   : > { %2324 = vrot.lane.b32.xlu0 %v1813_v33, %s10289_s21  ;;  %v545_v4 = vsel %vm10563_vm5, %v536_v57, %v544_v18  ;;  %v10900_v53 = vor.u32 %v1867_v59, %v1864_v28  ;;  %v1839_v60 = vrot.slane %v1837_v61, 7  ;;  %v1757_v36 = vsel %vm10661_vm10, %v1748_v22, %v10827_v58  ;;  %v1581_v32 = vld [vmem:[%s10340_s19 + $0x70] sm:$0xf]  ;;  %v1582_v31 = vld [vmem:[%s10340_s19 + $0x74] sm:$0x7] }
  0xb6   : > { %v1399_v37 = vpop.permute.xlu1 %1398  ;;  %1015 = vst.msk [vmem:[#allocation2 + $0x48] sm:$0xf] %vm996_vm6, %v545_v4  ;;  %v1860_v21 = vrot.slane %v1859_v54, 4  ;;  %v1846_v26 = vrot.slane %v1844_v1, 6  ;;  %v594_v47 = vshrl.u32 %v235_v51, 16  ;;  %2316 = vrot.lane.b32.xlu2 %v1757_v36, %s10289_s21  ;;  %v1849_v6 = vrot.slane %v1847_v5, 7 }
  0xb7   : > { %1524 = vst.msk [vmem:[#allocation2 + $0x4c] sm:$0xf] %vm1504_vm7, %v1399_v37  ;;  %v1397_v56 = vpop.permute.xlu0 %1396  ;;  %v10909_v40 = vor.u32 %v1839_v60, %v1836_v63  ;;  %v597_v10 = vshll.u32 %v235_v51, 16  ;;  %v604_v41 = vshrl.u32 %v236_v55, 16  ;;  %v607_v45 = vshll.u32 %v236_v55, 16  ;;  %v1407_v37 = vpop.permute.xlu2 %1406 }
  0xb8   : > { %1523 = vst.msk [vmem:[#allocation2 + $0x48] sm:$0xf] %vm1504_vm7, %v1397_v56  ;;  %v1869_v7 = vsel %vm10661_vm10, %v1860_v21, %v10900_v53  ;;  %v596_v11 = vrot.slane %v594_v47, 5  ;;  %v585_v58 = vshrl.u32 %v234_v44, 16  ;;  %v1850_v3 = vor.u32 %v1849_v6, %v1846_v26  ;;  %v1580_v8 = vld [vmem:[%s10340_s19 + $0x6c] sm:$0xc] }
  0xb9   : > { %v1842_v52 = vrot.slane %v10909_v40, 4  ;;  %v599_v33 = vrot.slane %v597_v10, 6  ;;  %v606_v12 = vrot.slane %v604_v41, 5  ;;  %v609_v14 = vrot.slane %v607_v45, 6  ;;  %v240_v51 = vld [vmem:[%s10340_s19 + $0x9c] sm:$0xe] }
  0xba   : > { %v587_v17 = vrot.slane %v585_v58, 5  ;;  %v588_v18 = vshll.u32 %v234_v44, 16  ;;  %v574_v19 = vrot.slane %v10877_v0, 4  ;;  %v576_v29 = vshrl.u32 %v233_v24, 16  ;;  %v241_v55 = vld [vmem:[%s10340_s19 + $0xa0] sm:$0xf] }
  0xbb   : > { %v1851_v25 = vsel %vm10661_vm10, %v1842_v52, %v1850_v3  ;;  %v600_v27 = vor.u32 %v599_v33, %v596_v11  ;;  %v579_v48 = vshll.u32 %v233_v24, 16  ;;  %v610_v15 = vor.u32 %v609_v14, %v606_v12  ;;  %v238_v4 = vld [vmem:[%s10340_s19 + $0x94] sm:$0xf]  ;;  %v239_v26 = vld [vmem:[%s10340_s19 + $0x98] sm:$0x3] }
  0xbc   : > { %2332 = vrot.lane.b32.xlu1 %v1869_v7, %s10289_s21  ;;  %v590_v16 = vrot.slane %v588_v18, 6  ;;  %v1786_v30 = vrot.slane %v10820_v43, 4  ;;  %v1788_v34 = vshrl.u32 %v1570_v13, 16  ;;  %v578_v0 = vrot.slane %v576_v29, 5  ;;  %v237_v7 = vld [vmem:[%s10340_s19 + $0x90] sm:$0xe] }
  0xbd   : > { %2330 = vrot.lane.b32.xlu0 %v1851_v25, %s10289_s21  ;;  %v602_v62 = vrot.slane %v600_v27, 4  ;;  %v581_v42 = vrot.slane %v579_v48, 6  ;;  %v1791_v35 = vshll.u32 %v1570_v13, 16  ;;  %v1890_v9 = vshrl.u32 %v1581_v32, 16 }
  0xbe   : > { %v591_v46 = vor.u32 %v590_v16, %v587_v17  ;;  %v1790_v38 = vrot.slane %v1788_v34, 6  ;;  %v1893_v39 = vshll.u32 %v1581_v32, 16  ;;  %v1900_v50 = vshrl.u32 %v1582_v31, 16  ;;  %v1405_v56 = vpop.permute.xlu1 %1404 }
  0xbf   : > { %v611_v49 = vsel %vm10563_vm5, %v602_v62, %v610_v15  ;;  %v582_v20 = vor.u32 %v581_v42, %v578_v0  ;;  %v1793_v43 = vrot.slane %v1791_v35, 7  ;;  %v1892_v28 = vrot.slane %v1890_v9, 6  ;;  %v1403_v5 = vpop.permute.xlu0 %1402  ;;  %v1586_v42 = vld [vmem:[%s10340_s19 + $0x84] sm:$0xc] }
  0xc0   : > { %1020 = vst.msk [vmem:[#allocation2 + $0x5c] sm:$0xf] %vm996_vm6, %v611_v49  ;;  %v592_v57 = vrot.slane %v591_v46, 4  ;;  %v1895_v59 = vrot.slane %v1893_v39, 7  ;;  %v1903_v61 = vshll.u32 %v1582_v31, 16  ;;  %v1902_v63 = vrot.slane %v1900_v50, 6 }
  0xc1   : > { %1528 = vst.msk [vmem:[#allocation2 + $0x5c] sm:$0xf] %vm1504_vm7, %v1407_v37  ;;  %v583_v22 = vsel %vm10563_vm5, %v574_v19, %v582_v20  ;;  %v1794_v54 = vor.u32 %v1793_v43, %v1790_v38  ;;  %v1881_v1 = vshrl.u32 %v1580_v8, 16  ;;  %v1884_v21 = vshll.u32 %v1580_v8, 16  ;;  %v1413_v37 = vpop.permute.xlu2 %1412  ;;  %v1587_v39 = vld [vmem:[%s10340_s19 + $0x88] sm:$0xf] }
  0xc2   : > { %v601_v60 = vsel %vm10563_vm5, %v592_v57, %v600_v27  ;;  %1018 = vst.msk [vmem:[#allocation2 + $0x54] sm:$0xf] %vm996_vm6, %v583_v22  ;;  %v1896_v44 = vor.u32 %v1895_v59, %v1892_v28  ;;  %v1905_v36 = vrot.slane %v1903_v61, 7  ;;  %v641_v10 = vshrl.u32 %v240_v51, 16  ;;  %v1584_v8 = vld [vmem:[%s10340_s19 + $0x7c] sm:$0xf] }
  0xc3   : > { %1019 = vst.msk [vmem:[#allocation2 + $0x58] sm:$0xf] %vm996_vm6, %v601_v60  ;;  %v1795_v47 = vsel %vm10661_vm10, %v1786_v30, %v1794_v54  ;;  %v1883_v6 = vrot.slane %v1881_v1, 6  ;;  %v644_v41 = vshll.u32 %v240_v51, 16  ;;  %v1886_v58 = vrot.slane %v1884_v21, 7 }
  0xc4   : > { %1527 = vst.msk [vmem:[#allocation2 + $0x58] sm:$0xf] %vm1504_vm7, %v1405_v56  ;;  %2322 = vrot.lane.b32.xlu2 %v1795_v47, %s10289_s21  ;;  %v1898_v11 = vrot.slane %v1896_v44, 4  ;;  %v1906_v45 = vor.u32 %v1905_v36, %v1902_v63  ;;  %v650_v24 = vshrl.u32 %v241_v55, 16  ;;  %v643_v52 = vrot.slane %v641_v10, 5 }
  0xc5   : > { %1526 = vst.msk [vmem:[#allocation2 + $0x54] sm:$0xf] %vm1504_vm7, %v1403_v5  ;;  %v646_v3 = vrot.slane %v644_v41, 6  ;;  %v653_v33 = vshll.u32 %v241_v55, 16  ;;  %v622_v12 = vshrl.u32 %v238_v4, 16  ;;  %v1887_v14 = vor.u32 %v1886_v58, %v1883_v6 }
  0xc6   : > { %v1907_v13 = vsel %vm10661_vm10, %v1898_v11, %v1906_v45  ;;  %v652_v17 = vrot.slane %v650_v24, 5  ;;  %v625_v18 = vshll.u32 %v238_v4, 16  ;;  %v632_v29 = vshrl.u32 %v239_v26, 16  ;;  %v1574_v30 = vld [vmem:[%s10340_s19 + $0x54] sm:$0xc]  ;;  %v1411_v61 = vpop.permute.xlu1 %1410 }
  0xc7   : > { %2338 = vrot.lane.b32.xlu1 %v1907_v13, %s10289_s21  ;;  %v647_v19 = vor.u32 %v646_v3, %v643_v52  ;;  %v655_v25 = vrot.slane %v653_v33, 6  ;;  %v624_v27 = vrot.slane %v622_v12, 5  ;;  %v1888_v48 = vrot.slane %v1887_v14, 4  ;;  %v1585_v51 = vld [vmem:[%s10340_s19 + $0x80] sm:$0x7]  ;;  %v1409_v4 = vpop.permute.xlu0 %1408 }
  0xc8   : > { %v627_v32 = vrot.slane %v625_v18, 6  ;;  %v635_v15 = vshll.u32 %v239_v26, 16  ;;  %v613_v16 = vshrl.u32 %v237_v7, 16  ;;  %v634_v62 = vrot.slane %v632_v29, 5  ;;  %v244_v36 = vld [vmem:[%s10340_s19 + $0xac] sm:$0xf] }
  0xc9   : > { %v648_v34 = vrot.slane %v647_v19, 4  ;;  %v10950_v31 = vor.u32 %v655_v25, %v652_v17  ;;  %v616_v0 = vshll.u32 %v237_v7, 16  ;;  %v1897_v35 = vsel %vm10661_vm10, %v1888_v48, %v1896_v44  ;;  %v245_v10 = vld [vmem:[%s10340_s19 + $0xb0] sm:$0x3]  ;;  %v243_v33 = vld [vmem:[%s10340_s19 + $0xa8] sm:$0xe] }
  0xca   : > { %v628_v46 = vor.u32 %v627_v32, %v624_v27  ;;  %v637_v38 = vrot.slane %v635_v15, 6  ;;  %v615_v9 = vrot.slane %v613_v16, 5  ;;  %2336 = vrot.lane.b32.xlu0 %v1897_v35, %s10289_s21  ;;  %v1825_v43 = vshrl.u32 %v1574_v30, 16  ;;  %v242_v16 = vld [vmem:[%s10340_s19 + $0xa4] sm:$0x3] }
  0xcb   : > { %v657_v49 = vsel %vm10563_vm5, %v648_v34, %v10950_v31  ;;  %v618_v20 = vrot.slane %v616_v0, 6  ;;  %v1828_v50 = vshll.u32 %v1574_v30, 16  ;;  %v1937_v28 = vshrl.u32 %v1586_v42, 16 }
  0xcc   : > { %1023 = vst.msk [vmem:[#allocation2 + $0x68] sm:$0xf] %vm996_vm6, %v657_v49  ;;  %v630_v55 = vrot.slane %v628_v46, 4  ;;  %v638_v57 = vor.u32 %v637_v38, %v634_v62  ;;  %v1940_v59 = vshll.u32 %v1586_v42, 16  ;;  %v1827_v22 = vrot.slane %v1825_v43, 6  ;;  %v1419_v38 = vpop.permute.xlu2 %1418 }
  0xcd   : > { %1531 = vst.msk [vmem:[#allocation2 + $0x68] sm:$0xf] %vm1504_vm7, %v1413_v37  ;;  %v619_v56 = vor.u32 %v618_v20, %v615_v9  ;;  %v1830_v54 = vrot.slane %v1828_v50, 7  ;;  %v1946_v63 = vshrl.u32 %v1587_v39, 16  ;;  %v1939_v60 = vrot.slane %v1937_v28, 6 }
  0xce   : > { %v639_v1 = vsel %vm10563_vm5, %v630_v55, %v638_v57  ;;  %v1942_v5 = vrot.slane %v1940_v59, 7  ;;  %v1949_v44 = vshll.u32 %v1587_v39, 16  ;;  %v1918_v6 = vshrl.u32 %v1584_v8, 16  ;;  %v1417_v39 = vpop.permute.xlu1 %1416  ;;  %v1590_v43 = vld [vmem:[%s10340_s19 + $0x94] sm:$0xf] }
  0xcf   : > { %1022 = vst.msk [vmem:[#allocation2 + $0x64] sm:$0xf] %vm996_vm6, %v639_v1  ;;  %v620_v21 = vrot.slane %v619_v56, 4  ;;  %v1831_v26 = vor.u32 %v1830_v54, %v1827_v22  ;;  %v1948_v47 = vrot.slane %v1946_v63, 6  ;;  %v1921_v11 = vshll.u32 %v1584_v8, 16  ;;  %v1415_v57 = vpop.permute.xlu0 %1414 }
  0xd0   : > { %1530 = vst.msk [vmem:[#allocation2 + $0x64] sm:$0xf] %vm1504_vm7, %v1411_v61  ;;  %v1943_v41 = vor.u32 %v1942_v5, %v1939_v60  ;;  %v1951_v7 = vrot.slane %v1949_v44, 7  ;;  %v1928_v45 = vshrl.u32 %v1585_v51, 16  ;;  %v1920_v52 = vrot.slane %v1918_v6, 6 }
  0xd1   : > { %v629_v58 = vsel %vm10563_vm5, %v620_v21, %v628_v46  ;;  %v1832_v24 = vrot.slane %v1831_v26, 4  ;;  %v1931_v3 = vshll.u32 %v1585_v51, 16  ;;  %v1923_v14 = vrot.slane %v1921_v11, 7  ;;  %v1579_v46 = vld [vmem:[%s10340_s19 + $0x68] sm:$0x7] }
  0xd2   : > { %1021 = vst.msk [vmem:[#allocation2 + $0x60] sm:$0xf] %vm996_vm6, %v629_v58  ;;  %v1944_v12 = vrot.slane %v1943_v41, 4  ;;  %v10974_v13 = vor.u32 %v1951_v7, %v1948_v47  ;;  %v1930_v17 = vrot.slane %v1928_v45, 6  ;;  %v678_v25 = vshrl.u32 %v244_v36, 16 }
  0xd3   : > { %1529 = vst.msk [vmem:[#allocation2 + $0x60] sm:$0xf] %vm1504_vm7, %v1409_v4  ;;  %v1841_v18 = vsel %vm10661_vm10, %v1832_v24, %v10909_v40  ;;  %v1933_v19 = vrot.slane %v1931_v3, 7  ;;  %v681_v27 = vshll.u32 %v244_v36, 16  ;;  %v10984_v48 = vor.u32 %v1923_v14, %v1920_v52  ;;  %v1591_v59 = vld [vmem:[%s10340_s19 + $0x98] sm:$0x7] }
  0xd4   : > { %2328 = vrot.lane.b32.xlu2 %v1841_v18, %s10289_s21  ;;  %v1953_v29 = vsel %vm10661_vm10, %v1944_v12, %v10974_v13  ;;  %v688_v32 = vshrl.u32 %v245_v10, 16  ;;  %v691_v15 = vshll.u32 %v245_v10, 16  ;;  %v680_v40 = vrot.slane %v678_v25, 5  ;;  %v249_v5 = vld [vmem:[%s10340_s19 + $0xc0] sm:$0xe] }
  0xd5   : > { %2344 = vrot.lane.b32.xlu1 %v1953_v29, %s10289_s21  ;;  %v1934_v30 = vor.u32 %v1933_v19, %v1930_v17  ;;  %v683_v34 = vrot.slane %v681_v27, 6  ;;  %v669_v62 = vshrl.u32 %v243_v33, 16  ;;  %v1926_v0 = vrot.slane %v10984_v48, 4  ;;  %v250_v47 = vld [vmem:[%s10340_s19 + $0xc4] sm:$0xf] }
  0xd6   : > { %v690_v42 = vrot.slane %v688_v32, 5  ;;  %v693_v35 = vrot.slane %v691_v15, 6  ;;  %v672_v37 = vshll.u32 %v243_v33, 16  ;;  %v658_v49 = vrot.slane %v10950_v31, 4  ;;  %v1589_v31 = vld [vmem:[%s10340_s19 + $0x90] sm:$0xc] }
  0xd7   : > { %v684_v9 = vor.u32 %v683_v34, %v680_v40  ;;  %v671_v8 = vrot.slane %v669_v62, 5  ;;  %v660_v20 = vshrl.u32 %v242_v16, 16  ;;  %v1935_v50 = vsel %vm10661_vm10, %v1926_v0, %v1934_v30  ;;  %v247_v12 = vld [vmem:[%s10340_s19 + $0xb8] sm:$0xf]  ;;  %v248_v14 = vld [vmem:[%s10340_s19 + $0xbc] sm:$0x3]  ;;  %v1425_v34 = vpop.permute.xlu2 %1424 }
  0xd8   : > { %v694_v51 = vor.u32 %v693_v35, %v690_v42  ;;  %v674_v55 = vrot.slane %v672_v37, 6  ;;  %v663_v28 = vshll.u32 %v242_v16, 16  ;;  %2342 = vrot.lane.b32.xlu0 %v1935_v50, %s10289_s21  ;;  %v1870_v22 = vrot.slane %v10900_v53, 4  ;;  %v246_v16 = vld [vmem:[%s10340_s19 + $0xb4] sm:$0xe]  ;;  %v1423_v42 = vpop.permute.xlu1 %1422 }
  0xd9   : > { %v686_v61 = vrot.slane %v684_v9, 4  ;;  %v662_v56 = vrot.slane %v660_v20, 5  ;;  %v1872_v54 = vshrl.u32 %v1579_v46, 16  ;;  %v1875_v4 = vshll.u32 %v1579_v46, 16 }
  0xda   : > { %v675_v63 = vor.u32 %v674_v55, %v671_v8  ;;  %v665_v1 = vrot.slane %v663_v28, 6  ;;  %v1974_v60 = vshrl.u32 %v1590_v43, 16  ;;  %v1977_v21 = vshll.u32 %v1590_v43, 16 }
  0xdb   : > { %v695_v44 = vsel %vm10563_vm5, %v686_v61, %v694_v51  ;;  %v1874_v36 = vrot.slane %v1872_v54, 6  ;;  %v1984_v26 = vshrl.u32 %v1591_v59, 16  ;;  %v1877_v10 = vrot.slane %v1875_v4, 7 }
  0xdc   : > { %1026 = vst.msk [vmem:[#allocation2 + $0x74] sm:$0xf] %vm996_vm6, %v695_v44  ;;  %v676_v6 = vrot.slane %v675_v63, 4  ;;  %v666_v53 = vor.u32 %v665_v1, %v662_v56  ;;  %v1976_v41 = vrot.slane %v1974_v60, 6  ;;  %v1979_v7 = vrot.slane %v1977_v21, 7 }
  0xdd   : > { %1534 = vst.msk [vmem:[#allocation2 + $0x74] sm:$0xf] %vm1504_vm7, %v1419_v38  ;;  %v1986_v11 = vrot.slane %v1984_v26, 6  ;;  %v1987_v45 = vshll.u32 %v1591_v59, 16  ;;  %v1965_v58 = vshrl.u32 %v1589_v31, 16  ;;  %v1878_v3 = vor.u32 %v1877_v10, %v1874_v36 }
  0xde   : > { %v685_v24 = vsel %vm10563_vm5, %v676_v6, %v684_v9  ;;  %v667_v52 = vsel %vm10563_vm5, %v658_v49, %v666_v53  ;;  %v1968_v33 = vshll.u32 %v1589_v31, 16  ;;  %v1980_v17 = vor.u32 %v1979_v7, %v1976_v41  ;;  %v11018_v9 = vpop.permute.xlu0 %1420  ;;  %v1596_v36 = vld [vmem:[%s10340_s19 + $0xac] sm:$0xf]  ;;  %v1593_v53 = vld [vmem:[%s10340_s19 + $0xa0] sm:$0xf] }
  0xdf   : > { %1025 = vst.msk [vmem:[#allocation2 + $0x70] sm:$0xf] %vm996_vm6, %v685_v24  ;;  %v1989_v18 = vrot.slane %v1987_v45, 7  ;;  %v1967_v19 = vrot.slane %v1965_v58, 6  ;;  %v725_v25 = vshrl.u32 %v249_v5, 16  ;;  %v1879_v27 = vsel %vm10661_vm10, %v1870_v22, %v1878_v3 }
  0xe0   : > { %1533 = vst.msk [vmem:[#allocation2 + $0x70] sm:$0xf] %vm1504_vm7, %v1417_v39  ;;  %v1970_v29 = vrot.slane %v1968_v33, 7  ;;  %v728_v32 = vshll.u32 %v249_v5, 16  ;;  %v734_v15 = vshrl.u32 %v250_v47, 16  ;;  %2334 = vrot.lane.b32.xlu2 %v1879_v27, %s10289_s21  ;;  %v1982_v30 = vrot.slane %v1980_v17, 4  ;;  %v11044_v27 = vpop.permute.xlu1 %1428 }
  0xe1   : > { %1024 = vst.msk [vmem:[#allocation2 + $0x6c] sm:$0xf] %vm996_vm6, %v667_v52  ;;  %v1990_v40 = vor.u32 %v1989_v18, %v1986_v11  ;;  %v727_v62 = vrot.slane %v725_v25, 5  ;;  %v737_v0 = vshll.u32 %v250_v47, 16  ;;  %v706_v38 = vshrl.u32 %v247_v12, 16  ;;  %v11040_v18 = vpop.permute.xlu2 %1430 }
  0xe2   : > { %1532 = vst.msk [vmem:[#allocation2 + $0x6c] sm:$0xf] %vm1504_vm7, %v1415_v57  ;;  %v1971_v35 = vor.u32 %v1970_v29, %v1967_v19  ;;  %v730_v37 = vrot.slane %v728_v32, 6  ;;  %v736_v46 = vrot.slane %v734_v15, 5  ;;  %v709_v49 = vshll.u32 %v247_v12, 16 }
  0xe3   : > { %v1991_v39 = vsel %vm10661_vm10, %v1982_v30, %v1990_v40  ;;  %v739_v8 = vrot.slane %v737_v0, 6  ;;  %v716_v20 = vshrl.u32 %v248_v14, 16  ;;  %v708_v51 = vrot.slane %v706_v38, 5  ;;  %v1583_v57 = vld [vmem:[%s10340_s19 + $0x78] sm:$0xc] }
  0xe4   : > { %2350 = vrot.lane.b32.xlu1 %v1991_v39, %s10289_s21  ;;  %v1972_v43 = vrot.slane %v1971_v35, 4  ;;  %v731_v50 = vor.u32 %v730_v37, %v727_v62  ;;  %v719_v55 = vshll.u32 %v248_v14, 16  ;;  %v711_v59 = vrot.slane %v709_v49, 6  ;;  %v1595_v22 = vld [vmem:[%s10340_s19 + $0xa8] sm:$0xc] }
  0xe5   : > { %v11024_v28 = vor.u32 %v739_v8, %v736_v46  ;;  %v718_v61 = vrot.slane %v716_v20, 5  ;;  %v697_v56 = vshrl.u32 %v246_v16, 16  ;;  %v700_v1 = vshll.u32 %v246_v16, 16  ;;  %v1594_v10 = vld [vmem:[%s10340_s19 + $0xa4] sm:$0x7] }
  0xe6   : > { %v1981_v54 = vsel %vm10661_vm10, %v1972_v43, %v1980_v17  ;;  %v732_v31 = vrot.slane %v731_v50, 4  ;;  %v721_v63 = vrot.slane %v719_v55, 6  ;;  %v712_v4 = vor.u32 %v711_v59, %v708_v51  ;;  %v253_v19 = vld [vmem:[%s10340_s19 + $0xd0] sm:$0xf]  ;;  %v254_v25 = vld [vmem:[%s10340_s19 + $0xd4] sm:$0x3]  ;;  %v11047_v30 = vpop.permute.xlu0 %1426 }
  0xe7   : > { %2348 = vrot.lane.b32.xlu0 %v1981_v54, %s10289_s21  ;;  %v699_v60 = vrot.slane %v697_v56, 5  ;;  %v1909_v5 = vshrl.u32 %v1583_v57, 16  ;;  %v1912_v44 = vshll.u32 %v1583_v57, 16  ;;  %v702_v47 = vrot.slane %v700_v1, 6  ;;  %v252_v39 = vld [vmem:[%s10340_s19 + $0xcc] sm:$0xe] }
  0xe8   : > { %v741_v21 = vsel %vm10563_vm5, %v732_v31, %v11024_v28  ;;  %v722_v26 = vor.u32 %v721_v63, %v718_v61  ;;  %v2021_v6 = vshrl.u32 %v1595_v22, 16  ;;  %v714_v41 = vrot.slane %v712_v4, 4  ;;  %v251_v56 = vld [vmem:[%s10340_s19 + $0xc8] sm:$0x3]  ;;  %v1588_v63 = vld [vmem:[%s10340_s19 + $0x8c] sm:$0x7] }
  0xe9   : > { %1029 = vst.msk [vmem:[#allocation2 + $0x80] sm:$0xf] %vm996_vm6, %v741_v21  ;;  %v1911_v7 = vrot.slane %v1909_v5, 6  ;;  %v1914_v11 = vrot.slane %v1912_v44, 7  ;;  %v2024_v45 = vshll.u32 %v1595_v22, 16  ;;  %v703_v58 = vor.u32 %v702_v47, %v699_v60 }
  0xea   : > { %1537 = vst.msk [vmem:[#allocation2 + $0x80] sm:$0xf] %vm1504_vm7, %v1425_v34  ;;  %v2023_v24 = vrot.slane %v2021_v6, 6  ;;  %v2030_v52 = vshrl.u32 %v1596_v36, 16  ;;  %v2033_v3 = vshll.u32 %v1596_v36, 16  ;;  %v723_v33 = vsel %vm10563_vm5, %v714_v41, %v722_v26 }
  0xeb   : > { %v1915_v12 = vor.u32 %v1914_v11, %v1911_v7  ;;  %v2026_v14 = vrot.slane %v2024_v45, 7  ;;  %v2002_v17 = vshrl.u32 %v1593_v53, 16  ;;  %1028 = vst.msk [vmem:[#allocation2 + $0x7c] sm:$0xf] %vm996_vm6, %v723_v33  ;;  %v704_v29 = vrot.slane %v703_v58, 4  ;;  %v11078_v11 = vpop.permute.xlu2 %1436 }
  0xec   : > { %v2032_v32 = vrot.slane %v2030_v52, 6  ;;  %v2035_v15 = vrot.slane %v2033_v3, 7  ;;  %v2005_v16 = vshll.u32 %v1593_v53, 16  ;;  %1536 = vst.msk [vmem:[#allocation2 + $0x7c] sm:$0xf] %vm1504_vm7, %v1423_v42  ;;  %v2012_v0 = vshrl.u32 %v1594_v10, 16 }
  0xed   : > { %v1916_v40 = vrot.slane %v1915_v12, 4  ;;  %v2027_v34 = vor.u32 %v2026_v14, %v2023_v24  ;;  %v2004_v62 = vrot.slane %v2002_v17, 6  ;;  %v713_v35 = vsel %vm10563_vm5, %v704_v29, %v712_v4  ;;  %v1599_v47 = vld [vmem:[%s10340_s19 + $0xb8] sm:$0xf]  ;;  %v1600_v7 = vld [vmem:[%s10340_s19 + $0xbc] sm:$0x7] }
  0xee   : > { %v11052_v37 = vor.u32 %v2035_v15, %v2032_v32  ;;  %v2007_v46 = vrot.slane %v2005_v16, 7  ;;  %v2015_v38 = vshll.u32 %v1594_v10, 16  ;;  %1027 = vst.msk [vmem:[#allocation2 + $0x78] sm:$0xf] %vm996_vm6, %v713_v35  ;;  %v2014_v49 = vrot.slane %v2012_v0, 6  ;;  %v11082_v3 = vpop.permute.xlu0 %1432 }
  0xef   : > { %v1925_v8 = vsel %vm10661_vm10, %v1916_v40, %v10984_v48  ;;  %v2028_v42 = vrot.slane %v2027_v34, 4  ;;  %v762_v20 = vshrl.u32 %v253_v19, 16  ;;  %1535 = vst.msk [vmem:[#allocation2 + $0x78] sm:$0xf] %vm1504_vm7, %v11018_v9  ;;  %v765_v51 = vshll.u32 %v253_v19, 16 }
  0xf0   : > { %2340 = vrot.lane.b32.xlu2 %v1925_v8, %s10289_s21  ;;  %v11062_v43 = vor.u32 %v2007_v46, %v2004_v62  ;;  %v2017_v50 = vrot.slane %v2015_v38, 7  ;;  %v772_v55 = vshrl.u32 %v254_v25, 16  ;;  %v775_v48 = vshll.u32 %v254_v25, 16  ;;  %v1598_v19 = vld [vmem:[%s10340_s19 + $0xb4] sm:$0xc] }
  0xf1   : > { %v2037_v57 = vsel %vm10661_vm10, %v2028_v42, %v11052_v37  ;;  %v764_v59 = vrot.slane %v762_v20, 5  ;;  %v753_v61 = vshrl.u32 %v252_v39, 16  ;;  %v767_v54 = vrot.slane %v765_v51, 6  ;;  %v258_v15 = vld [vmem:[%s10340_s19 + $0xe4] sm:$0xe] }
  0xf2   : > { %2356 = vrot.lane.b32.xlu1 %v2037_v57, %s10289_s21  ;;  %v2010_v9 = vrot.slane %v11062_v43, 4  ;;  %v2018_v22 = vor.u32 %v2017_v50, %v2014_v49  ;;  %v774_v31 = vrot.slane %v772_v55, 5  ;;  %v777_v1 = vrot.slane %v775_v48, 6  ;;  %v259_v16 = vld [vmem:[%s10340_s19 + $0xe8] sm:$0xf] }
  0xf3   : > { %v755_v4 = vrot.slane %v753_v61, 5  ;;  %v756_v60 = vshll.u32 %v252_v39, 16  ;;  %v742_v5 = vrot.slane %v11024_v28, 4  ;;  %v768_v36 = vor.u32 %v767_v54, %v764_v59  ;;  %v11080_v28 = vpop.permute.xlu1 %1434  ;;  %v256_v8 = vld [vmem:[%s10340_s19 + $0xdc] sm:$0xf] }
  0xf4   : > { %v2019_v44 = vsel %vm10661_vm10, %v2010_v9, %v2018_v22  ;;  %v744_v21 = vshrl.u32 %v251_v56, 16  ;;  %v747_v26 = vshll.u32 %v251_v56, 16  ;;  %v778_v6 = vor.u32 %v777_v1, %v774_v31  ;;  %v257_v51 = vld [vmem:[%s10340_s19 + $0xe0] sm:$0x3]  ;;  %v255_v48 = vld [vmem:[%s10340_s19 + $0xd8] sm:$0xe] }
  0xf5   : > { %2354 = vrot.lane.b32.xlu0 %v2019_v44, %s10289_s21  ;;  %v758_v53 = vrot.slane %v756_v60, 6  ;;  %v1954_v10 = vrot.slane %v10974_v13, 4  ;;  %v1956_v41 = vshrl.u32 %v1588_v63, 16  ;;  %v770_v45 = vrot.slane %v768_v36, 4  ;;  %v11110_v44 = vpop.permute.xlu2 %1442 }
  0xf6   : > { %v746_v58 = vrot.slane %v744_v21, 5  ;;  %v749_v24 = vrot.slane %v747_v26, 6  ;;  %v1959_v52 = vshll.u32 %v1588_v63, 16  ;;  %v2058_v14 = vshrl.u32 %v1599_v47, 16 }
  0xf7   : > { %v759_v33 = vor.u32 %v758_v53, %v755_v4  ;;  %v1958_v12 = vrot.slane %v1956_v41, 6  ;;  %v2061_v17 = vshll.u32 %v1599_v47, 16  ;;  %v779_v13 = vsel %vm10563_vm5, %v770_v45, %v778_v6  ;;  %v11115_v6 = vpop.permute.xlu0 %1438  ;;  %v1592_v45 = vld [vmem:[%s10340_s19 + $0x9c] sm:$0xc] }
  0xf8   : > { %v750_v25 = vor.u32 %v749_v24, %v746_v58  ;;  %v1961_v29 = vrot.slane %v1959_v52, 7  ;;  %v2068_v32 = vshrl.u32 %v1600_v7, 16  ;;  %1032 = vst.msk [vmem:[#allocation2 + $0x8c] sm:$0xf] %vm996_vm6, %v779_v13  ;;  %v2060_v34 = vrot.slane %v2058_v14, 6 }
  0xf9   : > { %v760_v40 = vrot.slane %v759_v33, 4  ;;  %v2063_v62 = vrot.slane %v2061_v17, 7  ;;  %v2071_v0 = vshll.u32 %v1600_v7, 16  ;;  %1540 = vst.msk [vmem:[#allocation2 + $0x8c] sm:$0xf] %vm1504_vm7, %v11040_v18  ;;  %v2049_v39 = vshrl.u32 %v1598_v19, 16 }
  0xfa   : > { %v751_v35 = vsel %vm10563_vm5, %v742_v5, %v750_v25  ;;  %v1962_v46 = vor.u32 %v1961_v29, %v1958_v12  ;;  %v2070_v38 = vrot.slane %v2068_v32, 6  ;;  %v2052_v50 = vshll.u32 %v1598_v19, 16  ;;  %v1604_v12 = vld [vmem:[%s10340_s19 + $0xcc] sm:$0xc]  ;;  %v1605_v25 = vld [vmem:[%s10340_s19 + $0xd0] sm:$0xf] }
  0xfb   : > { %v769_v42 = vsel %vm10563_vm5, %v760_v40, %v768_v36  ;;  %1030 = vst.msk [vmem:[#allocation2 + $0x84] sm:$0xf] %vm996_vm6, %v751_v35  ;;  %v2064_v49 = vor.u32 %v2063_v62, %v2060_v34  ;;  %v2073_v20 = vrot.slane %v2071_v0, 7  ;;  %v2051_v55 = vrot.slane %v2049_v39, 6  ;;  %v11112_v36 = vpop.permute.xlu1 %1440  ;;  %v1602_v29 = vld [vmem:[%s10340_s19 + $0xc4] sm:$0xf] }
  0xfc   : > { %1031 = vst.msk [vmem:[#allocation2 + $0x88] sm:$0xf] %vm996_vm6, %v769_v42  ;;  %v1963_v18 = vsel %vm10661_vm10, %v1954_v10, %v1962_v46  ;;  %v809_v57 = vshrl.u32 %v258_v15, 16  ;;  %v812_v59 = vshll.u32 %v258_v15, 16  ;;  %v2054_v9 = vrot.slane %v2052_v50, 7 }
  0xfd   : > { %1539 = vst.msk [vmem:[#allocation2 + $0x88] sm:$0xf] %vm1504_vm7, %v11044_v27  ;;  %2346 = vrot.lane.b32.xlu2 %v1963_v18, %s10289_s21  ;;  %v2066_v61 = vrot.slane %v2064_v49, 4  ;;  %v2074_v56 = vor.u32 %v2073_v20, %v2070_v38  ;;  %v818_v22 = vshrl.u32 %v259_v16, 16  ;;  %v821_v63 = vshll.u32 %v259_v16, 16 }
  0xfe   : > { %1538 = vst.msk [vmem:[#allocation2 + $0x84] sm:$0xf] %vm1504_vm7, %v11047_v30  ;;  %v811_v54 = vrot.slane %v809_v57, 5  ;;  %v814_v31 = vrot.slane %v812_v59, 6  ;;  %v790_v1 = vshrl.u32 %v256_v8, 16  ;;  %v2055_v60 = vor.u32 %v2054_v9, %v2051_v55 }
  0xff   : > { %v2075_v4 = vsel %vm10661_vm10, %v2066_v61, %v2074_v56  ;;  %v820_v5 = vrot.slane %v818_v22, 5  ;;  %v793_v27 = vshll.u32 %v256_v8, 16  ;;  %v823_v30 = vrot.slane %v821_v63, 6  ;;  %v1603_v34 = vld [vmem:[%s10340_s19 + $0xc8] sm:$0x7] }
 0x100   : > { %2362 = vrot.lane.b32.xlu1 %v2075_v4, %s10289_s21  ;;  %v815_v21 = vor.u32 %v814_v31, %v811_v54  ;;  %v792_v26 = vrot.slane %v790_v1, 5  ;;  %v800_v47 = vshrl.u32 %v257_v51, 16  ;;  %v2056_v53 = vrot.slane %v2055_v60, 4  ;;  %v262_v18 = vld [vmem:[%s10340_s19 + $0xf4] sm:$0xf]  ;;  %v11140_v54 = vpop.permute.xlu2 %1448 }
 0x101   : > { %v795_v10 = vrot.slane %v793_v27, 6  ;;  %v803_v41 = vshll.u32 %v257_v51, 16  ;;  %v781_v7 = vshrl.u32 %v255_v48, 16  ;;  %v11118_v24 = vor.u32 %v823_v30, %v820_v5  ;;  %v263_v61 = vld [vmem:[%s10340_s19 + $0xf8] sm:$0x3]  ;;  %v11147_v27 = vpop.permute.xlu0 %1444 }
 0x102   : > { %v816_v58 = vrot.slane %v815_v21, 4  ;;  %v802_v52 = vrot.slane %v800_v47, 5  ;;  %v784_v33 = vshll.u32 %v255_v48, 16  ;;  %v2065_v14 = vsel %vm10661_vm10, %v2056_v53, %v2064_v49  ;;  %v261_v5 = vld [vmem:[%s10340_s19 + $0xf0] sm:$0xe] }
 0x103   : > { %v796_v17 = vor.u32 %v795_v10, %v792_v26  ;;  %v805_v19 = vrot.slane %v803_v41, 6  ;;  %v783_v13 = vrot.slane %v781_v7, 5  ;;  %2360 = vrot.lane.b32.xlu0 %v2065_v14, %s10289_s21  ;;  %v1993_v16 = vshrl.u32 %v1592_v45, 16  ;;  %v11142_v31 = vpop.permute.xlu1 %1446 }
 0x104   : > { %v825_v32 = vsel %vm10563_vm5, %v816_v58, %v11118_v24  ;;  %v786_v15 = vrot.slane %v784_v33, 6  ;;  %v1996_v40 = vshll.u32 %v1592_v45, 16  ;;  %v2105_v35 = vshrl.u32 %v1604_v12, 16 }
 0x105   : > { %1035 = vst.msk [vmem:[#allocation2 + $0x98] sm:$0xf] %vm996_vm6, %v825_v32  ;;  %v798_v62 = vrot.slane %v796_v17, 4  ;;  %v806_v0 = vor.u32 %v805_v19, %v802_v52  ;;  %v2108_v46 = vshll.u32 %v1604_v12, 16  ;;  %v1995_v39 = vrot.slane %v1993_v16, 6 }
 0x106   : > { %1543 = vst.msk [vmem:[#allocation2 + $0x98] sm:$0xf] %vm1504_vm7, %v11078_v11  ;;  %v787_v38 = vor.u32 %v786_v15, %v783_v13  ;;  %v1998_v8 = vrot.slane %v1996_v40, 7  ;;  %v2114_v42 = vshrl.u32 %v1605_v25, 16  ;;  %v2107_v20 = vrot.slane %v2105_v35, 6 }
 0x107   : > { %v807_v49 = vsel %vm10563_vm5, %v798_v62, %v806_v0  ;;  %v2110_v50 = vrot.slane %v2108_v46, 7  ;;  %v2117_v51 = vshll.u32 %v1605_v25, 16  ;;  %v2086_v48 = vshrl.u32 %v1602_v29, 16 }
 0x108   : > { %1034 = vst.msk [vmem:[#allocation2 + $0x94] sm:$0xf] %vm996_vm6, %v807_v49  ;;  %v788_v55 = vrot.slane %v787_v38, 4  ;;  %v1999_v57 = vor.u32 %v1998_v8, %v1995_v39  ;;  %v2116_v59 = vrot.slane %v2114_v42, 6  ;;  %v2089_v9 = vshll.u32 %v1602_v29, 16 }
 0x109   : > { %1542 = vst.msk [vmem:[#allocation2 + $0x94] sm:$0xf] %vm1504_vm7, %v11080_v28  ;;  %v2111_v11 = vor.u32 %v2110_v50, %v2107_v20  ;;  %v2119_v56 = vrot.slane %v2117_v51, 7  ;;  %v2096_v22 = vshrl.u32 %v1603_v34, 16  ;;  %v2088_v4 = vrot.slane %v2086_v48, 6 }
 0x10a   : > { %v797_v63 = vsel %vm10563_vm5, %v788_v55, %v796_v17  ;;  %v2000_v1 = vrot.slane %v1999_v57, 4  ;;  %v2099_v60 = vshll.u32 %v1603_v34, 16  ;;  %v2091_v30 = vrot.slane %v2089_v9, 7  ;;  %v1597_v29 = vld [vmem:[%s10340_s19 + $0xb0] sm:$0x7]  ;;  %v11176_v57 = vpop.permute.xlu2 %1454 }
 0x10b   : > { %1033 = vst.msk [vmem:[#allocation2 + $0x90] sm:$0xf] %vm996_vm6, %v797_v63  ;;  %v2112_v28 = vrot.slane %v2111_v11, 4  ;;  %v11150_v21 = vor.u32 %v2119_v56, %v2116_v59  ;;  %v2098_v26 = vrot.slane %v2096_v22, 6  ;;  %v846_v10 = vshrl.u32 %v262_v18, 16  ;;  %v11178_v59 = vpop.permute.xlu1 %1452 }
 0x10c   : > { %1541 = vst.msk [vmem:[#allocation2 + $0x90] sm:$0xf] %vm1504_vm7, %v11082_v3  ;;  %v2009_v47 = vsel %vm10661_vm10, %v2000_v1, %v11062_v43  ;;  %v2101_v53 = vrot.slane %v2099_v60, 7  ;;  %v849_v41 = vshll.u32 %v262_v18, 16  ;;  %v11161_v45 = vor.u32 %v2091_v30, %v2088_v4  ;;  %v260_v3 = vld [vmem:[%s10340_s19 + $0xec] sm:$0x3] }
 0x10d   : > { %2352 = vrot.lane.b32.xlu2 %v2009_v47, %s10289_s21  ;;  %v2121_v7 = vsel %vm10661_vm10, %v2112_v28, %v11150_v21  ;;  %v856_v58 = vshrl.u32 %v263_v61, 16  ;;  %v859_v52 = vshll.u32 %v263_v61, 16  ;;  %v848_v43 = vrot.slane %v846_v10, 5  ;;  %v1608_v34 = vld [vmem:[%s10340_s19 + $0xdc] sm:$0xf] }
 0x10e   : > { %2368 = vrot.lane.b32.xlu1 %v2121_v7, %s10289_s21  ;;  %v2102_v33 = vor.u32 %v2101_v53, %v2098_v26  ;;  %v851_v12 = vrot.slane %v849_v41, 6  ;;  %v837_v14 = vshrl.u32 %v261_v5, 16  ;;  %v2094_v17 = vrot.slane %v11161_v45, 4  ;;  %v1609_v38 = vld [vmem:[%s10340_s19 + $0xe0] sm:$0x7] }
 0x10f   : > { %v858_v19 = vrot.slane %v856_v58, 5  ;;  %v861_v13 = vrot.slane %v859_v52, 6  ;;  %v840_v25 = vshll.u32 %v261_v5, 16  ;;  %v826_v16 = vrot.slane %v11118_v24, 4  ;;  %v1607_v20 = vld [vmem:[%s10340_s19 + $0xd8] sm:$0xc] }
 0x110   : > { %v852_v32 = vor.u32 %v851_v12, %v848_v43  ;;  %v839_v15 = vrot.slane %v837_v14, 5  ;;  %v828_v40 = vshrl.u32 %v260_v3, 16  ;;  %v2103_v62 = vsel %vm10661_vm10, %v2094_v17, %v2102_v33  ;;  %v267_v55 = vld [vmem:[%s10340_s19 + $0x108] sm:$0xe]  ;;  %v268_v9 = vld [vmem:[%s10340_s19 + $0x10c] sm:$0xf] }
 0x111   : > { %v862_v0 = vor.u32 %v861_v13, %v858_v19  ;;  %v842_v35 = vrot.slane %v840_v25, 6  ;;  %v831_v46 = vshll.u32 %v260_v3, 16  ;;  %2366 = vrot.lane.b32.xlu0 %v2103_v62, %s10289_s21  ;;  %v2038_v42 = vrot.slane %v11052_v37, 4  ;;  %v11183_v37 = vpop.permute.xlu0 %1450  ;;  %v265_v41 = vld [vmem:[%s10340_s19 + $0x100] sm:$0xf] }
 0x112   : > { %v854_v39 = vrot.slane %v852_v32, 4  ;;  %v830_v8 = vrot.slane %v828_v40, 5  ;;  %v2040_v49 = vshrl.u32 %v1597_v29, 16  ;;  %v2043_v51 = vshll.u32 %v1597_v29, 16  ;;  %v266_v7 = vld [vmem:[%s10340_s19 + $0x104] sm:$0x3] }
 0x113   : > { %v843_v24 = vor.u32 %v842_v35, %v839_v15  ;;  %v833_v50 = vrot.slane %v831_v46, 6  ;;  %v2142_v18 = vshrl.u32 %v1608_v34, 16  ;;  %v2145_v11 = vshll.u32 %v1608_v34, 16  ;;  %v264_v17 = vld [vmem:[%s10340_s19 + $0xfc] sm:$0xe] }
 0x114   : > { %v863_v48 = vsel %vm10563_vm5, %v854_v39, %v862_v0  ;;  %v2042_v61 = vrot.slane %v2040_v49, 6  ;;  %v2152_v56 = vshrl.u32 %v1609_v38, 16  ;;  %v2045_v1 = vrot.slane %v2043_v51, 7  ;;  %v1613_v51 = vld [vmem:[%s10340_s19 + $0xf0] sm:$0xc] }
 0x115   : > { %1038 = vst.msk [vmem:[#allocation2 + $0xa4] sm:$0xf] %vm996_vm6, %v863_v48  ;;  %v844_v22 = vrot.slane %v843_v24, 4  ;;  %v834_v63 = vor.u32 %v833_v50, %v830_v8  ;;  %v2144_v4 = vrot.slane %v2142_v18, 6  ;;  %v2147_v60 = vrot.slane %v2145_v11, 7 }
 0x116   : > { %1546 = vst.msk [vmem:[#allocation2 + $0xa4] sm:$0xf] %vm1504_vm7, %v11110_v44  ;;  %v2154_v5 = vrot.slane %v2152_v56, 6  ;;  %v2155_v28 = vshll.u32 %v1609_v38, 16  ;;  %v2133_v30 = vshrl.u32 %v1607_v20, 16  ;;  %v2046_v53 = vor.u32 %v2045_v1, %v2042_v61 }
 0x117   : > { %v853_v26 = vsel %vm10563_vm5, %v844_v22, %v852_v32  ;;  %v835_v47 = vsel %vm10563_vm5, %v826_v16, %v834_v63  ;;  %v2136_v10 = vshll.u32 %v1607_v20, 16  ;;  %v2148_v58 = vor.u32 %v2147_v60, %v2144_v4  ;;  %v1601_v8 = vld [vmem:[%s10340_s19 + $0xc0] sm:$0xc]  ;;  %v1614_v1 = vld [vmem:[%s10340_s19 + $0xf4] sm:$0xf] }
 0x118   : > { %1037 = vst.msk [vmem:[#allocation2 + $0xa0] sm:$0xf] %vm996_vm6, %v853_v26  ;;  %v2157_v52 = vrot.slane %v2155_v28, 7  ;;  %v2135_v44 = vrot.slane %v2133_v30, 6  ;;  %v893_v3 = vshrl.u32 %v267_v55, 16  ;;  %v2047_v33 = vsel %vm10661_vm10, %v2038_v42, %v2046_v53  ;;  %v11208_v42 = vpop.permute.xlu2 %2304 }
 0x119   : > { %1545 = vst.msk [vmem:[#allocation2 + $0xa0] sm:$0xf] %vm1504_vm7, %v11112_v36  ;;  %v2138_v43 = vrot.slane %v2136_v10, 7  ;;  %v896_v12 = vshll.u32 %v267_v55, 16  ;;  %v902_v14 = vshrl.u32 %v268_v9, 16  ;;  %2358 = vrot.lane.b32.xlu2 %v2047_v33, %s10289_s21  ;;  %v2150_v19 = vrot.slane %v2148_v58, 4  ;;  %v11215_v18 = vpop.permute.xlu0 %2300 }
 0x11a   : > { %1036 = vst.msk [vmem:[#allocation2 + $0x9c] sm:$0xf] %vm996_vm6, %v835_v47  ;;  %v2158_v13 = vor.u32 %v2157_v52, %v2154_v5  ;;  %v895_v25 = vrot.slane %v893_v3, 5  ;;  %v905_v29 = vshll.u32 %v268_v9, 16  ;;  %v874_v16 = vshrl.u32 %v265_v41, 16 }
 0x11b   : > { %1544 = vst.msk [vmem:[#allocation2 + $0x9c] sm:$0xf] %vm1504_vm7, %v11115_v6  ;;  %v2139_v36 = vor.u32 %v2138_v43, %v2135_v44  ;;  %v898_v32 = vrot.slane %v896_v12, 6  ;;  %v904_v15 = vrot.slane %v902_v14, 5  ;;  %v877_v62 = vshll.u32 %v265_v41, 16  ;;  %v11210_v6 = vpop.permute.xlu1 %2302 }
 0x11c   : > { %v2159_v40 = vsel %vm10661_vm10, %v2150_v19, %v2158_v13  ;;  %v907_v34 = vrot.slane %v905_v29, 6  ;;  %v884_v0 = vshrl.u32 %v266_v7, 16  ;;  %v876_v38 = vrot.slane %v874_v16, 5  ;;  %v1611_v30 = vld [vmem:[%s10340_s19 + $0xe8] sm:$0xf] }
 0x11d   : > { %2374 = vrot.lane.b32.xlu1 %v2159_v40, %s10289_s21  ;;  %v2140_v35 = vrot.slane %v2139_v36, 4  ;;  %v899_v46 = vor.u32 %v898_v32, %v895_v25  ;;  %v887_v39 = vshll.u32 %v266_v7, 16  ;;  %v879_v20 = vrot.slane %v877_v62, 6  ;;  %v1612_v26 = vld [vmem:[%s10340_s19 + $0xec] sm:$0x7] }
 0x11e   : > { %v11212_v49 = vor.u32 %v907_v34, %v904_v15  ;;  %v886_v24 = vrot.slane %v884_v0, 5  ;;  %v865_v50 = vshrl.u32 %v264_v17, 16  ;;  %v868_v11 = vshll.u32 %v264_v17, 16  ;;  %v271_v14 = vld [vmem:[%s10340_s19 + $0x118] sm:$0xf] }
 0x11f   : > { %v2149_v55 = vsel %vm10661_vm10, %v2140_v35, %v2148_v58  ;;  %v900_v48 = vrot.slane %v899_v46, 4  ;;  %v889_v61 = vrot.slane %v887_v39, 6  ;;  %v880_v56 = vor.u32 %v879_v20, %v876_v38  ;;  %v272_v17 = vld [vmem:[%s10340_s19 + $0x11c] sm:$0x3]  ;;  %v270_v38 = vld [vmem:[%s10340_s19 + $0x114] sm:$0xe] }
 0x120   : > { %2372 = vrot.lane.b32.xlu0 %v2149_v55, %s10289_s21  ;;  %v867_v9 = vrot.slane %v865_v50, 5  ;;  %v2077_v22 = vshrl.u32 %v1601_v8, 16  ;;  %v2080_v63 = vshll.u32 %v1601_v8, 16  ;;  %v870_v5 = vrot.slane %v868_v11, 6  ;;  %2447 = vst.msk [vmem:[#allocation2 + $0x8] sm:$0xf] %vm2444_vm11, %v11208_v42 }
 0x121   : > { %v909_v4 = vsel %vm10563_vm5, %v900_v48, %v11212_v49  ;;  %v890_v60 = vor.u32 %v889_v61, %v886_v24  ;;  %v2189_v28 = vshrl.u32 %v1613_v51, 16  ;;  %v882_v47 = vrot.slane %v880_v56, 4  ;;  %v11240_v34 = vpop.permute.xlu0 %2306  ;;  %2446 = vst.msk [vmem:[#allocation2 + $0x4] sm:$0xf] %vm2444_vm11, %v11210_v6 }
 0x122   : > { %1041 = vst.msk [vmem:[#allocation2 + $0xb0] sm:$0xf] %vm996_vm6, %v909_v4  ;;  %v2079_v53 = vrot.slane %v2077_v22, 6  ;;  %v2082_v10 = vrot.slane %v2080_v63, 7  ;;  %v2192_v41 = vshll.u32 %v1613_v51, 16  ;;  %v871_v7 = vor.u32 %v870_v5, %v867_v9 }
 0x123   : > { %1549 = vst.msk [vmem:[#allocation2 + $0xb0] sm:$0xf] %vm1504_vm7, %v11140_v54  ;;  %v2191_v58 = vrot.slane %v2189_v28, 6  ;;  %v2198_v52 = vshrl.u32 %v1614_v1, 16  ;;  %v2201_v44 = vshll.u32 %v1614_v1, 16  ;;  %v891_v3 = vsel %vm10563_vm5, %v882_v47, %v890_v60  ;;  %v11234_v54 = vpop.permute.xlu2 %2310  ;;  %v11236_v36 = vpop.permute.xlu1 %2308 }
 0x124   : > { %v2083_v33 = vor.u32 %v2082_v10, %v2079_v53  ;;  %v2194_v43 = vrot.slane %v2192_v41, 7  ;;  %v2170_v12 = vshrl.u32 %v1611_v30, 16  ;;  %1040 = vst.msk [vmem:[#allocation2 + $0xac] sm:$0xf] %vm996_vm6, %v891_v3  ;;  %v872_v19 = vrot.slane %v871_v7, 4 }
 0x125   : > { %v2200_v13 = vrot.slane %v2198_v52, 6  ;;  %v2203_v25 = vrot.slane %v2201_v44, 7  ;;  %v2173_v29 = vshll.u32 %v1611_v30, 16  ;;  %1548 = vst.msk [vmem:[#allocation2 + $0xac] sm:$0xf] %vm1504_vm7, %v11142_v31  ;;  %v2180_v40 = vshrl.u32 %v1612_v26, 16 }
 0x126   : > { %v2084_v32 = vrot.slane %v2083_v33, 4  ;;  %v2195_v15 = vor.u32 %v2194_v43, %v2191_v58  ;;  %v2172_v16 = vrot.slane %v2170_v12, 6  ;;  %v881_v62 = vsel %vm10563_vm5, %v872_v19, %v880_v56  ;;  %v269_v56 = vld [vmem:[%s10340_s19 + $0x110] sm:$0x3]  ;;  %v1606_v1 = vld [vmem:[%s10340_s19 + $0xd4] sm:$0x7] }
 0x127   : > { %v11244_v0 = vor.u32 %v2203_v25, %v2200_v13  ;;  %v2175_v35 = vrot.slane %v2173_v29, 7  ;;  %v2183_v46 = vshll.u32 %v1612_v26, 16  ;;  %1039 = vst.msk [vmem:[#allocation2 + $0xa8] sm:$0xf] %vm996_vm6, %v881_v62  ;;  %v2182_v8 = vrot.slane %v2180_v40, 6 }
 0x128   : > { %v2093_v31 = vsel %vm10661_vm10, %v2084_v32, %v11161_v45  ;;  %v2196_v39 = vrot.slane %v2195_v15, 4  ;;  %v930_v20 = vshrl.u32 %v271_v14, 16  ;;  %1547 = vst.msk [vmem:[#allocation2 + $0xa8] sm:$0xf] %vm1504_vm7, %v11147_v27  ;;  %v933_v51 = vshll.u32 %v271_v14, 16 }
 0x129   : > { %2364 = vrot.lane.b32.xlu2 %v2093_v31, %s10289_s21  ;;  %v11254_v24 = vor.u32 %v2175_v35, %v2172_v16  ;;  %v2185_v50 = vrot.slane %v2183_v46, 7  ;;  %v940_v55 = vshrl.u32 %v272_v17, 16  ;;  %v943_v45 = vshll.u32 %v272_v17, 16  ;;  %v1617_v10 = vld [vmem:[%s10340_s19 + $0x100] sm:$0xf]  ;;  %v11274_v33 = vpop.permute.xlu0 %2312 }
 0x12a   : > { %v2205_v48 = vsel %vm10661_vm10, %v2196_v39, %v11244_v0  ;;  %v932_v61 = vrot.slane %v930_v20, 5  ;;  %v921_v11 = vshrl.u32 %v270_v38, 16  ;;  %v935_v22 = vrot.slane %v933_v51, 6  ;;  %v1616_v32 = vld [vmem:[%s10340_s19 + $0xfc] sm:$0xc] }
 0x12b   : > { %2380 = vrot.lane.b32.xlu1 %v2205_v48, %s10289_s21  ;;  %v2178_v27 = vrot.slane %v11254_v24, 4  ;;  %v2186_v9 = vor.u32 %v2185_v50, %v2182_v8  ;;  %v942_v63 = vrot.slane %v940_v55, 5  ;;  %v945_v4 = vrot.slane %v943_v45, 6  ;;  %v11267_v41 = vpop.permute.xlu2 %2316  ;;  %v11269_v7 = vpop.permute.xlu1 %2314  ;;  %v1610_v62 = vld [vmem:[%s10340_s19 + $0xe4] sm:$0xc] }
 0x12c   : > { %v923_v60 = vrot.slane %v921_v11, 5  ;;  %v924_v5 = vshll.u32 %v270_v38, 16  ;;  %v910_v28 = vrot.slane %v11212_v49, 4  ;;  %v936_v26 = vor.u32 %v935_v22, %v932_v61  ;;  %v1618_v49 = vld [vmem:[%s10340_s19 + $0x104] sm:$0x7] }
 0x12d   : > { %v2187_v30 = vsel %vm10661_vm10, %v2178_v27, %v2186_v9  ;;  %v912_v47 = vshrl.u32 %v269_v56, 16  ;;  %v915_v53 = vshll.u32 %v269_v56, 16  ;;  %v946_v58 = vor.u32 %v945_v4, %v942_v63  ;;  %v1622_v39 = vld [vmem:[%s10340_s19 + $0x114] sm:$0xc]  ;;  %v1623_v55 = vld [vmem:[%s10340_s19 + $0x118] sm:$0xf] }
 0x12e   : > { %2378 = vrot.lane.b32.xlu0 %v2187_v30, %s10289_s21  ;;  %v926_v52 = vrot.slane %v924_v5, 6  ;;  %v2122_v44 = vrot.slane %v11150_v21, 4  ;;  %v2124_v3 = vshrl.u32 %v1606_v1, 16  ;;  %v938_v43 = vrot.slane %v936_v26, 4  ;;  %v1620_v56 = vld [vmem:[%s10340_s19 + $0x10c] sm:$0xf] }
 0x12f   : > { %v914_v12 = vrot.slane %v912_v47, 5  ;;  %v917_v14 = vrot.slane %v915_v53, 6  ;;  %v2127_v17 = vshll.u32 %v1606_v1, 16  ;;  %v2226_v25 = vshrl.u32 %v1617_v10, 16  ;;  %2445 = vst.msk [vmem:[#allocation2] sm:$0xf] %vm2444_vm11, %v11215_v18 }
 0x130   : > { %v927_v19 = vor.u32 %v926_v52, %v923_v60  ;;  %v2126_v13 = vrot.slane %v2124_v3, 6  ;;  %v2229_v29 = vshll.u32 %v1617_v10, 16  ;;  %v947_v15 = vsel %vm10563_vm5, %v938_v43, %v946_v58  ;;  %v1621_v52 = vld [vmem:[%s10340_s19 + $0x110] sm:$0x7]  ;;  %v1615_v43 = vld [vmem:[%s10340_s19 + $0xf8] sm:$0x7] }
 0x131   : > { %v918_v21 = vor.u32 %v917_v14, %v914_v12  ;;  %v2129_v16 = vrot.slane %v2127_v17, 7  ;;  %v2236_v40 = vshrl.u32 %v1618_v49, 16  ;;  %1044 = vst.msk [vmem:[#allocation2 + $0xbc] sm:$0xf] %vm996_vm6, %v947_v15  ;;  %v2228_v46 = vrot.slane %v2226_v25, 6  ;;  %v11301_v5 = vpop.permute.xlu0 %2318 }
 0x132   : > { %v928_v35 = vrot.slane %v927_v19, 4  ;;  %v2231_v38 = vrot.slane %v2229_v29, 7  ;;  %v2239_v31 = vshll.u32 %v1618_v49, 16  ;;  %1552 = vst.msk [vmem:[#allocation2 + $0xbc] sm:$0xf] %vm1504_vm7, %v11176_v57  ;;  %v2217_v51 = vshrl.u32 %v1616_v32, 16 }
 0x133   : > { %v919_v8 = vsel %vm10563_vm5, %v910_v28, %v918_v21  ;;  %v2130_v20 = vor.u32 %v2129_v16, %v2126_v13  ;;  %v2238_v50 = vrot.slane %v2236_v40, 6  ;;  %v2220_v11 = vshll.u32 %v1616_v32, 16  ;;  %v11294_v22 = vpop.permute.xlu2 %2322  ;;  %v11296_v63 = vpop.permute.xlu1 %2320  ;;  %2450 = vst.msk [vmem:[#allocation2 + $0x14] sm:$0xf] %vm2444_vm11, %v11234_v54  ;;  %v1619_v18 = vld [vmem:[%s10340_s19 + $0x108] sm:$0xc] }
 0x134   : > { %v937_v48 = vsel %vm10563_vm5, %v928_v35, %v936_v26  ;;  %1042 = vst.msk [vmem:[#allocation2 + $0xb4] sm:$0xf] %vm996_vm6, %v919_v8  ;;  %v2232_v61 = vor.u32 %v2231_v38, %v2228_v46  ;;  %v2241_v45 = vrot.slane %v2239_v31, 7  ;;  %v2219_v27 = vrot.slane %v2217_v51, 6  ;;  %vm11473_vm5 = vmor %vm4278_vm3, %vm4279_vm4 }
 0x135   : > { %1043 = vst.msk [vmem:[#allocation2 + $0xb8] sm:$0xf] %vm996_vm6, %v937_v48  ;;  %v2131_v57 = vsel %vm10661_vm10, %v2122_v44, %v2130_v20  ;;  %v2161_v9 = vshrl.u32 %v1610_v62, 16  ;;  %v2222_v4 = vrot.slane %v2220_v11, 7  ;;  %v2164_v60 = vshll.u32 %v1610_v62, 16 }
 0x136   : > { %1551 = vst.msk [vmem:[#allocation2 + $0xb8] sm:$0xf] %vm1504_vm7, %v11178_v59  ;;  %2370 = vrot.lane.b32.xlu2 %v2131_v57, %s10289_s21  ;;  %v2234_v23 = vrot.slane %v2232_v61, 4  ;;  %v2242_v1 = vor.u32 %v2241_v45, %v2238_v50  ;;  %v2273_v30 = vshrl.u32 %v1622_v39, 16  ;;  %v2276_v26 = vshll.u32 %v1622_v39, 16 }
 0x137   : > { %1550 = vst.msk [vmem:[#allocation2 + $0xb4] sm:$0xf] %vm1504_vm7, %v11183_v37  ;;  %v2163_v28 = vrot.slane %v2161_v9, 6  ;;  %v2282_v47 = vshrl.u32 %v1623_v55, 16  ;;  %v2223_v53 = vor.u32 %v2222_v4, %v2219_v27  ;;  %v2166_v10 = vrot.slane %v2164_v60, 7 }
 0x138   : > { %v2243_v59 = vsel %vm10661_vm10, %v2234_v23, %v2242_v1  ;;  %v2285_v58 = vshll.u32 %v1623_v55, 16  ;;  %v2275_v37 = vrot.slane %v2273_v30, 6  ;;  %v2278_v44 = vrot.slane %v2276_v26, 7  ;;  %2449 = vst.msk [vmem:[#allocation2 + $0x10] sm:$0xf] %vm2444_vm11, %v11236_v36 }
 0x139   : > { %2386 = vrot.lane.b32.xlu1 %v2243_v59, %s10289_s21  ;;  %v2284_v3 = vrot.slane %v2282_v47, 6  ;;  %v2254_v49 = vshrl.u32 %v1620_v56, 16  ;;  %v2224_v12 = vrot.slane %v2223_v53, 4  ;;  %v2167_v14 = vor.u32 %v2166_v10, %v2163_v28  ;;  %2448 = vst.msk [vmem:[#allocation2 + $0xc] sm:$0xf] %vm2444_vm11, %v11240_v34  ;;  %v2325_v36 = vpop.permute.xlu0 %2324 }
 0x13a   : > { %v2287_v42 = vrot.slane %v2285_v58, 7  ;;  %v2257_v17 = vshll.u32 %v1620_v56, 16  ;;  %v2279_v19 = vor.u32 %v2278_v44, %v2275_v37  ;;  %v2264_v25 = vshrl.u32 %v1621_v52, 16  ;;  %2453 = vst.msk [vmem:[#allocation2 + $0x20] sm:$0xf] %vm2444_vm11, %v11267_v41 }
 0x13b   : > { %v2256_v13 = vrot.slane %v2254_v49, 6  ;;  %v2267_v29 = vshll.u32 %v1621_v52, 16  ;;  %v2233_v6 = vsel %vm10661_vm10, %v2224_v12, %v2232_v61  ;;  %v2168_v32 = vrot.slane %v2167_v14, 4  ;;  %v2329_v54 = vpop.permute.xlu2 %2328  ;;  %v2327_v35 = vpop.permute.xlu1 %2326  ;;  %2452 = vst.msk [vmem:[#allocation2 + $0x1c] sm:$0xf] %vm2444_vm11, %v11269_v7 }
 0x13c   : > { %v11320_v15 = vor.u32 %v2287_v42, %v2284_v3  ;;  %v2259_v21 = vrot.slane %v2257_v17, 7  ;;  %2384 = vrot.lane.b32.xlu0 %v2233_v6, %s10289_s21  ;;  %v2280_v16 = vrot.slane %v2279_v19, 4  ;;  %v2266_v40 = vrot.slane %v2264_v25, 6  ;;  %2451 = vst.msk [vmem:[#allocation2 + $0x18] sm:$0xf] %vm2444_vm11, %v11274_v33 }
 0x13d   : > { %v2269_v62 = vrot.slane %v2267_v29, 7  ;;  %v2177_v46 = vsel %vm10661_vm10, %v2168_v32, %v11254_v24  ;;  %v2208_v31 = vshrl.u32 %v1615_v43, 16  ;;  %v2211_v39 = vshll.u32 %v1615_v43, 16  ;;  %2456 = vst.msk [vmem:[#allocation2 + $0x2c] sm:$0xf] %vm2444_vm11, %v11294_v22 }
 0x13e   : > { %v2260_v38 = vor.u32 %v2259_v21, %v2256_v13  ;;  %2376 = vrot.lane.b32.xlu2 %v2177_v46, %s10289_s21  ;;  %v2289_v8 = vsel %vm10661_vm10, %v2280_v16, %v11320_v15  ;;  %v2245_v20 = vshrl.u32 %v1619_v18, 16  ;;  %v2248_v50 = vshll.u32 %v1619_v18, 16  ;;  %2455 = vst.msk [vmem:[#allocation2 + $0x28] sm:$0xf] %vm2444_vm11, %v11296_v63  ;;  %v1624_v11 = vld [vmem:[%s10340_s19 + $0x11c] sm:$0x7] }
 0x13f   : > { %v2270_v34 = vor.u32 %v2269_v62, %v2266_v40  ;;  %v2206_v51 = vrot.slane %v11244_v0, 4  ;;  %v2210_v55 = vrot.slane %v2208_v31, 6  ;;  %v2213_v48 = vrot.slane %v2211_v39, 7  ;;  %2454 = vst.msk [vmem:[#allocation2 + $0x24] sm:$0xf] %vm2444_vm11, %v11301_v5 }
 0x140   : > { %v2262_v24 = vrot.slane %v2260_v38, 4  ;;  %v2247_v41 = vrot.slane %v2245_v20, 6  ;;  %v2250_v61 = vrot.slane %v2248_v50, 7  ;;  %2459 = vst.msk [vmem:[#allocation2 + $0x38] sm:$0xf] %vm2444_vm11, %v2329_v54  ;;  %v2292_v63 = vshrl.u32 %v1624_v11, 16 }
 0x141   : > { %2392 = vrot.lane.b32.xlu1 %v2289_v8, %s10289_s21  ;;  %v2214_v45 = vor.u32 %v2213_v48, %v2210_v55  ;;  %2458 = vst.msk [vmem:[#allocation2 + $0x34] sm:$0xf] %vm2444_vm11, %v2327_v35  ;;  %v2494_v27 = vld [vmem:[%s10340_s19 + $0x4] sm:$0xf]  ;;  %v2331_v9 = vpop.permute.xlu0 %2330  ;;  %v2295_v23 = vshll.u32 %v1624_v11, 16  ;;  %v2290_v59 = vrot.slane %v11320_v15, 4 }
 0x142   : > { %v2271_v7 = vsel %vm10661_vm10, %v2262_v24, %v2270_v34  ;;  %v2251_v33 = vor.u32 %v2250_v61, %v2247_v41  ;;  %2457 = vst.msk [vmem:[#allocation2 + $0x30] sm:$0xf] %vm2444_vm11, %v2325_v36  ;;  %v2493_v1 = vld [vmem:[%s10340_s19] sm:$0xf]  ;;  %v2294_v60 = vrot.slane %v2292_v63, 6  ;;  %vm5389_vm14 = vcmask 257248  }
 0x143   : > { %v2215_v0 = vsel %vm10661_vm10, %v2206_v51, %v2214_v45  ;;  %v2335_v56 = vpop.permute.xlu2 %2334  ;;  %v2333_v57 = vpop.permute.xlu1 %2332  ;;  %2460 = vst.msk [vmem:[#allocation2 + $0x3c] sm:$0xf] %vm2444_vm11, %v2331_v9  ;;  %v2297_v5 = vrot.slane %v2295_v23, 7  ;;  %v2497_v26 = vld [vmem:[%s10340_s19 + $0x18] sm:$0xf]  ;;  %vm5678_vm1 = vcmask 290048  }
 0x144   : > { %2390 = vrot.lane.b32.xlu0 %v2271_v7, %s10289_s21  ;;  %2462 = vst.msk [vmem:[#allocation2 + $0x44] sm:$0xf] %vm2444_vm11, %v2335_v56  ;;  %v2252_v22 = vrot.slane %v2251_v33, 4  ;;  %v2496_v10 = vld [vmem:[%s10340_s19 + $0x10] sm:$0xf]  ;;  %vm5915_vm3 = vcmask 97280  }
 0x145   : > { %2461 = vst.msk [vmem:[#allocation2 + $0x40] sm:$0xf] %vm2444_vm11, %v2333_v57  ;;  %v2298_v53 = vor.u32 %v2297_v5, %v2294_v60  ;;  %v2500_v37 = vld [vmem:[%s10340_s19 + $0x28] sm:$0xf]  ;;  %v2495_v49 = vld [vmem:[%s10340_s19 + $0xc] sm:$0xf] }
 0x146   : > { %2382 = vrot.lane.b32.xlu2 %v2215_v0, %s10289_s21  ;;  %v2261_v4 = vsel %vm10661_vm10, %v2252_v22, %v2260_v38  ;;  %v2503_v12 = vld [vmem:[%s10340_s19 + $0x3c] sm:$0xf]  ;;  %v2502_v42 = vld [vmem:[%s10340_s19 + $0x34] sm:$0xf]  ;;  %v2506_v13 = vld [vmem:[%s10340_s19 + $0x4c] sm:$0xf] }
 0x147   : > { %v2299_v58 = vsel %vm10661_vm10, %v2290_v59, %v2298_v53  ;;  %v2498_v17 = vld [vmem:[%s10340_s19 + $0x1c] sm:$0xf]  ;;  %v2505_v6 = vld [vmem:[%s10340_s19 + $0x48] sm:$0xf]  ;;  %v2501_v32 = vld [vmem:[%s10340_s19 + $0x30] sm:$0xf] }
 0x148   : > { %v2509_v15 = vld [vmem:[%s10340_s19 + $0x60] sm:$0xf]  ;;  %v2508_v21 = vld [vmem:[%s10340_s19 + $0x58] sm:$0xf]  ;;  %v2512_v62 = vld [vmem:[%s10340_s19 + $0x70] sm:$0xf] }
 0x149   : > { %2591 = vrot.lane.b32.xlu1 %v2494_v27, %s10290_s22  ;;  %v2337_v47 = vpop.permute.xlu0 %2336  ;;  %v2504_v16 = vld [vmem:[%s10340_s19 + $0x40] sm:$0xf]  ;;  %v2511_v35 = vld [vmem:[%s10340_s19 + $0x6c] sm:$0xf]  ;;  %v2507_v46 = vld [vmem:[%s10340_s19 + $0x54] sm:$0xf] }
 0x14a   : > { %2463 = vst.msk [vmem:[#allocation2 + $0x48] sm:$0xf] %vm2444_vm11, %v2337_v47  ;;  %v2515_v38 = vld [vmem:[%s10340_s19 + $0x84] sm:$0xf]  ;;  %v2795_v31 = vld [vmem:[%s10340_s19 + $0x34] sm:$0xf] }
 0x14b   : > { %v2341_v28 = vpop.permute.xlu2 %2340  ;;  %v2339_v30 = vpop.permute.xlu1 %2338  ;;  %v2963_v36 = vshll.u32 %v2795_v31, 16  ;;  %v2967_v8 = vshrl.u32 %v2795_v31, 16  ;;  %v2514_v34 = vld [vmem:[%s10340_s19 + $0x7c] sm:$0xf]  ;;  %v2510_v50 = vld [vmem:[%s10340_s19 + $0x64] sm:$0xf] }
 0x14c   : > { %2589 = vrot.lane.b32.xlu0 %v2493_v1, %s10290_s22  ;;  %2465 = vst.msk [vmem:[#allocation2 + $0x50] sm:$0xf] %vm2444_vm11, %v2341_v28  ;;  %v2518_v48 = vld [vmem:[%s10340_s19 + $0x94] sm:$0xf]  ;;  %v2796_v41 = vld [vmem:[%s10340_s19 + $0x38] sm:$0x1] }
 0x14d   : > { %2464 = vst.msk [vmem:[#allocation2 + $0x4c] sm:$0xf] %vm2444_vm11, %v2339_v30  ;;  %v11429_v51 = vrot.slane %v2963_v36, 5  ;;  %v2969_v55 = vrot.slane %v2967_v8, 4  ;;  %v3638_v61 = vld [vmem:[%s10340_s19 + $0x30] sm:$0xe] }
 0x14e   : > { %2388 = vrot.lane.b32.xlu2 %v2261_v4, %s10289_s21  ;;  %v11437_v7 = vld [vmem:[%s10340_s19 + $0x34] sm:$0xf]  ;;  %v2973_v0 = vshll.u32 %v2796_v41, 16  ;;  %v2794_v33 = vld [vmem:[%s10340_s19 + $0x30] sm:$0xf]  ;;  %v9207_v56 = vrot.slane %v3638_v61, 9 }
 0x14f   : > { %v2970_v45 = vor.u32 %v2969_v55, %v11429_v51  ;;  %v2517_v11 = vld [vmem:[%s10340_s19 + $0x90] sm:$0xf]  ;;  %v3803_v57 = vrot.slane %v11437_v7, 5  ;;  %v4147_v9 = vld [vmem:[%s10340_s19 + $0x34] sm:$0xf]  ;;  %v2954_v23 = vshrl.u32 %v2794_v33, 16 }
 0x150   : > { %v2806_v22 = vld [vmem:[%s10340_s19 + $0x60] sm:$0xf]  ;;  %v2513_v63 = vld [vmem:[%s10340_s19 + $0x78] sm:$0xf]  ;;  %v2957_v1 = vshll.u32 %v2794_v33, 16  ;;  %v2975_v60 = vrot.slane %v2973_v0, 5 }
 0x151   : > { %2597 = vrot.lane.b32.xlu1 %v2497_v26, %s10290_s22  ;;  %v2343_v44 = vpop.permute.xlu0 %2342  ;;  %v2971_v4 = vrot.slane %v2970_v45, 4  ;;  %v3804_v5 = vsel %vm11444_vm15, %v9207_v56, %v3803_v57  ;;  %v4311_v30 = vrot.slane %v4147_v9, 7  ;;  %v3050_v26 = vshrl.u32 %v2806_v22, 16  ;;  %v4148_v59 = vld [vmem:[%s10340_s19 + $0x38] sm:$0x7] }
 0x152   : > { %2466 = vst.msk [vmem:[#allocation2 + $0x54] sm:$0xf] %vm2444_vm11, %v2343_v44  ;;  %v3053_v47 = vshll.u32 %v2806_v22, 16  ;;  %v4146_v44 = vld [vmem:[%s10340_s19 + $0x30] sm:$0x8]  ;;  %v3805_v55 = vrot.slane %v3803_v57, 4 }
 0x153   : > { %v2345_v52 = vpop.permute.xlu1 %2344  ;;  %vm4714_vm6 = vsmask.f32 256  ;;  %vm4715_vm7 = vsmask.f32 4368  ;;  %v3640_v8 = vld [vmem:[%s10340_s19 + $0x38] sm:$0x1] }
 0x154   : > { %2595 = vrot.lane.b32.xlu0 %v2496_v10, %s10290_s22  ;;  %2467 = vst.msk [vmem:[#allocation2 + $0x58] sm:$0xf] %vm2444_vm11, %v2345_v52  ;;  %v2959_v52 = vrot.slane %v2957_v1, 5  ;;  %vm11502_vm8 = vmor %vm4714_vm6, %vm4715_vm7  ;;  %v4654_v61 = vld [vmem:[%s10340_s19 + $0x30] sm:$0x8]  ;;  %vm3577_vm10 = vcmask 158848  }
 0x155   : > { %v4806_v33 = vshrl.u32 %v4654_v61, 16  ;;  %v5447_v56 = vld [vmem:[%s10340_s19 + $0x38] sm:$0xf]  ;;  %v11520_v57 = vld [vmem:[%s10340_s19 + $0x64] sm:$0xf]  ;;  %vm5731_vm4 = vcmask 31744  }
 0x156   : > { %2394 = vrot.lane.b32.xlu2 %v2299_v58, %s10289_s21  ;;  %v2956_v58 = vrot.slane %v2954_v23, 4  ;;  %v4158_v9 = vld [vmem:[%s10340_s19 + $0x60] sm:$0x8]  ;;  %v11524_v22 = vld [vmem:[%s10340_s19 + $0x64] sm:$0xf] }
 0x157   : > { %v2347_v3 = vpop.permute.xlu2 %2346  ;;  %v4668_v23 = vld [vmem:[%s10340_s19 + $0x68] sm:$0xf]  ;;  %v5446_v1 = vld [vmem:[%s10340_s19 + $0x34] sm:$0xf] }
 0x158   : > { %2468 = vst.msk [vmem:[#allocation2 + $0x5c] sm:$0xf] %vm2444_vm11, %v2347_v3  ;;  %v4313_v3 = vrot.slane %v4311_v30, 4  ;;  %v4711_v27 = vld [vmem:[%s10340_s19 + $0x114] sm:$0x8] }
 0x159   : > { %2603 = vrot.lane.b32.xlu1 %v2500_v37, %s10290_s22  ;;  %v2349_v14 = vpop.permute.xlu0 %2348  ;;  %v2976_v37 = vsel %vm11456_vm2, %v2971_v4, %v2975_v60  ;;  %v9255_v4 = vrot.slane %v4806_v33, 11 }
 0x15a   : > { %2469 = vst.msk [vmem:[#allocation2 + $0x60] sm:$0xf] %vm2444_vm11, %v2349_v14  ;;  %v11469_v14 = vld [vmem:[%s10340_s19 + $0x34] sm:$0xf] }
 0x15b   : > { %v2351_v43 = vpop.permute.xlu1 %2350 }
 0x15c   : > { %2601 = vrot.lane.b32.xlu0 %v2499_v2, %s10290_s22  ;;  %2470 = vst.msk [vmem:[#allocation2 + $0x64] sm:$0xf] %vm2444_vm11, %v2351_v43  ;;  %v4314_v2 = vrot.slane %v4148_v59, 7  ;;  %v3052_v43 = vrot.slane %v3050_v26, 4  ;;  %v9235_v26 = vrot.slane %v4158_v9, 11  ;;  %v3831_v59 = vrot.slane %v11520_v57, 5 }
 0x15d   : > { %v4160_v9 = vld [vmem:[%s10340_s19 + $0x68] sm:$0x7] }
 0x15e   : > { %2593 = vrot.lane.b32.xlu2 %v2495_v49, %s10290_s22 }
 0x161   : > { %2609 = vrot.lane.b32.xlu1 %v2503_v12, %s10290_s22  ;;  %v3055_v12 = vrot.slane %v3053_v47, 5  ;;  %v4339_v47 = vrot.slane %v11524_v22, 7 }
 0x163   : > { %v4341_v57 = vrot.slane %v4339_v47, 4 }
 0x164   : > { %2607 = vrot.lane.b32.xlu0 %v2502_v42, %s10290_s22  ;;  %v2357_v19 = vpop.permute.xlu1 %2356 }
 0x165   : > { %2473 = vst.msk [vmem:[#allocation2 + $0x70] sm:$0xf] %vm2444_vm11, %v2357_v19  ;;  %v4656_v19 = vld [vmem:[%s10340_s19 + $0x38] sm:$0xf] }
 0x166   : > { %2599 = vrot.lane.b32.xlu2 %v2498_v17, %s10290_s22  ;;  %v2807_v17 = vld [vmem:[%s10340_s19 + $0x64] sm:$0xf]  ;;  %v4823_v31 = vshll.u32 %v4656_v19, 16 }
 0x167   : > { %v2353_v25 = vpop.permute.xlu2 %2352  ;;  %v2355_v29 = vpop.permute.xlu0 %2354  ;;  %v3063_v7 = vshrl.u32 %v2807_v17, 16 }
 0x168   : > { %2471 = vst.msk [vmem:[#allocation2 + $0x68] sm:$0xf] %vm2444_vm11, %v2353_v25  ;;  %v2960_v25 = vor.u32 %v2959_v52, %v2956_v58  ;;  %v3652_v58 = vld [vmem:[%s10340_s19 + $0x68] sm:$0x1]  ;;  %v4908_v52 = vshrl.u32 %v4668_v23, 16 }
 0x169   : > { %2615 = vrot.lane.b32.xlu1 %v2506_v13, %s10290_s22  ;;  %2472 = vst.msk [vmem:[#allocation2 + $0x6c] sm:$0xf] %vm2444_vm11, %v2355_v29  ;;  %v2516_v13 = vld [vmem:[%s10340_s19 + $0x88] sm:$0xf]  ;;  %v9231_v29 = vrot.slane %v4146_v44, 11 }
 0x16a   : > { %v2818_v44 = vld [vmem:[%s10340_s19 + $0x90] sm:$0xf] }
 0x16c   : > { %2613 = vrot.lane.b32.xlu0 %v2505_v6, %s10290_s22  ;;  %v4811_v6 = vshrl.u32 %v11469_v14, 16 }
 0x16e   : > { %2605 = vrot.lane.b32.xlu2 %v2501_v32, %s10290_s22  ;;  %v4315_v32 = vsel %vm11473_vm5, %v4313_v3, %v4314_v2 }
 0x171   : > { %2621 = vrot.lane.b32.xlu1 %v2509_v15, %s10290_s22  ;;  %v3056_v15 = vor.u32 %v3055_v12, %v3052_v43  ;;  %v4340_v43 = vsel %vm11473_vm5, %v9235_v26, %v4339_v47  ;;  %v3833_v12 = vrot.slane %v3831_v59, 4 }
 0x172   : > { %v2363_v18 = vpop.permute.xlu1 %2362 }
 0x173   : > { %2476 = vst.msk [vmem:[#allocation2 + $0x7c] sm:$0xf] %vm2444_vm11, %v2363_v18  ;;  %v2359_v40 = vpop.permute.xlu2 %2358  ;;  %v4820_v18 = vshrl.u32 %v4656_v19, 16  ;;  %v4910_v19 = vrot.slane %v4908_v52, 7 }
 0x174   : > { %2619 = vrot.lane.b32.xlu0 %v2508_v21, %s10290_s22  ;;  %2474 = vst.msk [vmem:[#allocation2 + $0x74] sm:$0xf] %vm2444_vm11, %v2359_v40  ;;  %v3059_v21 = vshll.u32 %v2807_v17, 16  ;;  %v4312_v40 = vsel %vm11473_vm5, %v9231_v29, %v4311_v30  ;;  %v3146_v29 = vshrl.u32 %v2818_v44, 16 }
 0x175   : > { %v2361_v54 = vpop.permute.xlu0 %2360 }
 0x176   : > { %2611 = vrot.lane.b32.xlu2 %v2504_v16, %s10290_s22  ;;  %2475 = vst.msk [vmem:[#allocation2 + $0x78] sm:$0xf] %vm2444_vm11, %v2361_v54  ;;  %v2961_v16 = vrot.slane %v2960_v25, 4  ;;  %v4813_v54 = vrot.slane %v4811_v6, 7  ;;  %v4666_v25 = vld [vmem:[%s10340_s19 + $0x60] sm:$0x8] }
 0x177   : > { %v3149_v6 = vshll.u32 %v2818_v44, 16 }
 0x179   : > { %2627 = vrot.lane.b32.xlu1 %v2512_v62, %s10290_s22 }
 0x17c   : > { %2625 = vrot.lane.b32.xlu0 %v2511_v35, %s10290_s22  ;;  %v3057_v35 = vrot.slane %v3056_v15, 4 }
 0x17e   : > { %2617 = vrot.lane.b32.xlu2 %v2507_v46, %s10290_s22  ;;  %v11490_v46 = vrot.slane %v3059_v21, 5 }
 0x180   : > { %v2369_v39 = vpop.permute.xlu1 %2368 }
 0x181   : > { %2633 = vrot.lane.b32.xlu1 %v2515_v38, %s10290_s22  ;;  %2479 = vst.msk [vmem:[#allocation2 + $0x88] sm:$0xf] %vm2444_vm11, %v2369_v39  ;;  %v4822_v38 = vrot.slane %v4820_v18, 7  ;;  %v2966_v39 = vsel %vm11456_vm2, %v2961_v16, %v11429_v51 }
 0x183   : > { %v2365_v20 = vpop.permute.xlu2 %2364  ;;  %v2367_v24 = vpop.permute.xlu0 %2366 }
 0x184   : > { %2477 = vst.msk [vmem:[#allocation2 + $0x80] sm:$0xf] %vm2444_vm11, %v2365_v20  ;;  %2631 = vrot.lane.b32.xlu0 %v2514_v34, %s10290_s22  ;;  %v3062_v34 = vsel %vm11456_vm2, %v3057_v35, %v11490_v46  ;;  %v4818_v20 = vrot.slane %v4813_v54, 4 }
 0x185   : > { %2478 = vst.msk [vmem:[#allocation2 + $0x84] sm:$0xf] %vm2444_vm11, %v2367_v24 }
 0x186   : > { %2623 = vrot.lane.b32.xlu2 %v2510_v50, %s10290_s22  ;;  %v4825_v50 = vor.u32 %v4823_v31, %v4822_v38  ;;  %v3151_v38 = vrot.slane %v3149_v6, 5  ;;  %v2797_v6 = vld [vmem:[%s10340_s19 + $0x3c] sm:$0xf] }
 0x188   : > { %v4826_v45 = vsel %vm11502_vm8, %v4818_v20, %v4825_v50 }
 0x189   : > { %2639 = vrot.lane.b32.xlu1 %v2518_v48, %s10290_s22  ;;  %v3806_v48 = vrot.slane %v3640_v8, 5 }
 0x18b   : > { %v3807_v0 = vsel %vm11444_vm15, %v3805_v55, %v3806_v48 }
 0x18c   : > { %2637 = vrot.lane.b32.xlu0 %v2517_v11, %s10290_s22  ;;  %v4814_v11 = vshll.u32 %v11469_v14, 16  ;;  %v3834_v14 = vrot.slane %v3652_v58, 5 }
 0x18e   : > { %2629 = vrot.lane.b32.xlu2 %v2513_v63, %s10290_s22  ;;  %v4667_v63 = vld [vmem:[%s10340_s19 + $0x64] sm:$0xf]  ;;  %v4816_v60 = vor.u32 %v4814_v11, %v4813_v54  ;;  %v3835_v18 = vsel %vm11444_vm15, %v3833_v12, %v3834_v14  ;;  %v3663_v11 = vld [vmem:[%s10340_s19 + $0x94] sm:$0xf]  ;;  %v4170_v12 = vld [vmem:[%s10340_s19 + $0x90] sm:$0x8] }
 0x18f   : > { %v2375_v53 = vpop.permute.xlu1 %2374  ;;  %v11603_v14 = vld [vmem:[%s10340_s19 + $0x94] sm:$0xf] }
 0x190   : > { %v2371_v10 = vpop.permute.xlu2 %2370  ;;  %2482 = vst.msk [vmem:[#allocation2 + $0x94] sm:$0xf] %vm2444_vm11, %v2375_v53  ;;  %v2808_v53 = vld [vmem:[%s10340_s19 + $0x68] sm:$0x1]  ;;  %v4817_v3 = vsel %vm11502_vm8, %v9255_v4, %v4816_v60  ;;  %v3664_v4 = vld [vmem:[%s10340_s19 + $0x98] sm:$0x1] }
 0x191   : > { %3957 = vrot.lane.b32.xlu1 %v3804_v5, %s10291_s23  ;;  %2480 = vst.msk [vmem:[#allocation2 + $0x8c] sm:$0xf] %vm2444_vm11, %v2371_v10  ;;  %v3065_v5 = vrot.slane %v3063_v7, 4  ;;  %v4899_v10 = vshrl.u32 %v4667_v63, 16  ;;  %v2798_v60 = vld [vmem:[%s10340_s19 + $0x40] sm:$0xf] }
 0x192   : > { %v2373_v49 = vpop.permute.xlu0 %2372  ;;  %v2987_v58 = vshll.u32 %v2798_v60, 16  ;;  %v2991_v52 = vshrl.u32 %v2798_v60, 16  ;;  %v11644_v60 = vld [vmem:[%s10340_s19 + $0x40] sm:$0xf] }
 0x193   : > { %2481 = vst.msk [vmem:[#allocation2 + $0x90] sm:$0xf] %vm2444_vm11, %v2373_v49  ;;  %v3066_v2 = vor.u32 %v3065_v5, %v11490_v46  ;;  %v3069_v49 = vshll.u32 %v2808_v53, 16  ;;  %v4901_v17 = vrot.slane %v4899_v10, 7  ;;  %v3148_v46 = vrot.slane %v3146_v29, 4 }
 0x194   : > { %3451 = vrot.lane.b32.xlu0 %v2976_v37, %s10292_s24  ;;  %v4342_v5 = vrot.slane %v4160_v9, 7  ;;  %v3862_v10 = vrot.slane %v3664_v4, 5  ;;  %v2820_v29 = vld [vmem:[%s10340_s19 + $0x98] sm:$0x1]  ;;  %v4149_v4 = vld [vmem:[%s10340_s19 + $0x3c] sm:$0x8] }
 0x195   : > { %v3067_v15 = vrot.slane %v3066_v2, 4  ;;  %v3071_v21 = vrot.slane %v3069_v49, 5  ;;  %v4906_v54 = vrot.slane %v4901_v17, 4  ;;  %v11598_v2 = vrot.slane %v2987_v58, 5 }
 0x196   : > { %2635 = vrot.lane.b32.xlu2 %v2516_v13, %s10290_s22  ;;  %v4911_v13 = vshll.u32 %v4668_v23, 16  ;;  %v3859_v23 = vrot.slane %v3663_v11, 5  ;;  %v4343_v22 = vsel %vm11473_vm5, %v4341_v57, %v4342_v5  ;;  %v2993_v49 = vrot.slane %v2991_v52, 4  ;;  %v11633_v11 = vld [vmem:[%s10340_s19 + $0x94] sm:$0xf] }
 0x197   : > { %v4987_v57 = vshrl.u32 %v11633_v11, 16 }
 0x198   : > { %v2377_v62 = vpop.permute.xlu2 %2376  ;;  %v4913_v35 = vor.u32 %v4911_v13, %v4910_v19  ;;  %v3861_v53 = vrot.slane %v3859_v23, 4 }
 0x199   : > { %4467 = vrot.lane.b32.xlu1 %v4315_v32, %s10293_s25  ;;  %2483 = vst.msk [vmem:[#allocation2 + $0x98] sm:$0xf] %vm2444_vm11, %v2377_v62  ;;  %v4902_v62 = vshll.u32 %v4667_v63, 16  ;;  %v4989_v52 = vrot.slane %v4987_v57, 7 }
 0x19a   : > { %v4914_v20 = vsel %vm11502_vm8, %v4906_v54, %v4913_v35  ;;  %v3165_v35 = vshll.u32 %v2820_v29, 16 }
 0x19b   : > { %v4904_v50 = vor.u32 %v4902_v62, %v4901_v17  ;;  %v2799_v17 = vld [vmem:[%s10340_s19 + $0x44] sm:$0x1]  ;;  %v3642_v62 = vld [vmem:[%s10340_s19 + $0x40] sm:$0xf] }
 0x19c   : > { %4465 = vrot.lane.b32.xlu0 %v4312_v40, %s10293_s25  ;;  %v4894_v40 = vshrl.u32 %v4666_v25, 16 }
 0x19d   : > { %v2381_v36 = vpop.permute.xlu1 %2380 }
 0x19e   : > { %2485 = vst.msk [vmem:[#allocation2 + $0xa0] sm:$0xf] %vm2444_vm11, %v2381_v36  ;;  %3449 = vrot.lane.b32.xlu2 %v2966_v39, %s10292_s24  ;;  %v2819_v39 = vld [vmem:[%s10340_s19 + $0x94] sm:$0xf]  ;;  %v3072_v36 = vsel %vm11456_vm2, %v3067_v15, %v3071_v21  ;;  %v9259_v8 = vrot.slane %v4894_v40, 11  ;;  %v4367_v15 = vrot.slane %v11603_v14, 7  ;;  %v2994_v21 = vor.u32 %v2993_v49, %v11598_v2 }
 0x19f   : > { %v3155_v55 = vshll.u32 %v2819_v39, 16  ;;  %v3159_v44 = vshrl.u32 %v2819_v39, 16  ;;  %v5454_v40 = vld [vmem:[%s10340_s19 + $0x64] sm:$0xf] }
 0x1a0   : > { %v2379_v51 = vpop.permute.xlu0 %2378  ;;  %v2383_v41 = vpop.permute.xlu2 %2382  ;;  %v2995_v39 = vrot.slane %v2994_v21, 4  ;;  %v4659_v14 = vld [vmem:[%s10340_s19 + $0x44] sm:$0xf] }
 0x1a1   : > { %3465 = vrot.lane.b32.xlu1 %v3062_v34, %s10292_s24  ;;  %2484 = vst.msk [vmem:[#allocation2 + $0x9c] sm:$0xf] %vm2444_vm11, %v2379_v51  ;;  %v3650_v34 = vld [vmem:[%s10340_s19 + $0x60] sm:$0xe]  ;;  %v3152_v51 = vor.u32 %v3151_v38, %v3148_v46  ;;  %v3161_v19 = vrot.slane %v3159_v44, 4  ;;  %v2978_v46 = vshrl.u32 %v2797_v6, 16 }
 0x1a2   : > { %2486 = vst.msk [vmem:[#allocation2 + $0xa4] sm:$0xf] %vm2444_vm11, %v2383_v41  ;;  %v9211_v41 = vrot.slane %v3650_v34, 9  ;;  %v2981_v38 = vshll.u32 %v2797_v6, 16 }
 0x1a3   : > { %v3153_v7 = vrot.slane %v3152_v51, 4  ;;  %v3167_v51 = vrot.slane %v3165_v35, 5 }
 0x1a4   : > { %5263 = vrot.lane.b32.xlu0 %v4826_v45, %s10294_s26  ;;  %v4905_v45 = vsel %vm11502_vm8, %v9259_v8, %v4904_v50  ;;  %v3810_v8 = vrot.slane %v3642_v62, 5 }
 0x1a6   : > { %3959 = vrot.lane.b32.xlu2 %v3807_v0, %s10291_s23  ;;  %v11569_v0 = vrot.slane %v3155_v55, 5  ;;  %v2980_v55 = vrot.slane %v2978_v46, 4  ;;  %v4990_v46 = vshll.u32 %v11633_v11, 16  ;;  %v4151_v11 = vld [vmem:[%s10340_s19 + $0x44] sm:$0x7] }
 0x1a8   : > { %v2389_v30 = vpop.permute.xlu2 %2388  ;;  %v3158_v63 = vsel %vm11456_vm2, %v3153_v7, %v11569_v0  ;;  %v3162_v54 = vor.u32 %v3161_v19, %v11569_v0  ;;  %v3641_v0 = vld [vmem:[%s10340_s19 + $0x3c] sm:$0xe] }
 0x1a9   : > { %5552 = vrot.lane.b32.xlu1 %v5447_v56, %s10295_s27  ;;  %2489 = vst.msk [vmem:[#allocation2 + $0xb0] sm:$0xf] %vm2444_vm11, %v2389_v30  ;;  %v3832_v56 = vsel %vm11444_vm15, %v9211_v41, %v3831_v59  ;;  %v5455_v30 = vld [vmem:[%s10340_s19 + $0x68] sm:$0xf]  ;;  %v3662_v59 = vld [vmem:[%s10340_s19 + $0x90] sm:$0xe] }
 0x1aa   : > { %v9215_v47 = vrot.slane %v3662_v59, 9  ;;  %v3163_v50 = vrot.slane %v3162_v54, 4  ;;  %v11678_v54 = vld [vmem:[%s10340_s19 + $0x70] sm:$0xf] }
 0x1ab   : > { %v2387_v37 = vpop.permute.xlu1 %2386 }
 0x1ac   : > { %2488 = vst.msk [vmem:[#allocation2 + $0xac] sm:$0xf] %vm2444_vm11, %v2387_v37  ;;  %5550 = vrot.lane.b32.xlu0 %v5446_v1, %s10295_s27  ;;  %v3860_v13 = vsel %vm11444_vm15, %v9215_v47, %v3859_v23  ;;  %v3168_v9 = vsel %vm11456_vm2, %v3163_v50, %v3167_v51  ;;  %v9208_v23 = vrot.slane %v3641_v0, 9  ;;  %v2809_v47 = vld [vmem:[%s10340_s19 + $0x6c] sm:$0xf]  ;;  %v4992_v50 = vor.u32 %v4990_v46, %v4989_v52 }
 0x1ad   : > { %v3074_v19 = vshrl.u32 %v2809_v47, 16  ;;  %v5462_v51 = vld [vmem:[%s10340_s19 + $0x94] sm:$0xf] }
 0x1ae   : > { %v2385_v32 = vpop.permute.xlu0 %2384  ;;  %5261 = vrot.lane.b32.xlu2 %v4817_v3, %s10294_s26  ;;  %v3863_v3 = vsel %vm11444_vm15, %v3861_v53, %v3862_v10  ;;  %v9232_v53 = vrot.slane %v4149_v4, 11  ;;  %v4318_v10 = vrot.slane %v11644_v60, 7  ;;  %v3811_v58 = vsel %vm11444_vm15, %v9208_v23, %v3810_v8 }
 0x1af   : > { %2487 = vst.msk [vmem:[#allocation2 + $0xa8] sm:$0xf] %vm2444_vm11, %v2385_v32  ;;  %v9239_v32 = vrot.slane %v4170_v12, 11  ;;  %v4994_v12 = vrot.slane %v4989_v52, 4  ;;  %v4321_v4 = vrot.slane %v4151_v11, 7 }
 0x1b0   : > { %v2395_v16 = vpop.permute.xlu2 %2394  ;;  %v4319_v49 = vsel %vm11473_vm5, %v9232_v53, %v4318_v10  ;;  %v4161_v52 = vld [vmem:[%s10340_s19 + $0x6c] sm:$0x8] }
 0x1b1   : > { %4481 = vrot.lane.b32.xlu1 %v4340_v43, %s10293_s25  ;;  %2492 = vst.msk [vmem:[#allocation2 + $0xbc] sm:$0xf] %vm2444_vm11, %v2395_v16 }
 0x1b3   : > { %v2393_v31 = vpop.permute.xlu1 %2392 }
 0x1b4   : > { %2491 = vst.msk [vmem:[#allocation2 + $0xb8] sm:$0xf] %vm2444_vm11, %v2393_v31  ;;  %3975 = vrot.lane.b32.xlu0 %v3835_v18, %s10291_s23  ;;  %v2997_v18 = vshll.u32 %v2799_v17, 16  ;;  %v4368_v31 = vsel %vm11473_vm5, %v9239_v32, %v4367_v15  ;;  %v4678_v32 = vld [vmem:[%s10340_s19 + $0x90] sm:$0x8] }
 0x1b5   : > { %v4982_v35 = vshrl.u32 %v4678_v32, 16 }
 0x1b6   : > { %v2391_v48 = vpop.permute.xlu0 %2390  ;;  %3467 = vrot.lane.b32.xlu2 %v3072_v36, %s10292_s24  ;;  %v2999_v36 = vrot.slane %v2997_v18, 5  ;;  %v3076_v18 = vrot.slane %v3074_v19, 4 }
 0x1b7   : > { %2490 = vst.msk [vmem:[#allocation2 + $0xb4] sm:$0xf] %vm2444_vm11, %v2391_v48  ;;  %v2983_v48 = vrot.slane %v2981_v38, 5  ;;  %vm4085_vm11 = vcmask 191648  }
 0x1b8   : > { %v2594_v61 = vpop.permute.xlu2 %2593 }
 0x1b9   : > { %5279 = vrot.lane.b32.xlu1 %v4914_v20, %s10294_s26  ;;  %2736 = vst.msk [vmem:[#allocation2 + $0x8] sm:$0xf] %vm2733_vm9, %v2594_v61  ;;  %v3643_v20 = vld [vmem:[%s10340_s19 + $0x44] sm:$0x1]  ;;  %v3000_v61 = vsel %vm11456_vm2, %v2995_v39, %v2999_v36  ;;  %v3083_v36 = vshll.u32 %v11678_v54, 16 }
 0x1ba   : > { %v3813_v7 = vrot.slane %v3643_v20, 5  ;;  %v9263_v20 = vrot.slane %v4982_v35, 11 }
 0x1bb   : > { %v2592_v33 = vpop.permute.xlu1 %2591 }
 0x1bc   : > { %2735 = vst.msk [vmem:[#allocation2 + $0x4] sm:$0xf] %vm2733_vm9, %v2592_v33  ;;  %5277 = vrot.lane.b32.xlu0 %v4905_v45, %s10294_s26  ;;  %v3812_v45 = vrot.slane %v3810_v8, 4  ;;  %v4842_v8 = vshrl.u32 %v4659_v14, 16 }
 0x1be   : > { %v2590_v1 = vpop.permute.xlu0 %2589  ;;  %3973 = vrot.lane.b32.xlu2 %v3832_v56, %s10291_s23  ;;  %v4680_v56 = vld [vmem:[%s10340_s19 + $0x98] sm:$0xf] }
 0x1bf   : > { %2734 = vst.msk [vmem:[#allocation2] sm:$0xf] %vm2733_vm9, %v2590_v1  ;;  %v3814_v1 = vsel %vm11444_vm15, %v3812_v45, %v3813_v7  ;;  %v4996_v5 = vshrl.u32 %v4680_v56, 16  ;;  %v4999_v44 = vshll.u32 %v4680_v56, 16  ;;  %v4844_v45 = vrot.slane %v4842_v8, 7 }
 0x1c0   : > { %v2600_v26 = vpop.permute.xlu2 %2599  ;;  %v4845_v7 = vshll.u32 %v4659_v14, 16 }
 0x1c1   : > { %3481 = vrot.lane.b32.xlu1 %v3158_v63, %s10292_s24  ;;  %2739 = vst.msk [vmem:[#allocation2 + $0x14] sm:$0xf] %vm2733_vm9, %v2600_v26  ;;  %v2984_v63 = vor.u32 %v2983_v48, %v2980_v55 }
 0x1c3   : > { %v2598_v37 = vpop.permute.xlu1 %2597  ;;  %v2985_v26 = vrot.slane %v2984_v63, 4  ;;  %v4847_v63 = vor.u32 %v4845_v7, %v4844_v45  ;;  %v2783_v7 = vld [vmem:[%s10340_s19 + $0x4] sm:$0xf] }
 0x1c4   : > { %2738 = vst.msk [vmem:[#allocation2 + $0x10] sm:$0xf] %vm2733_vm9, %v2598_v37  ;;  %5568 = vrot.lane.b32.xlu0 %v5455_v30, %s10295_s27  ;;  %v4998_v37 = vrot.slane %v4996_v5, 7  ;;  %v4657_v5 = vld [vmem:[%s10340_s19 + $0x3c] sm:$0x8] }
 0x1c5   : > { %v4828_v53 = vshrl.u32 %v4657_v5, 16  ;;  %v2782_v5 = vld [vmem:[%s10340_s19] sm:$0xf] }
 0x1c6   : > { %v2596_v43 = vpop.permute.xlu0 %2595  ;;  %4483 = vrot.lane.b32.xlu2 %v4343_v22, %s10293_s25  ;;  %v5001_v17 = vor.u32 %v4999_v44, %v4998_v37  ;;  %v11722_v37 = vld [vmem:[%s10340_s19 + $0x70] sm:$0xf] }
 0x1c7   : > { %2737 = vst.msk [vmem:[#allocation2 + $0xc] sm:$0xf] %vm2733_vm9, %v2596_v43  ;;  %v4172_v43 = vld [vmem:[%s10340_s19 + $0x98] sm:$0x7] }
 0x1c8   : > { %v2606_v25 = vpop.permute.xlu2 %2605  ;;  %v4370_v29 = vrot.slane %v4172_v43, 7  ;;  %v5002_v21 = vsel %vm11502_vm8, %v4994_v12, %v5001_v17  ;;  %v9256_v43 = vrot.slane %v4828_v53, 11 }
 0x1c9   : > { %3991 = vrot.lane.b32.xlu1 %v3863_v3, %s10291_s23  ;;  %2742 = vst.msk [vmem:[#allocation2 + $0x20] sm:$0xf] %vm2733_vm9, %v2606_v25  ;;  %v2990_v3 = vsel %vm11456_vm2, %v2985_v26, %v11598_v2  ;;  %v4369_v2 = vrot.slane %v4367_v15, 4 }
 0x1cb   : > { %v2604_v16 = vpop.permute.xlu1 %2603  ;;  %v4371_v15 = vsel %vm11473_vm5, %v4369_v2, %v4370_v29  ;;  %v2811_v2 = vld [vmem:[%s10340_s19 + $0x74] sm:$0x1]  ;;  %v9236_v29 = vrot.slane %v4161_v52, 11 }
 0x1cc   : > { %2741 = vst.msk [vmem:[#allocation2 + $0x1c] sm:$0xf] %vm2733_vm9, %v2604_v16  ;;  %3989 = vrot.lane.b32.xlu0 %v3860_v13, %s10291_s23  ;;  %v3077_v13 = vshll.u32 %v2809_v47, 16  ;;  %v4670_v47 = vld [vmem:[%s10340_s19 + $0x70] sm:$0xf] }
 0x1cd   : > { %v4921_v32 = vshrl.u32 %v4670_v47, 16 }
 0x1ce   : > { %v2602_v34 = vpop.permute.xlu0 %2601  ;;  %5566 = vrot.lane.b32.xlu2 %v5454_v40, %s10295_s27  ;;  %v3079_v16 = vrot.slane %v3077_v13, 5  ;;  %v11675_v40 = vld [vmem:[%s10340_s19 + $0x40] sm:$0xf]  ;;  %v3655_v13 = vld [vmem:[%s10340_s19 + $0x74] sm:$0x1] }
 0x1cf   : > { %2740 = vst.msk [vmem:[#allocation2 + $0x18] sm:$0xf] %vm2733_vm9, %v2602_v34  ;;  %v4833_v38 = vshrl.u32 %v11675_v40, 16  ;;  %v3841_v14 = vrot.slane %v3655_v13, 5  ;;  %v4923_v35 = vrot.slane %v4921_v32, 7 }
 0x1d0   : > { %v2612_v41 = vpop.permute.xlu2 %2611  ;;  %v3080_v39 = vor.u32 %v3079_v16, %v3076_v18  ;;  %v2822_v13 = vld [vmem:[%s10340_s19 + $0xa0] sm:$0xf] }
 0x1d1   : > { %4497 = vrot.lane.b32.xlu1 %v4368_v31, %s10293_s25  ;;  %2745 = vst.msk [vmem:[#allocation2 + $0x2c] sm:$0xf] %vm2733_vm9, %v2612_v41  ;;  %v5463_v31 = vld [vmem:[%s10340_s19 + $0x98] sm:$0xf]  ;;  %v4835_v48 = vrot.slane %v4833_v38, 7  ;;  %v3179_v32 = vshll.u32 %v2822_v13, 16 }
 0x1d2   : > { %v3081_v41 = vrot.slane %v3080_v39, 4 }
 0x1d3   : > { %v2610_v33 = vpop.permute.xlu1 %2609 }
 0x1d4   : > { %2744 = vst.msk [vmem:[#allocation2 + $0x28] sm:$0xf] %vm2733_vm9, %v2610_v33  ;;  %3455 = vrot.lane.b32.xlu0 %v3000_v61, %s10292_s24  ;;  %v11694_v61 = vrot.slane %v3083_v36, 5  ;;  %v4993_v33 = vsel %vm11502_vm8, %v9263_v20, %v4992_v50  ;;  %v4924_v50 = vshll.u32 %v4670_v47, 16 }
 0x1d6   : > { %v2608_v30 = vpop.permute.xlu0 %2607  ;;  %3483 = vrot.lane.b32.xlu2 %v3168_v9, %s10292_s24  ;;  %v3086_v56 = vsel %vm11456_vm2, %v3081_v41, %v11694_v61  ;;  %v4840_v9 = vrot.slane %v4835_v48, 4  ;;  %v9341_v41 = vld [vmem:[%s13770_s1] sm:$0xf] }
 0x1d7   : > { %2743 = vst.msk [vmem:[#allocation2 + $0x24] sm:$0xf] %vm2733_vm9, %v2608_v30 }
 0x1d8   : > { %v2618_v59 = vpop.permute.xlu2 %2617  ;;  %v4848_v30 = vsel %vm11502_vm8, %v4840_v9, %v4847_v63  ;;  %v3653_v9 = vld [vmem:[%s10340_s19 + $0x6c] sm:$0xe] }
 0x1d9   : > { %3963 = vrot.lane.b32.xlu1 %v3814_v1, %s10291_s23  ;;  %2748 = vst.msk [vmem:[#allocation2 + $0x38] sm:$0xf] %vm2733_vm9, %v2618_v59  ;;  %v4320_v1 = vrot.slane %v4318_v10, 4  ;;  %v3087_v59 = vshrl.u32 %v11678_v54, 16  ;;  %v4836_v10 = vshll.u32 %v11675_v40, 16 }
 0x1db   : > { %v2616_v22 = vpop.permute.xlu1 %2615  ;;  %v4322_v60 = vsel %vm11473_vm5, %v4320_v1, %v4321_v4  ;;  %v4838_v12 = vor.u32 %v4836_v10, %v4835_v48  ;;  %v3089_v17 = vrot.slane %v3087_v59, 4  ;;  %v2867_v1 = vshll.u32 %v2783_v7, 16 }
 0x1dc   : > { %2747 = vst.msk [vmem:[#allocation2 + $0x34] sm:$0xf] %vm2733_vm9, %v2616_v22  ;;  %3961 = vrot.lane.b32.xlu0 %v3811_v58, %s10291_s23  ;;  %v5449_v58 = vld [vmem:[%s10340_s19 + $0x44] sm:$0xf]  ;;  %v11726_v22 = vld [vmem:[%s10340_s19 + $0x70] sm:$0xf] }
 0x1dd   : > { %v4839_v16 = vsel %vm11502_vm8, %v9256_v43, %v4838_v12  ;;  %v3090_v40 = vor.u32 %v3089_v17, %v11694_v61  ;;  %v10087_v61 = vld [vmem:[%s13770_s1] sm:$0x30]  ;;  %v2871_v4 = vshrl.u32 %v2783_v7, 16  ;;  %v2858_v10 = vshrl.u32 %v2782_v5, 16 }
 0x1de   : > { %v2614_v25 = vpop.permute.xlu0 %2613  ;;  %3453 = vrot.lane.b32.xlu2 %v2990_v3, %s10292_s24  ;;  %v4671_v3 = vld [vmem:[%s10340_s19 + $0x74] sm:$0xf] }
 0x1df   : > { %2746 = vst.msk [vmem:[#allocation2 + $0x30] sm:$0xf] %vm2733_vm9, %v2614_v25  ;;  %v3838_v25 = vrot.slane %v11722_v37, 5  ;;  %v4933_v38 = vshll.u32 %v4671_v3, 16  ;;  %v3091_v36 = vrot.slane %v3090_v40, 4  ;;  %v2873_v53 = vrot.slane %v2871_v4, 4 }
 0x1e0   : > { %v2624_v6 = vpop.permute.xlu2 %2623  ;;  %v2860_v17 = vrot.slane %v2858_v10, 4 }
 0x1e1   : > { %4469 = vrot.lane.b32.xlu1 %v4319_v49, %s10293_s25  ;;  %2751 = vst.msk [vmem:[#allocation2 + $0x44] sm:$0xf] %vm2733_vm9, %v2624_v6  ;;  %v5448_v49 = vld [vmem:[%s10340_s19 + $0x40] sm:$0xf]  ;;  %v4346_v6 = vrot.slane %v11726_v22, 7  ;;  %v3840_v54 = vrot.slane %v3838_v25, 4 }
 0x1e3   : > { %v2622_v62 = vpop.permute.xlu1 %2621  ;;  %v4348_v37 = vrot.slane %v4346_v6, 4 }
 0x1e4   : > { %2750 = vst.msk [vmem:[#allocation2 + $0x40] sm:$0xf] %vm2733_vm9, %v2622_v62  ;;  %5295 = vrot.lane.b32.xlu0 %v5002_v21, %s10294_s26  ;;  %v4930_v21 = vshrl.u32 %v4671_v3, 16  ;;  %v3093_v62 = vshll.u32 %v2811_v2, 16  ;;  %v2519_v3 = vld [vmem:[%s10340_s19 + $0x9c] sm:$0xf] }
 0x1e6   : > { %v2620_v34 = vpop.permute.xlu0 %2619  ;;  %4499 = vrot.lane.b32.xlu2 %v4371_v15, %s10293_s25  ;;  %v4347_v15 = vsel %vm11473_vm5, %v9236_v29, %v4346_v6  ;;  %v4932_v46 = vrot.slane %v4930_v21, 7  ;;  %v3095_v8 = vrot.slane %v3093_v62, 5  ;;  %v3183_v21 = vshrl.u32 %v2822_v13, 16  ;;  %v11844_v13 = vld [vmem:[%s10340_s19 + $0x4] sm:$0xf] }
 0x1e7   : > { %2749 = vst.msk [vmem:[#allocation2 + $0x3c] sm:$0xf] %vm2733_vm9, %v2620_v34  ;;  %v11799_v6 = vrot.slane %v3179_v32, 5 }
 0x1e8   : > { %v2630_v55 = vpop.permute.xlu2 %2629  ;;  %v4935_v48 = vor.u32 %v4933_v38, %v4932_v46  ;;  %v2823_v46 = vld [vmem:[%s10340_s19 + $0xa4] sm:$0x1] }
 0x1e9   : > { %5584 = vrot.lane.b32.xlu1 %v5463_v31, %s10295_s27  ;;  %2754 = vst.msk [vmem:[#allocation2 + $0x50] sm:$0xf] %vm2733_vm9, %v2630_v55  ;;  %v4669_v31 = vld [vmem:[%s10340_s19 + $0x6c] sm:$0x8]  ;;  %v4928_v55 = vrot.slane %v4923_v35, 4 }
 0x1ea   : > { %v4916_v20 = vshrl.u32 %v4669_v31, 16  ;;  %v3626_v31 = vld [vmem:[%s10340_s19] sm:$0xe] }
 0x1eb   : > { %v2628_v0 = vpop.permute.xlu1 %2627 }
 0x1ec   : > { %2753 = vst.msk [vmem:[#allocation2 + $0x4c] sm:$0xf] %vm2733_vm9, %v2628_v0  ;;  %5582 = vrot.lane.b32.xlu0 %v5462_v51, %s10295_s27  ;;  %v3842_v51 = vsel %vm11444_vm15, %v3840_v54, %v3841_v14  ;;  %v9342_v0 = vor.u32 %v10087_v61, %v9341_v41  ;;  %v9260_v11 = vrot.slane %v4916_v20, 11  ;;  %v3185_v14 = vrot.slane %v3183_v21, 4  ;;  %v2821_v20 = vld [vmem:[%s10340_s19 + $0x9c] sm:$0xf] }
 0x1ed   : > { %v3666_v41 = vld [vmem:[%s10340_s19 + $0xa0] sm:$0xf]  ;;  %v5456_v61 = vld [vmem:[%s10340_s19 + $0x70] sm:$0xf]  ;;  %v3173_v7 = vshll.u32 %v2821_v20, 16  ;;  %v4283_v21 = vrot.slane %v11844_v13, 7 }
 0x1ee   : > { %v2626_v23 = vpop.permute.xlu0 %2625  ;;  %5293 = vrot.lane.b32.xlu2 %v4993_v33, %s10294_s26  ;;  %v3096_v33 = vsel %vm11456_vm2, %v3091_v36, %v3095_v8  ;;  %v5966_v63 = vsel %vm5964_vm12, %v9342_v0, 0  ;;  %v3186_v8 = vor.u32 %v3185_v14, %v11799_v6 }
 0x1ef   : > { %2752 = vst.msk [vmem:[#allocation2 + $0x48] sm:$0xf] %vm2733_vm9, %v2626_v23  ;;  %v4936_v23 = vsel %vm11502_vm8, %v4928_v55, %v4935_v48  ;;  %10227 = vmatpush.bf16.msra.mxu1 %v5966_v63  ;;  %10228 = vmatpush.bf16.msra.mxu2 %v5966_v63  ;;  %v3175_v4 = vrot.slane %v3173_v7, 5 }
 0x1f0   : > { %v2636_v57 = vpop.permute.xlu2 %2635  ;;  %10229 = vmatpush.bf16.msra.mxu3 %v5966_v63  ;;  %5975 = vmatpush.bf16.msra.mxu0 %v5966_v63  ;;  %v3187_v0 = vrot.slane %v3186_v8, 4  ;;  %v3667_v63 = vld [vmem:[%s10340_s19 + $0xa4] sm:$0x1] }
 0x1f1   : > { %3469 = vrot.lane.b32.xlu1 %v3086_v56, %s10292_s24  ;;  %2757 = vst.msk [vmem:[#allocation2 + $0x5c] sm:$0xf] %vm2733_vm9, %v2636_v57  ;;  %v4926_v56 = vor.u32 %v4924_v50, %v4923_v35  ;;  %v4175_v8 = vld [vmem:[%s10340_s19 + $0xa4] sm:$0x7] }
 0x1f2   : > { %v4377_v7 = vrot.slane %v4175_v8, 7 }
 0x1f3   : > { %v2634_v26 = vpop.permute.xlu1 %2633 }
 0x1f4   : > { %2756 = vst.msk [vmem:[#allocation2 + $0x58] sm:$0xf] %vm2733_vm9, %v2634_v26  ;;  %5267 = vrot.lane.b32.xlu0 %v4848_v30, %s10294_s26  ;;  %v9212_v30 = vrot.slane %v3653_v9, 9  ;;  %v4927_v26 = vsel %vm11502_vm8, %v9260_v11, %v4926_v56  ;;  %v3866_v56 = vrot.slane %v3666_v41, 5  ;;  %v4173_v41 = vld [vmem:[%s10340_s19 + $0x9c] sm:$0x8] }
 0x1f6   : > { %v2632_v44 = vpop.permute.xlu0 %2631  ;;  %4471 = vrot.lane.b32.xlu2 %v4322_v60, %s10293_s25  ;;  %v2869_v60 = vrot.slane %v2867_v1, 5  ;;  %v3839_v47 = vsel %vm11444_vm15, %v9212_v30, %v3838_v25  ;;  %v3868_v30 = vrot.slane %v3866_v56, 4 }
 0x1f7   : > { %2755 = vst.msk [vmem:[#allocation2 + $0x54] sm:$0xf] %vm2733_vm9, %v2632_v44  ;;  %v2784_v44 = vld [vmem:[%s10340_s19 + $0x8] sm:$0x1] }
 0x1f8   : > { %v3450_v19 = vpop.permute.xlu2 %3449  ;;  %v2874_v43 = vor.u32 %v2873_v53, %v2869_v60  ;;  %v2877_v12 = vshll.u32 %v2784_v44, 16 }
 0x1f9   : > { %5556 = vrot.lane.b32.xlu1 %v5449_v58, %s10295_s27  ;;  %3586 = vst.msk [vmem:[#allocation2 + $0x20] sm:$0xf] %vm3577_vm10, %v3450_v19  ;;  %v2861_v58 = vshll.u32 %v2782_v5, 16 }
 0x1fa   : > { %v2879_v40 = vrot.slane %v2877_v12, 5 }
 0x1fb   : > { %v2640_v18 = vpop.permute.xlu1 %2639  ;;  %v2863_v19 = vrot.slane %v2861_v58, 5  ;;  %v2520_v58 = vld [vmem:[%s10340_s19 + $0xa0] sm:$0xf] }
 0x1fc   : > { %2759 = vst.msk [vmem:[#allocation2 + $0x64] sm:$0xf] %vm2733_vm9, %v2640_v18  ;;  %5554 = vrot.lane.b32.xlu0 %v5448_v49, %s10295_s27  ;;  %v4163_v49 = vld [vmem:[%s10340_s19 + $0x74] sm:$0x7] }
 0x1fd   : > { %v4349_v25 = vrot.slane %v4163_v49, 7  ;;  %v5457_v18 = vld [vmem:[%s10340_s19 + $0x74] sm:$0xf]  ;;  %v2864_v62 = vor.u32 %v2863_v19, %v2860_v17  ;;  %v4134_v19 = vld [vmem:[%s10340_s19] sm:$0x8] }
 0x1fe   : > { %v2638_v39 = vpop.permute.xlu0 %2637  ;;  %5265 = vrot.lane.b32.xlu2 %v4839_v16, %s10294_s26  ;;  %v2875_v16 = vrot.slane %v2874_v43, 4  ;;  %v9227_v32 = vrot.slane %v4134_v19, 11  ;;  %v4136_v19 = vld [vmem:[%s10340_s19 + $0x8] sm:$0x7] }
 0x1ff   : > { %2758 = vst.msk [vmem:[#allocation2 + $0x60] sm:$0xf] %vm2733_vm9, %v2638_v39  ;;  %v4350_v22 = vsel %vm11473_vm5, %v4348_v37, %v4349_v25  ;;  %v2865_v35 = vrot.slane %v2864_v62, 4  ;;  %v11807_v39 = vld [vmem:[%s10340_s19 + $0x4] sm:$0xf] }
 0x200   : > { %v3960_v34 = vpop.permute.xlu2 %3959  ;;  %v3775_v55 = vrot.slane %v11807_v39, 5  ;;  %v4174_v62 = vld [vmem:[%s10340_s19 + $0xa0] sm:$0xf] }
 0x201   : > { %4485 = vrot.lane.b32.xlu1 %v4347_v15, %s10293_s25  ;;  %v2880_v15 = vsel %vm11456_vm2, %v2875_v16, %v2879_v40  ;;  %v2870_v50 = vsel %vm11456_vm2, %v2865_v35, %v2869_v60  ;;  %v4284_v35 = vsel %vm11473_vm5, %v9227_v32, %v4283_v21 }
 0x203   : > { %v3958_v45 = vpop.permute.xlu1 %3957 }
 0x204   : > { %4094 = vst.msk [vmem:[#allocation2 + $0x20] sm:$0xf] %vm4085_vm11, %v3958_v45  ;;  %3979 = vrot.lane.b32.xlu0 %v3842_v51, %s10291_s23  ;;  %v9203_v51 = vrot.slane %v3626_v31, 9  ;;  %v3170_v45 = vshrl.u32 %v2821_v20, 16  ;;  %v4374_v31 = vrot.slane %v4174_v62, 7 }
 0x206   : > { %v3452_v57 = vpop.permute.xlu0 %3451  ;;  %3471 = vrot.lane.b32.xlu2 %v3096_v33, %s10292_s24  ;;  %v3776_v11 = vsel %vm11444_vm15, %v9203_v51, %v3775_v55  ;;  %v3172_v1 = vrot.slane %v3170_v45, 4  ;;  %v4376_v45 = vrot.slane %v4374_v31, 4 }
 0x207   : > { %3587 = vst.msk [vmem:[#allocation2 + $0x24] sm:$0xf] %vm3577_vm10, %v3452_v57 }
 0x208   : > { %4095 = vst.msk [vmem:[#allocation2 + $0x24] sm:$0xf] %vm4085_vm11, %v3960_v34  ;;  %v5262_v59 = vpop.permute.xlu2 %5261  ;;  %v3189_v34 = vshll.u32 %v2823_v46, 16 }
 0x209   : > { %5283 = vrot.lane.b32.xlu1 %v4936_v23, %s10294_s26  ;;  %v2801_v23 = vld [vmem:[%s10340_s19 + $0x4c] sm:$0xf] }
 0x20a   : > { %v3191_v33 = vrot.slane %v3189_v34, 5  ;;  %v3011_v60 = vshll.u32 %v2801_v23, 16  ;;  %v3015_v53 = vshrl.u32 %v2801_v23, 16  ;;  %v4643_v34 = vld [vmem:[%s10340_s19 + $0x4] sm:$0xf] }
 0x20b   : > { %v4468_v52 = vpop.permute.xlu1 %4467  ;;  %v4723_v39 = vshrl.u32 %v4643_v34, 16 }
 0x20c   : > { %4603 = vst.msk [vmem:[#allocation2 + $0x24] sm:$0xf] %vm4593_vm13, %v4468_v52  ;;  %5281 = vrot.lane.b32.xlu0 %v4927_v26, %s10294_s26  ;;  %v3192_v57 = vsel %vm11456_vm2, %v3187_v0, %v3191_v33  ;;  %v3869_v26 = vrot.slane %v3667_v63, 5  ;;  %v3176_v52 = vor.u32 %v3175_v4, %v3172_v1  ;;  %v11839_v49 = vrot.slane %v3011_v60, 5  ;;  %v4642_v0 = vld [vmem:[%s10340_s19] sm:$0x8] }
 0x20d   : > { %v3017_v43 = vrot.slane %v3015_v53, 4  ;;  %v4718_v63 = vshrl.u32 %v4642_v0, 16  ;;  %v11885_v23 = vrot.slane %v4723_v39, 7  ;;  %v4726_v1 = vshll.u32 %v4643_v34, 16  ;;  %v11888_v4 = vld [vmem:[%s10340_s19 + $0x4c] sm:$0xf] }
 0x20e   : > { %v4466_v2 = vpop.permute.xlu0 %4465  ;;  %3977 = vrot.lane.b32.xlu2 %v3839_v47, %s10291_s23  ;;  %v3870_v47 = vsel %vm11444_vm15, %v3868_v30, %v3869_v26  ;;  %v4683_v30 = vld [vmem:[%s10340_s19 + $0xa4] sm:$0xf]  ;;  %v3646_v53 = vld [vmem:[%s10340_s19 + $0x50] sm:$0x1] }
 0x20f   : > { %4602 = vst.msk [vmem:[#allocation2 + $0x20] sm:$0xf] %vm4593_vm13, %v4466_v2  ;;  %v3177_v2 = vrot.slane %v3176_v52, 4  ;;  %v4728_v52 = vor.u32 %v4726_v1, %v11885_v23 }
 0x210   : > { %v3468_v29 = vpop.permute.xlu2 %3467  ;;  %5398 = vst.msk [vmem:[#allocation2 + $0x20] sm:$0xf] %vm5389_vm14, %v5262_v59  ;;  %v3665_v59 = vld [vmem:[%s10340_s19 + $0x9c] sm:$0xe] }
 0x211   : > { %2641 = vrot.lane.b32.xlu1 %v2519_v3, %s10290_s22  ;;  %3595 = vst.msk [vmem:[#allocation2 + $0x44] sm:$0xf] %vm3577_vm10, %v3468_v29  ;;  %v9216_v44 = vrot.slane %v3665_v59, 9  ;;  %v2802_v3 = vld [vmem:[%s10340_s19 + $0x50] sm:$0x1] }
 0x212   : > { %v2800_v29 = vld [vmem:[%s10340_s19 + $0x48] sm:$0xf]  ;;  %v3021_v16 = vshll.u32 %v2802_v3, 16 }
 0x213   : > { %v3466_v54 = vpop.permute.xlu1 %3465  ;;  %v3867_v37 = vsel %vm11444_vm15, %v9216_v44, %v3866_v56  ;;  %v3005_v14 = vshll.u32 %v2800_v29, 16  ;;  %v9240_v56 = vrot.slane %v4173_v41, 11 }
 0x214   : > { %3594 = vst.msk [vmem:[#allocation2 + $0x40] sm:$0xf] %vm3577_vm10, %v3466_v54  ;;  %5572 = vrot.lane.b32.xlu0 %v5457_v18, %s10295_s27  ;;  %v3018_v18 = vor.u32 %v3017_v43, %v11839_v49  ;;  %v3182_v54 = vsel %vm11456_vm2, %v3177_v2, %v11799_v6  ;;  %v3777_v6 = vrot.slane %v3775_v55, 4 }
 0x215   : > { %v3007_v51 = vrot.slane %v3005_v14, 5  ;;  %v4375_v59 = vsel %vm11473_vm5, %v9240_v56, %v4374_v31 }
 0x216   : > { %v5264_v38 = vpop.permute.xlu0 %5263  ;;  %4487 = vrot.lane.b32.xlu2 %v4350_v22, %s10293_s25  ;;  %v3002_v22 = vshrl.u32 %v2800_v29, 16  ;;  %v3019_v46 = vrot.slane %v3018_v18, 4  ;;  %v5021_v29 = vshll.u32 %v4683_v30, 16 }
 0x217   : > { %5399 = vst.msk [vmem:[#allocation2 + $0x24] sm:$0xf] %vm5389_vm14, %v5264_v38  ;;  %v3023_v38 = vrot.slane %v3021_v16, 5  ;;  %v4681_v16 = vld [vmem:[%s10340_s19 + $0x9c] sm:$0x8] }
 0x218   : > { %v3974_v36 = vpop.permute.xlu2 %3973 }
 0x219   : > { %3435 = vrot.lane.b32.xlu1 %v2880_v15, %s10292_s24  ;;  %4102 = vst.msk [vmem:[#allocation2 + $0x40] sm:$0xf] %vm4085_vm11, %v3974_v36  ;;  %v3628_v15 = vld [vmem:[%s10340_s19 + $0x8] sm:$0x1] }
 0x21a   : > { %v3778_v20 = vrot.slane %v3628_v15, 5  ;;  %v5004_v15 = vshrl.u32 %v4681_v16, 16 }
 0x21b   : > { %v5553_v48 = vpop.permute.xlu1 %5552 }
 0x21c   : > { %5688 = vst.msk [vmem:[#allocation2 + $0x24] sm:$0xf] %vm5678_vm1, %v5553_v48  ;;  %3433 = vrot.lane.b32.xlu0 %v2870_v50, %s10292_s24  ;;  %v3004_v50 = vrot.slane %v3002_v22, 4  ;;  %v3779_v33 = vsel %vm11444_vm15, %v3777_v6, %v3778_v20  ;;  %v11929_v6 = vld [vmem:[%s10340_s19 + $0x4c] sm:$0xf] }
 0x21d   : > { %v4325_v41 = vrot.slane %v11929_v6, 7  ;;  %v11987_v6 = vld [vmem:[%s10340_s19 + $0x7c] sm:$0xf] }
 0x21e   : > { %v5551_v9 = vpop.permute.xlu0 %5550  ;;  %5570 = vrot.lane.b32.xlu2 %v5456_v61, %s10295_s27  ;;  %v3024_v61 = vsel %vm11456_vm2, %v3019_v46, %v3023_v38  ;;  %v3644_v46 = vld [vmem:[%s10340_s19 + $0x48] sm:$0xe] }
 0x21f   : > { %5687 = vst.msk [vmem:[#allocation2 + $0x20] sm:$0xf] %vm5678_vm1, %v5551_v9  ;;  %v4378_v9 = vsel %vm11473_vm5, %v4376_v45, %v4377_v7  ;;  %v4644_v38 = vld [vmem:[%s10340_s19 + $0x8] sm:$0xf]  ;;  %v9209_v20 = vrot.slane %v3644_v46, 9 }
 0x220   : > { %v4484_v5 = vpop.permute.xlu2 %4483  ;;  %v4154_v45 = vld [vmem:[%s10340_s19 + $0x50] sm:$0x7]  ;;  %v2812_v7 = vld [vmem:[%s10340_s19 + $0x78] sm:$0xf]  ;;  %v4735_v0 = vshll.u32 %v4644_v38, 16 }
 0x221   : > { %3941 = vrot.lane.b32.xlu1 %v3776_v11, %s10291_s23  ;;  %v3008_v11 = vor.u32 %v3007_v51, %v3004_v50  ;;  %v4732_v50 = vshrl.u32 %v4644_v38, 16  ;;  %v4328_v56 = vrot.slane %v4154_v45, 7  ;;  %v5439_v38 = vld [vmem:[%s10340_s19 + $0x8] sm:$0xf] }
 0x223   : > { %v4482_v10 = vpop.permute.xlu1 %4481  ;;  %v3009_v26 = vrot.slane %v3008_v11, 4  ;;  %v4327_v11 = vrot.slane %v4325_v41, 4 }
 0x224   : > { %4610 = vst.msk [vmem:[#allocation2 + $0x40] sm:$0xf] %vm4593_vm13, %v4482_v10  ;;  %3487 = vrot.lane.b32.xlu0 %v3192_v57, %s10292_s24  ;;  %v3817_v10 = vrot.slane %v11888_v4, 5  ;;  %v4730_v4 = vrot.slane %v11885_v23, 4 }
 0x225   : > { %v3014_v43 = vsel %vm11456_vm2, %v3009_v26, %v11839_v49  ;;  %v4285_v49 = vrot.slane %v4283_v21, 4 }
 0x226   : > { %v3976_v12 = vpop.permute.xlu0 %3975  ;;  %v10075_v17 = vld [vmem:[#allocation2 + $0x20] sm:$0xff]  ;;  %2643 = vrot.lane.b32.xlu2 %v2520_v58, %s10290_s22  ;;  %v9251_v58 = vrot.slane %v4718_v63, 11  ;;  %v3818_v39 = vsel %vm11444_vm15, %v9209_v20, %v3817_v10  ;;  %v3101_v63 = vshll.u32 %v2812_v7, 16  ;;  %v11990_v20 = vld [vmem:[%s10340_s19 + $0x7c] sm:$0xf] }
 0x227   : > { %4103 = vst.msk [vmem:[#allocation2 + $0x44] sm:$0xf] %vm4085_vm11, %v3976_v12  ;;  %9347 = vmatmul.msk.bf16.vlgmr.msra.gmra.mxu1 %vm5915_vm3, %v10075_v17  ;;  %v3819_v12 = vrot.slane %v3817_v10, 4  ;;  %v3820_v17 = vrot.slane %v3646_v53, 5  ;;  %v2813_v10 = vld [vmem:[%s10340_s19 + $0x7c] sm:$0xf] }
 0x228   : > { %4611 = vst.msk [vmem:[#allocation2 + $0x44] sm:$0xf] %vm4593_vm13, %v4484_v5  ;;  %v5567_v25 = vpop.permute.xlu2 %5566  ;;  %v4682_v5 = vld [vmem:[%s10340_s19 + $0xa0] sm:$0xf]  ;;  %v4729_v2 = vsel %vm11502_vm8, %v9251_v58, %v4728_v52  ;;  %v4662_v58 = vld [vmem:[%s10340_s19 + $0x50] sm:$0xf] }
 0x229   : > { %3995 = vrot.lane.b32.xlu1 %v3870_v47, %s10291_s23  ;;  %v5009_v44 = vshrl.u32 %v4682_v5, 16  ;;  %v5018_v47 = vshrl.u32 %v4683_v30, 16  ;;  %v3821_v62 = vsel %vm11444_vm15, %v3819_v12, %v3820_v17  ;;  %v4329_v30 = vsel %vm11473_vm5, %v4327_v11, %v4328_v56  ;;  %v4152_v52 = vld [vmem:[%s10340_s19 + $0x48] sm:$0x8]  ;;  %v2814_v11 = vld [vmem:[%s10340_s19 + $0x80] sm:$0x1] }
 0x22a   : > { %v4864_v12 = vshrl.u32 %v4662_v58, 16  ;;  %v4867_v16 = vshll.u32 %v4662_v58, 16 }
 0x22b   : > { %v5280_v40 = vpop.permute.xlu1 %5279 }
 0x22c   : > { %5407 = vst.msk [vmem:[#allocation2 + $0x44] sm:$0xf] %vm5389_vm14, %v5280_v40  ;;  %3993 = vrot.lane.b32.xlu0 %v3867_v37, %s10291_s23  ;;  %v5011_v37 = vrot.slane %v5009_v44, 7  ;;  %v4286_v40 = vrot.slane %v4136_v19, 7  ;;  %v9233_v19 = vrot.slane %v4152_v52, 11 }
 0x22e   : > { %v5278_v36 = vpop.permute.xlu0 %5277  ;;  %3485 = vrot.lane.b32.xlu2 %v3182_v54, %s10292_s24  ;;  %v5016_v22 = vrot.slane %v5011_v37, 4  ;;  %v4287_v21 = vsel %vm11473_vm5, %v4285_v49, %v4286_v40  ;;  %v4326_v40 = vsel %vm11473_vm5, %v9233_v19, %v4325_v41  ;;  %v4674_v41 = vld [vmem:[%s10340_s19 + $0x80] sm:$0xf] }
 0x22f   : > { %5406 = vst.msk [vmem:[#allocation2 + $0x40] sm:$0xf] %vm5389_vm14, %v5278_v36  ;;  %v9264_v36 = vrot.slane %v5004_v15, 11  ;;  %v4955_v58 = vshll.u32 %v4674_v41, 16 }
 0x230   : > { %5695 = vst.msk [vmem:[#allocation2 + $0x40] sm:$0xf] %vm5678_vm1, %v5567_v25  ;;  %v3484_v48 = vpop.permute.xlu2 %3483  ;;  %v5020_v25 = vrot.slane %v5018_v47, 7  ;;  %v5465_v47 = vld [vmem:[%s10340_s19 + $0xa4] sm:$0xf] }
 0x231   : > { %4449 = vrot.lane.b32.xlu1 %v4284_v35, %s10293_s25  ;;  %3603 = vst.msk [vmem:[#allocation2 + $0x64] sm:$0xf] %vm3577_vm10, %v3484_v48  ;;  %v5012_v35 = vshll.u32 %v4682_v5, 16 }
 0x232   : > { %v5023_v14 = vor.u32 %v5021_v29, %v5020_v25 }
 0x233   : > { %v3482_v55 = vpop.permute.xlu1 %3481  ;;  %v5014_v8 = vor.u32 %v5012_v35, %v5011_v37  ;;  %v4660_v35 = vld [vmem:[%s10340_s19 + $0x48] sm:$0x8] }
 0x234   : > { %3602 = vst.msk [vmem:[#allocation2 + $0x60] sm:$0xf] %vm3577_vm10, %v3482_v55  ;;  %3459 = vrot.lane.b32.xlu0 %v3024_v61, %s10292_s24  ;;  %v5024_v31 = vsel %vm11502_vm8, %v5016_v22, %v5023_v14  ;;  %v4734_v55 = vrot.slane %v4732_v50, 7 }
 0x235   : > { %v5015_v48 = vsel %vm11502_vm8, %v9264_v36, %v5014_v8  ;;  %v5451_v8 = vld [vmem:[%s10340_s19 + $0x50] sm:$0xf] }
 0x236   : > { %v5569_v57 = vpop.permute.xlu0 %5568  ;;  %3943 = vrot.lane.b32.xlu2 %v3779_v33, %s10291_s23  ;;  %v5438_v33 = vld [vmem:[%s10340_s19 + $0x4] sm:$0xf] }
 0x237   : > { %5696 = vst.msk [vmem:[#allocation2 + $0x44] sm:$0xf] %vm5678_vm1, %v5569_v57  ;;  %v4737_v57 = vor.u32 %v4735_v0, %v4734_v55  ;;  %v3658_v0 = vld [vmem:[%s10340_s19 + $0x80] sm:$0x1] }
 0x238   : > { %v3454_v60 = vpop.permute.xlu2 %3453 }
 0x239   : > { %4503 = vrot.lane.b32.xlu1 %v4378_v9, %s10293_s25  ;;  %3588 = vst.msk [vmem:[#allocation2 + $0x28] sm:$0xf] %vm3577_vm10, %v3454_v60  ;;  %v3098_v9 = vshrl.u32 %v2812_v7, 16  ;;  %v4661_v60 = vld [vmem:[%s10340_s19 + $0x4c] sm:$0xf]  ;;  %v4738_v23 = vsel %vm11502_vm8, %v4730_v4, %v4737_v57 }
 0x23a   : > { %v4855_v44 = vshrl.u32 %v4661_v60, 16  ;;  %v4858_v36 = vshll.u32 %v4661_v60, 16 }
 0x23b   : > { %v3992_v3 = vpop.permute.xlu1 %3991  ;;  %v3100_v26 = vrot.slane %v3098_v9, 4  ;;  %v4353_v9 = vrot.slane %v11987_v6, 7 }
 0x23c   : > { %4111 = vst.msk [vmem:[#allocation2 + $0x64] sm:$0xf] %vm4085_vm11, %v3992_v3  ;;  %4501 = vrot.lane.b32.xlu0 %v4375_v59, %s10293_s25  ;;  %v3103_v59 = vrot.slane %v3101_v63, 5  ;;  %v4857_v25 = vrot.slane %v4855_v44, 7 }
 0x23e   : > { %v3990_v32 = vpop.permute.xlu0 %3989  ;;  %v10079_v18 = vld [vmem:[#allocation2 + $0x40] sm:$0xff]  ;;  %3457 = vrot.lane.b32.xlu2 %v3014_v43, %s10292_s24  ;;  %v3104_v3 = vor.u32 %v3103_v59, %v3100_v26  ;;  %v3107_v43 = vshll.u32 %v2813_v10, 16  ;;  %v4860_v7 = vor.u32 %v4858_v36, %v4857_v25  ;;  %v3848_v59 = vrot.slane %v3658_v0, 5 }
 0x23f   : > { %4110 = vst.msk [vmem:[#allocation2 + $0x60] sm:$0xf] %vm4085_vm11, %v3990_v32  ;;  %9351 = vmatmul.msk.bf16.vlgmr.msra.gmra.mxu2 %vm5915_vm3, %v10079_v18  ;;  %v4866_v18 = vrot.slane %v4864_v12, 7 }
 0x240   : > { %v4500_v54 = vpop.permute.xlu2 %4499  ;;  %v3105_v29 = vrot.slane %v3104_v3, 4  ;;  %v11965_v32 = vrot.slane %v3107_v43, 5 }
 0x241   : > { %5245 = vrot.lane.b32.xlu1 %v4729_v2, %s10294_s26  ;;  %4619 = vst.msk [vmem:[#allocation2 + $0x64] sm:$0xf] %vm4593_vm13, %v4500_v54  ;;  %v5464_v2 = vld [vmem:[%s10340_s19 + $0xa0] sm:$0xf]  ;;  %v4862_v54 = vrot.slane %v4857_v25, 4  ;;  %v4869_v22 = vor.u32 %v4867_v16, %v4866_v18 }
 0x242   : > { %v2786_v25 = vld [vmem:[%s10340_s19 + $0x10] sm:$0xf]  ;;  %v3656_v18 = vld [vmem:[%s10340_s19 + $0x78] sm:$0xe] }
 0x243   : > { %v4498_v13 = vpop.permute.xlu1 %4497 }
 0x244   : > { %4618 = vst.msk [vmem:[#allocation2 + $0x60] sm:$0xf] %vm4593_vm13, %v4498_v13  ;;  %3967 = vrot.lane.b32.xlu0 %v3821_v62, %s10291_s23  ;;  %v3110_v62 = vsel %vm11456_vm2, %v3105_v29, %v11965_v32  ;;  %v4870_v13 = vsel %vm11502_vm8, %v4862_v54, %v4869_v22  ;;  %v2785_v54 = vld [vmem:[%s10340_s19 + $0xc] sm:$0xf] }
 0x246   : > { %v3456_v34 = vpop.permute.xlu0 %3455  ;;  %4451 = vrot.lane.b32.xlu2 %v4287_v21, %s10293_s25  ;;  %v3111_v21 = vshrl.u32 %v2813_v10, 16 }
 0x247   : > { %3589 = vst.msk [vmem:[#allocation2 + $0x2c] sm:$0xf] %vm3577_vm10, %v3456_v34  ;;  %v4164_v34 = vld [vmem:[%s10340_s19 + $0x78] sm:$0x8] }
 0x248   : > { %v5294_v51 = vpop.permute.xlu2 %5293  ;;  %v9237_v56 = vrot.slane %v4164_v34, 11 }
 0x249   : > { %5299 = vrot.lane.b32.xlu1 %v5024_v31, %s10294_s26  ;;  %5414 = vst.msk [vmem:[#allocation2 + $0x60] sm:$0xf] %vm5389_vm14, %v5294_v51  ;;  %v4850_v31 = vshrl.u32 %v4660_v35, 16 }
 0x24a   : > { %v4354_v60 = vsel %vm11473_vm5, %v9237_v56, %v4353_v9 }
 0x24b   : > { %v3964_v61 = vpop.permute.xlu1 %3963  ;;  %v9257_v45 = vrot.slane %v4850_v31, 11  ;;  %v2885_v31 = vshll.u32 %v2785_v54, 16 }
 0x24c   : > { %4097 = vst.msk [vmem:[#allocation2 + $0x2c] sm:$0xf] %vm4085_vm11, %v3964_v61  ;;  %5297 = vrot.lane.b32.xlu0 %v5015_v48, %s10294_s26  ;;  %v4673_v48 = vld [vmem:[%s10340_s19 + $0x7c] sm:$0xf]  ;;  %v5450_v61 = vld [vmem:[%s10340_s19 + $0x4c] sm:$0xf] }
 0x24d   : > { %v4943_v63 = vshrl.u32 %v4673_v48, 16  ;;  %v4861_v57 = vsel %vm11502_vm8, %v9257_v45, %v4860_v7  ;;  %v2887_v45 = vrot.slane %v2885_v31, 5  ;;  %v2825_v7 = vld [vmem:[%s10340_s19 + $0xac] sm:$0xf] }
 0x24e   : > { %v3962_v1 = vpop.permute.xlu0 %3961  ;;  %3965 = vrot.lane.b32.xlu2 %v3818_v39, %s10291_s23  ;;  %v3113_v39 = vrot.slane %v3111_v21, 4  ;;  %v3207_v56 = vshrl.u32 %v2825_v7, 16 }
 0x24f   : > { %4096 = vst.msk [vmem:[#allocation2 + $0x28] sm:$0xf] %vm4085_vm11, %v3962_v1  ;;  %v4952_v1 = vshrl.u32 %v4674_v41, 16 }
 0x250   : > { %v4472_v5 = vpop.permute.xlu2 %4471 }
 0x251   : > { %5534 = vrot.lane.b32.xlu1 %v5438_v33, %s10295_s27  ;;  %4605 = vst.msk [vmem:[#allocation2 + $0x2c] sm:$0xf] %vm4593_vm13, %v4472_v5  ;;  %v3845_v33 = vrot.slane %v11990_v20, 5  ;;  %v3114_v5 = vor.u32 %v3113_v39, %v11965_v32  ;;  %v4954_v10 = vrot.slane %v4952_v1, 7  ;;  %v2521_v20 = vld [vmem:[%s10340_s19 + $0xa8] sm:$0xf] }
 0x253   : > { %v4470_v53 = vpop.permute.xlu1 %4469  ;;  %v3847_v26 = vrot.slane %v3845_v33, 4  ;;  %v3115_v44 = vrot.slane %v3114_v5, 4  ;;  %v4957_v19 = vor.u32 %v4955_v58, %v4954_v10  ;;  %v3629_v10 = vld [vmem:[%s10340_s19 + $0xc] sm:$0xe]  ;;  %v12079_v58 = vld [vmem:[%s10340_s19 + $0x10] sm:$0xf] }
 0x254   : > { %4604 = vst.msk [vmem:[#allocation2 + $0x28] sm:$0xf] %vm4593_vm13, %v4470_v53  ;;  %4475 = vrot.lane.b32.xlu0 %v4329_v30, %s10293_s25  ;;  %v3117_v30 = vshll.u32 %v2814_v11, 16  ;;  %v4945_v53 = vrot.slane %v4943_v63, 7  ;;  %v3203_v11 = vshll.u32 %v2825_v7, 16 }
 0x255   : > { %v3849_v12 = vsel %vm11444_vm15, %v3847_v26, %v3848_v59  ;;  %v5459_v63 = vld [vmem:[%s10340_s19 + $0x80] sm:$0xf]  ;;  %v12138_v7 = vld [vmem:[%s10340_s19 + $0x10] sm:$0xf] }
 0x256   : > { %v5296_v17 = vpop.permute.xlu0 %5295  ;;  %5247 = vrot.lane.b32.xlu2 %v4738_v23, %s10294_s26  ;;  %v4672_v23 = vld [vmem:[%s10340_s19 + $0x78] sm:$0x8] }
 0x257   : > { %5415 = vst.msk [vmem:[#allocation2 + $0x64] sm:$0xf] %vm5389_vm14, %v5296_v17  ;;  %v4938_v43 = vshrl.u32 %v4672_v23, 16  ;;  %v4950_v17 = vrot.slane %v4945_v53, 4 }
 0x258   : > { %v5266_v37 = vpop.permute.xlu2 %5265 }
 0x259   : > { %5588 = vrot.lane.b32.xlu1 %v5465_v47, %s10295_s27  ;;  %5400 = vst.msk [vmem:[#allocation2 + $0x28] sm:$0xf] %vm5389_vm14, %v5266_v37  ;;  %v3119_v47 = vrot.slane %v3117_v30, 5  ;;  %v9261_v32 = vrot.slane %v4938_v43, 11  ;;  %v4958_v16 = vsel %vm11502_vm8, %v4950_v17, %v4957_v19  ;;  %v3209_v30 = vrot.slane %v3207_v56, 4 }
 0x25a   : > { %v9204_v43 = vrot.slane %v3629_v10, 9  ;;  %v3669_v19 = vld [vmem:[%s10340_s19 + $0xac] sm:$0xf] }
 0x25b   : > { %v5585_v49 = vpop.permute.xlu1 %5584  ;;  %v3120_v29 = vsel %vm11456_vm2, %v3115_v44, %v3119_v47  ;;  %v2824_v47 = vld [vmem:[%s10340_s19 + $0xa8] sm:$0xf] }
 0x25c   : > { %5704 = vst.msk [vmem:[#allocation2 + $0x64] sm:$0xf] %vm5678_vm1, %v5585_v49  ;;  %5586 = vrot.lane.b32.xlu0 %v5464_v2, %s10295_s27  ;;  %v4946_v2 = vshll.u32 %v4673_v48, 16  ;;  %v12047_v48 = vld [vmem:[%s13771_s2] ss:$0 sm:$0xff] }
 0x25d   : > { %5740 = vst.msk [vmem:[#allocation3 + $0x40] sm:$0xff] %vm5731_vm4, %v12047_v48 }
 0x25e   : > { %v5583_v14 = vpop.permute.xlu0 %5582  ;;  %4473 = vrot.lane.b32.xlu2 %v4326_v40, %s10293_s25  ;;  %v4948_v49 = vor.u32 %v4946_v2, %v4945_v53  ;;  %v2891_v40 = vshll.u32 %v2786_v25, 16  ;;  %5732 = vst.msk [vmem:[#allocation3] sm:$0xff] %vm5731_vm4, %v12047_v48  ;;  %v5458_v2 = vld [vmem:[%s10340_s19 + $0x7c] sm:$0xf] }
 0x25f   : > { %5703 = vst.msk [vmem:[#allocation2 + $0x60] sm:$0xf] %vm5678_vm1, %v5583_v14 }
 0x260   : > { %v3472_v15 = vpop.permute.xlu2 %3471  ;;  %v4949_v21 = vsel %vm11502_vm8, %v9261_v32, %v4948_v49  ;;  %5733 = vst.msk [vmem:[#allocation3 + $0x8] sm:$0xff] %vm5731_vm4, %v12047_v48 }
 0x261   : > { %3473 = vrot.lane.b32.xlu1 %v3110_v62, %s10292_s24  ;;  %3597 = vst.msk [vmem:[#allocation2 + $0x4c] sm:$0xf] %vm3577_vm10, %v3472_v15  ;;  %v2895_v62 = vshrl.u32 %v2786_v25, 16  ;;  %v9213_v15 = vrot.slane %v3656_v18, 9  ;;  %v3197_v25 = vshll.u32 %v2824_v47, 16 }
 0x262   : > { %5734 = vst.msk [vmem:[#allocation3 + $0x10] sm:$0xff] %vm5731_vm4, %v12047_v48 }
 0x263   : > { %v3470_v46 = vpop.permute.xlu1 %3469  ;;  %v3846_v34 = vsel %vm11444_vm15, %v9213_v15, %v3845_v33  ;;  %5735 = vst.msk [vmem:[#allocation3 + $0x18] sm:$0xff] %vm5731_vm4, %v12047_v48 }
 0x264   : > { %3596 = vst.msk [vmem:[#allocation2 + $0x48] sm:$0xf] %vm3577_vm10, %v3470_v46  ;;  %5271 = vrot.lane.b32.xlu0 %v4870_v13, %s10294_s26  ;;  %v2882_v13 = vshrl.u32 %v2785_v54, 16  ;;  %v12035_v46 = vrot.slane %v2891_v40, 5  ;;  %v2804_v54 = vld [vmem:[%s10340_s19 + $0x58] sm:$0xf] }
 0x265   : > { %5736 = vst.msk [vmem:[#allocation3 + $0x20] sm:$0xff] %vm5731_vm4, %v12047_v48 }
 0x266   : > { %v5268_v50 = vpop.permute.xlu0 %5267  ;;  %v10083_v51 = vld [vmem:[#allocation2 + $0x60] sm:$0xff]  ;;  %5536 = vrot.lane.b32.xlu2 %v5439_v38, %s10295_s27  ;;  %v2897_v38 = vrot.slane %v2895_v62, 4  ;;  %5737 = vst.msk [vmem:[#allocation3 + $0x28] sm:$0xff] %vm5731_vm4, %v12047_v48  ;;  %v3670_v62 = vld [vmem:[%s10340_s19 + $0xb0] sm:$0x1] }
 0x267   : > { %5401 = vst.msk [vmem:[#allocation2 + $0x2c] sm:$0xf] %vm5389_vm14, %v5268_v50  ;;  %9355 = vmatmul.msk.bf16.vlgmr.msra.gmra.mxu3 %vm5915_vm3, %v10083_v51  ;;  %v4166_v50 = vld [vmem:[%s10340_s19 + $0x80] sm:$0x7]  ;;  %v2884_v51 = vrot.slane %v2882_v13, 4 }
 0x268   : > { %v3978_v55 = vpop.permute.xlu2 %3977  ;;  %v2898_v41 = vor.u32 %v2897_v38, %v12035_v46  ;;  %v4356_v0 = vrot.slane %v4166_v50, 7  ;;  %5738 = vst.msk [vmem:[#allocation3 + $0x30] sm:$0xff] %vm5731_vm4, %v12047_v48  ;;  %v3039_v38 = vshrl.u32 %v2804_v54, 16 }
 0x269   : > { %5560 = vrot.lane.b32.xlu1 %v5451_v8, %s10295_s27  ;;  %4104 = vst.msk [vmem:[#allocation2 + $0x48] sm:$0xf] %vm4085_vm11, %v3978_v55  ;;  %v2787_v8 = vld [vmem:[%s10340_s19 + $0x14] sm:$0x1]  ;;  %v4355_v55 = vrot.slane %v4353_v9, 4  ;;  %v12067_v9 = vrot.slane %v3203_v11, 5 }
 0x26a   : > { %v2899_v1 = vrot.slane %v2898_v41, 4  ;;  %5739 = vst.msk [vmem:[#allocation3 + $0x38] sm:$0xff] %vm5731_vm4, %v12047_v48  ;;  %v2803_v11 = vld [vmem:[%s10340_s19 + $0x54] sm:$0xf] }
 0x26b   : > { %v5557_v4 = vpop.permute.xlu1 %5556  ;;  %v4357_v6 = vsel %vm11473_vm5, %v4355_v55, %v4356_v0  ;;  %5741 = vst.msk [vmem:[#allocation3 + $0x48] sm:$0xff] %vm5731_vm4, %v12047_v48 }
 0x26c   : > { %5690 = vst.msk [vmem:[#allocation2 + $0x2c] sm:$0xf] %vm5678_vm1, %v5557_v4  ;;  %5558 = vrot.lane.b32.xlu0 %v5450_v61, %s10295_s27  ;;  %v2901_v61 = vshll.u32 %v2787_v8, 16  ;;  %v2522_v8 = vld [vmem:[%s10340_s19 + $0xac] sm:$0xf] }
 0x26d   : > { %5742 = vst.msk [vmem:[#allocation3 + $0x50] sm:$0xff] %vm5731_vm4, %v12047_v48 }
 0x26e   : > { %v5555_v52 = vpop.permute.xlu0 %5554  ;;  %5269 = vrot.lane.b32.xlu2 %v4861_v57, %s10294_s26  ;;  %v2903_v4 = vrot.slane %v2901_v61, 5  ;;  %v2888_v57 = vor.u32 %v2887_v45, %v2884_v51  ;;  %5743 = vst.msk [vmem:[#allocation3 + $0x58] sm:$0xff] %vm5731_vm4, %v12047_v48  ;;  %v4137_v51 = vld [vmem:[%s10340_s19 + $0xc] sm:$0x8]  ;;  %v3041_v61 = vrot.slane %v3039_v38, 4 }
 0x26f   : > { %5689 = vst.msk [vmem:[#allocation2 + $0x28] sm:$0xf] %vm5678_vm1, %v5555_v52  ;;  %v3210_v52 = vor.u32 %v3209_v30, %v12067_v9  ;;  %v3026_v30 = vshrl.u32 %v2803_v11, 16  ;;  %v4686_v38 = vld [vmem:[%s10340_s19 + $0xb0] sm:$0xf] }
 0x270   : > { %v4488_v3 = vpop.permute.xlu2 %4487  ;;  %v2904_v26 = vsel %vm11456_vm2, %v2899_v1, %v2903_v4  ;;  %v2889_v59 = vrot.slane %v2888_v57, 4  ;;  %5744 = vst.msk [vmem:[#allocation3 + $0x60] sm:$0xff] %vm5731_vm4, %v12047_v48  ;;  %v12154_v57 = vld [vmem:[%s10340_s19 + $0xac] sm:$0xf] }
 0x271   : > { %4489 = vrot.lane.b32.xlu1 %v4354_v60, %s10293_s25  ;;  %v2826_v60 = vld [vmem:[%s10340_s19 + $0xb0] sm:$0x1]  ;;  %5745 = vst.msk [vmem:[#allocation3 + $0x68] sm:$0xff] %vm5731_vm4, %v12047_v48 }
 0x272   : > { %v3213_v44 = vshll.u32 %v2826_v60, 16  ;;  %5746 = vst.msk [vmem:[#allocation3 + $0x70] sm:$0xff] %vm5731_vm4, %v12047_v48  ;;  %v4381_v60 = vrot.slane %v12154_v57, 7 }
 0x273   : > { %v4486_v37 = vpop.permute.xlu1 %4485  ;;  %5747 = vst.msk [vmem:[#allocation3 + $0x78] sm:$0xff] %vm5731_vm4, %v12047_v48 }
 0x274   : > { %4612 = vst.msk [vmem:[#allocation2 + $0x48] sm:$0xf] %vm4593_vm13, %v4486_v37  ;;  %3983 = vrot.lane.b32.xlu0 %v3849_v12, %s10291_s23  ;;  %v3782_v12 = vrot.slane %v12079_v58, 5  ;;  %v3194_v37 = vshrl.u32 %v2824_v47, 16  ;;  %v3215_v32 = vrot.slane %v3213_v44, 5 }
 0x275   : > { %5748 = vst.msk [vmem:[#allocation3 + $0x80] sm:$0xff] %vm5731_vm4, %v12047_v48  ;;  %v4646_v44 = vld [vmem:[%s10340_s19 + $0x10] sm:$0xf] }
 0x276   : > { %v3980_v22 = vpop.permute.xlu0 %3979  ;;  %v10076_v14 = vld [vmem:[#allocation2 + $0x28] sm:$0xff]  ;;  %3475 = vrot.lane.b32.xlu2 %v3120_v29, %s10292_s24  ;;  %v3211_v29 = vrot.slane %v3210_v52, 4  ;;  %v3783_v18 = vsel %vm11444_vm15, %v9204_v43, %v3782_v12  ;;  %5749 = vst.msk [vmem:[#allocation3 + $0x88] sm:$0xff] %vm5731_vm4, %v12047_v48  ;;  %v4178_v52 = vld [vmem:[%s10340_s19 + $0xb0] sm:$0x7]  ;;  %v3784_v47 = vrot.slane %v3782_v12, 4 }
 0x277   : > { %4105 = vst.msk [vmem:[#allocation2 + $0x4c] sm:$0xf] %vm4085_vm11, %v3980_v22  ;;  %9348 = vmatmul.msk.bf16.gmra.mxu1 %vm5915_vm3, %v10076_v14  ;;  %v3196_v22 = vrot.slane %v3194_v37, 4  ;;  %v3199_v14 = vrot.slane %v3197_v25, 5  ;;  %v3028_v43 = vrot.slane %v3026_v30, 4  ;;  %v4384_v25 = vrot.slane %v4178_v52, 7 }
 0x278   : > { %4613 = vst.msk [vmem:[#allocation2 + $0x4c] sm:$0xf] %vm4593_vm13, %v4488_v3  ;;  %v5571_v35 = vpop.permute.xlu2 %5570  ;;  %v2894_v3 = vsel %vm11456_vm2, %v2889_v59, %v12035_v46  ;;  %v3216_v15 = vsel %vm11456_vm2, %v3211_v29, %v3215_v32  ;;  %v3035_v46 = vshll.u32 %v2804_v54, 16  ;;  %v3631_v59 = vld [vmem:[%s10340_s19 + $0x14] sm:$0x1]  ;;  %v4745_v58 = vshrl.u32 %v4646_v44, 16 }
 0x279   : > { %5287 = vrot.lane.b32.xlu1 %v4958_v16, %s10294_s26  ;;  %v3873_v16 = vrot.slane %v3669_v19, 5  ;;  %5750 = vst.msk [vmem:[#allocation3 + $0x90] sm:$0xff] %vm5731_vm4, %v12047_v48  ;;  %v4176_v29 = vld [vmem:[%s10340_s19 + $0xa8] sm:$0x8]  ;;  %v4645_v12 = vld [vmem:[%s10340_s19 + $0xc] sm:$0x8] }
 0x27a   : > { %v12132_v41 = vrot.slane %v3035_v46, 5  ;;  %5751 = vst.msk [vmem:[#allocation3 + $0x98] sm:$0xff] %vm5731_vm4, %v12047_v48  ;;  %v4685_v46 = vld [vmem:[%s10340_s19 + $0xac] sm:$0xf]  ;;  %v4684_v30 = vld [vmem:[%s10340_s19 + $0xa8] sm:$0x8] }
 0x27b   : > { %v5284_v36 = vpop.permute.xlu1 %5283  ;;  %v3875_v13 = vrot.slane %v3873_v16, 4  ;;  %5752 = vst.msk [vmem:[#allocation3 + $0xa0] sm:$0xff] %vm5731_vm4, %v12047_v48  ;;  %v5034_v52 = vshll.u32 %v4685_v46, 16 }
 0x27c   : > { %5409 = vst.msk [vmem:[#allocation2 + $0x4c] sm:$0xf] %vm5389_vm14, %v5284_v36  ;;  %5285 = vrot.lane.b32.xlu0 %v4949_v21, %s10294_s26  ;;  %v3876_v21 = vrot.slane %v3670_v62, 5  ;;  %v3668_v36 = vld [vmem:[%s10340_s19 + $0xa8] sm:$0xe]  ;;  %v3042_v1 = vor.u32 %v3041_v61, %v12132_v41  ;;  %v5031_v61 = vshrl.u32 %v4685_v46, 16 }
 0x27d   : > { %v9217_v50 = vrot.slane %v3668_v36, 9  ;;  %5753 = vst.msk [vmem:[#allocation3 + $0xa8] sm:$0xff] %vm5731_vm4, %v12047_v48 }
 0x27e   : > { %v5282_v39 = vpop.permute.xlu0 %5281  ;;  %3981 = vrot.lane.b32.xlu2 %v3846_v34, %s10291_s23  ;;  %v3200_v34 = vor.u32 %v3199_v14, %v3196_v22  ;;  %v3043_v10 = vrot.slane %v3042_v1, 4  ;;  %5754 = vst.msk [vmem:[#allocation3 + $0xb0] sm:$0xff] %vm5731_vm4, %v12047_v48  ;;  %v4740_v22 = vshrl.u32 %v4645_v12, 16  ;;  %v12201_v14 = vrot.slane %v4745_v58, 7 }
 0x27f   : > { %5408 = vst.msk [vmem:[#allocation2 + $0x48] sm:$0xf] %vm5389_vm14, %v5282_v39  ;;  %v2805_v39 = vld [vmem:[%s10340_s19 + $0x5c] sm:$0x1]  ;;  %v3874_v56 = vsel %vm11444_vm15, %v9217_v50, %v3873_v16 }
 0x280   : > { %5697 = vst.msk [vmem:[#allocation2 + $0x48] sm:$0xf] %vm5678_vm1, %v5571_v35  ;;  %v2644_v33 = vpop.permute.xlu2 %2643  ;;  %v3201_v55 = vrot.slane %v3200_v34, 4  ;;  %v3045_v4 = vshll.u32 %v2805_v39, 16 }
 0x281   : > { %2645 = vrot.lane.b32.xlu1 %v2521_v20, %s10290_s22  ;;  %2761 = vst.msk [vmem:[#allocation2 + $0x6c] sm:$0xf] %vm2733_vm9, %v2644_v33  ;;  %v3877_v20 = vsel %vm11444_vm15, %v3875_v13, %v3876_v21  ;;  %v9228_v33 = vrot.slane %v4137_v51, 11  ;;  %v3649_v51 = vld [vmem:[%s10340_s19 + $0x5c] sm:$0x1] }
 0x282   : > { %5755 = vst.msk [vmem:[#allocation3 + $0xb8] sm:$0xff] %vm5731_vm4, %v12047_v48 }
 0x283   : > { %v2642_v5 = vpop.permute.xlu1 %2641  ;;  %5756 = vst.msk [vmem:[#allocation3 + $0xc0] sm:$0xff] %vm5731_vm4, %v12047_v48 }
 0x284   : > { %2760 = vst.msk [vmem:[#allocation2 + $0x68] sm:$0xf] %vm2733_vm9, %v2642_v5  ;;  %5576 = vrot.lane.b32.xlu0 %v5459_v63, %s10295_s27  ;;  %v4290_v63 = vrot.slane %v12138_v7, 7 }
 0x285   : > { %5757 = vst.msk [vmem:[#allocation3 + $0xc8] sm:$0xff] %vm5731_vm4, %v12047_v48 }
 0x286   : > { %v5573_v53 = vpop.permute.xlu0 %5572  ;;  %4491 = vrot.lane.b32.xlu2 %v4357_v6, %s10293_s25  ;;  %v3206_v6 = vsel %vm11456_vm2, %v3201_v55, %v12067_v9  ;;  %5758 = vst.msk [vmem:[#allocation3 + $0xd0] sm:$0xff] %vm5731_vm4, %v12047_v48 }
 0x287   : > { %5698 = vst.msk [vmem:[#allocation2 + $0x4c] sm:$0xf] %vm5678_vm1, %v5573_v53  ;;  %v4291_v53 = vsel %vm11473_vm5, %v9228_v33, %v4290_v63 }
 0x288   : > { %v3486_v23 = vpop.permute.xlu2 %3485  ;;  %5759 = vst.msk [vmem:[#allocation3 + $0xd8] sm:$0xff] %vm5731_vm4, %v12047_v48 }
 0x289   : > { %3439 = vrot.lane.b32.xlu1 %v2904_v26, %s10292_s24  ;;  %3604 = vst.msk [vmem:[#allocation2 + $0x68] sm:$0xf] %vm3577_vm10, %v3486_v23  ;;  %v3029_v26 = vshll.u32 %v2803_v11, 16  ;;  %v3047_v23 = vrot.slane %v3045_v4, 5  ;;  %v3827_v11 = vrot.slane %v3649_v51, 5 }
 0x28a   : > { %5760 = vst.msk [vmem:[#allocation3 + $0xe0] sm:$0xff] %vm5731_vm4, %v12047_v48 }
 0x28b   : > { %v3436_v17 = vpop.permute.xlu1 %3435  ;;  %v3048_v37 = vsel %vm11456_vm2, %v3043_v10, %v3047_v23  ;;  %5761 = vst.msk [vmem:[#allocation3 + $0xe8] sm:$0xff] %vm5731_vm4, %v12047_v48 }
 0x28c   : > { %3579 = vst.msk [vmem:[#allocation2 + $0x4] sm:$0xf] %vm3577_vm10, %v3436_v17  ;;  %3437 = vrot.lane.b32.xlu0 %v2894_v3, %s10292_s24  ;;  %v3785_v3 = vrot.slane %v3631_v59, 5  ;;  %v3031_v17 = vrot.slane %v3029_v26, 5  ;;  %v4292_v59 = vrot.slane %v4290_v63, 4 }
 0x28d   : > { %5762 = vst.msk [vmem:[#allocation3 + $0xf0] sm:$0xff] %vm5731_vm4, %v12047_v48 }
 0x28e   : > { %v3434_v49 = vpop.permute.xlu0 %3433  ;;  %v10080_v40 = vld [vmem:[#allocation2 + $0x48] sm:$0xff]  ;;  %5574 = vrot.lane.b32.xlu2 %v5458_v2, %s10295_s27  ;;  %v4383_v2 = vrot.slane %v4381_v60, 4  ;;  %v3786_v16 = vsel %vm11444_vm15, %v3784_v47, %v3785_v3  ;;  %5763 = vst.msk [vmem:[#allocation3 + $0xf8] sm:$0xff] %vm5731_vm4, %v12047_v48  ;;  %v5026_v48 = vshrl.u32 %v4684_v30, 16  ;;  %v4647_v47 = vld [vmem:[%s10340_s19 + $0x14] sm:$0xf] }
 0x28f   : > { %3578 = vst.msk [vmem:[#allocation2] sm:$0xf] %vm3577_vm10, %v3434_v49  ;;  %9352 = vmatmul.msk.bf16.gmra.mxu2 %vm5915_vm3, %v10080_v40  ;;  %v3032_v49 = vor.u32 %v3031_v17, %v3028_v43  ;;  %v9241_v40 = vrot.slane %v4176_v29, 11 }
 0x290   : > { %v3944_v35 = vpop.permute.xlu2 %3943  ;;  %v4385_v54 = vsel %vm11473_vm5, %v4383_v2, %v4384_v25  ;;  %v9265_v43 = vrot.slane %v5026_v48, 11  ;;  %v12264_v2 = vld [vmem:[%s10340_s19 + $0x58] sm:$0xf]  ;;  %v4754_v25 = vshrl.u32 %v4647_v47, 16 }
 0x291   : > { %3945 = vrot.lane.b32.xlu1 %v3783_v18, %s10291_s23  ;;  %4087 = vst.msk [vmem:[#allocation2 + $0x4] sm:$0xf] %vm4085_vm11, %v3944_v35  ;;  %v5804_v18 = vld [vmem:[#allocation3 + $0x40] sm:$0xff]  ;;  %v12204_v35 = vld [vmem:[%s10340_s19 + $0x58] sm:$0xf]  ;;  %v4382_v36 = vsel %vm11473_vm5, %v9241_v40, %v4381_v60 }
 0x292   : > { %v3824_v34 = vrot.slane %v12204_v35, 5  ;;  %v4756_v40 = vrot.slane %v4754_v25, 7  ;;  %v4752_v35 = vrot.slane %v12201_v14, 4  ;;  %v5441_v25 = vld [vmem:[%s10340_s19 + $0x14] sm:$0xf] }
 0x293   : > { %v3942_v31 = vpop.permute.xlu1 %3941 }
 0x294   : > { %4086 = vst.msk [vmem:[#allocation2] sm:$0xf] %vm4085_vm11, %v3942_v31  ;;  %3491 = vrot.lane.b32.xlu0 %v3216_v15, %s10292_s24  ;;  %v4748_v15 = vshll.u32 %v4646_v44, 16  ;;  %v3033_v31 = vrot.slane %v3032_v49, 4  ;;  %v3826_v33 = vrot.slane %v3824_v34, 4 }
 0x295   : > { %v3647_v44 = vld [vmem:[%s10340_s19 + $0x54] sm:$0xe] }
 0x296   : > { %v3488_v45 = vpop.permute.xlu0 %3487  ;;  %2647 = vrot.lane.b32.xlu2 %v2522_v8, %s10290_s22  ;;  %v4750_v50 = vor.u32 %v4748_v15, %v12201_v14  ;;  %v3038_v55 = vsel %vm11456_vm2, %v3033_v31, %v12132_v41  ;;  %v5033_v41 = vrot.slane %v5031_v61, 7  ;;  %v5812_v31 = vld [vmem:[#allocation3 + $0x80] sm:$0xff]  ;;  %v12292_v61 = vld [vmem:[%s10340_s19 + $0x58] sm:$0xf]  ;;  %v4665_v14 = vld [vmem:[%s10340_s19 + $0x5c] sm:$0xf] }
 0x297   : > { %3605 = vst.msk [vmem:[#allocation2 + $0x6c] sm:$0xf] %vm3577_vm10, %v3488_v45  ;;  %v5040_v45 = vshrl.u32 %v4686_v38, 16 }
 0x298   : > { %v3458_v0 = vpop.permute.xlu2 %3457  ;;  %v5038_v23 = vrot.slane %v5033_v41, 4  ;;  %v5036_v17 = vor.u32 %v5034_v52, %v5033_v41 }
 0x299   : > { %3999 = vrot.lane.b32.xlu1 %v3877_v20, %s10291_s23  ;;  %3590 = vst.msk [vmem:[#allocation2 + $0x30] sm:$0xf] %vm3577_vm10, %v3458_v0  ;;  %v9252_v20 = vrot.slane %v4740_v22, 11  ;;  %v5805_v0 = vld [vmem:[#allocation3 + $0x48] sm:$0xff]  ;;  %v5042_v57 = vrot.slane %v5040_v45, 7 }
 0x29a   : > { %v5037_v58 = vsel %vm11502_vm8, %v9265_v43, %v5036_v17  ;;  %v4663_v17 = vld [vmem:[%s10340_s19 + $0x54] sm:$0x8] }
 0x29b   : > { %v3996_v5 = vpop.permute.xlu1 %3995  ;;  %v4751_v4 = vsel %vm11502_vm8, %v9252_v20, %v4750_v50 }
 0x29c   : > { %4113 = vst.msk [vmem:[#allocation2 + $0x6c] sm:$0xf] %vm4085_vm11, %v3996_v5  ;;  %3997 = vrot.lane.b32.xlu0 %v3874_v56, %s10291_s23  ;;  %v4139_v56 = vld [vmem:[%s10340_s19 + $0x14] sm:$0x7]  ;;  %v5043_v5 = vshll.u32 %v4686_v38, 16 }
 0x29d   : > { %v4293_v60 = vrot.slane %v4139_v56, 7 }
 0x29e   : > { %v3994_v9 = vpop.permute.xlu0 %3993  ;;  %3489 = vrot.lane.b32.xlu2 %v3206_v6, %s10292_s24 }
 0x29f   : > { %4112 = vst.msk [vmem:[#allocation2 + $0x68] sm:$0xf] %vm4085_vm11, %v3994_v9  ;;  %v5045_v9 = vor.u32 %v5043_v5, %v5042_v57  ;;  %v4294_v63 = vsel %vm11473_vm5, %v4292_v59, %v4293_v60  ;;  %v5466_v5 = vld [vmem:[%s10340_s19 + $0xac] sm:$0xf] }
 0x2a0   : > { %v4452_v19 = vpop.permute.xlu2 %4451 }
 0x2a1   : > { %4453 = vrot.lane.b32.xlu1 %v4291_v53, %s10293_s25  ;;  %4595 = vst.msk [vmem:[#allocation2 + $0x4] sm:$0xf] %vm4593_vm13, %v4452_v19  ;;  %v3828_v53 = vsel %vm11444_vm15, %v3826_v33, %v3827_v11  ;;  %v5046_v3 = vsel %vm11502_vm8, %v5038_v23, %v5045_v9  ;;  %v5467_v11 = vld [vmem:[%s10340_s19 + $0xb0] sm:$0xf] }
 0x2a3   : > { %v4450_v32 = vpop.permute.xlu1 %4449 }
 0x2a4   : > { %4594 = vst.msk [vmem:[#allocation2] sm:$0xf] %vm4593_vm13, %v4450_v32  ;;  %3463 = vrot.lane.b32.xlu0 %v3048_v37, %s10292_s24  ;;  %v5997_v62 = vpop.f32.mrf.mxu1  ;;  %v9210_v37 = vrot.slane %v3647_v44, 9  ;;  %v4332_v32 = vrot.slane %v12264_v2, 7 }
 0x2a5   : > { %v6065_v21 = vadd.f32 %v5997_v62, %v5804_v18  ;;  %v4157_v18 = vld [vmem:[%s10340_s19 + $0x5c] sm:$0x7]  ;;  %v4757_v62 = vshll.u32 %v4647_v47, 16 }
 0x2a6   : > { %v3460_v13 = vpop.permute.xlu0 %3459  ;;  %3947 = vrot.lane.b32.xlu2 %v3786_v16, %s10291_s23  ;;  %v2815_v16 = vld [vmem:[%s10340_s19 + $0x84] sm:$0xf]  ;;  %v3825_v49 = vsel %vm11444_vm15, %v9210_v37, %v3824_v34  ;;  %v4334_v22 = vrot.slane %v4332_v32, 4  ;;  %v4335_v15 = vrot.slane %v4157_v18, 7  ;;  %v12289_v34 = vld [vmem:[%s10340_s19 + $0x88] sm:$0xf] }
 0x2a7   : > { %3591 = vst.msk [vmem:[#allocation2 + $0x34] sm:$0xf] %vm3577_vm10, %v3460_v13  ;;  %v3122_v13 = vshrl.u32 %v2815_v16, 16  ;;  %v4759_v38 = vor.u32 %v4757_v62, %v4756_v40  ;;  %v3131_v33 = vshll.u32 %v12289_v34, 16  ;;  %v3135_v2 = vshrl.u32 %v12289_v34, 16 }
 0x2a8   : > { %6097 = vst.msk [vmem:[#allocation3 + $0x40] sm:$0xff] %vm5731_vm4, %v6065_v21  ;;  %v3966_v8 = vpop.permute.xlu2 %3965  ;;  %v3125_v21 = vshll.u32 %v2815_v16, 16  ;;  %v12335_v18 = vld [vmem:[%s10340_s19 + $0x88] sm:$0xf] }
 0x2a9   : > { %4507 = vrot.lane.b32.xlu1 %v4385_v54, %s10293_s25  ;;  %4098 = vst.msk [vmem:[#allocation2 + $0x30] sm:$0xf] %vm4085_vm11, %v3966_v8  ;;  %v5440_v54 = vld [vmem:[%s10340_s19 + $0x10] sm:$0xf]  ;;  %v4336_v8 = vsel %vm11473_vm5, %v4334_v22, %v4335_v15  ;;  %v3124_v20 = vrot.slane %v3122_v13, 4 }
 0x2aa   : > { %v3127_v50 = vrot.slane %v3125_v21, 5  ;;  %v12338_v16 = vld [vmem:[%s10340_s19 + $0x88] sm:$0xf]  ;;  %v5452_v22 = vld [vmem:[%s10340_s19 + $0x58] sm:$0xf]  ;;  %v3137_v21 = vrot.slane %v3135_v2, 4 }
 0x2ab   : > { %v4504_v39 = vpop.permute.xlu1 %4503  ;;  %v4676_v62 = vld [vmem:[%s10340_s19 + $0x88] sm:$0xf] }
 0x2ac   : > { %4505 = vrot.lane.b32.xlu0 %v4382_v36, %s10293_s25  ;;  %v5999_v1 = vpop.f32.mrf.mxu1  ;;  %4621 = vst.msk [vmem:[#allocation2 + $0x6c] sm:$0xf] %vm4593_vm13, %v4504_v39  ;;  %v4760_v39 = vsel %vm11502_vm8, %v4752_v35, %v4759_v38  ;;  %v3128_v56 = vor.u32 %v3127_v50, %v3124_v20  ;;  %v4360_v38 = vrot.slane %v12335_v18, 7  ;;  %v4965_v34 = vshrl.u32 %v4676_v62, 16  ;;  %v5806_v18 = vld [vmem:[#allocation3 + $0x50] sm:$0xff] }
 0x2ad   : > { %v6066_v26 = vadd.f32 %v5999_v1, %v5805_v0  ;;  %v4155_v0 = vld [vmem:[%s10340_s19 + $0x54] sm:$0x8]  ;;  %v4877_v1 = vshrl.u32 %v12292_v61, 16 }
 0x2ae   : > { %v4502_v6 = vpop.permute.xlu0 %4501  ;;  %3461 = vrot.lane.b32.xlu2 %v3038_v55, %s10292_s24  ;;  %v9234_v57 = vrot.slane %v4155_v0, 11  ;;  %v3129_v59 = vrot.slane %v3128_v56, 4  ;;  %v4967_v0 = vrot.slane %v4965_v34, 7  ;;  %v4675_v56 = vld [vmem:[%s10340_s19 + $0x84] sm:$0x8]  ;;  %v5821_v34 = vld [vmem:[#allocation3 + $0xc8] sm:$0xff] }
 0x2af   : > { %4620 = vst.msk [vmem:[#allocation2 + $0x68] sm:$0xf] %vm4593_vm13, %v4502_v6  ;;  %v5813_v6 = vld [vmem:[#allocation3 + $0x88] sm:$0xff]  ;;  %v4879_v60 = vrot.slane %v4877_v1, 7 }
 0x2b0   : > { %v5248_v10 = vpop.permute.xlu2 %5247  ;;  %6098 = vst.msk [vmem:[#allocation3 + $0x48] sm:$0xff] %vm5731_vm4, %v6066_v26  ;;  %v12308_v26 = vrot.slane %v3131_v33, 5  ;;  %v4333_v52 = vsel %vm11473_vm5, %v9234_v57, %v4332_v32  ;;  %v5453_v32 = vld [vmem:[%s10340_s19 + $0x5c] sm:$0xf] }
 0x2b1   : > { %5249 = vrot.lane.b32.xlu1 %v4751_v4, %s10294_s26  ;;  %5391 = vst.msk [vmem:[#allocation2 + $0x4] sm:$0xf] %vm5389_vm14, %v5248_v10  ;;  %v4886_v4 = vshrl.u32 %v4665_v14, 16  ;;  %v4889_v10 = vshll.u32 %v4665_v14, 16  ;;  %v4884_v44 = vrot.slane %v4879_v60, 4 }
 0x2b3   : > { %v5246_v7 = vpop.permute.xlu1 %5245 }
 0x2b4   : > { %3971 = vrot.lane.b32.xlu0 %v3828_v53, %s10291_s23  ;;  %5390 = vst.msk [vmem:[#allocation2] sm:$0xf] %vm5389_vm14, %v5246_v7  ;;  %v4888_v53 = vrot.slane %v4886_v4, 7 }
 0x2b6   : > { %v3968_v19 = vpop.permute.xlu0 %3967  ;;  %4455 = vrot.lane.b32.xlu2 %v4294_v63, %s10293_s25  ;;  %v3134_v63 = vsel %vm11456_vm2, %v3129_v59, %v12308_v26  ;;  %v4891_v47 = vor.u32 %v4889_v10, %v4888_v53  ;;  %v4968_v59 = vshll.u32 %v4676_v62, 16  ;;  %v2789_v53 = vld [vmem:[%s10340_s19 + $0x1c] sm:$0xf]  ;;  %v4169_v62 = vld [vmem:[%s10340_s19 + $0x8c] sm:$0x7] }
 0x2b7   : > { %4099 = vst.msk [vmem:[#allocation2 + $0x34] sm:$0xf] %vm4085_vm11, %v3968_v19 }
 0x2b8   : > { %v4474_v29 = vpop.permute.xlu2 %4473  ;;  %v4892_v19 = vsel %vm11502_vm8, %v4884_v44, %v4891_v47  ;;  %v2788_v44 = vld [vmem:[%s10340_s19 + $0x18] sm:$0xf] }
 0x2b9   : > { %5303 = vrot.lane.b32.xlu1 %v5046_v3, %s10294_s26  ;;  %4606 = vst.msk [vmem:[#allocation2 + $0x30] sm:$0xf] %vm4593_vm13, %v4474_v29  ;;  %v4872_v29 = vshrl.u32 %v4663_v17, 16  ;;  %v2909_v2 = vshll.u32 %v2788_v44, 16 }
 0x2bb   : > { %v5300_v12 = vpop.permute.xlu1 %5299  ;;  %v9258_v15 = vrot.slane %v4872_v29, 11 }
 0x2bc   : > { %5417 = vst.msk [vmem:[#allocation2 + $0x6c] sm:$0xf] %vm5389_vm14, %v5300_v12  ;;  %5301 = vrot.lane.b32.xlu0 %v5037_v58, %s10294_s26  ;;  %v4880_v58 = vshll.u32 %v12292_v61, 16  ;;  %v4167_v12 = vld [vmem:[%s10340_s19 + $0x84] sm:$0x8]  ;;  %v3138_v61 = vor.u32 %v3137_v21, %v12308_v26 }
 0x2bd   : > { %v9238_v35 = vrot.slane %v4167_v12, 11  ;;  %v2790_v12 = vld [vmem:[%s10340_s19 + $0x20] sm:$0x1] }
 0x2be   : > { %v5298_v46 = vpop.permute.xlu0 %5297  ;;  %3969 = vrot.lane.b32.xlu2 %v3825_v49, %s10291_s23  ;;  %v4882_v13 = vor.u32 %v4880_v58, %v4879_v60  ;;  %v3139_v4 = vrot.slane %v3138_v61, 4  ;;  %v2925_v21 = vshll.u32 %v2790_v12, 16 }
 0x2bf   : > { %5416 = vst.msk [vmem:[#allocation2 + $0x68] sm:$0xf] %vm5389_vm14, %v5298_v46 }
 0x2c0   : > { %v5537_v36 = vpop.permute.xlu2 %5536  ;;  %v2927_v61 = vrot.slane %v2925_v21, 5 }
 0x2c1   : > { %5538 = vrot.lane.b32.xlu1 %v5440_v54, %s10295_s27  ;;  %5680 = vst.msk [vmem:[#allocation2 + $0x4] sm:$0xf] %vm5678_vm1, %v5537_v36  ;;  %v4677_v54 = vld [vmem:[%s10340_s19 + $0x8c] sm:$0xf] }
 0x2c2   : > { %v6017_v45 = vpop.f32.mrf.mxu2  ;;  %v2817_v36 = vld [vmem:[%s10340_s19 + $0x8c] sm:$0x1]  ;;  %v4974_v20 = vshrl.u32 %v4677_v54, 16 }
 0x2c3   : > { %v5535_v51 = vpop.permute.xlu1 %5534  ;;  %v6073_v55 = vadd.f32 %v6017_v45, %v5812_v31  ;;  %v3661_v31 = vld [vmem:[%s10340_s19 + $0x8c] sm:$0x1]  ;;  %v3141_v14 = vshll.u32 %v2817_v36, 16  ;;  %v4361_v45 = vsel %vm11473_vm5, %v9238_v35, %v4360_v38  ;;  %v2828_v35 = vld [vmem:[%s10340_s19 + $0xb8] sm:$0xf]  ;;  %v4363_v36 = vrot.slane %v4169_v62, 7 }
 0x2c4   : > { %5679 = vst.msk [vmem:[#allocation2] sm:$0xf] %vm5678_vm1, %v5535_v51  ;;  %4479 = vrot.lane.b32.xlu0 %v4336_v8, %s10293_s25  ;;  %v3852_v8 = vrot.slane %v12338_v16, 5  ;;  %v4883_v51 = vsel %vm11502_vm8, %v9258_v15, %v4882_v13  ;;  %v4976_v33 = vrot.slane %v4974_v20, 7  ;;  %v2523_v15 = vld [vmem:[%s10340_s19 + $0xb4] sm:$0xf] }
 0x2c5   : > { %6105 = vst.msk [vmem:[#allocation3 + $0x80] sm:$0xff] %vm5731_vm4, %v6073_v55 }
 0x2c6   : > { %v4476_v41 = vpop.permute.xlu0 %4475  ;;  %5251 = vrot.lane.b32.xlu2 %v4760_v39, %s10294_s26  ;;  %v3855_v39 = vrot.slane %v3661_v31, 5  ;;  %v3854_v55 = vrot.slane %v3852_v8, 4  ;;  %v4362_v31 = vrot.slane %v4360_v38, 4 }
 0x2c7   : > { %4607 = vst.msk [vmem:[#allocation2 + $0x34] sm:$0xf] %vm4593_vm13, %v4476_v41  ;;  %v3143_v41 = vrot.slane %v3141_v14, 5  ;;  %v3227_v14 = vshll.u32 %v2828_v35, 16 }
 0x2c8   : > { %v5270_v30 = vpop.permute.xlu2 %5269  ;;  %v4364_v38 = vsel %vm11473_vm5, %v4362_v31, %v4363_v36  ;;  %v12453_v31 = vld [vmem:[%s10340_s19 + $0xb8] sm:$0xf] }
 0x2c9   : > { %5592 = vrot.lane.b32.xlu1 %v5467_v11, %s10295_s27  ;;  %5402 = vst.msk [vmem:[#allocation2 + $0x30] sm:$0xf] %vm5389_vm14, %v5270_v30  ;;  %v4977_v11 = vshll.u32 %v4677_v54, 16  ;;  %v4972_v30 = vrot.slane %v4967_v0, 4  ;;  %v3144_v10 = vsel %vm11456_vm2, %v3139_v4, %v3143_v41  ;;  %v12410_v4 = vrot.slane %v3227_v14, 5 }
 0x2ca   : > { %v6019_v48 = vpop.f32.mrf.mxu2  ;;  %v4388_v14 = vrot.slane %v12453_v31, 7 }
 0x2cb   : > { %v5589_v23 = vpop.permute.xlu1 %5588  ;;  %v10071_v9 = vld [vmem:[#allocation2] sm:$0xff]  ;;  %v6074_v7 = vadd.f32 %v6019_v48, %v5813_v6  ;;  %v3856_v6 = vsel %vm11444_vm15, %v3854_v55, %v3855_v39  ;;  %v4979_v26 = vor.u32 %v4977_v11, %v4976_v33 }
 0x2cc   : > { %5706 = vst.msk [vmem:[#allocation2 + $0x6c] sm:$0xf] %vm5678_vm1, %v5589_v23  ;;  %5590 = vrot.lane.b32.xlu0 %v5466_v5, %s10295_s27  ;;  %9343 = vmatmul.msk.bf16.vlgmr.msra.gmra.mxu0 %vm5915_vm3, %v10071_v9  ;;  %v4960_v5 = vshrl.u32 %v4675_v56, 16  ;;  %v3659_v9 = vld [vmem:[%s10340_s19 + $0x84] sm:$0xe] }
 0x2cd   : > { %6106 = vst.msk [vmem:[#allocation3 + $0x88] sm:$0xff] %vm5731_vm4, %v6074_v7  ;;  %v4980_v48 = vsel %vm11502_vm8, %v4972_v30, %v4979_v26  ;;  %v2915_v7 = vshll.u32 %v2789_v53, 16  ;;  %v2829_v30 = vld [vmem:[%s10340_s19 + $0xbc] sm:$0x1] }
 0x2ce   : > { %v5587_v3 = vpop.permute.xlu0 %5586  ;;  %4477 = vrot.lane.b32.xlu2 %v4333_v52, %s10293_s25  ;;  %v9262_v23 = vrot.slane %v4960_v5, 11  ;;  %v4970_v52 = vor.u32 %v4968_v59, %v4967_v0 }
 0x2cf   : > { %5705 = vst.msk [vmem:[#allocation2 + $0x68] sm:$0xf] %vm5678_vm1, %v5587_v3  ;;  %v12383_v29 = vrot.slane %v2915_v7, 5  ;;  %v3672_v7 = vld [vmem:[%s10340_s19 + $0xb8] sm:$0xf] }
 0x2d0   : > { %v3476_v43 = vpop.permute.xlu2 %3475 }
 0x2d1   : > { %3477 = vrot.lane.b32.xlu1 %v3134_v63, %s10292_s24  ;;  %3599 = vst.msk [vmem:[#allocation2 + $0x54] sm:$0xf] %vm3577_vm10, %v3476_v43  ;;  %v2919_v63 = vshrl.u32 %v2789_v53, 16  ;;  %v9214_v43 = vrot.slane %v3659_v9, 9  ;;  %v3237_v9 = vshll.u32 %v2829_v30, 16 }
 0x2d3   : > { %v3474_v37 = vpop.permute.xlu1 %3473  ;;  %v2921_v58 = vrot.slane %v2919_v63, 4  ;;  %v5460_v63 = vld [vmem:[%s10340_s19 + $0x88] sm:$0xf] }
 0x2d4   : > { %3598 = vst.msk [vmem:[#allocation2 + $0x50] sm:$0xf] %vm3577_vm10, %v3474_v37  ;;  %5275 = vrot.lane.b32.xlu0 %v4892_v19, %s10294_s26  ;;  %v2906_v19 = vshrl.u32 %v2788_v44, 16  ;;  %v4971_v37 = vsel %vm11502_vm8, %v9262_v23, %v4970_v52  ;;  %v5807_v52 = vld [vmem:[#allocation3 + $0x58] sm:$0xff] }
 0x2d5   : > { %v2922_v13 = vor.u32 %v2921_v58, %v12383_v29  ;;  %v3673_v58 = vld [vmem:[%s10340_s19 + $0xbc] sm:$0x1] }
 0x2d6   : > { %v5272_v49 = vpop.permute.xlu0 %5271  ;;  %v10084_v40 = vld [vmem:[#allocation2 + $0x68] sm:$0xff]  ;;  %5540 = vrot.lane.b32.xlu2 %v5441_v25, %s10295_s27  ;;  %v5820_v25 = vld [vmem:[#allocation3 + $0xc0] sm:$0xff]  ;;  %v2908_v54 = vrot.slane %v2906_v19, 4  ;;  %v3239_v19 = vrot.slane %v3237_v9, 5  ;;  %v3883_v62 = vrot.slane %v3673_v58, 5 }
 0x2d7   : > { %5403 = vst.msk [vmem:[#allocation2 + $0x34] sm:$0xf] %vm5389_vm14, %v5272_v49  ;;  %9356 = vmatmul.msk.bf16.gmra.mxu3 %vm5915_vm3, %v10084_v40  ;;  %v3853_v49 = vsel %vm11444_vm15, %v9214_v43, %v3852_v8  ;;  %v5461_v8 = vld [vmem:[%s10340_s19 + $0x8c] sm:$0xf] }
 0x2d8   : > { %v3982_v46 = vpop.permute.xlu2 %3981 }
 0x2d9   : > { %5564 = vrot.lane.b32.xlu1 %v5453_v32, %s10295_s27  ;;  %4106 = vst.msk [vmem:[#allocation2 + $0x50] sm:$0xf] %vm4085_vm11, %v3982_v46 }
 0x2db   : > { %v5561_v50 = vpop.permute.xlu1 %5560 }
 0x2dc   : > { %5692 = vst.msk [vmem:[#allocation2 + $0x34] sm:$0xf] %vm5678_vm1, %v5561_v50  ;;  %5562 = vrot.lane.b32.xlu0 %v5452_v22, %s10295_s27  ;;  %v2911_v22 = vrot.slane %v2909_v2, 5  ;;  %v3880_v2 = vrot.slane %v3672_v7, 5 }
 0x2de   : > { %v5559_v1 = vpop.permute.xlu0 %5558  ;;  %5273 = vrot.lane.b32.xlu2 %v4883_v51, %s10294_s26  ;;  %v2912_v50 = vor.u32 %v2911_v22, %v2908_v54  ;;  %v2923_v51 = vrot.slane %v2922_v13, 4  ;;  %v3671_v22 = vld [vmem:[%s10340_s19 + $0xb4] sm:$0xe] }
 0x2df   : > { %5691 = vst.msk [vmem:[#allocation2 + $0x30] sm:$0xf] %vm5678_vm1, %v5559_v1  ;;  %v3632_v1 = vld [vmem:[%s10340_s19 + $0x18] sm:$0xe] }
 0x2e0   : > { %v4492_v57 = vpop.permute.xlu2 %4491  ;;  %v2913_v33 = vrot.slane %v2912_v50, 4  ;;  %v2928_v56 = vsel %vm11456_vm2, %v2923_v51, %v2927_v61  ;;  %v9205_v53 = vrot.slane %v3632_v1, 9  ;;  %v3634_v1 = vld [vmem:[%s10340_s19 + $0x20] sm:$0x1] }
 0x2e1   : > { %4493 = vrot.lane.b32.xlu1 %v4361_v45, %s10293_s25  ;;  %v3231_v45 = vshrl.u32 %v2828_v35, 16  ;;  %v4179_v35 = vld [vmem:[%s10340_s19 + $0xb4] sm:$0x8] }
 0x2e2   : > { %v2918_v26 = vsel %vm11456_vm2, %v2913_v33, %v12383_v29  ;;  %v9242_v61 = vrot.slane %v4179_v35, 11  ;;  %v5442_v35 = vld [vmem:[%s10340_s19 + $0x1c] sm:$0xf] }
 0x2e3   : > { %v4490_v60 = vpop.permute.xlu1 %4489  ;;  %v3233_v41 = vrot.slane %v3231_v45, 4  ;;  %v4142_v45 = vld [vmem:[%s10340_s19 + $0x20] sm:$0x7] }
 0x2e4   : > { %4614 = vst.msk [vmem:[#allocation2 + $0x50] sm:$0xf] %vm4593_vm13, %v4490_v60  ;;  %3987 = vrot.lane.b32.xlu0 %v3856_v6, %s10291_s23  ;;  %v12415_v6 = vld [vmem:[%s10340_s19 + $0x1c] sm:$0xf]  ;;  %v2827_v60 = vld [vmem:[%s10340_s19 + $0xb4] sm:$0xf] }
 0x2e5   : > { %v3234_v23 = vor.u32 %v3233_v41, %v12410_v4  ;;  %v3218_v44 = vshrl.u32 %v2827_v60, 16 }
 0x2e6   : > { %v3984_v47 = vpop.permute.xlu0 %3983  ;;  %v10077_v3 = vld [vmem:[#allocation2 + $0x30] sm:$0xff]  ;;  %3479 = vrot.lane.b32.xlu2 %v3144_v10, %s10292_s24  ;;  %v3789_v10 = vrot.slane %v12415_v6, 5  ;;  %v4689_v6 = vld [vmem:[%s10340_s19 + $0xbc] sm:$0xf] }
 0x2e7   : > { %4107 = vst.msk [vmem:[#allocation2 + $0x54] sm:$0xf] %vm4085_vm11, %v3984_v47  ;;  %9349 = vmatmul.msk.bf16.gmra.mxu1 %vm5915_vm3, %v10077_v3  ;;  %v3221_v47 = vshll.u32 %v2827_v60, 16  ;;  %v3792_v60 = vrot.slane %v3634_v1, 5 }
 0x2e8   : > { %4615 = vst.msk [vmem:[#allocation2 + $0x54] sm:$0xf] %vm4593_vm13, %v4492_v57  ;;  %v5575_v17 = vpop.permute.xlu2 %5574  ;;  %v3790_v43 = vsel %vm11444_vm15, %v9205_v53, %v3789_v10 }
 0x2e9   : > { %5291 = vrot.lane.b32.xlu1 %v4980_v48, %s10294_s26  ;;  %v3223_v12 = vrot.slane %v3221_v47, 5  ;;  %v12489_v47 = vld [vmem:[%s10340_s19 + $0xb8] sm:$0xf] }
 0x2ea   : > { %v6037_v16 = vpop.f32.mrf.mxu3 }
 0x2eb   : > { %v5288_v32 = vpop.permute.xlu1 %5287  ;;  %v6081_v40 = vadd.f32 %v6037_v16, %v5820_v25 }
 0x2ec   : > { %5411 = vst.msk [vmem:[#allocation2 + $0x54] sm:$0xf] %vm5389_vm14, %v5288_v32  ;;  %5289 = vrot.lane.b32.xlu0 %v4971_v37, %s10294_s26  ;;  %v3220_v32 = vrot.slane %v3218_v44, 4 }
 0x2ed   : > { %6113 = vst.msk [vmem:[#allocation3 + $0xc0] sm:$0xff] %vm5731_vm4, %v6081_v40  ;;  %v3882_v40 = vrot.slane %v3880_v2, 4 }
 0x2ee   : > { %v5286_v46 = vpop.permute.xlu0 %5285  ;;  %3985 = vrot.lane.b32.xlu2 %v3853_v49, %s10291_s23  ;;  %v3224_v13 = vor.u32 %v3223_v12, %v3220_v32 }
 0x2ef   : > { %5410 = vst.msk [vmem:[#allocation2 + $0x50] sm:$0xf] %vm5389_vm14, %v5286_v46  ;;  %v3884_v21 = vsel %vm11444_vm15, %v3882_v40, %v3883_v62  ;;  %v9218_v46 = vrot.slane %v3671_v22, 9 }
 0x2f0   : > { %5699 = vst.msk [vmem:[#allocation2 + $0x50] sm:$0xf] %vm5678_vm1, %v5575_v17  ;;  %v2648_v20 = vpop.permute.xlu2 %2647  ;;  %v3235_v17 = vrot.slane %v3234_v23, 4  ;;  %v3225_v50 = vrot.slane %v3224_v13, 4 }
 0x2f1   : > { %2649 = vrot.lane.b32.xlu1 %v2523_v15, %s10290_s22  ;;  %2763 = vst.msk [vmem:[#allocation2 + $0x74] sm:$0xf] %vm2733_vm9, %v2648_v20  ;;  %v2524_v15 = vld [vmem:[%s10340_s19 + $0xb8] sm:$0xf]  ;;  %v4650_v20 = vld [vmem:[%s10340_s19 + $0x20] sm:$0xf] }
 0x2f2   : > { %v6039_v55 = vpop.f32.mrf.mxu3  ;;  %v3240_v49 = vsel %vm11456_vm2, %v3235_v17, %v3239_v19  ;;  %v3230_v33 = vsel %vm11456_vm2, %v3225_v50, %v12410_v4  ;;  %v4779_v30 = vshll.u32 %v4650_v20, 16  ;;  %v3791_v4 = vrot.slane %v3789_v10, 4  ;;  %v4140_v19 = vld [vmem:[%s10340_s19 + $0x18] sm:$0x8] }
 0x2f3   : > { %v2646_v39 = vpop.permute.xlu1 %2645  ;;  %v6082_v0 = vadd.f32 %v6039_v55, %v5821_v34  ;;  %v4649_v34 = vld [vmem:[%s10340_s19 + $0x1c] sm:$0xf]  ;;  %v9229_v32 = vrot.slane %v4140_v19, 11  ;;  %v4390_v50 = vrot.slane %v4388_v14, 4  ;;  %v4145_v19 = vld [vmem:[%s10340_s19 + $0x2c] sm:$0x7] }
 0x2f4   : > { %2762 = vst.msk [vmem:[#allocation2 + $0x70] sm:$0xf] %vm2733_vm9, %v2646_v39  ;;  %5580 = vrot.lane.b32.xlu0 %v5461_v8, %s10295_s27  ;;  %v6002_v11 = vpop.f32.mrf.mxu1  ;;  %v12457_v8 = vld [vmem:[%s10340_s19 + $0x1c] sm:$0xf]  ;;  %v3881_v39 = vsel %vm11444_vm15, %v9218_v46, %v3880_v2 }
 0x2f5   : > { %6114 = vst.msk [vmem:[#allocation3 + $0xc8] sm:$0xff] %vm5731_vm4, %v6082_v0  ;;  %v6067_v5 = vadd.f32 %v6002_v11, %v5806_v18  ;;  %v4297_v55 = vrot.slane %v12457_v8, 7  ;;  %v4767_v18 = vshrl.u32 %v4649_v34, 16  ;;  %v4389_v11 = vsel %vm11473_vm5, %v9242_v61, %v4388_v14  ;;  %v4181_v46 = vld [vmem:[%s10340_s19 + $0xbc] sm:$0x7] }
 0x2f6   : > { %v5577_v57 = vpop.permute.xlu0 %5576  ;;  %4495 = vrot.lane.b32.xlu2 %v4364_v38, %s10293_s25  ;;  %v4776_v38 = vshrl.u32 %v4650_v20, 16  ;;  %v2792_v20 = vld [vmem:[%s10340_s19 + $0x28] sm:$0xf] }
 0x2f7   : > { %5700 = vst.msk [vmem:[#allocation2 + $0x54] sm:$0xf] %vm5678_vm1, %v5577_v57  ;;  %v4299_v41 = vrot.slane %v4297_v55, 4  ;;  %v4769_v57 = vrot.slane %v4767_v18, 7  ;;  %v4298_v13 = vsel %vm11473_vm5, %v9229_v32, %v4297_v55  ;;  %v2939_v55 = vshll.u32 %v2792_v20, 16 }
 0x2f8   : > { %6099 = vst.msk [vmem:[#allocation3 + $0x50] sm:$0xff] %vm5731_vm4, %v6067_v5  ;;  %v3490_v59 = vpop.permute.xlu2 %3489  ;;  %v4778_v5 = vrot.slane %v4776_v38, 7  ;;  %v2943_v18 = vshrl.u32 %v2792_v20, 16  ;;  %v4307_v32 = vrot.slane %v4145_v19, 7 }
 0x2f9   : > { %3443 = vrot.lane.b32.xlu1 %v2928_v56, %s10292_s24  ;;  %3606 = vst.msk [vmem:[#allocation2 + $0x70] sm:$0xf] %vm3577_vm10, %v3490_v59  ;;  %v4300_v56 = vrot.slane %v4142_v45, 7  ;;  %v4687_v45 = vld [vmem:[%s10340_s19 + $0xb4] sm:$0x8] }
 0x2fa   : > { %v4781_v7 = vor.u32 %v4779_v30, %v4778_v5  ;;  %v5048_v14 = vshrl.u32 %v4687_v45, 16  ;;  %v12536_v5 = vld [vmem:[%s10340_s19 + $0x28] sm:$0xf] }
 0x2fb   : > { %v3440_v48 = vpop.permute.xlu1 %3439  ;;  %v4301_v9 = vsel %vm11473_vm5, %v4299_v41, %v4300_v56  ;;  %v2945_v56 = vrot.slane %v2943_v18, 4  ;;  %v2793_v41 = vld [vmem:[%s10340_s19 + $0x2c] sm:$0x1] }
 0x2fc   : > { %3581 = vst.msk [vmem:[#allocation2 + $0xc] sm:$0xf] %vm3577_vm10, %v3440_v48  ;;  %3441 = vrot.lane.b32.xlu0 %v2918_v26, %s10292_s24  ;;  %v6004_v3 = vpop.f32.mrf.mxu1  ;;  %v4648_v26 = vld [vmem:[%s10340_s19 + $0x18] sm:$0x8]  ;;  %v5814_v48 = vld [vmem:[#allocation3 + $0x90] sm:$0xff]  ;;  %v9266_v30 = vrot.slane %v5048_v14, 11 }
 0x2fd   : > { %v6068_v25 = vadd.f32 %v6004_v3, %v5807_v52  ;;  %v4762_v23 = vshrl.u32 %v4648_v26, 16  ;;  %v4774_v52 = vrot.slane %v4769_v57, 4  ;;  %v3793_v3 = vsel %vm11444_vm15, %v3791_v4, %v3792_v60  ;;  %v2791_v60 = vld [vmem:[%s10340_s19 + $0x24] sm:$0xf] }
 0x2fe   : > { %v3438_v37 = vpop.permute.xlu0 %3437  ;;  %v10081_v29 = vld [vmem:[#allocation2 + $0x50] sm:$0xff]  ;;  %5578 = vrot.lane.b32.xlu2 %v5460_v63, %s10295_s27  ;;  %v4770_v63 = vshll.u32 %v4649_v34, 16 }
 0x2ff   : > { %3580 = vst.msk [vmem:[#allocation2 + $0x8] sm:$0xf] %vm3577_vm10, %v3438_v37  ;;  %9353 = vmatmul.msk.bf16.gmra.mxu2 %vm5915_vm3, %v10081_v29  ;;  %v9253_v17 = vrot.slane %v4762_v23, 11  ;;  %v4782_v2 = vsel %vm11502_vm8, %v4774_v52, %v4781_v7  ;;  %v5062_v29 = vshrl.u32 %v4689_v6, 16  ;;  %v2949_v23 = vshll.u32 %v2793_v41, 16 }
 0x300   : > { %6100 = vst.msk [vmem:[#allocation3 + $0x58] sm:$0xff] %vm5731_vm4, %v6068_v25  ;;  %v3948_v16 = vpop.permute.xlu2 %3947  ;;  %v4772_v37 = vor.u32 %v4770_v63, %v4769_v57  ;;  %v5053_v25 = vshrl.u32 %v12489_v47, 16  ;;  %v3635_v57 = vld [vmem:[%s10340_s19 + $0x24] sm:$0xe]  ;;  %v4144_v7 = vld [vmem:[%s10340_s19 + $0x28] sm:$0xf] }
 0x301   : > { %3949 = vrot.lane.b32.xlu1 %v3790_v43, %s10291_s23  ;;  %4089 = vst.msk [vmem:[#allocation2 + $0xc] sm:$0xf] %vm4085_vm11, %v3948_v16  ;;  %v5064_v62 = vrot.slane %v5062_v29, 7 }
 0x302   : > { %v4773_v16 = vsel %vm11502_vm8, %v9253_v17, %v4772_v37  ;;  %v5055_v40 = vrot.slane %v5053_v25, 7 }
 0x303   : > { %v3946_v54 = vpop.permute.xlu1 %3945 }
 0x304   : > { %4088 = vst.msk [vmem:[#allocation2 + $0x8] sm:$0xf] %vm4085_vm11, %v3946_v54  ;;  %3495 = vrot.lane.b32.xlu0 %v3240_v49, %s10292_s24  ;;  %v5815_v49 = vld [vmem:[#allocation3 + $0x98] sm:$0xff]  ;;  %v5065_v54 = vshll.u32 %v4689_v6, 16 }
 0x306   : > { %v3492_v36 = vpop.permute.xlu0 %3491  ;;  %2651 = vrot.lane.b32.xlu2 %v2524_v15, %s10290_s22  ;;  %v5067_v8 = vor.u32 %v5065_v54, %v5064_v62  ;;  %v5443_v62 = vld [vmem:[%s10340_s19 + $0x20] sm:$0xf] }
 0x307   : > { %3607 = vst.msk [vmem:[#allocation2 + $0x74] sm:$0xf] %vm3577_vm10, %v3492_v36  ;;  %v5060_v36 = vrot.slane %v5055_v40, 4 }
 0x308   : > { %v3462_v51 = vpop.permute.xlu2 %3461 }
 0x309   : > { %4003 = vrot.lane.b32.xlu1 %v3884_v21, %s10291_s23  ;;  %3592 = vst.msk [vmem:[#allocation2 + $0x38] sm:$0xf] %vm3577_vm10, %v3462_v51  ;;  %v4391_v51 = vrot.slane %v4181_v46, 7 }
 0x30b   : > { %v4000_v0 = vpop.permute.xlu1 %3999  ;;  %v4392_v31 = vsel %vm11473_vm5, %v4390_v50, %v4391_v51 }
 0x30c   : > { %4115 = vst.msk [vmem:[#allocation2 + $0x74] sm:$0xf] %vm4085_vm11, %v4000_v0  ;;  %4001 = vrot.lane.b32.xlu0 %v3881_v39, %s10291_s23  ;;  %v5068_v39 = vsel %vm11502_vm8, %v5060_v36, %v5067_v8  ;;  %v5056_v0 = vshll.u32 %v12489_v47, 16  ;;  %v2933_v47 = vshll.u32 %v2791_v60, 16 }
 0x30e   : > { %v3998_v59 = vpop.permute.xlu0 %3997  ;;  %3493 = vrot.lane.b32.xlu2 %v3230_v33, %s10292_s24  ;;  %v5469_v33 = vld [vmem:[%s10340_s19 + $0xbc] sm:$0xf]  ;;  %v5058_v26 = vor.u32 %v5056_v0, %v5055_v40  ;;  %v2935_v37 = vrot.slane %v2933_v47, 5  ;;  %v4653_v40 = vld [vmem:[%s10340_s19 + $0x2c] sm:$0xf] }
 0x30f   : > { %4114 = vst.msk [vmem:[#allocation2 + $0x70] sm:$0xf] %vm4085_vm11, %v3998_v59  ;;  %v5468_v59 = vld [vmem:[%s10340_s19 + $0xb8] sm:$0xf]  ;;  %v4801_v50 = vshll.u32 %v4653_v40, 16 }
 0x310   : > { %v4456_v53 = vpop.permute.xlu2 %4455  ;;  %v5059_v63 = vsel %vm11502_vm8, %v9266_v30, %v5058_v26  ;;  %v9427_v30 = vld [vmem:[%s13770_s1 + $0x14] sm:$0xf]  ;;  %v10104_v26 = vld [vmem:[%s13770_s1 + $0x14] sm:$0x30] }
 0x311   : > { %4509 = vrot.lane.b32.xlu1 %v4389_v11, %s10293_s25  ;;  %4597 = vst.msk [vmem:[#allocation2 + $0xc] sm:$0xf] %vm4593_vm13, %v4456_v53  ;;  %v12530_v11 = vrot.slane %v2939_v55, 5 }
 0x312   : > { %v6022_v10 = vpop.f32.mrf.mxu2 }
 0x313   : > { %v4454_v44 = vpop.permute.xlu1 %4453  ;;  %v6075_v43 = vadd.f32 %v6022_v10, %v5814_v48  ;;  %v2946_v53 = vor.u32 %v2945_v56, %v12530_v11  ;;  %v3796_v48 = vrot.slane %v12536_v5, 5  ;;  %v2951_v10 = vrot.slane %v2949_v23, 5  ;;  %v4651_v56 = vld [vmem:[%s10340_s19 + $0x24] sm:$0x8] }
 0x314   : > { %4596 = vst.msk [vmem:[#allocation2 + $0x8] sm:$0xf] %vm4593_vm13, %v4454_v44  ;;  %4459 = vrot.lane.b32.xlu0 %v4301_v9, %s10293_s25  ;;  %v9206_v9 = vrot.slane %v3635_v57, 9  ;;  %v2930_v44 = vshrl.u32 %v2791_v60, 16  ;;  %v4784_v57 = vshrl.u32 %v4651_v56, 16 }
 0x315   : > { %6107 = vst.msk [vmem:[#allocation3 + $0x90] sm:$0xff] %vm5731_vm4, %v6075_v43  ;;  %v2947_v6 = vrot.slane %v2946_v53, 4  ;;  %v4304_v43 = vrot.slane %v4144_v7, 7  ;;  %v3798_v14 = vrot.slane %v3796_v48, 4  ;;  %v5796_v53 = vld [vmem:[#allocation3] sm:$0xff] }
 0x316   : > { %v3464_v58 = vpop.permute.xlu0 %3463  ;;  %3951 = vrot.lane.b32.xlu2 %v3793_v3, %s10291_s23  ;;  %v3797_v3 = vsel %vm11444_vm15, %v9206_v9, %v3796_v48  ;;  %v9254_v23 = vrot.slane %v4784_v57, 11  ;;  %v9628_v56 = vld [vmem:[%s13770_s1 + $0x60] sm:$0x3] }
 0x317   : > { %3593 = vst.msk [vmem:[#allocation2 + $0x3c] sm:$0xf] %vm3577_vm10, %v3464_v58  ;;  %v2952_v29 = vsel %vm11456_vm2, %v2947_v6, %v2951_v10  ;;  %v4306_v58 = vrot.slane %v4304_v43, 4  ;;  %v5797_v10 = vld [vmem:[#allocation3 + $0x8] sm:$0xff] }
 0x318   : > { %v3970_v12 = vpop.permute.xlu2 %3969 }
 0x319   : > { %5255 = vrot.lane.b32.xlu1 %v4782_v2, %s10294_s26  ;;  %4100 = vst.msk [vmem:[#allocation2 + $0x38] sm:$0xf] %vm4085_vm11, %v3970_v12  ;;  %v2932_v2 = vrot.slane %v2930_v44, 4 }
 0x31a   : > { %v6024_v15 = vpop.f32.mrf.mxu2 }
 0x31b   : > { %v4508_v22 = vpop.permute.xlu1 %4507  ;;  %v6076_v21 = vadd.f32 %v6024_v15, %v5815_v49  ;;  %v4652_v49 = vld [vmem:[%s10340_s19 + $0x28] sm:$0xf]  ;;  %v2936_v54 = vor.u32 %v2935_v37, %v2932_v2  ;;  %v4308_v15 = vsel %vm11473_vm5, %v4306_v58, %v4307_v32  ;;  %v5445_v2 = vld [vmem:[%s10340_s19 + $0x2c] sm:$0xf] }
 0x31c   : > { %4623 = vst.msk [vmem:[#allocation2 + $0x74] sm:$0xf] %vm4593_vm13, %v4508_v22  ;;  %5253 = vrot.lane.b32.xlu0 %v4773_v16, %s10294_s26  ;;  %v4143_v16 = vld [vmem:[%s10340_s19 + $0x24] sm:$0x8]  ;;  %v4792_v5 = vshll.u32 %v4652_v49, 16 }
 0x31d   : > { %6108 = vst.msk [vmem:[#allocation3 + $0x98] sm:$0xff] %vm5731_vm4, %v6076_v21  ;;  %v9230_v22 = vrot.slane %v4143_v16, 11  ;;  %v4798_v21 = vshrl.u32 %v4653_v40, 16  ;;  %v10121_v58 = vld [vmem:[%s13770_s1 + $0x28] sm:$0x30]  ;;  %v5822_v16 = vld [vmem:[#allocation3 + $0xd0] sm:$0xff] }
 0x31e   : > { %v4506_v34 = vpop.permute.xlu0 %4505  ;;  %4457 = vrot.lane.b32.xlu2 %v4298_v13, %s10293_s25  ;;  %v4789_v13 = vshrl.u32 %v4652_v49, 16 }
 0x31f   : > { %4622 = vst.msk [vmem:[#allocation2 + $0x70] sm:$0xf] %vm4593_vm13, %v4506_v34  ;;  %v4305_v8 = vsel %vm11473_vm5, %v9230_v22, %v4304_v43  ;;  %v4800_v20 = vrot.slane %v4798_v21, 7 }
 0x320   : > { %v5252_v61 = vpop.permute.xlu2 %5251  ;;  %v4791_v34 = vrot.slane %v4789_v13, 7 }
 0x321   : > { %5542 = vrot.lane.b32.xlu1 %v5442_v35, %s10295_s27  ;;  %5393 = vst.msk [vmem:[#allocation2 + $0xc] sm:$0xf] %vm5389_vm14, %v5252_v61  ;;  %v2937_v35 = vrot.slane %v2936_v54, 4  ;;  %v4803_v18 = vor.u32 %v4801_v50, %v4800_v20 }
 0x322   : > { %v4796_v55 = vrot.slane %v4791_v34, 4  ;;  %v4794_v9 = vor.u32 %v4792_v5, %v4791_v34  ;;  %v5808_v34 = vld [vmem:[#allocation3 + $0x60] sm:$0xff] }
 0x323   : > { %v5250_v38 = vpop.permute.xlu1 %5249  ;;  %v2942_v45 = vsel %vm11456_vm2, %v2937_v35, %v12530_v11 }
 0x324   : > { %5392 = vst.msk [vmem:[#allocation2 + $0x8] sm:$0xf] %vm5389_vm14, %v5250_v38  ;;  %5307 = vrot.lane.b32.xlu0 %v5068_v39, %s10294_s26  ;;  %v3637_v39 = vld [vmem:[%s10340_s19 + $0x2c] sm:$0x1]  ;;  %v5444_v38 = vld [vmem:[%s10340_s19 + $0x28] sm:$0xf]  ;;  %v4804_v11 = vsel %vm11502_vm8, %v4796_v55, %v4803_v18  ;;  %v4795_v47 = vsel %vm11502_vm8, %v9254_v23, %v4794_v9 }
 0x325   : > { %v3799_v0 = vrot.slane %v3637_v39, 5  ;;  %v5816_v23 = vld [vmem:[#allocation3 + $0xa0] sm:$0xff] }
 0x326   : > { %v3972_v1 = vpop.permute.xlu0 %3971  ;;  %4511 = vrot.lane.b32.xlu2 %v4392_v31, %s10293_s25 }
 0x327   : > { %4101 = vst.msk [vmem:[#allocation2 + $0x3c] sm:$0xf] %vm4085_vm11, %v3972_v1  ;;  %v3800_v41 = vsel %vm11444_vm15, %v3798_v14, %v3799_v0 }
 0x328   : > { %v4478_v4 = vpop.permute.xlu2 %4477 }
 0x329   : > { %5596 = vrot.lane.b32.xlu1 %v5469_v33, %s10295_s27  ;;  %4608 = vst.msk [vmem:[#allocation2 + $0x38] sm:$0xf] %vm4593_vm13, %v4478_v4 }
 0x32b   : > { %v5304_v52 = vpop.permute.xlu1 %5303 }
 0x32c   : > { %5419 = vst.msk [vmem:[#allocation2 + $0x74] sm:$0xf] %vm5389_vm14, %v5304_v52  ;;  %5594 = vrot.lane.b32.xlu0 %v5468_v59, %s10295_s27  ;;  %v9428_v59 = vor.u32 %v10104_v26, %v9427_v30  ;;  %v10139_v26 = vld [vmem:[%s13770_s1 + $0x44] sm:$0xff] }
 0x32e   : > { %v5302_v17 = vpop.permute.xlu0 %5301  ;;  %5305 = vrot.lane.b32.xlu2 %v5059_v63, %s10294_s26  ;;  %v6323_v48 = vsel %vm5964_vm12, %v9428_v59, 0 }
 0x32f   : > { %5418 = vst.msk [vmem:[#allocation2 + $0x70] sm:$0xf] %vm5389_vm14, %v5302_v17  ;;  %6332 = vmatpush.bf16.msrb.mxu1 %v6323_v48 }
 0x330   : > { %v5541_v25 = vpop.permute.xlu2 %5540 }
 0x331   : > { %3953 = vrot.lane.b32.xlu1 %v3797_v3, %s10291_s23  ;;  %5682 = vst.msk [vmem:[#allocation2 + $0xc] sm:$0xf] %vm5678_vm1, %v5541_v25 }
 0x333   : > { %v5539_v12 = vpop.permute.xlu1 %5538 }
 0x334   : > { %5681 = vst.msk [vmem:[#allocation2 + $0x8] sm:$0xf] %vm5678_vm1, %v5539_v12  ;;  %3447 = vrot.lane.b32.xlu0 %v2952_v29, %s10292_s24  ;;  %v9513_v29 = vld [vmem:[%s13770_s1 + $0x28] sm:$0xf] }
 0x335   : > { %v9514_v12 = vor.u32 %v10121_v58, %v9513_v29 }
 0x336   : > { %v4480_v46 = vpop.permute.xlu0 %4479  ;;  %5544 = vrot.lane.b32.xlu2 %v5443_v62, %s10295_s27 }
 0x337   : > { %4609 = vst.msk [vmem:[#allocation2 + $0x3c] sm:$0xf] %vm4593_vm13, %v4480_v46  ;;  %v6680_v40 = vsel %vm5964_vm12, %v9514_v12, 0  ;;  %v5823_v46 = vld [vmem:[#allocation3 + $0xd8] sm:$0xff] }
 0x338   : > { %v5274_v36 = vpop.permute.xlu2 %5273  ;;  %6689 = vmatpush.bf16.msrb.mxu2 %v6680_v40  ;;  %v10156_v40 = vld [vmem:[%s13770_s1 + $0x50] sm:$0xff] }
 0x339   : > { %4463 = vrot.lane.b32.xlu1 %v4308_v15, %s10293_s25  ;;  %5404 = vst.msk [vmem:[#allocation2 + $0x38] sm:$0xf] %vm5389_vm14, %v5274_v36  ;;  %v9535_v15 = vld [vmem:[%s13770_s1 + $0x4c] sm:$0x3] }
 0x33a   : > { %v6995_v21 = vunpack.c.l.b16 %v9535_v15 }
 0x33b   : > { %v5593_v51 = vpop.permute.xlu1 %5592  ;;  %v10072_v61 = vld [vmem:[#allocation2 + $0x8] sm:$0xff] }
 0x33c   : > { %5708 = vst.msk [vmem:[#allocation2 + $0x74] sm:$0xf] %vm5678_vm1, %v5593_v51  ;;  %4461 = vrot.lane.b32.xlu0 %v4305_v8, %s10293_s25  ;;  %9344 = vmatmul.msk.bf16.gmra.mxu0 %vm5915_vm3, %v10072_v61  ;;  %v6998_v36 = vpack.c.b16 %v6995_v21, %v6995_v21  ;;  %v10088_v39 = vld [vmem:[#allocation2 + $0x8] sm:$0xff] }
 0x33e   : > { %v5591_v31 = vpop.permute.xlu0 %5590  ;;  %3445 = vrot.lane.b32.xlu2 %v2942_v45, %s10292_s24  ;;  %v7052_v50 = vsel %vm1189_vm0, %v6998_v36, 0 }
 0x33f   : > { %5707 = vst.msk [vmem:[#allocation2 + $0x70] sm:$0xf] %vm5678_vm1, %v5591_v31  ;;  %7059 = vmatpush.bf16.msrb.mxu3 %v7052_v50  ;;  %v2525_v50 = vld [vmem:[%s10340_s19 + $0xc0] sm:$0xf] }
 0x340   : > { %v3480_v33 = vpop.permute.xlu2 %3479 }
 0x341   : > { %5546 = vrot.lane.b32.xlu1 %v5444_v38, %s10295_s27  ;;  %3601 = vst.msk [vmem:[#allocation2 + $0x5c] sm:$0xf] %vm3577_vm10, %v3480_v33  ;;  %v5809_v38 = vld [vmem:[#allocation3 + $0x68] sm:$0xff] }
 0x343   : > { %v3478_v1 = vpop.permute.xlu1 %3477  ;;  %7060 = vmatpush.bf16.msrb.mxu3 %v10139_v26 }
 0x344   : > { %3600 = vst.msk [vmem:[#allocation2 + $0x58] sm:$0xf] %vm3577_vm10, %v3478_v1  ;;  %5259 = vrot.lane.b32.xlu0 %v4804_v11, %s10294_s26  ;;  %v7367_v1 = vunpack.c.l.b16 %v9628_v56 }
 0x346   : > { %v5276_v4 = vpop.permute.xlu0 %5275  ;;  %v10085_v60 = vld [vmem:[#allocation2 + $0x70] sm:$0xff]  ;;  %3955 = vrot.lane.b32.xlu2 %v3800_v41, %s10291_s23  ;;  %v7370_v57 = vpack.c.b16 %v7367_v1, %v7367_v1 }
 0x347   : > { %5405 = vst.msk [vmem:[#allocation2 + $0x3c] sm:$0xf] %vm5389_vm14, %v5276_v4  ;;  %9357 = vmatmul.msk.bf16.gmra.mxu3 %vm5915_vm3, %v10085_v60 }
 0x348   : > { %v3986_v52 = vpop.permute.xlu2 %3985  ;;  %v7422_v5 = vsel %vm1189_vm0, %v7370_v57, 0  ;;  %v10226_v57 = vld [vmem:[%s13770_s1 + $0xa0] sm:$0x30] }
 0x349   : > { %4108 = vst.msk [vmem:[#allocation2 + $0x58] sm:$0xf] %vm4085_vm11, %v3986_v52  ;;  %v5977_v7 = vpop.f32.mrf.mxu0  ;;  %7429 = vmatpush.bf16.msrb.mxu0 %v7422_v5 }
 0x34a   : > { %v6057_v44 = vadd.f32 %v5977_v7, %v5796_v53 }
 0x34b   : > { %v5565_v63 = vpop.permute.xlu1 %5564 }
 0x34c   : > { %5694 = vst.msk [vmem:[#allocation2 + $0x3c] sm:$0xf] %vm5678_vm1, %v5565_v63  ;;  %2653 = vrot.lane.b32.xlu0 %v2525_v50, %s10290_s22 }
 0x34d   : > { %6089 = vst.msk [vmem:[#allocation3] sm:$0xff] %vm5731_vm4, %v6057_v44  ;;  %v10157_v44 = vld [vmem:[%s13770_s1 + $0x58] sm:$0xff] }
 0x34e   : > { %v5563_v6 = vpop.permute.xlu0 %5562  ;;  %5257 = vrot.lane.b32.xlu2 %v4795_v47, %s10294_s26  ;;  %v10138_v47 = vld [vmem:[%s13770_s1 + $0x3c] sm:$0xff]  ;;  %7430 = vmatpush.bf16.msrb.mxu0 %v10157_v44  ;;  %v5798_v44 = vld [vmem:[#allocation3 + $0x10] sm:$0xff] }
 0x34f   : > { %5693 = vst.msk [vmem:[#allocation2 + $0x38] sm:$0xf] %vm5678_vm1, %v5563_v6  ;;  %v5817_v6 = vld [vmem:[#allocation3 + $0xa8] sm:$0xff]  ;;  %7061 = vmatpush.bf16.msrb.mxu3 %v10138_v47 }
 0x350   : > { %v4496_v3 = vpop.permute.xlu2 %4495 }
 0x351   : > { %v5979_v43 = vpop.f32.mrf.mxu0 }
 0x352   : > { %v6058_v19 = vadd.f32 %v5979_v43, %v5797_v10  ;;  %7431 = vmatpush.bf16.msrb.mxu0 %v10156_v40 }
 0x353   : > { %v4494_v17 = vpop.permute.xlu1 %4493 }
 0x354   : > { %4616 = vst.msk [vmem:[#allocation2 + $0x58] sm:$0xf] %vm4593_vm13, %v4494_v17 }
 0x355   : > { %6090 = vst.msk [vmem:[#allocation3 + $0x8] sm:$0xff] %vm5731_vm4, %v6058_v19 }
 0x356   : > { %v3988_v37 = vpop.permute.xlu0 %3987  ;;  %v10078_v25 = vld [vmem:[#allocation2 + $0x38] sm:$0xff]  ;;  %5548 = vrot.lane.b32.xlu2 %v5445_v2, %s10295_s27  ;;  %v9721_v2 = vld [vmem:[%s13770_s1 + $0x74] sm:$0x3] }
 0x357   : > { %4109 = vst.msk [vmem:[#allocation2 + $0x5c] sm:$0xf] %vm4085_vm11, %v3988_v37  ;;  %9350 = vmatmul.msk.bf16.gmra.mxu1 %vm5915_vm3, %v10078_v25  ;;  %v7737_v37 = vunpack.c.l.b16 %v9721_v2 }
 0x358   : > { %4617 = vst.msk [vmem:[#allocation2 + $0x5c] sm:$0xf] %vm4593_vm13, %v4496_v3  ;;  %v5579_v32 = vpop.permute.xlu2 %5578 }
 0x359   : > { %v7740_v29 = vpack.c.b16 %v7737_v37, %v7737_v37 }
 0x35a   : > { %v6042_v62 = vpop.f32.mrf.mxu3 }
 0x35b   : > { %v5292_v49 = vpop.permute.xlu1 %5291  ;;  %v6083_v54 = vadd.f32 %v6042_v62, %v5822_v16  ;;  %v7792_v58 = vsel %vm1189_vm0, %v7740_v29, 0  ;;  %v9878_v16 = vld [vmem:[%s13770_s1 + $0x78] sm:$0xf]  ;;  %vm7001_vm0 = vcmask 293888  }
 0x35c   : > { %5413 = vst.msk [vmem:[#allocation2 + $0x5c] sm:$0xf] %vm5389_vm14, %v5292_v49  ;;  %7799 = vmatpush.bf16.msra.mxu1 %v7792_v58  ;;  %v10192_v49 = vld [vmem:[%s13770_s1 + $0x78] sm:$0x30] }
 0x35d   : > { %6115 = vst.msk [vmem:[#allocation3 + $0xd0] sm:$0xff] %vm5731_vm4, %v6083_v54  ;;  %v9879_v62 = vor.u32 %v10192_v49, %v9878_v16 }
 0x35e   : > { %v5290_v22 = vpop.permute.xlu0 %5289 }
 0x35f   : > { %5412 = vst.msk [vmem:[#allocation2 + $0x58] sm:$0xf] %vm5389_vm14, %v5290_v22  ;;  %v8149_v21 = vsel %vm5964_vm12, %v9879_v62, 0 }
 0x360   : > { %5701 = vst.msk [vmem:[#allocation2 + $0x58] sm:$0xf] %vm5678_vm1, %v5579_v32  ;;  %v2652_v13 = vpop.permute.xlu2 %2651  ;;  %8158 = vmatpush.bf16.msra.mxu2 %v8149_v21 }
 0x361   : > { %2765 = vst.msk [vmem:[#allocation2 + $0x7c] sm:$0xf] %vm2733_vm9, %v2652_v13 }
 0x362   : > { %v6044_v8 = vpop.f32.mrf.mxu3 }
 0x363   : > { %v2650_v35 = vpop.permute.xlu1 %2649  ;;  %v6084_v20 = vadd.f32 %v6044_v8, %v5823_v46  ;;  %v9964_v8 = vld [vmem:[%s13770_s1 + $0x8c] sm:$0xf] }
 0x364   : > { %2764 = vst.msk [vmem:[#allocation2 + $0x78] sm:$0xf] %vm2733_vm9, %v2650_v35  ;;  %v6007_v51 = vpop.f32.mrf.mxu1 }
 0x365   : > { %6116 = vst.msk [vmem:[#allocation3 + $0xd8] sm:$0xff] %vm5731_vm4, %v6084_v20  ;;  %v6069_v45 = vadd.f32 %v6007_v51, %v5808_v34  ;;  %v10209_v34 = vld [vmem:[%s13770_s1 + $0x8c] sm:$0x30] }
 0x366   : > { %v5581_v61 = vpop.permute.xlu0 %5580  ;;  %v9965_v20 = vor.u32 %v10209_v34, %v9964_v8 }
 0x367   : > { %5702 = vst.msk [vmem:[#allocation2 + $0x5c] sm:$0xf] %vm5678_vm1, %v5581_v61  ;;  %9429 = vmatmul.msk.bf16.vlgmr.msrb.gmra.mxu1 %vm5915_vm3, %v10088_v39 }
 0x368   : > { %6101 = vst.msk [vmem:[#allocation3 + $0x60] sm:$0xff] %vm5731_vm4, %v6069_v45  ;;  %v3494_v55 = vpop.permute.xlu2 %3493  ;;  %v8506_v51 = vsel %vm5964_vm12, %v9965_v20, 0 }
 0x369   : > { %3608 = vst.msk [vmem:[#allocation2 + $0x78] sm:$0xf] %vm3577_vm10, %v3494_v55  ;;  %8515 = vmatpush.bf16.msra.mxu3 %v8506_v51 }
 0x36b   : > { %v3444_v18 = vpop.permute.xlu1 %3443 }
 0x36c   : > { %3583 = vst.msk [vmem:[#allocation2 + $0x14] sm:$0xf] %vm3577_vm10, %v3444_v18  ;;  %v6009_v31 = vpop.f32.mrf.mxu1  ;;  %v2831_v18 = vld [vmem:[%s10340_s19 + $0xc4] sm:$0xf] }
 0x36d   : > { %v6070_v0 = vadd.f32 %v6009_v31, %v5809_v38  ;;  %v2526_v31 = vld [vmem:[%s10340_s19 + $0xc4] sm:$0xf] }
 0x36e   : > { %v3442_v14 = vpop.permute.xlu0 %3441  ;;  %v10082_v33 = vld [vmem:[#allocation2 + $0x58] sm:$0xff]  ;;  %2655 = vrot.lane.b32.xlu1 %v2526_v31, %s10290_s22 }
 0x36f   : > { %3582 = vst.msk [vmem:[#allocation2 + $0x10] sm:$0xf] %vm3577_vm10, %v3442_v14  ;;  %9354 = vmatmul.msk.bf16.gmra.mxu2 %vm5915_vm3, %v10082_v33  ;;  %v3251_v14 = vshll.u32 %v2831_v18, 16 }
 0x370   : > { %6102 = vst.msk [vmem:[#allocation3 + $0x68] sm:$0xff] %vm5731_vm4, %v6070_v0  ;;  %v3952_v11 = vpop.permute.xlu2 %3951  ;;  %v3255_v0 = vshrl.u32 %v2831_v18, 16  ;;  %v5470_v18 = vld [vmem:[%s10340_s19 + $0xc4] sm:$0xf] }
 0x371   : > { %4091 = vst.msk [vmem:[#allocation2 + $0x14] sm:$0xf] %vm4085_vm11, %v3952_v11  ;;  %v12711_v33 = vrot.slane %v3251_v14, 5  ;;  %v2832_v11 = vld [vmem:[%s10340_s19 + $0xc8] sm:$0x1] }
 0x372   : > { %v3257_v56 = vrot.slane %v3255_v0, 4  ;;  %v3676_v14 = vld [vmem:[%s10340_s19 + $0xc8] sm:$0x1]  ;;  %v5824_v0 = vld [vmem:[#allocation3 + $0xe0] sm:$0xff] }
 0x373   : > { %v3950_v41 = vpop.permute.xlu1 %3949 }
 0x374   : > { %4090 = vst.msk [vmem:[#allocation2 + $0x10] sm:$0xf] %vm4085_vm11, %v3950_v41  ;;  %v10050_v41 = vld [vmem:[%s13770_s1 + $0xa0] sm:$0xf]  ;;  %v3258_v5 = vor.u32 %v3257_v56, %v12711_v33 }
 0x375   : > { %v10051_v26 = vor.u32 %v10226_v57, %v10050_v41  ;;  %v2527_v57 = vld [vmem:[%s10340_s19 + $0xcc] sm:$0xf] }
 0x376   : > { %v3496_v30 = vpop.permute.xlu0 %3495 }
 0x377   : > { %3609 = vst.msk [vmem:[#allocation2 + $0x7c] sm:$0xf] %vm3577_vm10, %v3496_v30  ;;  %v3261_v30 = vshll.u32 %v2832_v11, 16  ;;  %v3890_v11 = vrot.slane %v3676_v14, 5  ;;  %v10108_v14 = vld [vmem:[#allocation2 + $0x28] sm:$0xff] }
 0x378   : > { %v4458_v59 = vpop.permute.xlu2 %4457 }
 0x379   : > { %4598 = vst.msk [vmem:[#allocation2 + $0x10] sm:$0xf] %vm4593_vm13, %v4458_v59  ;;  %v3259_v59 = vrot.slane %v3258_v5, 4 }
 0x37b   : > { %v4004_v4 = vpop.permute.xlu1 %4003 }
 0x37c   : > { %4117 = vst.msk [vmem:[#allocation2 + $0x7c] sm:$0xf] %vm4085_vm11, %v4004_v4  ;;  %v3263_v4 = vrot.slane %v3261_v30, 5  ;;  %v2834_v30 = vld [vmem:[%s10340_s19 + $0xd0] sm:$0xf] }
 0x37e   : > { %v4002_v60 = vpop.permute.xlu0 %4001 }
 0x37f   : > { %4116 = vst.msk [vmem:[#allocation2 + $0x78] sm:$0xf] %vm4085_vm11, %v4002_v60  ;;  %v3674_v60 = vld [vmem:[%s10340_s19 + $0xc0] sm:$0xe] }
 0x380   : > { %v4512_v53 = vpop.permute.xlu2 %4511 }
 0x381   : > { %4625 = vst.msk [vmem:[#allocation2 + $0x7c] sm:$0xf] %vm4593_vm13, %v4512_v53  ;;  %v12724_v53 = vld [vmem:[%s10340_s19 + $0xc4] sm:$0xf] }
 0x382   : > { %v6027_v48 = vpop.f32.mrf.mxu2 }
 0x383   : > { %v4510_v9 = vpop.permute.xlu1 %4509  ;;  %v6077_v52 = vadd.f32 %v6027_v48, %v5816_v23  ;;  %v9219_v48 = vrot.slane %v3674_v60, 9  ;;  %v10107_v60 = vld [vmem:[#allocation2 + $0x20] sm:$0xff] }
 0x384   : > { %4624 = vst.msk [vmem:[#allocation2 + $0x78] sm:$0xf] %vm4593_vm13, %v4510_v9  ;;  %v8863_v9 = vsel %vm5964_vm12, %v10051_v26, 0  ;;  %v3279_v26 = vshrl.u32 %v2834_v30, 16 }
 0x385   : > { %6109 = vst.msk [vmem:[#allocation3 + $0xa0] sm:$0xff] %vm5731_vm4, %v6077_v52  ;;  %v3887_v52 = vrot.slane %v12724_v53, 5  ;;  %8872 = vmatpush.bf16.msra.mxu0 %v8863_v9  ;;  %v10123_v53 = vld [vmem:[#allocation2 + $0x20] sm:$0xff] }
 0x386   : > { %v4460_v7 = vpop.permute.xlu0 %4459 }
 0x387   : > { %4599 = vst.msk [vmem:[#allocation2 + $0x14] sm:$0xf] %vm4593_vm13, %v4460_v7  ;;  %v3888_v47 = vsel %vm11444_vm15, %v9219_v48, %v3887_v52  ;;  %v3889_v56 = vrot.slane %v3887_v52, 4  ;;  %v3281_v48 = vrot.slane %v3279_v26, 4  ;;  %v5825_v52 = vld [vmem:[#allocation3 + $0xe8] sm:$0xff] }
 0x388   : > { %v5306_v63 = vpop.permute.xlu2 %5305  ;;  %4005 = vrot.lane.b32.xlu1 %v3888_v47, %s10291_s23  ;;  %v4690_v47 = vld [vmem:[%s10340_s19 + $0xc0] sm:$0x8]  ;;  %v10175_v26 = vld [vmem:[%s13770_s1 + $0x6c] sm:$0xff] }
 0x389   : > { %5420 = vst.msk [vmem:[#allocation2 + $0x78] sm:$0xf] %vm5389_vm14, %v5306_v63  ;;  %v3264_v63 = vsel %vm11456_vm2, %v3259_v59, %v3263_v4  ;;  %v3891_v5 = vsel %vm11444_vm15, %v3889_v56, %v3890_v11  ;;  %v10091_v59 = vld [vmem:[#allocation2 + $0x20] sm:$0xff]  ;;  %7800 = vmatpush.bf16.msra.mxu1 %v10175_v26  ;;  %v5473_v26 = vld [vmem:[%s10340_s19 + $0xd4] sm:$0xf] }
 0x38a   : > { %v6029_v3 = vpop.f32.mrf.mxu2  ;;  %3499 = vrot.lane.b32.xlu0 %v3264_v63, %s10292_s24  ;;  %v10140_v4 = vld [vmem:[#allocation2 + $0x20] sm:$0xff] }
 0x38b   : > { %v5256_v10 = vpop.permute.xlu1 %5255  ;;  %v6078_v43 = vadd.f32 %v6029_v3, %v5817_v6  ;;  %v4182_v6 = vld [vmem:[%s10340_s19 + $0xc0] sm:$0x8] }
 0x38c   : > { %5395 = vst.msk [vmem:[#allocation2 + $0x14] sm:$0xf] %vm5389_vm14, %v5256_v10  ;;  %v4183_v10 = vld [vmem:[%s10340_s19 + $0xc4] sm:$0xf] }
 0x38d   : > { %6110 = vst.msk [vmem:[#allocation3 + $0xa8] sm:$0xff] %vm5731_vm4, %v6078_v43  ;;  %v9243_v43 = vrot.slane %v4182_v6, 11 }
 0x38e   : > { %v5254_v17 = vpop.permute.xlu0 %5253 }
 0x38f   : > { %5394 = vst.msk [vmem:[#allocation2 + $0x10] sm:$0xf] %vm5389_vm14, %v5254_v17  ;;  %v4395_v17 = vrot.slane %v4183_v10, 7  ;;  %v5810_v10 = vld [vmem:[#allocation3 + $0x70] sm:$0xff] }
 0x390   : > { %v5545_v19 = vpop.permute.xlu2 %5544 }
 0x391   : > { %5684 = vst.msk [vmem:[#allocation2 + $0x14] sm:$0xf] %vm5678_vm1, %v5545_v19  ;;  %v4184_v19 = vld [vmem:[%s10340_s19 + $0xc8] sm:$0x7]  ;;  %v4396_v29 = vsel %vm11473_vm5, %v9243_v43, %v4395_v17 }
 0x392   : > { %v4398_v37 = vrot.slane %v4184_v19, 7  ;;  %4513 = vrot.lane.b32.xlu0 %v4396_v29, %s10293_s25 }
 0x393   : > { %v5543_v25 = vpop.permute.xlu1 %5542 }
 0x394   : > { %5683 = vst.msk [vmem:[#allocation2 + $0x10] sm:$0xf] %vm5678_vm1, %v5543_v25  ;;  %v4397_v25 = vrot.slane %v4395_v17, 4 }
 0x396   : > { %v5308_v32 = vpop.permute.xlu0 %5307  ;;  %v4399_v58 = vsel %vm11473_vm5, %v4397_v25, %v4398_v37  ;;  %v3677_v37 = vld [vmem:[%s10340_s19 + $0xcc] sm:$0xe]  ;;  %v12788_v25 = vld [vmem:[%s10340_s19 + $0xd0] sm:$0xf] }
 0x397   : > { %5421 = vst.msk [vmem:[#allocation2 + $0x7c] sm:$0xf] %vm5389_vm14, %v5308_v32  ;;  %v5799_v32 = vld [vmem:[#allocation3 + $0x18] sm:$0xff]  ;;  %4515 = vrot.lane.b32.xlu1 %v4399_v58, %s10293_s25 }
 0x398   : > { %v3446_v12 = vpop.permute.xlu2 %3445 }
 0x399   : > { %3584 = vst.msk [vmem:[#allocation2 + $0x18] sm:$0xf] %vm3577_vm10, %v3446_v12  ;;  %v2830_v12 = vld [vmem:[%s10340_s19 + $0xc0] sm:$0xf] }
 0x39a   : > { %v3242_v62 = vshrl.u32 %v2830_v12, 16 }
 0x39b   : > { %v5597_v54 = vpop.permute.xlu1 %5596  ;;  %v10073_v22 = vld [vmem:[#allocation2 + $0x10] sm:$0xff] }
 0x39c   : > { %v10089_v15 = vld [vmem:[#allocation2 + $0x10] sm:$0xff]  ;;  %5710 = vst.msk [vmem:[#allocation2 + $0x7c] sm:$0xf] %vm5678_vm1, %v5597_v54  ;;  %9345 = vmatmul.msk.bf16.gmra.mxu0 %vm5915_vm3, %v10073_v22  ;;  %v3245_v54 = vshll.u32 %v2830_v12, 16  ;;  %v9220_v12 = vrot.slane %v3677_v37, 9 }
 0x39d   : > { %v10105_v13 = vld [vmem:[#allocation2 + $0x10] sm:$0xff]  ;;  %9430 = vmatmul.msk.bf16.gmra.mxu1 %vm5915_vm3, %v10089_v15  ;;  %v12748_v15 = vld [vmem:[%s10340_s19 + $0xc4] sm:$0xf] }
 0x39e   : > { %9515 = vmatmul.msk.bf16.vlgmr.msrb.gmra.mxu2 %vm5915_vm3, %v10105_v13  ;;  %v5595_v46 = vpop.permute.xlu0 %5594  ;;  %v4692_v13 = vld [vmem:[%s10340_s19 + $0xc8] sm:$0xf]  ;;  %v3247_v8 = vrot.slane %v3245_v54, 5  ;;  %v5078_v43 = vshll.u32 %v12748_v15, 16  ;;  %v4186_v54 = vld [vmem:[%s10340_s19 + $0xd0] sm:$0xf] }
 0x39f   : > { %5709 = vst.msk [vmem:[#allocation2 + $0x78] sm:$0xf] %vm5678_vm1, %v5595_v46  ;;  %v5075_v46 = vshrl.u32 %v12748_v15, 16  ;;  %v5087_v20 = vshll.u32 %v4692_v13, 16  ;;  %5598 = vrot.lane.b32.xlu1 %v5470_v18, %s10295_s27  ;;  %v4695_v18 = vld [vmem:[%s10340_s19 + $0xd4] sm:$0xf] }
 0x3a0   : > { %v3956_v35 = vpop.permute.xlu2 %3955 }
 0x3a1   : > { %v5077_v50 = vrot.slane %v5075_v46, 7  ;;  %v5811_v46 = vld [vmem:[#allocation3 + $0x78] sm:$0xff] }
 0x3a3   : > { %v3954_v36 = vpop.permute.xlu1 %3953 }
 0x3a4   : > { %4092 = vst.msk [vmem:[#allocation2 + $0x18] sm:$0xf] %vm4085_vm11, %v3954_v36  ;;  %v3244_v36 = vrot.slane %v3242_v62, 4  ;;  %v4185_v62 = vld [vmem:[%s10340_s19 + $0xcc] sm:$0x8] }
 0x3a6   : > { %v3448_v61 = vpop.permute.xlu0 %3447  ;;  %v10086_v45 = vld [vmem:[#allocation2 + $0x78] sm:$0xff] }
 0x3a7   : > { %3585 = vst.msk [vmem:[#allocation2 + $0x1c] sm:$0xf] %vm3577_vm10, %v3448_v61  ;;  %9358 = vmatmul.msk.bf16.gmra.mxu3 %vm5915_vm3, %v10086_v45  ;;  %v3248_v61 = vor.u32 %v3247_v8, %v3244_v36  ;;  %v5082_v45 = vrot.slane %v5077_v50, 4  ;;  %v10092_v8 = vld [vmem:[#allocation2 + $0x28] sm:$0xff] }
 0x3a8   : > { %4093 = vst.msk [vmem:[#allocation2 + $0x1c] sm:$0xf] %vm4085_vm11, %v3956_v35  ;;  %v5258_v55 = vpop.permute.xlu2 %5257  ;;  %v5084_v35 = vshrl.u32 %v4692_v13, 16  ;;  %v9244_v13 = vrot.slane %v4185_v62, 11  ;;  %v5818_v62 = vld [vmem:[#allocation3 + $0xb0] sm:$0xff] }
 0x3aa   : > { %v5086_v51 = vrot.slane %v5084_v35, 7  ;;  %v4187_v35 = vld [vmem:[%s10340_s19 + $0xd4] sm:$0x7] }
 0x3ab   : > { %v4464_v39 = vpop.permute.xlu1 %4463 }
 0x3ac   : > { %4601 = vst.msk [vmem:[#allocation2 + $0x1c] sm:$0xf] %vm4593_vm13, %v4464_v39  ;;  %v5089_v39 = vor.u32 %v5087_v20, %v5086_v51 }
 0x3ae   : > { %v4462_v38 = vpop.permute.xlu0 %4461 }
 0x3af   : > { %4600 = vst.msk [vmem:[#allocation2 + $0x18] sm:$0xf] %vm4593_vm13, %v4462_v38  ;;  %v5090_v38 = vsel %vm11502_vm8, %v5082_v45, %v5089_v39  ;;  %v5471_v45 = vld [vmem:[%s10340_s19 + $0xc8] sm:$0xf]  ;;  %v2833_v39 = vld [vmem:[%s10340_s19 + $0xcc] sm:$0xf] }
 0x3b0   : > { %5396 = vst.msk [vmem:[#allocation2 + $0x18] sm:$0xf] %vm5389_vm14, %v5258_v55  ;;  %v5549_v23 = vpop.permute.xlu2 %5548  ;;  %v3249_v55 = vrot.slane %v3248_v61, 4  ;;  %5311 = vrot.lane.b32.xlu0 %v5090_v38, %s10294_s26  ;;  %v10141_v61 = vld [vmem:[#allocation2 + $0x28] sm:$0xff]  ;;  %v3266_v38 = vshrl.u32 %v2833_v39, 16 }
 0x3b2   : > { %v3254_v31 = vsel %vm11456_vm2, %v3249_v55, %v12711_v33  ;;  %v3275_v33 = vshll.u32 %v2834_v30, 16  ;;  %v12810_v55 = vld [vmem:[%s10340_s19 + $0xd0] sm:$0xf] }
 0x3b3   : > { %v5547_v1 = vpop.permute.xlu1 %5546  ;;  %3497 = vrot.lane.b32.xlu2 %v3254_v31, %s10292_s24  ;;  %v3269_v31 = vshll.u32 %v2833_v39, 16  ;;  %v5097_v11 = vshrl.u32 %v12810_v55, 16 }
 0x3b4   : > { %5685 = vst.msk [vmem:[#allocation2 + $0x18] sm:$0xf] %vm5678_vm1, %v5547_v1  ;;  %v12775_v9 = vrot.slane %v3275_v33, 5  ;;  %v5109_v33 = vshll.u32 %v4695_v18, 16 }
 0x3b6   : > { %v5260_v7 = vpop.permute.xlu0 %5259  ;;  %v3282_v63 = vor.u32 %v3281_v48, %v12775_v9 }
 0x3b7   : > { %5397 = vst.msk [vmem:[#allocation2 + $0x1c] sm:$0xf] %vm5389_vm14, %v5260_v7  ;;  %v2835_v7 = vld [vmem:[%s10340_s19 + $0xd4] sm:$0x1] }
 0x3b8   : > { %5686 = vst.msk [vmem:[#allocation2 + $0x1c] sm:$0xf] %vm5678_vm1, %v5549_v23  ;;  %2657 = vrot.lane.b32.xlu0 %v2527_v57, %s10290_s22  ;;  %v2528_v23 = vld [vmem:[%s10340_s19 + $0xd0] sm:$0xf]  ;;  %v3283_v19 = vrot.slane %v3282_v63, 4  ;;  %v3271_v57 = vrot.slane %v3269_v31, 5 }
 0x3b9   : > { %v5982_v3 = vpop.f32.mrf.mxu0  ;;  %2659 = vrot.lane.b32.xlu1 %v2528_v23, %s10290_s22  ;;  %v3679_v63 = vld [vmem:[%s10340_s19 + $0xd4] sm:$0x1] }
 0x3ba   : > { %v6059_v2 = vadd.f32 %v5982_v3, %v5798_v44  ;;  %v3285_v44 = vshll.u32 %v2835_v7, 16  ;;  %v5070_v3 = vshrl.u32 %v4690_v47, 16  ;;  %v5472_v47 = vld [vmem:[%s10340_s19 + $0xd0] sm:$0xf] }
 0x3bb   : > { %4007 = vrot.lane.b32.xlu2 %v3891_v5, %s10291_s23  ;;  %v5099_v5 = vrot.slane %v5097_v11, 7 }
 0x3bc   : > { %6091 = vst.msk [vmem:[#allocation3 + $0x10] sm:$0xff] %vm5731_vm4, %v6059_v2  ;;  %v3287_v2 = vrot.slane %v3285_v44, 5  ;;  %v9267_v58 = vrot.slane %v5070_v3, 11  ;;  %v6155_v3 = vld [vmem:[#allocation3 + $0x8] sm:$0xff] }
 0x3bf   : > { %v10074_v16 = vld [vmem:[#allocation2 + $0x18] sm:$0xff] }
 0x3c0   : > { %v10090_v49 = vld [vmem:[#allocation2 + $0x18] sm:$0xff]  ;;  %9346 = vmatmul.msk.bf16.gmra.mxu0 %vm5915_vm3, %v10074_v16  ;;  %v3894_v16 = vrot.slane %v12788_v25, 5 }
 0x3c1   : > { %v10106_v40 = vld [vmem:[#allocation2 + $0x18] sm:$0xff]  ;;  %9431 = vmatmul.msk.bf16.gmra.mxu1 %vm5915_vm3, %v10090_v49  ;;  %v5984_v21 = vpop.f32.mrf.mxu0 }
 0x3c2   : > { %v10122_v22 = vld [vmem:[#allocation2 + $0x18] sm:$0xff]  ;;  %9516 = vmatmul.msk.bf16.gmra.mxu2 %vm5915_vm3, %v10106_v40  ;;  %v6060_v34 = vadd.f32 %v5984_v21, %v5799_v32  ;;  %v5080_v32 = vor.u32 %v5078_v43, %v5077_v50  ;;  %v3288_v40 = vsel %vm11456_vm2, %v3283_v19, %v3287_v2  ;;  %v3895_v15 = vsel %vm11444_vm15, %v9220_v12, %v3894_v16  ;;  %v10125_v12 = vld [vmem:[#allocation2 + $0x30] sm:$0xff] }
 0x3c3   : > { %9608 = vmatmul.msk.bf16.vlgmr.msrb.gmra.mxu3 %vm7001_vm0, %v10122_v22  ;;  %3503 = vrot.lane.b32.xlu0 %v3288_v40, %s10292_s24  ;;  %v4402_v21 = vrot.slane %v4186_v54, 7  ;;  %v4405_v50 = vrot.slane %v4187_v35, 7  ;;  %v2837_v2 = vld [vmem:[%s10340_s19 + $0xdc] sm:$0xf]  ;;  %v2838_v54 = vld [vmem:[%s10340_s19 + $0xe0] sm:$0x1] }
 0x3c4   : > { %6092 = vst.msk [vmem:[#allocation3 + $0x18] sm:$0xff] %vm5731_vm4, %v6060_v34  ;;  %v5081_v22 = vsel %vm11502_vm8, %v9267_v58, %v5080_v32  ;;  %4009 = vrot.lane.b32.xlu1 %v3895_v15, %s10291_s23  ;;  %v3299_v37 = vshll.u32 %v2837_v2, 16  ;;  %v3303_v25 = vshrl.u32 %v2837_v2, 16  ;;  %v10109_v58 = vld [vmem:[#allocation2 + $0x30] sm:$0xff]  ;;  %v3309_v15 = vshll.u32 %v2838_v54, 16 }
 0x3c5   : > { %5309 = vrot.lane.b32.xlu2 %v5081_v22, %s10294_s26  ;;  %v4403_v34 = vsel %vm11473_vm5, %v9244_v13, %v4402_v21  ;;  %v4404_v20 = vrot.slane %v4402_v21, 4  ;;  %v10142_v32 = vld [vmem:[#allocation2 + $0x30] sm:$0xff]  ;;  %v4693_v13 = vld [vmem:[%s10340_s19 + $0xcc] sm:$0x8]  ;;  %v5100_v21 = vshll.u32 %v12810_v55, 16 }
 0x3c6   : > { %v3305_v40 = vrot.slane %v3303_v25, 4  ;;  %v2840_v54 = vld [vmem:[%s10340_s19 + $0xe8] sm:$0xf] }
 0x3c7   : > { %v4406_v56 = vsel %vm11473_vm5, %v4404_v20, %v4405_v50 }
 0x3ca   : > { %v6047_v1 = vpop.f32.mrf.mxu3 }
 0x3cb   : > { %v6085_v41 = vadd.f32 %v6047_v1, %v5824_v0  ;;  %v10124_v0 = vld [vmem:[#allocation2 + $0x28] sm:$0xff]  ;;  %4517 = vrot.lane.b32.xlu0 %v4403_v34, %s10293_s25  ;;  %v5106_v1 = vshrl.u32 %v4695_v18, 16  ;;  %v4189_v18 = vld [vmem:[%s10340_s19 + $0xdc] sm:$0xf] }
 0x3cc   : > { %4519 = vrot.lane.b32.xlu1 %v4406_v56, %s10293_s25  ;;  %v5819_v56 = vld [vmem:[#allocation3 + $0xb8] sm:$0xff] }
 0x3cd   : > { %6117 = vst.msk [vmem:[#allocation3 + $0xe0] sm:$0xff] %vm5731_vm4, %v6085_v41  ;;  %5600 = vrot.lane.b32.xlu2 %v5471_v45, %s10295_s27  ;;  %v3268_v41 = vrot.slane %v3266_v38, 4  ;;  %v5108_v30 = vrot.slane %v5106_v1, 7  ;;  %v4188_v38 = vld [vmem:[%s10340_s19 + $0xd8] sm:$0x8] }
 0x3ce   : > { %v9245_v11 = vrot.slane %v4188_v38, 11  ;;  %v4190_v1 = vld [vmem:[%s10340_s19 + $0xe0] sm:$0x7]  ;;  %v3683_v38 = vld [vmem:[%s10340_s19 + $0xe4] sm:$0xe] }
 0x3d0   : > { %9701 = vmatmul.msk.bf16.vlgmr.msrb.gmra.mxu0 %vm7001_vm0, %v10140_v4  ;;  %v5104_v4 = vrot.slane %v5099_v5, 4 }
 0x3d1   : > { %9432 = vmatmul.msk.bf16.gmra.mxu1 %vm5915_vm3, %v10091_v59  ;;  %v3272_v59 = vor.u32 %v3271_v57, %v3268_v41 }
 0x3d2   : > { %9517 = vmatmul.msk.bf16.gmra.mxu2 %vm5915_vm3, %v10107_v60  ;;  %v6049_v6 = vpop.f32.mrf.mxu3  ;;  %v5111_v60 = vor.u32 %v5109_v33, %v5108_v30  ;;  %v4412_v30 = vrot.slane %v4190_v1, 7  ;;  %v4191_v1 = vld [vmem:[%s10340_s19 + $0xe4] sm:$0x8] }
 0x3d3   : > { %9609 = vmatmul.msk.bf16.gmra.mxu3 %vm7001_vm0, %v10123_v53  ;;  %v6086_v17 = vadd.f32 %v6049_v6, %v5825_v52  ;;  %v6154_v53 = vld [vmem:[#allocation3] sm:$0xff]  ;;  %v3273_v48 = vrot.slane %v3272_v59, 4  ;;  %v3896_v6 = vrot.slane %v3894_v16, 4  ;;  %v2530_v16 = vld [vmem:[%s10340_s19 + $0xdc] sm:$0xf] }
 0x3d4   : > { %v6012_v29 = vpop.f32.mrf.mxu1  ;;  %v5112_v7 = vsel %vm11502_vm8, %v5104_v4, %v5111_v60  ;;  %5602 = vrot.lane.b32.xlu1 %v5472_v47, %s10295_s27  ;;  %v10094_v59 = vld [vmem:[#allocation2 + $0x38] sm:$0xff] }
 0x3d5   : > { %6118 = vst.msk [vmem:[#allocation3 + $0xe8] sm:$0xff] %vm5731_vm4, %v6086_v17  ;;  %v6071_v49 = vadd.f32 %v6012_v29, %v5810_v10  ;;  %v3278_v44 = vsel %vm11456_vm2, %v3273_v48, %v12775_v9  ;;  %5315 = vrot.lane.b32.xlu0 %v5112_v7, %s10294_s26  ;;  %v3897_v10 = vrot.slane %v3679_v63, 5  ;;  %v2529_v17 = vld [vmem:[%s10340_s19 + $0xd8] sm:$0xf]  ;;  %v10093_v29 = vld [vmem:[#allocation2 + $0x30] sm:$0xff] }
 0x3d6   : > { %3501 = vrot.lane.b32.xlu2 %v3278_v44, %s10292_s24  ;;  %v10143_v4 = vld [vmem:[#allocation2 + $0x38] sm:$0xff] }
 0x3d7   : > { %6103 = vst.msk [vmem:[#allocation3 + $0x70] sm:$0xff] %vm5731_vm4, %v6071_v49  ;;  %v3898_v19 = vsel %vm11444_vm15, %v3896_v6, %v3897_v10  ;;  %v12846_v49 = vrot.slane %v3299_v37, 5  ;;  %v2836_v60 = vld [vmem:[%s10340_s19 + $0xd8] sm:$0xf] }
 0x3d8   : > { %v3290_v48 = vshrl.u32 %v2836_v60, 16  ;;  %v10110_v7 = vld [vmem:[#allocation2 + $0x38] sm:$0xff] }
 0x3d9   : > { %v3306_v22 = vor.u32 %v3305_v40, %v12846_v49  ;;  %v10126_v63 = vld [vmem:[#allocation2 + $0x38] sm:$0xff] }
 0x3da   : > { %v3292_v10 = vrot.slane %v3290_v48, 4  ;;  %v4193_v48 = vld [vmem:[%s10340_s19 + $0xec] sm:$0x7] }
 0x3db   : > { %v3307_v50 = vrot.slane %v3306_v22, 4  ;;  %v10095_v22 = vld [vmem:[#allocation2 + $0x40] sm:$0xff] }
 0x3dc   : > { %v6014_v36 = vpop.f32.mrf.mxu1  ;;  %2663 = vrot.lane.b32.xlu1 %v2530_v16, %s10290_s22  ;;  %v2531_v16 = vld [vmem:[%s10340_s19 + $0xe4] sm:$0xf] }
 0x3dd   : > { %v6072_v51 = vadd.f32 %v6014_v36, %v5811_v46  ;;  %2661 = vrot.lane.b32.xlu0 %v2529_v17, %s10290_s22  ;;  %v3680_v46 = vld [vmem:[%s10340_s19 + $0xd8] sm:$0xe]  ;;  %v5092_v36 = vshrl.u32 %v4693_v13, 16 }
 0x3de   : > { %4011 = vrot.lane.b32.xlu2 %v3898_v19, %s10291_s23  ;;  %v9221_v34 = vrot.slane %v3680_v46, 9  ;;  %v10111_v46 = vld [vmem:[#allocation2 + $0x40] sm:$0xff] }
 0x3df   : > { %6104 = vst.msk [vmem:[#allocation3 + $0x78] sm:$0xff] %vm5731_vm4, %v6072_v51  ;;  %v3311_v51 = vrot.slane %v3309_v15, 5  ;;  %v9268_v45 = vrot.slane %v5092_v36, 11  ;;  %v10144_v15 = vld [vmem:[#allocation2 + $0x40] sm:$0xff]  ;;  %v2532_v36 = vld [vmem:[%s10340_s19 + $0xe8] sm:$0xf] }
 0x3e0   : > { %9702 = vmatmul.msk.bf16.gmra.mxu0 %vm7001_vm0, %v10141_v61  ;;  %v5102_v61 = vor.u32 %v5100_v21, %v5099_v5  ;;  %v3327_v21 = vshrl.u32 %v2840_v54, 16 }
 0x3e1   : > { %9433 = vmatmul.msk.bf16.gmra.mxu1 %vm5915_vm3, %v10092_v8  ;;  %v12859_v8 = vld [vmem:[%s10340_s19 + $0xdc] sm:$0xf]  ;;  %v3312_v55 = vsel %vm11456_vm2, %v3307_v50, %v3311_v51 }
 0x3e2   : > { %9518 = vmatmul.msk.bf16.gmra.mxu2 %vm5915_vm3, %v10108_v14  ;;  %v3901_v39 = vrot.slane %v12859_v8, 5  ;;  %v5103_v31 = vsel %vm11502_vm8, %v9268_v45, %v5102_v61  ;;  %v4696_v61 = vld [vmem:[%s10340_s19 + $0xd8] sm:$0x8] }
 0x3e3   : > { %9610 = vmatmul.msk.bf16.gmra.mxu3 %vm7001_vm0, %v10124_v0  ;;  %v4409_v0 = vrot.slane %v4189_v18, 7  ;;  %v5114_v45 = vshrl.u32 %v4696_v61, 16 }
 0x3e4   : > { %v6334_v23 = vpop.f32.mrf.mxu1  ;;  %v3902_v14 = vsel %vm11444_vm15, %v9221_v34, %v3901_v39  ;;  %v3903_v40 = vrot.slane %v3901_v39, 4  ;;  %v3329_v34 = vrot.slane %v3327_v21, 4 }
 0x3e5   : > { %v6414_v52 = vadd.f32 %v6334_v23, %v6154_v53  ;;  %3507 = vrot.lane.b32.xlu0 %v3312_v55, %s10292_s24  ;;  %4013 = vrot.lane.b32.xlu1 %v3902_v14, %s10291_s23  ;;  %v4411_v5 = vrot.slane %v4409_v0, 4  ;;  %v4410_v33 = vsel %vm11473_vm5, %v9245_v11, %v4409_v0  ;;  %v12881_v53 = vld [vmem:[%s10340_s19 + $0xdc] sm:$0xf]  ;;  %v4698_v23 = vld [vmem:[%s10340_s19 + $0xe0] sm:$0xf]  ;;  %v9269_v14 = vrot.slane %v5114_v45, 11 }
 0x3e6   : > { %5313 = vrot.lane.b32.xlu2 %v5103_v31, %s10294_s26  ;;  %v5119_v47 = vshrl.u32 %v12881_v53, 16  ;;  %v5128_v6 = vshrl.u32 %v4698_v23, 16  ;;  %v5131_v19 = vshll.u32 %v4698_v23, 16  ;;  %v5122_v39 = vshll.u32 %v12881_v53, 16  ;;  %v12924_v31 = vld [vmem:[%s10340_s19 + $0xe8] sm:$0xf] }
 0x3e7   : > { %6446 = vst.msk [vmem:[#allocation3] sm:$0xff] %vm5731_vm4, %v6414_v52  ;;  %v3293_v52 = vshll.u32 %v2836_v60, 16  ;;  %v4413_v44 = vsel %vm11473_vm5, %v4411_v5, %v4412_v30  ;;  %v3908_v11 = vrot.slane %v12924_v31, 5  ;;  %v4192_v5 = vld [vmem:[%s10340_s19 + $0xe8] sm:$0xf]  ;;  %v2654_v30 = vpop.permute.xlu0 %2653  ;;  %v6156_v60 = vld [vmem:[#allocation3 + $0x10] sm:$0xff] }
 0x3e8   : > { %v5130_v17 = vrot.slane %v5128_v6, 7  ;;  %2766 = vst.msk [vmem:[#allocation2 + $0x80] sm:$0xf] %vm2733_vm9, %v2654_v30  ;;  %v9246_v23 = vrot.slane %v4191_v1, 11 }
 0x3ea   : > { %v5133_v37 = vor.u32 %v5131_v19, %v5130_v17  ;;  %v5801_v19 = vld [vmem:[#allocation3 + $0x28] sm:$0xff] }
 0x3ec   : > { %v6336_v43 = vpop.f32.mrf.mxu1 }
 0x3ed   : > { %v6415_v9 = vadd.f32 %v6336_v43, %v6155_v3  ;;  %4521 = vrot.lane.b32.xlu0 %v4410_v33, %s10293_s25  ;;  %v3295_v3 = vrot.slane %v3293_v52, 5  ;;  %v5121_v43 = vrot.slane %v5119_v47, 7  ;;  %4523 = vrot.lane.b32.xlu1 %v4413_v44, %s10293_s25  ;;  %v4419_v44 = vrot.slane %v4193_v48, 7  ;;  %v10096_v47 = vld [vmem:[#allocation2 + $0x48] sm:$0xff] }
 0x3ee   : > { %5604 = vrot.lane.b32.xlu2 %v5473_v26, %s10295_s27  ;;  %v6511_v17 = vld [vmem:[#allocation3] sm:$0xff] }
 0x3ef   : > { %6447 = vst.msk [vmem:[#allocation3 + $0x8] sm:$0xff] %vm5731_vm4, %v6415_v9  ;;  %v3296_v2 = vor.u32 %v3295_v3, %v3292_v10  ;;  %v5126_v9 = vrot.slane %v5121_v43, 4  ;;  %v5124_v0 = vor.u32 %v5122_v39, %v5121_v43  ;;  %v10112_v10 = vld [vmem:[#allocation2 + $0x48] sm:$0xff] }
 0x3f0   : > { %9703 = vmatmul.msk.bf16.gmra.mxu0 %vm7001_vm0, %v10142_v32  ;;  %v5474_v32 = vld [vmem:[%s10340_s19 + $0xdc] sm:$0xf]  ;;  %v10128_v3 = vld [vmem:[#allocation2 + $0x48] sm:$0xff] }
 0x3f1   : > { %9434 = vmatmul.msk.bf16.gmra.mxu1 %vm5915_vm3, %v10093_v29  ;;  %v3297_v25 = vrot.slane %v3296_v2, 4  ;;  %v5134_v29 = vsel %vm11502_vm8, %v5126_v9, %v5133_v37  ;;  %v5125_v33 = vsel %vm11502_vm8, %v9269_v14, %v5124_v0  ;;  %v10145_v43 = vld [vmem:[#allocation2 + $0x48] sm:$0xff]  ;;  %v5475_v2 = vld [vmem:[%s10340_s19 + $0xe0] sm:$0xf]  ;;  %v2839_v9 = vld [vmem:[%s10340_s19 + $0xe4] sm:$0xf] }
 0x3f2   : > { %9519 = vmatmul.msk.bf16.gmra.mxu2 %vm5915_vm3, %v10109_v58  ;;  %v6032_v35 = vpop.f32.mrf.mxu2  ;;  %v5476_v14 = vld [vmem:[%s10340_s19 + $0xe8] sm:$0xf]  ;;  %v5826_v0 = vld [vmem:[#allocation3 + $0xf0] sm:$0xff] }
 0x3f3   : > { %9611 = vmatmul.msk.bf16.gmra.mxu3 %vm7001_vm0, %v10125_v12  ;;  %v6079_v20 = vadd.f32 %v6032_v35, %v5818_v62  ;;  %v3302_v58 = vsel %vm11456_vm2, %v3297_v25, %v12846_v49  ;;  %v3682_v12 = vld [vmem:[%s10340_s19 + $0xe0] sm:$0x1]  ;;  %v3323_v49 = vshll.u32 %v2840_v54, 16 }
 0x3f4   : > { %v3904_v62 = vrot.slane %v3682_v12, 5  ;;  %v10127_v35 = vld [vmem:[#allocation2 + $0x40] sm:$0xff]  ;;  %v3317_v12 = vshll.u32 %v2839_v9, 16 }
 0x3f5   : > { %6111 = vst.msk [vmem:[#allocation3 + $0xb0] sm:$0xff] %vm5731_vm4, %v6079_v20  ;;  %5319 = vrot.lane.b32.xlu0 %v5134_v29, %s10294_s26  ;;  %5606 = vrot.lane.b32.xlu1 %v5474_v32, %s10295_s27  ;;  %v12913_v8 = vrot.slane %v3323_v49, 5  ;;  %v2841_v20 = vld [vmem:[%s10340_s19 + $0xec] sm:$0x1]  ;;  %v12952_v29 = vld [vmem:[%s10340_s19 + $0xe8] sm:$0xf] }
 0x3f6   : > { %3505 = vrot.lane.b32.xlu2 %v3302_v58, %s10292_s24  ;;  %v3905_v13 = vsel %vm11444_vm15, %v3903_v40, %v3904_v62  ;;  %v3333_v51 = vshll.u32 %v2841_v20, 16  ;;  %v4701_v58 = vld [vmem:[%s10340_s19 + $0xec] sm:$0xf]  ;;  %v3314_v32 = vshrl.u32 %v2839_v9, 16  ;;  %v6157_v62 = vld [vmem:[#allocation3 + $0x18] sm:$0xff] }
 0x3f7   : > { %v3330_v50 = vor.u32 %v3329_v34, %v12913_v8 }
 0x3f8   : > { %v3335_v55 = vrot.slane %v3333_v51, 5 }
 0x3f9   : > { %v3331_v18 = vrot.slane %v3330_v50, 4  ;;  %v3319_v50 = vrot.slane %v3317_v12, 5 }
 0x3fa   : > { %v6034_v41 = vpop.f32.mrf.mxu2 }
 0x3fb   : > { %v6080_v57 = vadd.f32 %v6034_v41, %v5819_v56  ;;  %v9222_v56 = vrot.slane %v3683_v38, 9  ;;  %v5800_v41 = vld [vmem:[#allocation3 + $0x20] sm:$0xff] }
 0x3fd   : > { %6112 = vst.msk [vmem:[#allocation3 + $0xb8] sm:$0xff] %vm5731_vm4, %v6080_v57  ;;  %2665 = vrot.lane.b32.xlu0 %v2531_v16, %s10290_s22  ;;  %2667 = vrot.lane.b32.xlu1 %v2532_v36, %s10290_s22  ;;  %v3336_v57 = vsel %vm11456_vm2, %v3331_v18, %v3335_v55  ;;  %v3909_v26 = vsel %vm11444_vm15, %v9222_v56, %v3908_v11  ;;  %v3316_v36 = vrot.slane %v3314_v32, 4  ;;  %v6512_v55 = vld [vmem:[#allocation3 + $0x8] sm:$0xff] }
 0x3fe   : > { %4015 = vrot.lane.b32.xlu2 %v3905_v13, %s10291_s23 }
 0x3ff   : > { %v3320_v45 = vor.u32 %v3319_v50, %v3316_v36 }
 0x400   : > { %9704 = vmatmul.msk.bf16.gmra.mxu0 %vm7001_vm0, %v10143_v4 }
 0x401   : > { %9435 = vmatmul.msk.bf16.gmra.mxu1 %vm5915_vm3, %v10094_v59  ;;  %v4416_v59 = vrot.slane %v4192_v5, 7  ;;  %v3321_v18 = vrot.slane %v3320_v45, 4 }
 0x402   : > { %9520 = vmatmul.msk.bf16.gmra.mxu2 %vm5915_vm3, %v10110_v7 }
 0x403   : > { %9612 = vmatmul.msk.bf16.gmra.mxu3 %vm7001_vm0, %v10126_v63  ;;  %v4418_v63 = vrot.slane %v4416_v59, 4  ;;  %v4417_v6 = vsel %vm11473_vm5, %v9246_v23, %v4416_v59  ;;  %v3326_v1 = vsel %vm11456_vm2, %v3321_v18, %v12913_v8  ;;  %v3910_v59 = vrot.slane %v3908_v11, 4  ;;  %v10129_v23 = vld [vmem:[#allocation2 + $0x50] sm:$0xff] }
 0x405   : > { %3511 = vrot.lane.b32.xlu0 %v3336_v57, %s10292_s24  ;;  %4017 = vrot.lane.b32.xlu1 %v3909_v26, %s10291_s23  ;;  %v4420_v25 = vsel %vm11473_vm5, %v4418_v63, %v4419_v44  ;;  %v4699_v44 = vld [vmem:[%s10340_s19 + $0xe4] sm:$0x8] }
 0x406   : > { %5317 = vrot.lane.b32.xlu2 %v5125_v33, %s10294_s26  ;;  %v3685_v33 = vld [vmem:[%s10340_s19 + $0xec] sm:$0x1] }
 0x407   : > { %v3911_v8 = vrot.slane %v3685_v33, 5 }
 0x409   : > { %v3912_v48 = vsel %vm11444_vm15, %v3910_v59, %v3911_v8  ;;  %v10099_v8 = vld [vmem:[#allocation2 + $0x60] sm:$0xff] }
 0x40d   : > { %4525 = vrot.lane.b32.xlu0 %v4417_v6, %s10293_s25  ;;  %v3498_v21 = vpop.permute.xlu2 %3497  ;;  %4527 = vrot.lane.b32.xlu1 %v4420_v25, %s10293_s25 }
 0x40e   : > { %5608 = vrot.lane.b32.xlu2 %v5475_v2, %s10295_s27  ;;  %3610 = vst.msk [vmem:[#allocation2 + $0x80] sm:$0xf] %vm3577_vm10, %v3498_v21  ;;  %v5803_v21 = vld [vmem:[#allocation3 + $0x38] sm:$0xff] }
 0x410   : > { %9705 = vmatmul.msk.bf16.gmra.mxu0 %vm7001_vm0, %v10144_v15  ;;  %v5150_v15 = vshrl.u32 %v4701_v58, 16 }
 0x411   : > { %9436 = vmatmul.msk.bf16.gmra.mxu1 %vm5915_vm3, %v10095_v22  ;;  %v5141_v22 = vshrl.u32 %v12952_v29, 16 }
 0x412   : > { %9521 = vmatmul.msk.bf16.gmra.mxu2 %vm5915_vm3, %v10111_v46  ;;  %v2656_v46 = vpop.permute.xlu1 %2655  ;;  %v5152_v20 = vrot.slane %v5150_v15, 7 }
 0x413   : > { %9613 = vmatmul.msk.bf16.gmra.mxu3 %vm7001_vm0, %v10127_v35  ;;  %v5153_v35 = vshll.u32 %v4701_v58, 16  ;;  %v5143_v34 = vrot.slane %v5141_v22, 7  ;;  %2767 = vst.msk [vmem:[#allocation2 + $0x84] sm:$0xf] %vm2733_vm9, %v2656_v46  ;;  %v5477_v22 = vld [vmem:[%s10340_s19 + $0xec] sm:$0xf] }
 0x415   : > { %v5148_v51 = vrot.slane %v5143_v34, 4  ;;  %v5155_v61 = vor.u32 %v5153_v35, %v5152_v20  ;;  %v4008_v57 = vpop.permute.xlu2 %4007  ;;  %5610 = vrot.lane.b32.xlu1 %v5476_v14, %s10295_s27 }
 0x416   : > { %3509 = vrot.lane.b32.xlu2 %v3326_v1, %s10292_s24 }
 0x417   : > { %v5156_v39 = vsel %vm11502_vm8, %v5148_v51, %v5155_v61 }
 0x418   : > { %5323 = vrot.lane.b32.xlu0 %v5156_v39, %s10294_s26 }
 0x419   : > { %v5987_v4 = vpop.f32.mrf.mxu0 }
 0x41a   : > { %v6339_v53 = vpop.f32.mrf.mxu1  ;;  %v6061_v52 = vadd.f32 %v5987_v4, %v5800_v41  ;;  %v3500_v41 = vpop.permute.xlu0 %3499  ;;  %v10097_v4 = vld [vmem:[#allocation2 + $0x50] sm:$0xff] }
 0x41b   : > { %v6416_v7 = vadd.f32 %v6339_v53, %v6156_v60  ;;  %3611 = vst.msk [vmem:[#allocation2 + $0x84] sm:$0xf] %vm3577_vm10, %v3500_v41  ;;  %v4006_v5 = vpop.permute.xlu1 %4005  ;;  %v10146_v60 = vld [vmem:[#allocation2 + $0x50] sm:$0xff] }
 0x41c   : > { %6093 = vst.msk [vmem:[#allocation3 + $0x20] sm:$0xff] %vm5731_vm4, %v6061_v52  ;;  %v10113_v53 = vld [vmem:[#allocation2 + $0x50] sm:$0xff]  ;;  %v5827_v52 = vld [vmem:[#allocation3 + $0xf8] sm:$0xff] }
 0x41d   : > { %6448 = vst.msk [vmem:[#allocation3 + $0x10] sm:$0xff] %vm5731_vm4, %v6416_v7 }
 0x41e   : > { %4119 = vst.msk [vmem:[#allocation2 + $0x84] sm:$0xf] %vm4085_vm11, %v4008_v57  ;;  %4019 = vrot.lane.b32.xlu2 %v3912_v48, %s10291_s23  ;;  %v10131_v48 = vld [vmem:[#allocation2 + $0x60] sm:$0xff] }
 0x41f   : > { %4118 = vst.msk [vmem:[#allocation2 + $0x80] sm:$0xf] %vm4085_vm11, %v4006_v5  ;;  %v5310_v11 = vpop.permute.xlu2 %5309 }
 0x420   : > { %9706 = vmatmul.msk.bf16.gmra.mxu0 %vm7001_vm0, %v10145_v43 }
 0x421   : > { %v6691_v37 = vpop.f32.mrf.mxu2  ;;  %9437 = vmatmul.msk.bf16.gmra.mxu1 %vm5915_vm3, %v10096_v47  ;;  %v5989_v40 = vpop.f32.mrf.mxu0  ;;  %v5144_v47 = vshll.u32 %v12952_v29, 16 }
 0x422   : > { %v6771_v16 = vadd.f32 %v6691_v37, %v6511_v17  ;;  %v6341_v54 = vpop.f32.mrf.mxu1  ;;  %9522 = vmatmul.msk.bf16.gmra.mxu2 %vm5915_vm3, %v10112_v10  ;;  %v6062_v13 = vadd.f32 %v5989_v40, %v5801_v19  ;;  %v4514_v31 = vpop.permute.xlu0 %4513  ;;  %v5136_v10 = vshrl.u32 %v4699_v44, 16  ;;  %v5802_v37 = vld [vmem:[#allocation3 + $0x30] sm:$0xff]  ;;  %v10147_v40 = vld [vmem:[#allocation2 + $0x58] sm:$0xff] }
 0x423   : > { %9614 = vmatmul.msk.bf16.gmra.mxu3 %vm7001_vm0, %v10128_v3  ;;  %v6417_v49 = vadd.f32 %v6341_v54, %v6157_v62  ;;  %4626 = vst.msk [vmem:[#allocation2 + $0x80] sm:$0xf] %vm4593_vm13, %v4514_v31  ;;  %v4516_v7 = vpop.permute.xlu1 %4515  ;;  %v5146_v3 = vor.u32 %v5144_v47, %v5143_v34  ;;  %v6158_v29 = vld [vmem:[#allocation3 + $0x20] sm:$0xff]  ;;  %v10114_v62 = vld [vmem:[#allocation2 + $0x58] sm:$0xff] }
 0x424   : > { %6803 = vst.msk [vmem:[#allocation3] sm:$0xff] %vm5731_vm4, %v6771_v16  ;;  %v9270_v43 = vrot.slane %v5136_v10, 11  ;;  %v10098_v16 = vld [vmem:[#allocation2 + $0x58] sm:$0xff]  ;;  %v6513_v46 = vld [vmem:[#allocation3 + $0x10] sm:$0xff] }
 0x425   : > { %6094 = vst.msk [vmem:[#allocation3 + $0x28] sm:$0xff] %vm5731_vm4, %v6062_v13  ;;  %v10130_v54 = vld [vmem:[#allocation2 + $0x58] sm:$0xff] }
 0x426   : > { %6449 = vst.msk [vmem:[#allocation3 + $0x18] sm:$0xff] %vm5731_vm4, %v6417_v49  ;;  %v5147_v17 = vsel %vm11502_vm8, %v9270_v43, %v5146_v3  ;;  %v10174_v49 = vld [vmem:[%s13770_s1 + $0x64] sm:$0xff] }
 0x427   : > { %5422 = vst.msk [vmem:[#allocation2 + $0x80] sm:$0xf] %vm5389_vm14, %v5310_v11  ;;  %v5601_v2 = vpop.permute.xlu2 %5600  ;;  %5321 = vrot.lane.b32.xlu2 %v5147_v17, %s10294_s26  ;;  %7801 = vmatpush.bf16.msra.mxu1 %v10174_v49  ;;  %v10100_v49 = vld [vmem:[#allocation2 + $0x68] sm:$0xff] }
 0x428   : > { %4627 = vst.msk [vmem:[#allocation2 + $0x84] sm:$0xf] %vm4593_vm13, %v4516_v7 }
 0x429   : > { %v6693_v38 = vpop.f32.mrf.mxu2 }
 0x42a   : > { %v6772_v56 = vadd.f32 %v6693_v38, %v6512_v55  ;;  %v6052_v30 = vpop.f32.mrf.mxu3  ;;  %v5312_v19 = vpop.permute.xlu0 %5311 }
 0x42b   : > { %v6087_v26 = vadd.f32 %v6052_v30, %v5826_v0  ;;  %5423 = vst.msk [vmem:[#allocation2 + $0x84] sm:$0xf] %vm5389_vm14, %v5312_v19  ;;  %v5599_v9 = vpop.permute.xlu1 %5598  ;;  %v6868_v36 = vld [vmem:[#allocation3] sm:$0xff] }
 0x42c   : > { %6804 = vst.msk [vmem:[#allocation3 + $0x8] sm:$0xff] %vm5731_vm4, %v6772_v56  ;;  %v6159_v61 = vld [vmem:[#allocation3 + $0x28] sm:$0xff] }
 0x42d   : > { %6119 = vst.msk [vmem:[#allocation3 + $0xf0] sm:$0xff] %vm5731_vm4, %v6087_v26  ;;  %v6514_v0 = vld [vmem:[#allocation3 + $0x18] sm:$0xff] }
 0x42e   : > { %5712 = vst.msk [vmem:[#allocation2 + $0x84] sm:$0xf] %vm5678_vm1, %v5601_v2 }
 0x42f   : > { %5711 = vst.msk [vmem:[#allocation2 + $0x80] sm:$0xf] %vm5678_vm1, %v5599_v9  ;;  %5612 = vrot.lane.b32.xlu2 %v5477_v22, %s10295_s27 }
 0x430   : > { %9707 = vmatmul.msk.bf16.gmra.mxu0 %vm7001_vm0, %v10146_v60  ;;  %v3502_v13 = vpop.permute.xlu2 %3501 }
 0x431   : > { %9438 = vmatmul.msk.bf16.gmra.mxu1 %vm5915_vm3, %v10097_v4  ;;  %v10148_v4 = vld [vmem:[#allocation2 + $0x60] sm:$0xff] }
 0x432   : > { %9523 = vmatmul.msk.bf16.gmra.mxu2 %vm5915_vm3, %v10113_v53  ;;  %v6054_v63 = vpop.f32.mrf.mxu3  ;;  %v2658_v15 = vpop.permute.xlu0 %2657 }
 0x433   : > { %9615 = vmatmul.msk.bf16.gmra.mxu3 %vm7001_vm0, %v10129_v23  ;;  %v6088_v6 = vadd.f32 %v6054_v63, %v5827_v52  ;;  %2768 = vst.msk [vmem:[#allocation2 + $0x88] sm:$0xf] %vm2733_vm9, %v2658_v15  ;;  %v2660_v55 = vpop.permute.xlu1 %2659  ;;  %v6869_v1 = vld [vmem:[#allocation3 + $0x8] sm:$0xff]  ;;  %v10115_v23 = vld [vmem:[#allocation2 + $0x60] sm:$0xff] }
 0x434   : > { %3612 = vst.msk [vmem:[#allocation2 + $0x88] sm:$0xf] %vm3577_vm10, %v3502_v13 }
 0x435   : > { %6120 = vst.msk [vmem:[#allocation3 + $0xf8] sm:$0xff] %vm5731_vm4, %v6088_v6 }
 0x436   : > { %2769 = vst.msk [vmem:[#allocation2 + $0x8c] sm:$0xf] %vm2733_vm9, %v2660_v55 }
 0x438   : > { %v4012_v14 = vpop.permute.xlu2 %4011 }
 0x43a   : > { %v3504_v38 = vpop.permute.xlu0 %3503 }
 0x43b   : > { %3613 = vst.msk [vmem:[#allocation2 + $0x8c] sm:$0xf] %vm3577_vm10, %v3504_v38  ;;  %v4010_v60 = vpop.permute.xlu1 %4009 }
 0x43c   : > { %4121 = vst.msk [vmem:[#allocation2 + $0x8c] sm:$0xf] %vm4085_vm11, %v4012_v14  ;;  %v6163_v14 = vld [vmem:[#allocation3 + $0x48] sm:$0xff] }
 0x43d   : > { %v5992_v25 = vpop.f32.mrf.mxu0  ;;  %4120 = vst.msk [vmem:[#allocation2 + $0x88] sm:$0xf] %vm4085_vm11, %v4010_v60 }
 0x43e   : > { %v6344_v58 = vpop.f32.mrf.mxu1  ;;  %v6063_v32 = vadd.f32 %v5992_v25, %v5802_v37 }
 0x43f   : > { %v6418_v12 = vadd.f32 %v6344_v58, %v6158_v29 }
 0x440   : > { %6095 = vst.msk [vmem:[#allocation3 + $0x30] sm:$0xff] %vm5731_vm4, %v6063_v32  ;;  %9708 = vmatmul.msk.bf16.gmra.mxu0 %vm7001_vm0, %v10147_v40  ;;  %v5314_v11 = vpop.permute.xlu2 %5313 }
 0x441   : > { %9439 = vmatmul.msk.bf16.gmra.mxu1 %vm5915_vm3, %v10098_v16  ;;  %6450 = vst.msk [vmem:[#allocation3 + $0x20] sm:$0xff] %vm5731_vm4, %v6418_v12 }
 0x442   : > { %9524 = vmatmul.msk.bf16.gmra.mxu2 %vm5915_vm3, %v10114_v62  ;;  %v4518_v31 = vpop.permute.xlu0 %4517 }
 0x443   : > { %9616 = vmatmul.msk.bf16.gmra.mxu3 %vm7001_vm0, %v10130_v54  ;;  %4628 = vst.msk [vmem:[#allocation2 + $0x88] sm:$0xf] %vm4593_vm13, %v4518_v31  ;;  %v4520_v2 = vpop.permute.xlu1 %4519  ;;  %v6162_v54 = vld [vmem:[#allocation3 + $0x40] sm:$0xff] }
 0x444   : > { %5424 = vst.msk [vmem:[#allocation2 + $0x88] sm:$0xf] %vm5389_vm14, %v5314_v11  ;;  %v10101_v11 = vld [vmem:[#allocation2 + $0x70] sm:$0xff] }
 0x445   : > { %v6696_v35 = vpop.f32.mrf.mxu2  ;;  %v5994_v51 = vpop.f32.mrf.mxu0  ;;  %4629 = vst.msk [vmem:[#allocation2 + $0x8c] sm:$0xf] %vm4593_vm13, %v4520_v2 }
 0x446   : > { %v7063_v34 = vpop.f32.mrf.mxu3  ;;  %v6773_v20 = vadd.f32 %v6696_v35, %v6513_v46  ;;  %v6346_v45 = vpop.f32.mrf.mxu1  ;;  %v6064_v39 = vadd.f32 %v5994_v51, %v5803_v21  ;;  %v10149_v21 = vld [vmem:[#allocation2 + $0x68] sm:$0xff] }
 0x447   : > { %v7143_v50 = vadd.f32 %v7063_v34, %v6868_v36  ;;  %v6419_v18 = vadd.f32 %v6346_v45, %v6159_v61  ;;  %v6160_v30 = vld [vmem:[#allocation3 + $0x30] sm:$0xff]  ;;  %v10116_v36 = vld [vmem:[#allocation2 + $0x68] sm:$0xff] }
 0x448   : > { %6805 = vst.msk [vmem:[#allocation3 + $0x10] sm:$0xff] %vm5731_vm4, %v6773_v20  ;;  %v6515_v7 = vld [vmem:[#allocation3 + $0x20] sm:$0xff]  ;;  %v5605_v29 = vpop.permute.xlu2 %5604  ;;  %v10132_v34 = vld [vmem:[#allocation2 + $0x68] sm:$0xff] }
 0x449   : > { %7175 = vst.msk [vmem:[#allocation3] sm:$0xff] %vm5731_vm4, %v7143_v50 }
 0x44a   : > { %6096 = vst.msk [vmem:[#allocation3 + $0x38] sm:$0xff] %vm5731_vm4, %v6064_v39  ;;  %v5316_v25 = vpop.permute.xlu0 %5315 }
 0x44b   : > { %6451 = vst.msk [vmem:[#allocation3 + $0x28] sm:$0xff] %vm5731_vm4, %v6419_v18  ;;  %v5603_v46 = vpop.permute.xlu1 %5602 }
 0x44c   : > { %5425 = vst.msk [vmem:[#allocation2 + $0x8c] sm:$0xf] %vm5389_vm14, %v5316_v25 }
 0x44d   : > { %v6698_v56 = vpop.f32.mrf.mxu2  ;;  %v7433_v26 = vpop.f32.mrf.mxu0  ;;  %5714 = vst.msk [vmem:[#allocation2 + $0x8c] sm:$0xf] %vm5678_vm1, %v5605_v29  ;;  %v6165_v29 = vld [vmem:[#allocation3 + $0x58] sm:$0xff] }
 0x44e   : > { %v7065_v41 = vpop.f32.mrf.mxu3  ;;  %v6774_v57 = vadd.f32 %v6698_v56, %v6514_v0  ;;  %v6349_v33 = vpop.f32.mrf.mxu1  ;;  %5713 = vst.msk [vmem:[#allocation2 + $0x88] sm:$0xf] %vm5678_vm1, %v5603_v46 }
 0x44f   : > { %v7144_v5 = vadd.f32 %v7065_v41, %v6869_v1  ;;  %v6420_v59 = vadd.f32 %v6349_v33, %v6160_v30  ;;  %v6870_v44 = vld [vmem:[#allocation3 + $0x10] sm:$0xff] }
 0x450   : > { %6806 = vst.msk [vmem:[#allocation3 + $0x18] sm:$0xff] %vm5731_vm4, %v6774_v57  ;;  %v7240_v53 = vld [vmem:[#allocation3] sm:$0xff]  ;;  %9709 = vmatmul.msk.bf16.gmra.mxu0 %vm7001_vm0, %v10148_v4  ;;  %v3506_v51 = vpop.permute.xlu2 %3505 }
 0x451   : > { %7176 = vst.msk [vmem:[#allocation3 + $0x8] sm:$0xff] %vm5731_vm4, %v7144_v5  ;;  %v7513_v52 = vadd.f32 %v7433_v26, %v7240_v53  ;;  %9440 = vmatmul.msk.bf16.gmra.mxu1 %vm5915_vm3, %v10099_v8  ;;  %v6161_v3 = vld [vmem:[#allocation3 + $0x38] sm:$0xff] }
 0x452   : > { %6452 = vst.msk [vmem:[#allocation3 + $0x30] sm:$0xff] %vm5731_vm4, %v6420_v59  ;;  %9525 = vmatmul.msk.bf16.gmra.mxu2 %vm5915_vm3, %v10115_v23  ;;  %v6516_v58 = vld [vmem:[#allocation3 + $0x28] sm:$0xff]  ;;  %v2662_v50 = vpop.permute.xlu0 %2661  ;;  %v6164_v23 = vld [vmem:[#allocation3 + $0x50] sm:$0xff] }
 0x453   : > { %9617 = vmatmul.msk.bf16.gmra.mxu3 %vm7001_vm0, %v10131_v48  ;;  %7545 = vst.msk [vmem:[#allocation3] sm:$0xff] %vm5731_vm4, %v7513_v52  ;;  %v2664_v41 = vpop.permute.xlu1 %2663 }
 0x454   : > { %2770 = vst.msk [vmem:[#allocation2 + $0x90] sm:$0xf] %vm2733_vm9, %v2662_v50  ;;  %v10102_v50 = vld [vmem:[#allocation2 + $0x78] sm:$0xff] }
 0x455   : > { %v6701_v63 = vpop.f32.mrf.mxu2  ;;  %v7435_v17 = vpop.f32.mrf.mxu0  ;;  %3614 = vst.msk [vmem:[#allocation2 + $0x90] sm:$0xf] %vm3577_vm10, %v3506_v51  ;;  %v10151_v51 = vld [vmem:[#allocation2 + $0x78] sm:$0xff] }
 0x456   : > { %v7068_v47 = vpop.f32.mrf.mxu3  ;;  %v6775_v6 = vadd.f32 %v6701_v63, %v6515_v7  ;;  %v6351_v43 = vpop.f32.mrf.mxu1  ;;  %2771 = vst.msk [vmem:[#allocation2 + $0x94] sm:$0xf] %vm2733_vm9, %v2664_v41  ;;  %v10150_v7 = vld [vmem:[#allocation2 + $0x70] sm:$0xff] }
 0x457   : > { %v7145_v10 = vadd.f32 %v7068_v47, %v6870_v44  ;;  %v6421_v19 = vadd.f32 %v6351_v43, %v6161_v3  ;;  %v6871_v12 = vld [vmem:[#allocation3 + $0x18] sm:$0xff]  ;;  %v10117_v47 = vld [vmem:[#allocation2 + $0x70] sm:$0xff] }
 0x458   : > { %6807 = vst.msk [vmem:[#allocation3 + $0x20] sm:$0xff] %vm5731_vm4, %v6775_v6  ;;  %v7241_v9 = vld [vmem:[#allocation3 + $0x8] sm:$0xff]  ;;  %v4016_v33 = vpop.permute.xlu2 %4015  ;;  %v10133_v6 = vld [vmem:[#allocation2 + $0x70] sm:$0xff] }
 0x459   : > { %7177 = vst.msk [vmem:[#allocation3 + $0x10] sm:$0xff] %vm5731_vm4, %v7145_v10  ;;  %v7514_v37 = vadd.f32 %v7435_v17, %v7241_v9  ;;  %v6517_v61 = vld [vmem:[#allocation3 + $0x30] sm:$0xff] }
 0x45a   : > { %6453 = vst.msk [vmem:[#allocation3 + $0x38] sm:$0xff] %vm5731_vm4, %v6421_v19  ;;  %v3508_v30 = vpop.permute.xlu0 %3507 }
 0x45b   : > { %7546 = vst.msk [vmem:[#allocation3 + $0x8] sm:$0xff] %vm5731_vm4, %v7514_v37  ;;  %v4014_v63 = vpop.permute.xlu1 %4013 }
 0x45c   : > { %3615 = vst.msk [vmem:[#allocation2 + $0x94] sm:$0xf] %vm3577_vm10, %v3508_v30  ;;  %v6167_v30 = vld [vmem:[#allocation3 + $0x68] sm:$0xff] }
 0x45d   : > { %v6703_v32 = vpop.f32.mrf.mxu2  ;;  %v7438_v15 = vpop.f32.mrf.mxu0  ;;  %4123 = vst.msk [vmem:[#allocation2 + $0x94] sm:$0xf] %vm4085_vm11, %v4016_v33 }
 0x45e   : > { %v7070_v16 = vpop.f32.mrf.mxu3  ;;  %v6776_v40 = vadd.f32 %v6703_v32, %v6516_v58  ;;  %v6354_v22 = vpop.f32.mrf.mxu1  ;;  %4122 = vst.msk [vmem:[#allocation2 + $0x90] sm:$0xf] %vm4085_vm11, %v4014_v63 }
 0x45f   : > { %v7146_v62 = vadd.f32 %v7070_v16, %v6871_v12  ;;  %v6422_v13 = vadd.f32 %v6354_v22, %v6162_v54  ;;  %v6872_v39 = vld [vmem:[#allocation3 + $0x20] sm:$0xff] }
 0x460   : > { %6808 = vst.msk [vmem:[#allocation3 + $0x28] sm:$0xff] %vm5731_vm4, %v6776_v40  ;;  %v7242_v35 = vld [vmem:[#allocation3 + $0x10] sm:$0xff]  ;;  %9710 = vmatmul.msk.bf16.gmra.mxu0 %vm7001_vm0, %v10149_v21  ;;  %v5318_v43 = vpop.permute.xlu2 %5317 }
 0x461   : > { %7178 = vst.msk [vmem:[#allocation3 + $0x18] sm:$0xff] %vm5731_vm4, %v7146_v62  ;;  %v7515_v20 = vadd.f32 %v7438_v15, %v7242_v35  ;;  %9441 = vmatmul.msk.bf16.gmra.mxu1 %vm5915_vm3, %v10100_v49  ;;  %v6518_v26 = vld [vmem:[#allocation3 + $0x38] sm:$0xff]  ;;  %v6166_v35 = vld [vmem:[#allocation3 + $0x60] sm:$0xff] }
 0x462   : > { %6454 = vst.msk [vmem:[#allocation3 + $0x40] sm:$0xff] %vm5731_vm4, %v6422_v13  ;;  %9526 = vmatmul.msk.bf16.gmra.mxu2 %vm5915_vm3, %v10116_v36  ;;  %v4522_v3 = vpop.permute.xlu0 %4521 }
 0x463   : > { %9618 = vmatmul.msk.bf16.gmra.mxu3 %vm7001_vm0, %v10132_v34  ;;  %7547 = vst.msk [vmem:[#allocation3 + $0x10] sm:$0xff] %vm5731_vm4, %v7515_v20  ;;  %v4524_v16 = vpop.permute.xlu1 %4523 }
 0x464   : > { %4630 = vst.msk [vmem:[#allocation2 + $0x90] sm:$0xf] %vm4593_vm13, %v4522_v3  ;;  %v10103_v3 = vld [vmem:[#allocation2 + $0x80] sm:$0xff] }
 0x465   : > { %v6706_v45 = vpop.f32.mrf.mxu2  ;;  %v7440_v56 = vpop.f32.mrf.mxu0  ;;  %5426 = vst.msk [vmem:[#allocation2 + $0x90] sm:$0xf] %vm5389_vm14, %v5318_v43  ;;  %v10152_v43 = vld [vmem:[#allocation2 + $0x80] sm:$0xff] }
 0x466   : > { %v7073_v18 = vpop.f32.mrf.mxu3  ;;  %v6777_v55 = vadd.f32 %v6706_v45, %v6517_v61  ;;  %v6356_v0 = vpop.f32.mrf.mxu1  ;;  %4631 = vst.msk [vmem:[#allocation2 + $0x94] sm:$0xf] %vm4593_vm13, %v4524_v16 }
 0x467   : > { %v7147_v38 = vadd.f32 %v7073_v18, %v6872_v39  ;;  %v6423_v1 = vadd.f32 %v6356_v0, %v6163_v14  ;;  %v6873_v8 = vld [vmem:[#allocation3 + $0x28] sm:$0xff]  ;;  %v10118_v18 = vld [vmem:[#allocation2 + $0x78] sm:$0xff] }
 0x468   : > { %6809 = vst.msk [vmem:[#allocation3 + $0x30] sm:$0xff] %vm5731_vm4, %v6777_v55  ;;  %v7243_v57 = vld [vmem:[#allocation3 + $0x18] sm:$0xff]  ;;  %v5609_v61 = vpop.permute.xlu2 %5608 }
 0x469   : > { %7179 = vst.msk [vmem:[#allocation3 + $0x20] sm:$0xff] %vm5731_vm4, %v7147_v38  ;;  %v7516_v5 = vadd.f32 %v7440_v56, %v7243_v57  ;;  %v6519_v17 = vld [vmem:[#allocation3 + $0x40] sm:$0xff]  ;;  %v10134_v55 = vld [vmem:[#allocation2 + $0x78] sm:$0xff] }
 0x46a   : > { %6455 = vst.msk [vmem:[#allocation3 + $0x48] sm:$0xff] %vm5731_vm4, %v6423_v1  ;;  %v5320_v54 = vpop.permute.xlu0 %5319 }
 0x46b   : > { %7548 = vst.msk [vmem:[#allocation3 + $0x18] sm:$0xff] %vm5731_vm4, %v7516_v5  ;;  %v5607_v45 = vpop.permute.xlu1 %5606 }
 0x46c   : > { %5427 = vst.msk [vmem:[#allocation2 + $0x94] sm:$0xf] %vm5389_vm14, %v5320_v54  ;;  %v6169_v54 = vld [vmem:[#allocation3 + $0x78] sm:$0xff] }
 0x46d   : > { %v6708_v59 = vpop.f32.mrf.mxu2  ;;  %v7443_v52 = vpop.f32.mrf.mxu0  ;;  %5716 = vst.msk [vmem:[#allocation2 + $0x94] sm:$0xf] %vm5678_vm1, %v5609_v61 }
 0x46e   : > { %v7075_v4 = vpop.f32.mrf.mxu3  ;;  %v6778_v60 = vadd.f32 %v6708_v59, %v6518_v26  ;;  %v6359_v48 = vpop.f32.mrf.mxu1  ;;  %5715 = vst.msk [vmem:[#allocation2 + $0x90] sm:$0xf] %vm5678_vm1, %v5607_v45 }
 0x46f   : > { %v7148_v53 = vadd.f32 %v7075_v4, %v6873_v8  ;;  %v6424_v31 = vadd.f32 %v6359_v48, %v6164_v23  ;;  %v6874_v2 = vld [vmem:[#allocation3 + $0x30] sm:$0xff] }
 0x470   : > { %6810 = vst.msk [vmem:[#allocation3 + $0x38] sm:$0xff] %vm5731_vm4, %v6778_v60  ;;  %v7244_v44 = vld [vmem:[#allocation3 + $0x20] sm:$0xff]  ;;  %9711 = vmatmul.msk.bf16.gmra.mxu0 %vm7001_vm0, %v10150_v7  ;;  %v3510_v8 = vpop.permute.xlu2 %3509 }
 0x471   : > { %7180 = vst.msk [vmem:[#allocation3 + $0x28] sm:$0xff] %vm5731_vm4, %v7148_v53  ;;  %v7517_v10 = vadd.f32 %v7443_v52, %v7244_v44  ;;  %9442 = vmatmul.msk.bf16.gmra.mxu1 %vm5915_vm3, %v10101_v11  ;;  %v6520_v22 = vld [vmem:[#allocation3 + $0x48] sm:$0xff]  ;;  %v6168_v44 = vld [vmem:[#allocation3 + $0x70] sm:$0xff] }
 0x472   : > { %6456 = vst.msk [vmem:[#allocation3 + $0x50] sm:$0xff] %vm5731_vm4, %v6424_v31  ;;  %9527 = vmatmul.msk.bf16.gmra.mxu2 %vm5915_vm3, %v10117_v47  ;;  %v2666_v14 = vpop.permute.xlu0 %2665 }
 0x473   : > { %9619 = vmatmul.msk.bf16.gmra.mxu3 %vm7001_vm0, %v10133_v6  ;;  %7549 = vst.msk [vmem:[#allocation3 + $0x20] sm:$0xff] %vm5731_vm4, %v7517_v10  ;;  %v2668_v4 = vpop.permute.xlu1 %2667 }
 0x474   : > { %2772 = vst.msk [vmem:[#allocation2 + $0x98] sm:$0xf] %vm2733_vm9, %v2666_v14  ;;  %v10153_v14 = vld [vmem:[#allocation2 + $0x88] sm:$0xff] }
 0x475   : > { %v6711_v19 = vpop.f32.mrf.mxu2  ;;  %v7445_v32 = vpop.f32.mrf.mxu0  ;;  %3616 = vst.msk [vmem:[#allocation2 + $0x98] sm:$0xf] %vm3577_vm10, %v3510_v8 }
 0x476   : > { %v7078_v9 = vpop.f32.mrf.mxu3  ;;  %v6779_v37 = vadd.f32 %v6711_v19, %v6519_v17  ;;  %v6361_v58 = vpop.f32.mrf.mxu1  ;;  %2773 = vst.msk [vmem:[#allocation2 + $0x9c] sm:$0xf] %vm2733_vm9, %v2668_v4 }
 0x477   : > { %v7149_v25 = vadd.f32 %v7078_v9, %v6874_v2  ;;  %v6425_v12 = vadd.f32 %v6361_v58, %v6165_v29  ;;  %v6875_v13 = vld [vmem:[#allocation3 + $0x38] sm:$0xff]  ;;  %v10119_v9 = vld [vmem:[#allocation2 + $0x80] sm:$0xff] }
 0x478   : > { %6811 = vst.msk [vmem:[#allocation3 + $0x40] sm:$0xff] %vm5731_vm4, %v6779_v37  ;;  %v7245_v40 = vld [vmem:[#allocation3 + $0x28] sm:$0xff]  ;;  %v4020_v17 = vpop.permute.xlu2 %4019  ;;  %v10135_v37 = vld [vmem:[#allocation2 + $0x80] sm:$0xff] }
 0x479   : > { %7181 = vst.msk [vmem:[#allocation3 + $0x30] sm:$0xff] %vm5731_vm4, %v7149_v25  ;;  %v7518_v62 = vadd.f32 %v7445_v32, %v7245_v40  ;;  %v6521_v0 = vld [vmem:[#allocation3 + $0x50] sm:$0xff] }
 0x47a   : > { %6457 = vst.msk [vmem:[#allocation3 + $0x58] sm:$0xff] %vm5731_vm4, %v6425_v12  ;;  %v3512_v23 = vpop.permute.xlu0 %3511 }
 0x47b   : > { %7550 = vst.msk [vmem:[#allocation3 + $0x28] sm:$0xff] %vm5731_vm4, %v7518_v62  ;;  %v4018_v19 = vpop.permute.xlu1 %4017 }
 0x47c   : > { %3617 = vst.msk [vmem:[#allocation2 + $0x9c] sm:$0xf] %vm3577_vm10, %v3512_v23 }
 0x47d   : > { %v6713_v15 = vpop.f32.mrf.mxu2  ;;  %v7448_v34 = vpop.f32.mrf.mxu0  ;;  %4125 = vst.msk [vmem:[#allocation2 + $0x9c] sm:$0xf] %vm4085_vm11, %v4020_v17  ;;  %v6172_v17 = vld [vmem:[#allocation3 + $0x90] sm:$0xff] }
 0x47e   : > { %v7080_v49 = vpop.f32.mrf.mxu3  ;;  %v6780_v21 = vadd.f32 %v6713_v15, %v6520_v22  ;;  %v6364_v36 = vpop.f32.mrf.mxu1  ;;  %4124 = vst.msk [vmem:[#allocation2 + $0x98] sm:$0xf] %vm4085_vm11, %v4018_v19 }
 0x47f   : > { %v7150_v46 = vadd.f32 %v7080_v49, %v6875_v13  ;;  %v6426_v20 = vadd.f32 %v6364_v36, %v6166_v35  ;;  %v6876_v1 = vld [vmem:[#allocation3 + $0x40] sm:$0xff] }
 0x480   : > { %6812 = vst.msk [vmem:[#allocation3 + $0x48] sm:$0xff] %vm5731_vm4, %v6780_v21  ;;  %v7246_v39 = vld [vmem:[#allocation3 + $0x30] sm:$0xff]  ;;  %9712 = vmatmul.msk.bf16.gmra.mxu0 %vm7001_vm0, %v10151_v51 }
 0x481   : > { %7182 = vst.msk [vmem:[#allocation3 + $0x38] sm:$0xff] %vm5731_vm4, %v7150_v46  ;;  %v7519_v38 = vadd.f32 %v7448_v34, %v7246_v39  ;;  %9443 = vmatmul.msk.bf16.gmra.mxu1 %vm5915_vm3, %v10102_v50  ;;  %v6522_v48 = vld [vmem:[#allocation3 + $0x58] sm:$0xff]  ;;  %v5322_v49 = vpop.permute.xlu2 %5321  ;;  %v6170_v39 = vld [vmem:[#allocation3 + $0x80] sm:$0xff] }
 0x482   : > { %6458 = vst.msk [vmem:[#allocation3 + $0x60] sm:$0xff] %vm5731_vm4, %v6426_v20  ;;  %9528 = vmatmul.msk.bf16.gmra.mxu2 %vm5915_vm3, %v10118_v18  ;;  %v4526_v29 = vpop.permute.xlu0 %4525 }
 0x483   : > { %9620 = vmatmul.msk.bf16.gmra.mxu3 %vm7001_vm0, %v10134_v55  ;;  %7551 = vst.msk [vmem:[#allocation3 + $0x30] sm:$0xff] %vm5731_vm4, %v7519_v38  ;;  %v4528_v46 = vpop.permute.xlu1 %4527 }
 0x484   : > { %4632 = vst.msk [vmem:[#allocation2 + $0x98] sm:$0xf] %vm4593_vm13, %v4526_v29  ;;  %v10159_v29 = vld [vmem:[#allocation2 + $0x30] sm:$0xff] }
 0x485   : > { %v6716_v56 = vpop.f32.mrf.mxu2  ;;  %v7450_v26 = vpop.f32.mrf.mxu0  ;;  %5428 = vst.msk [vmem:[#allocation2 + $0x98] sm:$0xf] %vm5389_vm14, %v5322_v49 }
 0x486   : > { %v7083_v41 = vpop.f32.mrf.mxu3  ;;  %v6781_v57 = vadd.f32 %v6716_v56, %v6521_v0  ;;  %v6366_v33 = vpop.f32.mrf.mxu1  ;;  %4633 = vst.msk [vmem:[#allocation2 + $0x9c] sm:$0xf] %vm4593_vm13, %v4528_v46  ;;  %v10158_v0 = vld [vmem:[#allocation2 + $0x28] sm:$0xff]  ;;  %v13145_v46 = vld [vmem:[%s10340_s19 + $0xf4] sm:$0xf] }
 0x487   : > { %v7151_v5 = vadd.f32 %v7083_v41, %v6876_v1  ;;  %v6427_v59 = vadd.f32 %v6366_v33, %v6167_v30  ;;  %v6877_v31 = vld [vmem:[#allocation3 + $0x48] sm:$0xff] }
 0x488   : > { %6813 = vst.msk [vmem:[#allocation3 + $0x50] sm:$0xff] %vm5731_vm4, %v6781_v57  ;;  %v7247_v60 = vld [vmem:[#allocation3 + $0x38] sm:$0xff]  ;;  %v10120_v1 = vld [vmem:[#allocation2 + $0x88] sm:$0xff] }
 0x489   : > { %7183 = vst.msk [vmem:[#allocation3 + $0x40] sm:$0xff] %vm5731_vm4, %v7151_v5  ;;  %v7520_v53 = vadd.f32 %v7450_v26, %v7247_v60  ;;  %v6523_v58 = vld [vmem:[#allocation3 + $0x60] sm:$0xff]  ;;  %v10136_v41 = vld [vmem:[#allocation2 + $0x88] sm:$0xff]  ;;  %v5613_v5 = vpop.permute.xlu2 %5612 }
 0x48a   : > { %6459 = vst.msk [vmem:[#allocation3 + $0x68] sm:$0xff] %vm5731_vm4, %v6427_v59  ;;  %v5324_v36 = vpop.permute.xlu0 %5323 }
 0x48b   : > { %7552 = vst.msk [vmem:[#allocation3 + $0x38] sm:$0xff] %vm5731_vm4, %v7520_v53  ;;  %v5611_v30 = vpop.permute.xlu1 %5610  ;;  %v6171_v53 = vld [vmem:[#allocation3 + $0x88] sm:$0xff] }
 0x48c   : > { %5429 = vst.msk [vmem:[#allocation2 + $0x9c] sm:$0xf] %vm5389_vm14, %v5324_v36  ;;  %v3915_v36 = vrot.slane %v13145_v46, 5 }
 0x48d   : > { %v6718_v52 = vpop.f32.mrf.mxu2  ;;  %v7453_v6 = vpop.f32.mrf.mxu0  ;;  %5718 = vst.msk [vmem:[#allocation2 + $0x9c] sm:$0xf] %vm5678_vm1, %v5613_v5  ;;  %v4194_v5 = vld [vmem:[%s10340_s19 + $0xf0] sm:$0x8] }
 0x48e   : > { %v7085_v11 = vpop.f32.mrf.mxu3  ;;  %v6782_v7 = vadd.f32 %v6718_v52, %v6522_v48  ;;  %v6369_v47 = vpop.f32.mrf.mxu1  ;;  %5717 = vst.msk [vmem:[#allocation2 + $0x98] sm:$0xf] %vm5678_vm1, %v5611_v30  ;;  %v4195_v30 = vld [vmem:[%s10340_s19 + $0xf4] sm:$0xf] }
 0x48f   : > { %v7152_v63 = vadd.f32 %v7085_v11, %v6877_v31  ;;  %v6428_v10 = vadd.f32 %v6369_v47, %v6168_v44  ;;  %v6878_v12 = vld [vmem:[#allocation3 + $0x50] sm:$0xff] }
 0x490   : > { %6814 = vst.msk [vmem:[#allocation3 + $0x58] sm:$0xff] %vm5731_vm4, %v6782_v7  ;;  %v7248_v2 = vld [vmem:[#allocation3 + $0x40] sm:$0xff]  ;;  %9713 = vmatmul.msk.bf16.gmra.mxu0 %vm7001_vm0, %v10152_v43  ;;  %v2533_v7 = vld [vmem:[%s10340_s19 + $0xf0] sm:$0xf] }
 0x491   : > { %7184 = vst.msk [vmem:[#allocation3 + $0x48] sm:$0xff] %vm5731_vm4, %v7152_v63  ;;  %v7521_v25 = vadd.f32 %v7453_v6, %v7248_v2  ;;  %9444 = vmatmul.msk.bf16.gmra.mxu1 %vm5915_vm3, %v10103_v3  ;;  %v6524_v34 = vld [vmem:[#allocation3 + $0x68] sm:$0xff]  ;;  %v2534_v63 = vld [vmem:[%s10340_s19 + $0xf4] sm:$0xf]  ;;  %2669 = vrot.lane.b32.xlu0 %v2533_v7, %s10290_s22 }
 0x492   : > { %6460 = vst.msk [vmem:[#allocation3 + $0x70] sm:$0xff] %vm5731_vm4, %v6428_v10  ;;  %9529 = vmatmul.msk.bf16.gmra.mxu2 %vm5915_vm3, %v10119_v9  ;;  %2671 = vrot.lane.b32.xlu1 %v2534_v63, %s10290_s22  ;;  %v2843_v9 = vld [vmem:[%s10340_s19 + $0xf4] sm:$0xf] }
 0x493   : > { %9621 = vmatmul.msk.bf16.gmra.mxu3 %vm7001_vm0, %v10135_v37  ;;  %7553 = vst.msk [vmem:[#allocation3 + $0x40] sm:$0xff] %vm5731_vm4, %v7521_v25  ;;  %v10154_v25 = vld [vmem:[#allocation2 + $0x90] sm:$0xff] }
 0x495   : > { %v6721_v32 = vpop.f32.mrf.mxu2  ;;  %v7455_v15 = vpop.f32.mrf.mxu0 }
 0x496   : > { %v7088_v16 = vpop.f32.mrf.mxu3  ;;  %v6783_v40 = vadd.f32 %v6721_v32, %v6523_v58  ;;  %v6371_v22 = vpop.f32.mrf.mxu1  ;;  %v3347_v58 = vshll.u32 %v2843_v9, 16  ;;  %v3351_v32 = vshrl.u32 %v2843_v9, 16  ;;  %v13171_v9 = vld [vmem:[%s10340_s19 + $0xf4] sm:$0xf] }
 0x497   : > { %v7153_v62 = vadd.f32 %v7088_v16, %v6878_v12  ;;  %v6429_v13 = vadd.f32 %v6371_v22, %v6169_v54  ;;  %v6879_v50 = vld [vmem:[#allocation3 + $0x58] sm:$0xff]  ;;  %v10137_v16 = vld [vmem:[#allocation2 + $0x90] sm:$0xff] }
 0x498   : > { %6815 = vst.msk [vmem:[#allocation3 + $0x60] sm:$0xff] %vm5731_vm4, %v6783_v40  ;;  %v7249_v21 = vld [vmem:[#allocation3 + $0x48] sm:$0xff]  ;;  %v10176_v40 = vld [vmem:[#allocation2 + $0x30] sm:$0xff]  ;;  %v13135_v54 = vrot.slane %v3347_v58, 5  ;;  %v3353_v22 = vrot.slane %v3351_v32, 4 }
 0x499   : > { %7185 = vst.msk [vmem:[#allocation3 + $0x50] sm:$0xff] %vm5731_vm4, %v7153_v62  ;;  %v7522_v35 = vadd.f32 %v7455_v15, %v7249_v21  ;;  %v6525_v33 = vld [vmem:[#allocation3 + $0x70] sm:$0xff]  ;;  %v2844_v15 = vld [vmem:[%s10340_s19 + $0xf8] sm:$0x1] }
 0x49a   : > { %6461 = vst.msk [vmem:[#allocation3 + $0x78] sm:$0xff] %vm5731_vm4, %v6429_v13  ;;  %v3354_v13 = vor.u32 %v3353_v22, %v13135_v54  ;;  %v3357_v49 = vshll.u32 %v2844_v15, 16  ;;  %v3686_v21 = vld [vmem:[%s10340_s19 + $0xf0] sm:$0xe] }
 0x49b   : > { %7554 = vst.msk [vmem:[#allocation3 + $0x48] sm:$0xff] %vm5731_vm4, %v7522_v35  ;;  %v9223_v35 = vrot.slane %v3686_v21, 9 }
 0x49d   : > { %v6723_v20 = vpop.f32.mrf.mxu2  ;;  %v7458_v55 = vpop.f32.mrf.mxu0 }
 0x49e   : > { %v7090_v51 = vpop.f32.mrf.mxu3  ;;  %v6784_v61 = vadd.f32 %v6723_v20, %v6524_v34  ;;  %v6374_v18 = vpop.f32.mrf.mxu1 }
 0x49f   : > { %v7154_v45 = vadd.f32 %v7090_v51, %v6879_v50  ;;  %v6430_v38 = vadd.f32 %v6374_v18, %v6170_v39  ;;  %v6880_v59 = vld [vmem:[#allocation3 + $0x60] sm:$0xff] }
 0x4a0   : > { %6816 = vst.msk [vmem:[#allocation3 + $0x68] sm:$0xff] %vm5731_vm4, %v6784_v61  ;;  %v7250_v56 = vld [vmem:[#allocation3 + $0x50] sm:$0xff]  ;;  %9714 = vmatmul.msk.bf16.gmra.mxu0 %vm7001_vm0, %v10153_v14  ;;  %v3355_v61 = vrot.slane %v3354_v13, 4 }
 0x4a1   : > { %7186 = vst.msk [vmem:[#allocation3 + $0x58] sm:$0xff] %vm5731_vm4, %v7154_v45  ;;  %v7523_v57 = vadd.f32 %v7458_v55, %v7250_v56  ;;  %9794 = vmatmul.msk.bf16.vlgmr.msra.gmra.mxu1 %vm7001_vm0, %v10158_v0  ;;  %v6526_v44 = vld [vmem:[#allocation3 + $0x78] sm:$0xff]  ;;  %v3359_v45 = vrot.slane %v3357_v49, 5  ;;  %v3916_v0 = vsel %vm11444_vm15, %v9223_v35, %v3915_v36 }
 0x4a2   : > { %6462 = vst.msk [vmem:[#allocation3 + $0x80] sm:$0xff] %vm5731_vm4, %v6430_v38  ;;  %9530 = vmatmul.msk.bf16.gmra.mxu2 %vm5915_vm3, %v10120_v1  ;;  %v6173_v55 = vld [vmem:[#allocation3 + $0x98] sm:$0xff]  ;;  %4021 = vrot.lane.b32.xlu1 %v3916_v0, %s10291_s23 }
 0x4a3   : > { %9622 = vmatmul.msk.bf16.gmra.mxu3 %vm7001_vm0, %v10136_v41  ;;  %7555 = vst.msk [vmem:[#allocation3 + $0x50] sm:$0xff] %vm5731_vm4, %v7523_v57  ;;  %v3360_v1 = vsel %vm11456_vm2, %v3355_v61, %v3359_v45  ;;  %v6175_v61 = vld [vmem:[#allocation3 + $0xa8] sm:$0xff] }
 0x4a4   : > { %3515 = vrot.lane.b32.xlu0 %v3360_v1, %s10292_s24 }
 0x4a5   : > { %v6726_v26 = vpop.f32.mrf.mxu2  ;;  %v7460_v48 = vpop.f32.mrf.mxu0 }
 0x4a6   : > { %v7093_v8 = vpop.f32.mrf.mxu3  ;;  %v6785_v4 = vadd.f32 %v6726_v26, %v6525_v33  ;;  %v6376_v23 = vpop.f32.mrf.mxu1  ;;  %v9247_v33 = vrot.slane %v4194_v5, 11  ;;  %v4423_v26 = vrot.slane %v4195_v30, 7  ;;  %v3917_v5 = vrot.slane %v3915_v36, 4 }
 0x4a7   : > { %v7155_v60 = vadd.f32 %v7093_v8, %v6880_v59  ;;  %v6431_v52 = vadd.f32 %v6376_v23, %v6171_v53  ;;  %v6881_v6 = vld [vmem:[#allocation3 + $0x68] sm:$0xff]  ;;  %v4196_v59 = vld [vmem:[%s10340_s19 + $0xf8] sm:$0x7] }
 0x4a8   : > { %6817 = vst.msk [vmem:[#allocation3 + $0x70] sm:$0xff] %vm5731_vm4, %v6785_v4  ;;  %v7251_v31 = vld [vmem:[#allocation3 + $0x58] sm:$0xff] }
 0x4a9   : > { %7187 = vst.msk [vmem:[#allocation3 + $0x60] sm:$0xff] %vm5731_vm4, %v7155_v60  ;;  %v7524_v11 = vadd.f32 %v7460_v48, %v7251_v31  ;;  %v6527_v34 = vld [vmem:[#allocation3 + $0x80] sm:$0xff]  ;;  %v10155_v23 = vld [vmem:[#allocation2 + $0x98] sm:$0xff]  ;;  %v4426_v48 = vrot.slane %v4196_v59, 7 }
 0x4aa   : > { %6463 = vst.msk [vmem:[#allocation3 + $0x88] sm:$0xff] %vm5731_vm4, %v6431_v52 }
 0x4ab   : > { %7556 = vst.msk [vmem:[#allocation3 + $0x58] sm:$0xff] %vm5731_vm4, %v7524_v11  ;;  %v6174_v11 = vld [vmem:[#allocation3 + $0xa0] sm:$0xff] }
 0x4ad   : > { %v6728_v47 = vpop.f32.mrf.mxu2  ;;  %v7463_v2 = vpop.f32.mrf.mxu0 }
 0x4ae   : > { %v7095_v10 = vpop.f32.mrf.mxu3  ;;  %v6786_v3 = vadd.f32 %v6728_v47, %v6526_v44  ;;  %v6379_v19 = vpop.f32.mrf.mxu1  ;;  %v10160_v44 = vld [vmem:[#allocation2 + $0x38] sm:$0xff]  ;;  %v4424_v47 = vsel %vm11473_vm5, %v9247_v33, %v4423_v26 }
 0x4af   : > { %v7156_v43 = vadd.f32 %v7095_v10, %v6881_v6  ;;  %v6432_v37 = vadd.f32 %v6379_v19, %v6172_v17  ;;  %v6882_v50 = vld [vmem:[#allocation3 + $0x70] sm:$0xff]  ;;  %v4425_v6 = vrot.slane %v4423_v26, 4  ;;  %4529 = vrot.lane.b32.xlu0 %v4424_v47, %s10293_s25  ;;  %v2846_v47 = vld [vmem:[%s10340_s19 + $0x100] sm:$0xf] }
 0x4b0   : > { %6818 = vst.msk [vmem:[#allocation3 + $0x78] sm:$0xff] %vm5731_vm4, %v6786_v3  ;;  %v7252_v12 = vld [vmem:[#allocation3 + $0x60] sm:$0xff]  ;;  %9715 = vmatmul.msk.bf16.gmra.mxu0 %vm7001_vm0, %v10154_v25  ;;  %v10177_v3 = vld [vmem:[#allocation2 + $0x38] sm:$0xff]  ;;  %v2842_v17 = vld [vmem:[%s10340_s19 + $0xf0] sm:$0xf] }
 0x4b1   : > { %7188 = vst.msk [vmem:[#allocation3 + $0x68] sm:$0xff] %vm5731_vm4, %v7156_v43  ;;  %v7525_v62 = vadd.f32 %v7463_v2, %v7252_v12  ;;  %9795 = vmatmul.msk.bf16.gmra.mxu1 %vm7001_vm0, %v10159_v29  ;;  %v6528_v8 = vld [vmem:[#allocation3 + $0x88] sm:$0xff]  ;;  %v10193_v43 = vld [vmem:[#allocation2 + $0x38] sm:$0xff]  ;;  %v4427_v2 = vsel %vm11473_vm5, %v4425_v6, %v4426_v48  ;;  %v5163_v29 = vshrl.u32 %v13171_v9, 16  ;;  %v3338_v32 = vshrl.u32 %v2842_v17, 16 }
 0x4b2   : > { %6464 = vst.msk [vmem:[#allocation3 + $0x90] sm:$0xff] %vm5731_vm4, %v6432_v37  ;;  %9880 = vmatmul.msk.bf16.vlgmr.msra.gmra.mxu2 %vm5915_vm3, %v10176_v40  ;;  %v4704_v37 = vld [vmem:[%s10340_s19 + $0xf8] sm:$0xf]  ;;  %v3341_v12 = vshll.u32 %v2842_v17, 16  ;;  %4531 = vrot.lane.b32.xlu1 %v4427_v2, %s10293_s25  ;;  %v5166_v2 = vshll.u32 %v13171_v9, 16 }
 0x4b3   : > { %9623 = vmatmul.msk.bf16.gmra.mxu3 %vm7001_vm0, %v10137_v16  ;;  %7557 = vst.msk [vmem:[#allocation3 + $0x60] sm:$0xff] %vm5731_vm4, %v7525_v62  ;;  %v5172_v58 = vshrl.u32 %v4704_v37, 16  ;;  %v13183_v16 = vrot.slane %v5163_v29, 7  ;;  %v5175_v62 = vshll.u32 %v4704_v37, 16  ;;  %v3340_v22 = vrot.slane %v3338_v32, 4 }
 0x4b4   : > { %v3343_v15 = vrot.slane %v3341_v12, 5  ;;  %v3689_v29 = vld [vmem:[%s10340_s19 + $0xfc] sm:$0xe] }
 0x4b5   : > { %v6731_v20 = vpop.f32.mrf.mxu2  ;;  %v7465_v14 = vpop.f32.mrf.mxu0  ;;  %v5174_v40 = vrot.slane %v5172_v58, 7 }
 0x4b6   : > { %v7098_v51 = vpop.f32.mrf.mxu3  ;;  %v6787_v39 = vadd.f32 %v6731_v20, %v6527_v34  ;;  %v6381_v38 = vpop.f32.mrf.mxu1  ;;  %v5170_v34 = vrot.slane %v13183_v16, 4 }
 0x4b7   : > { %v7157_v18 = vadd.f32 %v7098_v51, %v6882_v50  ;;  %v6433_v56 = vadd.f32 %v6381_v38, %v6173_v55  ;;  %v6883_v60 = vld [vmem:[#allocation3 + $0x78] sm:$0xff]  ;;  %v5177_v20 = vor.u32 %v5175_v62, %v5174_v40 }
 0x4b8   : > { %6819 = vst.msk [vmem:[#allocation3 + $0x80] sm:$0xff] %vm5731_vm4, %v6787_v39  ;;  %v7253_v41 = vld [vmem:[#allocation3 + $0x68] sm:$0xff] }
 0x4b9   : > { %7189 = vst.msk [vmem:[#allocation3 + $0x70] sm:$0xff] %vm5731_vm4, %v7157_v18  ;;  %v7526_v57 = vadd.f32 %v7465_v14, %v7253_v41  ;;  %v6529_v13 = vld [vmem:[#allocation3 + $0x90] sm:$0xff]  ;;  %v3344_v18 = vor.u32 %v3343_v15, %v3340_v22  ;;  %v5178_v38 = vsel %vm11502_vm8, %v5170_v34, %v5177_v20  ;;  %v5168_v15 = vor.u32 %v5166_v2, %v13183_v16  ;;  %v6177_v34 = vld [vmem:[#allocation3 + $0xb8] sm:$0xff] }
 0x4ba   : > { %6465 = vst.msk [vmem:[#allocation3 + $0x98] sm:$0xff] %vm5731_vm4, %v6433_v56  ;;  %5327 = vrot.lane.b32.xlu0 %v5178_v38, %s10294_s26  ;;  %v5478_v56 = vld [vmem:[%s10340_s19 + $0xf4] sm:$0xf] }
 0x4bb   : > { %7558 = vst.msk [vmem:[#allocation3 + $0x68] sm:$0xff] %vm5731_vm4, %v7526_v57  ;;  %v3345_v0 = vrot.slane %v3344_v18, 4  ;;  %5614 = vrot.lane.b32.xlu1 %v5478_v56, %s10295_s27  ;;  %v3688_v57 = vld [vmem:[%s10340_s19 + $0xf8] sm:$0x1]  ;;  %v4198_v56 = vld [vmem:[%s10340_s19 + $0x100] sm:$0xf] }
 0x4bc   : > { %v3918_v30 = vrot.slane %v3688_v57, 5  ;;  %v4199_v57 = vld [vmem:[%s10340_s19 + $0x104] sm:$0x7] }
 0x4bd   : > { %v6733_v4 = vpop.f32.mrf.mxu2  ;;  %v7468_v63 = vpop.f32.mrf.mxu0  ;;  %v3350_v41 = vsel %vm11456_vm2, %v3345_v0, %v13135_v54  ;;  %v4197_v0 = vld [vmem:[%s10340_s19 + $0xfc] sm:$0x8] }
 0x4be   : > { %v7100_v53 = vpop.f32.mrf.mxu3  ;;  %v6788_v52 = vadd.f32 %v6733_v4, %v6528_v8  ;;  %v6384_v7 = vpop.f32.mrf.mxu1  ;;  %3513 = vrot.lane.b32.xlu2 %v3350_v41, %s10292_s24  ;;  %v2535_v4 = vld [vmem:[%s10340_s19 + $0xfc] sm:$0xf]  ;;  %v3919_v36 = vsel %vm11444_vm15, %v3917_v5, %v3918_v30  ;;  %v4430_v41 = vrot.slane %v4198_v56, 7 }
 0x4bf   : > { %v7158_v31 = vadd.f32 %v7100_v53, %v6883_v60  ;;  %v6434_v10 = vadd.f32 %v6384_v7, %v6174_v11  ;;  %v6884_v21 = vld [vmem:[#allocation3 + $0x80] sm:$0xff]  ;;  %v6176_v53 = vld [vmem:[#allocation3 + $0xb0] sm:$0xff] }
 0x4c0   : > { %6820 = vst.msk [vmem:[#allocation3 + $0x88] sm:$0xff] %vm5731_vm4, %v6788_v52  ;;  %v7254_v19 = vld [vmem:[#allocation3 + $0x70] sm:$0xff]  ;;  %9716 = vmatmul.msk.bf16.gmra.mxu0 %vm7001_vm0, %v10155_v23  ;;  %v10161_v52 = vld [vmem:[#allocation2 + $0x40] sm:$0xff] }
 0x4c1   : > { %7190 = vst.msk [vmem:[#allocation3 + $0x78] sm:$0xff] %vm5731_vm4, %v7158_v31  ;;  %v7527_v25 = vadd.f32 %v7468_v63, %v7254_v19  ;;  %9796 = vmatmul.msk.bf16.gmra.mxu1 %vm7001_vm0, %v10160_v44  ;;  %v6530_v33 = vld [vmem:[#allocation3 + $0x98] sm:$0xff]  ;;  %v10178_v11 = vld [vmem:[#allocation2 + $0x40] sm:$0xff] }
 0x4c2   : > { %6466 = vst.msk [vmem:[#allocation3 + $0xa0] sm:$0xff] %vm5731_vm4, %v6434_v10  ;;  %9881 = vmatmul.msk.bf16.gmra.mxu2 %vm5915_vm3, %v10177_v3  ;;  %v10194_v7 = vld [vmem:[#allocation2 + $0x40] sm:$0xff]  ;;  %2673 = vrot.lane.b32.xlu0 %v2535_v4, %s10290_s22  ;;  %v3371_v10 = vshll.u32 %v2846_v47, 16  ;;  %v3375_v3 = vshrl.u32 %v2846_v47, 16 }
 0x4c3   : > { %9966 = vmatmul.msk.bf16.vlgmr.msra.gmra.mxu3 %vm5915_vm3, %v10193_v43  ;;  %7559 = vst.msk [vmem:[#allocation3 + $0x70] sm:$0xff] %vm5731_vm4, %v7527_v25  ;;  %v10210_v63 = vld [vmem:[#allocation2 + $0x40] sm:$0xff]  ;;  %v4702_v25 = vld [vmem:[%s10340_s19 + $0xf0] sm:$0x8] }
 0x4c4   : > { %v2536_v44 = vld [vmem:[%s10340_s19 + $0x100] sm:$0xf]  ;;  %v2847_v43 = vld [vmem:[%s10340_s19 + $0x104] sm:$0x1]  ;;  %v13219_v17 = vrot.slane %v3371_v10, 5  ;;  %v3377_v19 = vrot.slane %v3375_v3, 4 }
 0x4c5   : > { %v6736_v49 = vpop.f32.mrf.mxu2  ;;  %v7470_v39 = vpop.f32.mrf.mxu0  ;;  %2675 = vrot.lane.b32.xlu1 %v2536_v44, %s10290_s22  ;;  %v3381_v37 = vshll.u32 %v2847_v43, 16  ;;  %v5158_v22 = vshrl.u32 %v4702_v25, 16  ;;  %v13262_v10 = vld [vmem:[%s10340_s19 + $0x100] sm:$0xf]  ;;  %v4707_v3 = vld [vmem:[%s10340_s19 + $0x104] sm:$0xf] }
 0x4c6   : > { %v7103_v35 = vpop.f32.mrf.mxu3  ;;  %v6789_v50 = vadd.f32 %v6736_v49, %v6529_v13  ;;  %v6386_v45 = vpop.f32.mrf.mxu1  ;;  %4023 = vrot.lane.b32.xlu2 %v3919_v36, %s10291_s23  ;;  %v3378_v62 = vor.u32 %v3377_v19, %v13219_v17  ;;  %v13227_v13 = vld [vmem:[%s10340_s19 + $0x100] sm:$0xf]  ;;  %v9224_v49 = vrot.slane %v3689_v29, 9  ;;  %v5479_v36 = vld [vmem:[%s10340_s19 + $0xf8] sm:$0xf]  ;;  %v5185_v19 = vshrl.u32 %v13262_v10, 16 }
 0x4c7   : > { %v7159_v51 = vadd.f32 %v7103_v35, %v6884_v21  ;;  %v6435_v55 = vadd.f32 %v6386_v45, %v6175_v61  ;;  %v6885_v59 = vld [vmem:[#allocation3 + $0x88] sm:$0xff]  ;;  %v5194_v2 = vshrl.u32 %v4707_v3, 16 }
 0x4c8   : > { %6821 = vst.msk [vmem:[#allocation3 + $0x90] sm:$0xff] %vm5731_vm4, %v6789_v50  ;;  %v7255_v14 = vld [vmem:[#allocation3 + $0x78] sm:$0xff]  ;;  %v3383_v50 = vrot.slane %v3381_v37, 5  ;;  %v3379_v45 = vrot.slane %v3378_v62, 4  ;;  %v5197_v37 = vshll.u32 %v4707_v3, 16  ;;  %v13270_v62 = vrot.slane %v5185_v19, 7 }
 0x4c9   : > { %7191 = vst.msk [vmem:[#allocation3 + $0x80] sm:$0xff] %vm5731_vm4, %v7159_v51  ;;  %v7528_v1 = vadd.f32 %v7470_v39, %v7255_v14  ;;  %v6531_v58 = vld [vmem:[#allocation3 + $0xa0] sm:$0xff]  ;;  %v3922_v51 = vrot.slane %v13227_v13, 5  ;;  %v9271_v39 = vrot.slane %v5158_v22, 11  ;;  %v5196_v22 = vrot.slane %v5194_v2, 7 }
 0x4ca   : > { %6467 = vst.msk [vmem:[#allocation3 + $0xa8] sm:$0xff] %vm5731_vm4, %v6435_v55  ;;  %v3384_v38 = vsel %vm11456_vm2, %v3379_v45, %v3383_v50  ;;  %v5192_v50 = vrot.slane %v13270_v62, 4  ;;  %v2849_v13 = vld [vmem:[%s10340_s19 + $0x10c] sm:$0xf]  ;;  %v4705_v3 = vld [vmem:[%s10340_s19 + $0xfc] sm:$0x8] }
 0x4cb   : > { %7560 = vst.msk [vmem:[#allocation3 + $0x78] sm:$0xff] %vm5731_vm4, %v7528_v1  ;;  %v3923_v18 = vsel %vm11444_vm15, %v9224_v49, %v3922_v51  ;;  %v5169_v14 = vsel %vm11502_vm8, %v9271_v39, %v5168_v15  ;;  %3519 = vrot.lane.b32.xlu0 %v3384_v38, %s10292_s24  ;;  %v9248_v1 = vrot.slane %v4197_v0, 11  ;;  %v5480_v38 = vld [vmem:[%s10340_s19 + $0x100] sm:$0xf]  ;;  %v3691_v0 = vld [vmem:[%s10340_s19 + $0x104] sm:$0x1] }
 0x4cd   : > { %v6738_v26 = vpop.f32.mrf.mxu2  ;;  %v7473_v48 = vpop.f32.mrf.mxu0  ;;  %4025 = vrot.lane.b32.xlu1 %v3923_v18, %s10291_s23 }
 0x4ce   : > { %v7105_v8 = vpop.f32.mrf.mxu3  ;;  %v6790_v60 = vadd.f32 %v6738_v26, %v6530_v33  ;;  %v6389_v23 = vpop.f32.mrf.mxu1  ;;  %5325 = vrot.lane.b32.xlu2 %v5169_v14, %s10294_s26 }
 0x4cf   : > { %v7160_v54 = vadd.f32 %v7105_v8, %v6885_v59  ;;  %v6436_v31 = vadd.f32 %v6389_v23, %v6176_v53  ;;  %v6886_v12 = vld [vmem:[#allocation3 + $0x90] sm:$0xff]  ;;  %v4433_v59 = vrot.slane %v4199_v57, 7  ;;  %v4432_v23 = vrot.slane %v4430_v41, 4 }
 0x4d0   : > { %6822 = vst.msk [vmem:[#allocation3 + $0x98] sm:$0xff] %vm5731_vm4, %v6790_v60  ;;  %v7256_v46 = vld [vmem:[#allocation3 + $0x80] sm:$0xff]  ;;  %10052 = vmatmul.msk.bf16.vlgmr.msra.gmra.mxu0 %vm5915_vm3, %v10210_v63  ;;  %v10195_v63 = vld [vmem:[#allocation2 + $0x48] sm:$0xff] }
 0x4d1   : > { %7192 = vst.msk [vmem:[#allocation3 + $0x88] sm:$0xff] %vm5731_vm4, %v7160_v54  ;;  %v7529_v6 = vadd.f32 %v7473_v48, %v7256_v46  ;;  %9797 = vmatmul.msk.bf16.gmra.mxu1 %vm7001_vm0, %v10161_v52  ;;  %v6532_v5 = vld [vmem:[#allocation3 + $0xa8] sm:$0xff]  ;;  %v6178_v60 = vld [vmem:[#allocation3 + $0xc0] sm:$0xff]  ;;  %v4431_v46 = vsel %vm11473_vm5, %v9248_v1, %v4430_v41  ;;  %v4434_v47 = vsel %vm11473_vm5, %v4432_v23, %v4433_v59  ;;  %v6180_v59 = vld [vmem:[#allocation3 + $0xd0] sm:$0xff] }
 0x4d2   : > { %6468 = vst.msk [vmem:[#allocation3 + $0xb0] sm:$0xff] %vm5731_vm4, %v6436_v31  ;;  %9882 = vmatmul.msk.bf16.gmra.mxu2 %vm5915_vm3, %v10178_v11  ;;  %v10162_v52 = vld [vmem:[#allocation2 + $0x48] sm:$0xff]  ;;  %v10212_v23 = vld [vmem:[#allocation2 + $0x50] sm:$0xff] }
 0x4d3   : > { %9967 = vmatmul.msk.bf16.gmra.mxu3 %vm5915_vm3, %v10194_v7  ;;  %7561 = vst.msk [vmem:[#allocation3 + $0x80] sm:$0xff] %vm5731_vm4, %v7529_v6  ;;  %v10179_v31 = vld [vmem:[#allocation2 + $0x48] sm:$0xff]  ;;  %v2845_v6 = vld [vmem:[%s10340_s19 + $0xfc] sm:$0xf]  ;;  %4533 = vrot.lane.b32.xlu0 %v4431_v46, %s10293_s25  ;;  %v2850_v46 = vld [vmem:[%s10340_s19 + $0x110] sm:$0x1] }
 0x4d4   : > { %v10211_v11 = vld [vmem:[#allocation2 + $0x48] sm:$0xff]  ;;  %v3362_v43 = vshrl.u32 %v2845_v6, 16  ;;  %v3365_v25 = vshll.u32 %v2845_v6, 16  ;;  %v3405_v6 = vshll.u32 %v2850_v46, 16 }
 0x4d5   : > { %v6741_v32 = vpop.f32.mrf.mxu2  ;;  %v7475_v9 = vpop.f32.mrf.mxu0  ;;  %4535 = vrot.lane.b32.xlu1 %v4434_v47, %s10293_s25  ;;  %v5188_v47 = vshll.u32 %v13262_v10, 16 }
 0x4d6   : > { %v7108_v40 = vpop.f32.mrf.mxu3  ;;  %v6791_v21 = vadd.f32 %v6741_v32, %v6531_v58  ;;  %v6391_v20 = vpop.f32.mrf.mxu1  ;;  %5616 = vrot.lane.b32.xlu2 %v5479_v36, %s10295_s27  ;;  %v3364_v29 = vrot.slane %v3362_v43, 4  ;;  %v3367_v15 = vrot.slane %v3365_v25, 5  ;;  %v3692_v43 = vld [vmem:[%s10340_s19 + $0x108] sm:$0xe] }
 0x4d7   : > { %v7161_v35 = vadd.f32 %v7108_v40, %v6886_v12  ;;  %v6437_v61 = vadd.f32 %v6391_v20, %v6177_v34  ;;  %v6887_v33 = vld [vmem:[#allocation3 + $0x98] sm:$0xff] }
 0x4d8   : > { %6823 = vst.msk [vmem:[#allocation3 + $0xa0] sm:$0xff] %vm5731_vm4, %v6791_v21  ;;  %v7257_v16 = vld [vmem:[#allocation3 + $0x88] sm:$0xff]  ;;  %v3368_v45 = vor.u32 %v3367_v15, %v3364_v29  ;;  %v6181_v15 = vld [vmem:[#allocation3 + $0xd8] sm:$0xff] }
 0x4d9   : > { %7193 = vst.msk [vmem:[#allocation3 + $0x90] sm:$0xff] %vm5731_vm4, %v7161_v35  ;;  %v7530_v55 = vadd.f32 %v7475_v9, %v7257_v16  ;;  %v6533_v58 = vld [vmem:[#allocation3 + $0xb0] sm:$0xff]  ;;  %v6179_v35 = vld [vmem:[#allocation3 + $0xc8] sm:$0xff] }
 0x4da   : > { %6469 = vst.msk [vmem:[#allocation3 + $0xb8] sm:$0xff] %vm5731_vm4, %v6437_v61  ;;  %v5199_v61 = vor.u32 %v5197_v37, %v5196_v22 }
 0x4db   : > { %7562 = vst.msk [vmem:[#allocation3 + $0x88] sm:$0xff] %vm5731_vm4, %v7530_v55  ;;  %v3369_v55 = vrot.slane %v3368_v45, 4 }
 0x4dc   : > { %v5200_v18 = vsel %vm11502_vm8, %v5192_v50, %v5199_v61 }
 0x4dd   : > { %v6743_v30 = vpop.f32.mrf.mxu2  ;;  %v7478_v53 = vpop.f32.mrf.mxu0  ;;  %5331 = vrot.lane.b32.xlu0 %v5200_v18, %s10294_s26  ;;  %v3374_v14 = vsel %vm11456_vm2, %v3369_v55, %v13219_v17  ;;  %5618 = vrot.lane.b32.xlu1 %v5480_v38, %s10295_s27  ;;  %v4200_v18 = vld [vmem:[%s10340_s19 + $0x108] sm:$0x8]  ;;  %v4201_v55 = vld [vmem:[%s10340_s19 + $0x10c] sm:$0xf] }
 0x4de   : > { %v7110_v26 = vpop.f32.mrf.mxu3  ;;  %v6792_v8 = vadd.f32 %v6743_v30, %v6532_v5  ;;  %v6394_v54 = vpop.f32.mrf.mxu1  ;;  %3517 = vrot.lane.b32.xlu2 %v3374_v14, %s10292_s24  ;;  %v3924_v5 = vrot.slane %v3922_v51, 4  ;;  %v3925_v30 = vrot.slane %v3691_v0, 5  ;;  %v9249_v38 = vrot.slane %v4200_v18, 11  ;;  %v4202_v0 = vld [vmem:[%s10340_s19 + $0x110] sm:$0x7] }
 0x4df   : > { %v7162_v4 = vadd.f32 %v7110_v26, %v6887_v33  ;;  %v6438_v48 = vadd.f32 %v6394_v54, %v6178_v60  ;;  %v6888_v12 = vld [vmem:[#allocation3 + $0xa0] sm:$0xff]  ;;  %v10180_v54 = vld [vmem:[#allocation2 + $0x50] sm:$0xff]  ;;  %v4437_v14 = vrot.slane %v4201_v55, 7 }
 0x4e0   : > { %6824 = vst.msk [vmem:[#allocation3 + $0xa8] sm:$0xff] %vm5731_vm4, %v6792_v8  ;;  %v7258_v7 = vld [vmem:[#allocation3 + $0x90] sm:$0xff]  ;;  %10053 = vmatmul.msk.bf16.gmra.mxu0 %vm5915_vm3, %v10211_v11  ;;  %v2538_v11 = vld [vmem:[%s10340_s19 + $0x10c] sm:$0xf] }
 0x4e1   : > { %7194 = vst.msk [vmem:[#allocation3 + $0x98] sm:$0xff] %vm5731_vm4, %v7162_v4  ;;  %v7531_v44 = vadd.f32 %v7478_v53, %v7258_v7  ;;  %9798 = vmatmul.msk.bf16.gmra.mxu1 %vm7001_vm0, %v10162_v52  ;;  %v6534_v56 = vld [vmem:[#allocation3 + $0xb8] sm:$0xff]  ;;  %v10163_v4 = vld [vmem:[#allocation2 + $0x50] sm:$0xff]  ;;  %v2537_v52 = vld [vmem:[%s10340_s19 + $0x108] sm:$0xf]  ;;  %v3395_v7 = vshll.u32 %v2849_v13, 16 }
 0x4e2   : > { %6470 = vst.msk [vmem:[#allocation3 + $0xc0] sm:$0xff] %vm5731_vm4, %v6438_v48  ;;  %9883 = vmatmul.msk.bf16.gmra.mxu2 %vm5915_vm3, %v10179_v31  ;;  %v10196_v53 = vld [vmem:[#allocation2 + $0x50] sm:$0xff]  ;;  %v3926_v31 = vsel %vm11444_vm15, %v3924_v5, %v3925_v30  ;;  %v4440_v5 = vrot.slane %v4202_v0, 7 }
 0x4e3   : > { %9968 = vmatmul.msk.bf16.gmra.mxu3 %vm5915_vm3, %v10195_v63  ;;  %7563 = vst.msk [vmem:[#allocation3 + $0x90] sm:$0xff] %vm5731_vm4, %v7531_v44  ;;  %v3399_v63 = vshrl.u32 %v2849_v13, 16  ;;  %v13304_v36 = vrot.slane %v3395_v7, 5  ;;  %v13349_v7 = vld [vmem:[%s10340_s19 + $0x10c] sm:$0xf] }
 0x4e4   : > { %v3694_v18 = vld [vmem:[%s10340_s19 + $0x110] sm:$0x1] }
 0x4e5   : > { %v6746_v32 = vpop.f32.mrf.mxu2  ;;  %v7480_v20 = vpop.f32.mrf.mxu0  ;;  %2677 = vrot.lane.b32.xlu0 %v2537_v52, %s10290_s22  ;;  %v3401_v44 = vrot.slane %v3399_v63, 4  ;;  %2679 = vrot.lane.b32.xlu1 %v2538_v11, %s10290_s22  ;;  %v4438_v52 = vsel %vm11473_vm5, %v9249_v38, %v4437_v14  ;;  %v2848_v11 = vld [vmem:[%s10340_s19 + $0x108] sm:$0xf]  ;;  %v4710_v63 = vld [vmem:[%s10340_s19 + $0x110] sm:$0xf] }
 0x4e6   : > { %v7113_v40 = vpop.f32.mrf.mxu3  ;;  %v6793_v49 = vadd.f32 %v6746_v32, %v6533_v58  ;;  %v6396_v34 = vpop.f32.mrf.mxu1  ;;  %4027 = vrot.lane.b32.xlu2 %v3926_v31, %s10291_s23  ;;  %v5180_v58 = vshrl.u32 %v4705_v3, 16  ;;  %v5190_v32 = vor.u32 %v5188_v47, %v13270_v62  ;;  %v3386_v46 = vshrl.u32 %v2848_v11, 16 }
 0x4e7   : > { %v7163_v21 = vadd.f32 %v7113_v40, %v6888_v12  ;;  %v6439_v9 = vadd.f32 %v6396_v34, %v6179_v35  ;;  %v6889_v41 = vld [vmem:[#allocation3 + $0xa8] sm:$0xff]  ;;  %v3402_v29 = vor.u32 %v3401_v44, %v13304_v36  ;;  %v9225_v40 = vrot.slane %v3692_v43, 9 }
 0x4e8   : > { %6825 = vst.msk [vmem:[#allocation3 + $0xb0] sm:$0xff] %vm5731_vm4, %v6793_v49  ;;  %v7259_v39 = vld [vmem:[#allocation3 + $0x98] sm:$0xff]  ;;  %v13314_v12 = vld [vmem:[%s10340_s19 + $0x10c] sm:$0xf]  ;;  %v3407_v35 = vrot.slane %v3405_v6, 5  ;;  %v9272_v50 = vrot.slane %v5180_v58, 11 }
 0x4e9   : > { %7195 = vst.msk [vmem:[#allocation3 + $0xa0] sm:$0xff] %vm5731_vm4, %v7163_v21  ;;  %v7532_v16 = vadd.f32 %v7480_v20, %v7259_v39  ;;  %v6535_v19 = vld [vmem:[#allocation3 + $0xc0] sm:$0xff]  ;;  %v3929_v34 = vrot.slane %v13314_v12, 5  ;;  %v5207_v44 = vshrl.u32 %v13349_v7, 16  ;;  %v5216_v47 = vshrl.u32 %v4710_v63, 16 }
 0x4ea   : > { %6471 = vst.msk [vmem:[#allocation3 + $0xc8] sm:$0xff] %vm5731_vm4, %v6439_v9  ;;  %v3403_v9 = vrot.slane %v3402_v29, 4  ;;  %v5191_v39 = vsel %vm11502_vm8, %v9272_v50, %v5190_v32  ;;  %v5219_v6 = vshll.u32 %v4710_v63, 16  ;;  %v3389_v3 = vshll.u32 %v2848_v11, 16  ;;  %v2852_v12 = vld [vmem:[%s10340_s19 + $0x118] sm:$0xf] }
 0x4eb   : > { %7564 = vst.msk [vmem:[#allocation3 + $0x98] sm:$0xff] %vm5731_vm4, %v7532_v16  ;;  %v3930_v16 = vsel %vm11444_vm15, %v9225_v40, %v3929_v34  ;;  %v3388_v43 = vrot.slane %v3386_v46, 4  ;;  %v13357_v29 = vrot.slane %v5207_v44, 7  ;;  %v5218_v58 = vrot.slane %v5216_v47, 7  ;;  %v4708_v63 = vld [vmem:[%s10340_s19 + $0x108] sm:$0x8] }
 0x4ec   : > { %v3408_v45 = vsel %vm11456_vm2, %v3403_v9, %v3407_v35  ;;  %v3391_v32 = vrot.slane %v3389_v3, 5  ;;  %v3695_v46 = vld [vmem:[%s10340_s19 + $0x114] sm:$0xe] }
 0x4ed   : > { %v6748_v1 = vpop.f32.mrf.mxu2  ;;  %v7483_v17 = vpop.f32.mrf.mxu0  ;;  %3523 = vrot.lane.b32.xlu0 %v3408_v45, %s10292_s24  ;;  %4029 = vrot.lane.b32.xlu1 %v3930_v16, %s10291_s23  ;;  %v5214_v35 = vrot.slane %v13357_v29, 4 }
 0x4ee   : > { %v7115_v57 = vpop.f32.mrf.mxu3  ;;  %v6794_v33 = vadd.f32 %v6748_v1, %v6534_v56  ;;  %v6399_v8 = vpop.f32.mrf.mxu1  ;;  %5329 = vrot.lane.b32.xlu2 %v5191_v39, %s10294_s26  ;;  %v3392_v9 = vor.u32 %v3391_v32, %v3388_v43  ;;  %v5482_v39 = vld [vmem:[%s10340_s19 + $0x10c] sm:$0xf]  ;;  %v6185_v32 = vld [vmem:[#allocation3 + $0xf8] sm:$0xff] }
 0x4ef   : > { %v7164_v26 = vadd.f32 %v7115_v57, %v6889_v41  ;;  %v6440_v60 = vadd.f32 %v6399_v8, %v6180_v59  ;;  %v6890_v37 = vld [vmem:[#allocation3 + $0xb0] sm:$0xff] }
 0x4f0   : > { %6826 = vst.msk [vmem:[#allocation3 + $0xb8] sm:$0xff] %vm5731_vm4, %v6794_v33  ;;  %v7260_v48 = vld [vmem:[#allocation3 + $0xa0] sm:$0xff]  ;;  %10054 = vmatmul.msk.bf16.gmra.mxu0 %vm5915_vm3, %v10212_v23  ;;  %v10181_v23 = vld [vmem:[#allocation2 + $0x58] sm:$0xff]  ;;  %v3393_v45 = vrot.slane %v3392_v9, 4 }
 0x4f1   : > { %7196 = vst.msk [vmem:[#allocation3 + $0xa8] sm:$0xff] %vm5731_vm4, %v7164_v26  ;;  %v7533_v51 = vadd.f32 %v7483_v17, %v7260_v48  ;;  %9799 = vmatmul.msk.bf16.gmra.mxu1 %vm7001_vm0, %v10163_v4  ;;  %v6536_v56 = vld [vmem:[#allocation3 + $0xc8] sm:$0xff]  ;;  %v6182_v26 = vld [vmem:[#allocation3 + $0xe0] sm:$0xff]  ;;  %v4439_v17 = vrot.slane %v4437_v14, 4  ;;  %v10197_v48 = vld [vmem:[#allocation2 + $0x58] sm:$0xff] }
 0x4f2   : > { %6472 = vst.msk [vmem:[#allocation3 + $0xd0] sm:$0xff] %vm5731_vm4, %v6440_v60  ;;  %9884 = vmatmul.msk.bf16.gmra.mxu2 %vm5915_vm3, %v10180_v54  ;;  %v10164_v60 = vld [vmem:[#allocation2 + $0x58] sm:$0xff]  ;;  %v3398_v16 = vsel %vm11456_vm2, %v3393_v45, %v13304_v36 }
 0x4f3   : > { %9969 = vmatmul.msk.bf16.gmra.mxu3 %vm5915_vm3, %v10196_v53  ;;  %7565 = vst.msk [vmem:[#allocation3 + $0xa0] sm:$0xff] %vm5731_vm4, %v7533_v51  ;;  %v10213_v54 = vld [vmem:[#allocation2 + $0x58] sm:$0xff]  ;;  %v5481_v51 = vld [vmem:[%s10340_s19 + $0x104] sm:$0xf]  ;;  %v4441_v31 = vsel %vm11473_vm5, %v4439_v17, %v4440_v5  ;;  %v6184_v5 = vld [vmem:[#allocation3 + $0xf0] sm:$0xff] }
 0x4f4   : > { %v10214_v17 = vld [vmem:[#allocation2 + $0x60] sm:$0xff]  ;;  %v4204_v45 = vld [vmem:[%s10340_s19 + $0x118] sm:$0xf] }
 0x4f5   : > { %v6751_v2 = vpop.f32.mrf.mxu2  ;;  %v7485_v21 = vpop.f32.mrf.mxu0  ;;  %4537 = vrot.lane.b32.xlu0 %v4438_v52, %s10293_s25  ;;  %4539 = vrot.lane.b32.xlu1 %v4441_v31, %s10293_s25  ;;  %v2853_v52 = vld [vmem:[%s10340_s19 + $0x11c] sm:$0x1]  ;;  %v5210_v31 = vshll.u32 %v13349_v7, 16 }
 0x4f6   : > { %v7118_v25 = vpop.f32.mrf.mxu3  ;;  %v6795_v10 = vadd.f32 %v6751_v2, %v6535_v19  ;;  %v6401_v49 = vpop.f32.mrf.mxu1  ;;  %5620 = vrot.lane.b32.xlu2 %v5481_v51, %s10295_s27  ;;  %v3429_v11 = vshll.u32 %v2853_v52, 16  ;;  %v13436_v52 = vld [vmem:[%s10340_s19 + $0x118] sm:$0xf] }
 0x4f7   : > { %v7165_v22 = vadd.f32 %v7118_v25, %v6890_v37  ;;  %v6441_v20 = vadd.f32 %v6401_v49, %v6181_v15  ;;  %v6891_v41 = vld [vmem:[#allocation3 + $0xb8] sm:$0xff]  ;;  %v5229_v42 = vshrl.u32 %v13436_v52, 16 }
 0x4f8   : > { %6827 = vst.msk [vmem:[#allocation3 + $0xc0] sm:$0xff] %vm5731_vm4, %v6795_v10  ;;  %v7261_v62 = vld [vmem:[#allocation3 + $0xa8] sm:$0xff] }
 0x4f9   : > { %7197 = vst.msk [vmem:[#allocation3 + $0xb0] sm:$0xff] %vm5731_vm4, %v7165_v22  ;;  %v7534_v61 = vadd.f32 %v7485_v21, %v7261_v62  ;;  %v6537_v19 = vld [vmem:[#allocation3 + $0xd0] sm:$0xff]  ;;  %v6183_v22 = vld [vmem:[#allocation3 + $0xe8] sm:$0xff] }
 0x4fa   : > { %6473 = vst.msk [vmem:[#allocation3 + $0xd8] sm:$0xff] %vm5731_vm4, %v6441_v20  ;;  %v5221_v20 = vor.u32 %v5219_v6, %v5218_v58 }
 0x4fb   : > { %7566 = vst.msk [vmem:[#allocation3 + $0xa8] sm:$0xff] %vm5731_vm4, %v7534_v61 }
 0x4fc   : > { %v5222_v61 = vsel %vm11502_vm8, %v5214_v35, %v5221_v20 }
 0x4fd   : > { %v6753_v1 = vpop.f32.mrf.mxu2  ;;  %v7488_v8 = vpop.f32.mrf.mxu0  ;;  %5335 = vrot.lane.b32.xlu0 %v5222_v61, %s10294_s26  ;;  %5622 = vrot.lane.b32.xlu1 %v5482_v39, %s10295_s27  ;;  %v4203_v61 = vld [vmem:[%s10340_s19 + $0x114] sm:$0x8] }
 0x4fe   : > { %v7120_v57 = vpop.f32.mrf.mxu3  ;;  %v6796_v30 = vadd.f32 %v6753_v1, %v6536_v56  ;;  %v6404_v59 = vpop.f32.mrf.mxu1  ;;  %3521 = vrot.lane.b32.xlu2 %v3398_v16, %s10292_s24  ;;  %v3931_v56 = vrot.slane %v3929_v34, 4  ;;  %v3932_v1 = vrot.slane %v3694_v18, 5  ;;  %v9250_v39 = vrot.slane %v4203_v61, 11  ;;  %v4205_v18 = vld [vmem:[%s10340_s19 + $0x11c] sm:$0x7] }
 0x4ff   : > { %v7166_v33 = vadd.f32 %v7120_v57, %v6891_v41  ;;  %v6442_v4 = vadd.f32 %v6404_v59, %v6182_v26  ;;  %v6892_v37 = vld [vmem:[#allocation3 + $0xc0] sm:$0xff]  ;;  %v4444_v16 = vrot.slane %v4204_v45, 7  ;;  %v5484_v61 = vld [vmem:[%s10340_s19 + $0x118] sm:$0xf] }
 0x500   : > { %6828 = vst.msk [vmem:[#allocation3 + $0xc8] sm:$0xff] %vm5731_vm4, %v6796_v30  ;;  %v7262_v53 = vld [vmem:[#allocation3 + $0xb0] sm:$0xff]  ;;  %10055 = vmatmul.msk.bf16.gmra.mxu0 %vm5915_vm3, %v10213_v54  ;;  %v10182_v59 = vld [vmem:[#allocation2 + $0x60] sm:$0xff]  ;;  %v3933_v54 = vsel %vm11444_vm15, %v3931_v56, %v3932_v1  ;;  %v4447_v56 = vrot.slane %v4205_v18, 7  ;;  %v3697_v18 = vld [vmem:[%s10340_s19 + $0x11c] sm:$0x1] }
 0x501   : > { %7198 = vst.msk [vmem:[#allocation3 + $0xb8] sm:$0xff] %vm5731_vm4, %v7166_v33  ;;  %v7535_v13 = vadd.f32 %v7488_v8, %v7262_v53  ;;  %9800 = vmatmul.msk.bf16.gmra.mxu1 %vm7001_vm0, %v10164_v60  ;;  %v6538_v55 = vld [vmem:[#allocation3 + $0xd8] sm:$0xff]  ;;  %v10165_v33 = vld [vmem:[#allocation2 + $0x60] sm:$0xff]  ;;  %v2539_v60 = vld [vmem:[%s10340_s19 + $0x114] sm:$0xf] }
 0x502   : > { %6474 = vst.msk [vmem:[#allocation3 + $0xe0] sm:$0xff] %vm5731_vm4, %v6442_v4  ;;  %9885 = vmatmul.msk.bf16.gmra.mxu2 %vm5915_vm3, %v10181_v23  ;;  %v10198_v8 = vld [vmem:[#allocation2 + $0x60] sm:$0xff]  ;;  %v2540_v53 = vld [vmem:[%s10340_s19 + $0x118] sm:$0xf]  ;;  %v3419_v23 = vshll.u32 %v2852_v12, 16 }
 0x503   : > { %9970 = vmatmul.msk.bf16.gmra.mxu3 %vm5915_vm3, %v10197_v48  ;;  %7567 = vst.msk [vmem:[#allocation3 + $0xb0] sm:$0xff] %vm5731_vm4, %v7535_v13  ;;  %v3423_v48 = vshrl.u32 %v2852_v12, 16 }
 0x504   : > { %v13391_v13 = vrot.slane %v3419_v23, 5  ;;  %v2672_v23 = vpop.permute.xlu1 %2671 }
 0x505   : > { %v6756_v2 = vpop.f32.mrf.mxu2  ;;  %v7490_v49 = vpop.f32.mrf.mxu0  ;;  %2681 = vrot.lane.b32.xlu0 %v2539_v60, %s10290_s22  ;;  %v3425_v51 = vrot.slane %v3423_v48, 4  ;;  %2683 = vrot.lane.b32.xlu1 %v2540_v53, %s10290_s22  ;;  %v4445_v60 = vsel %vm11473_vm5, %v9250_v39, %v4444_v16  ;;  %v2851_v48 = vld [vmem:[%s10340_s19 + $0x114] sm:$0xf]  ;;  %2775 = vst.msk [vmem:[#allocation2 + $0xa4] sm:$0xf] %vm2733_vm9, %v2672_v23 }
 0x506   : > { %v7123_v25 = vpop.f32.mrf.mxu3  ;;  %v6797_v40 = vadd.f32 %v6756_v2, %v6537_v19  ;;  %v6406_v15 = vpop.f32.mrf.mxu1  ;;  %4031 = vrot.lane.b32.xlu2 %v3933_v54, %s10291_s23  ;;  %v5202_v19 = vshrl.u32 %v4708_v63, 16  ;;  %v5212_v2 = vor.u32 %v5210_v31, %v13357_v29  ;;  %v3410_v31 = vshrl.u32 %v2851_v48, 16 }
 0x507   : > { %v7167_v10 = vadd.f32 %v7123_v25, %v6892_v37  ;;  %v6443_v21 = vadd.f32 %v6406_v15, %v6183_v22  ;;  %v6893_v14 = vld [vmem:[#allocation3 + $0xc8] sm:$0xff]  ;;  %v3426_v43 = vor.u32 %v3425_v51, %v13391_v13  ;;  %v13401_v37 = vld [vmem:[%s10340_s19 + $0x118] sm:$0xf]  ;;  %v9226_v25 = vrot.slane %v3695_v46, 9  ;;  %v2670_v53 = vpop.permute.xlu0 %2669  ;;  %v4713_v51 = vld [vmem:[%s10340_s19 + $0x11c] sm:$0xf] }
 0x508   : > { %6829 = vst.msk [vmem:[#allocation3 + $0xd0] sm:$0xff] %vm5731_vm4, %v6797_v40  ;;  %v7263_v50 = vld [vmem:[#allocation3 + $0xb8] sm:$0xff]  ;;  %v3431_v22 = vrot.slane %v3429_v11, 5  ;;  %v3936_v15 = vrot.slane %v13401_v37, 5  ;;  %v9273_v35 = vrot.slane %v5202_v19, 11  ;;  %v5238_v11 = vshrl.u32 %v4713_v51, 16 }
 0x509   : > { %7199 = vst.msk [vmem:[#allocation3 + $0xc0] sm:$0xff] %vm5731_vm4, %v7167_v10  ;;  %v7536_v62 = vadd.f32 %v7490_v49, %v7263_v50  ;;  %v6539_v44 = vld [vmem:[#allocation3 + $0xe0] sm:$0xff]  ;;  %v5241_v63 = vshll.u32 %v4713_v51, 16  ;;  %v3413_v46 = vshll.u32 %v2851_v48, 16  ;;  %v13446_v19 = vrot.slane %v5229_v42, 7  ;;  %v7613_v51 = vld [vmem:[#allocation3 + $0x18] sm:$0xff] }
 0x50a   : > { %6475 = vst.msk [vmem:[#allocation3 + $0xe8] sm:$0xff] %vm5731_vm4, %v6443_v21  ;;  %v3427_v21 = vrot.slane %v3426_v43, 4  ;;  %v5213_v50 = vsel %vm11502_vm8, %v9273_v35, %v5212_v2  ;;  %v5240_v2 = vrot.slane %v5238_v11, 7  ;;  %v5224_v42 = vshrl.u32 %v4711_v27, 16 }
 0x50b   : > { %7568 = vst.msk [vmem:[#allocation3 + $0xb8] sm:$0xff] %vm5731_vm4, %v7536_v62  ;;  %v3937_v62 = vsel %vm11444_vm15, %v9226_v25, %v3936_v15  ;;  %v3415_v25 = vrot.slane %v3413_v46, 5  ;;  %v5232_v11 = vshll.u32 %v13436_v52, 16 }
 0x50c   : > { %v3432_v9 = vsel %vm11456_vm2, %v3427_v21, %v3431_v22  ;;  %2774 = vst.msk [vmem:[#allocation2 + $0xa0] sm:$0xf] %vm2733_vm9, %v2670_v53  ;;  %v5236_v21 = vrot.slane %v13446_v19, 4  ;;  %v5243_v35 = vor.u32 %v5241_v63, %v5240_v2 }
 0x50d   : > { %v6758_v38 = vpop.f32.mrf.mxu2  ;;  %v7493_v36 = vpop.f32.mrf.mxu0  ;;  %3527 = vrot.lane.b32.xlu0 %v3432_v9, %s10292_s24  ;;  %4033 = vrot.lane.b32.xlu1 %v3937_v62, %s10291_s23 }
 0x50e   : > { %v7125_v0 = vpop.f32.mrf.mxu3  ;;  %v6798_v41 = vadd.f32 %v6758_v38, %v6538_v55  ;;  %v6409_v30 = vpop.f32.mrf.mxu1  ;;  %5333 = vrot.lane.b32.xlu2 %v5213_v50, %s10294_s26  ;;  %v5244_v50 = vsel %vm11502_vm8, %v5236_v21, %v5243_v35  ;;  %v10168_v35 = vld [vmem:[#allocation2 + $0x78] sm:$0xff] }
 0x50f   : > { %v7168_v57 = vadd.f32 %v7125_v0, %v6893_v14  ;;  %v6444_v26 = vadd.f32 %v6409_v30, %v6184_v5  ;;  %v6894_v6 = vld [vmem:[#allocation3 + $0xd0] sm:$0xff]  ;;  %v7610_v5 = vld [vmem:[#allocation3] sm:$0xff] }
 0x510   : > { %6830 = vst.msk [vmem:[#allocation3 + $0xd8] sm:$0xff] %vm5731_vm4, %v6798_v41  ;;  %v7264_v4 = vld [vmem:[#allocation3 + $0xc0] sm:$0xff]  ;;  %10056 = vmatmul.msk.bf16.gmra.mxu0 %vm5915_vm3, %v10214_v17  ;;  %v10183_v17 = vld [vmem:[#allocation2 + $0x68] sm:$0xff] }
 0x511   : > { %7200 = vst.msk [vmem:[#allocation3 + $0xc8] sm:$0xff] %vm5731_vm4, %v7168_v57  ;;  %v7537_v34 = vadd.f32 %v7493_v36, %v7264_v4  ;;  %9801 = vmatmul.msk.bf16.gmra.mxu1 %vm7001_vm0, %v10165_v33  ;;  %v6540_v55 = vld [vmem:[#allocation3 + $0xe8] sm:$0xff]  ;;  %v4446_v36 = vrot.slane %v4444_v16, 4 }
 0x512   : > { %6476 = vst.msk [vmem:[#allocation3 + $0xf0] sm:$0xff] %vm5731_vm4, %v6444_v26  ;;  %9886 = vmatmul.msk.bf16.gmra.mxu2 %vm5915_vm3, %v10182_v59  ;;  %v10166_v26 = vld [vmem:[#allocation2 + $0x68] sm:$0xff] }
 0x513   : > { %9971 = vmatmul.msk.bf16.gmra.mxu3 %vm5915_vm3, %v10198_v8  ;;  %7569 = vst.msk [vmem:[#allocation3 + $0xc0] sm:$0xff] %vm5731_vm4, %v7537_v34  ;;  %v10215_v59 = vld [vmem:[#allocation2 + $0x68] sm:$0xff]  ;;  %v5483_v34 = vld [vmem:[%s10340_s19 + $0x110] sm:$0xf]  ;;  %v4448_v54 = vsel %vm11473_vm5, %v4446_v36, %v4447_v56  ;;  %v3938_v56 = vrot.slane %v3936_v15, 4 }
 0x514   : > { %v10199_v4 = vld [vmem:[#allocation2 + $0x68] sm:$0xff]  ;;  %v4022_v16 = vpop.permute.xlu1 %4021  ;;  %v10167_v36 = vld [vmem:[#allocation2 + $0x70] sm:$0xff] }
 0x515   : > { %v6761_v47 = vpop.f32.mrf.mxu2  ;;  %v7495_v10 = vpop.f32.mrf.mxu0  ;;  %4541 = vrot.lane.b32.xlu0 %v4445_v60, %s10293_s25  ;;  %4543 = vrot.lane.b32.xlu1 %v4448_v54, %s10293_s25 }
 0x516   : > { %v7128_v3 = vpop.f32.mrf.mxu3  ;;  %v6799_v7 = vadd.f32 %v6761_v47, %v6539_v44  ;;  %v6411_v40 = vpop.f32.mrf.mxu1  ;;  %5624 = vrot.lane.b32.xlu2 %v5483_v34, %s10295_s27  ;;  %v3412_v47 = vrot.slane %v3410_v31, 4 }
 0x517   : > { %v7169_v58 = vadd.f32 %v7128_v3, %v6894_v6  ;;  %v6445_v49 = vadd.f32 %v6411_v40, %v6185_v32  ;;  %v6895_v14 = vld [vmem:[#allocation3 + $0xd8] sm:$0xff]  ;;  %v7611_v40 = vld [vmem:[#allocation3 + $0x8] sm:$0xff]  ;;  %v3516_v45 = vpop.permute.xlu0 %3515 }
 0x518   : > { %6831 = vst.msk [vmem:[#allocation3 + $0xe0] sm:$0xff] %vm5731_vm4, %v6799_v7  ;;  %v7265_v29 = vld [vmem:[#allocation3 + $0xc8] sm:$0xff] }
 0x519   : > { %7201 = vst.msk [vmem:[#allocation3 + $0xd0] sm:$0xff] %vm5731_vm4, %v7169_v58  ;;  %v7538_v20 = vadd.f32 %v7495_v10, %v7265_v29  ;;  %v6541_v44 = vld [vmem:[#allocation3 + $0xf0] sm:$0xff]  ;;  %v3416_v29 = vor.u32 %v3415_v25, %v3412_v47 }
 0x51a   : > { %6477 = vst.msk [vmem:[#allocation3 + $0xf8] sm:$0xff] %vm5731_vm4, %v6445_v49  ;;  %v3514_v49 = vpop.permute.xlu2 %3513 }
 0x51b   : > { %7570 = vst.msk [vmem:[#allocation3 + $0xc8] sm:$0xff] %vm5731_vm4, %v7538_v20  ;;  %v3417_v62 = vrot.slane %v3416_v29, 4  ;;  %v10217_v29 = vld [vmem:[#allocation2 + $0x78] sm:$0xff] }
 0x51c   : > { %3618 = vst.msk [vmem:[#allocation2 + $0xa0] sm:$0xf] %vm3577_vm10, %v3514_v49 }
 0x51d   : > { %v6763_v38 = vpop.f32.mrf.mxu2  ;;  %v7498_v57 = vpop.f32.mrf.mxu0  ;;  %5339 = vrot.lane.b32.xlu0 %v5244_v50, %s10294_s26  ;;  %v3422_v39 = vsel %vm11456_vm2, %v3417_v62, %v13391_v13  ;;  %5626 = vrot.lane.b32.xlu1 %v5484_v61, %s10295_s27  ;;  %3619 = vst.msk [vmem:[#allocation2 + $0xa4] sm:$0xf] %vm3577_vm10, %v3516_v45  ;;  %v10185_v62 = vld [vmem:[#allocation2 + $0x78] sm:$0xff] }
 0x51e   : > { %v7130_v0 = vpop.f32.mrf.mxu3  ;;  %v6800_v1 = vadd.f32 %v6763_v38, %v6540_v55  ;;  %v7803_v30 = vpop.f32.mrf.mxu1  ;;  %3525 = vrot.lane.b32.xlu2 %v3422_v39, %s10292_s24  ;;  %4126 = vst.msk [vmem:[#allocation2 + $0xa0] sm:$0xf] %vm4085_vm11, %v4022_v16  ;;  %v10201_v61 = vld [vmem:[#allocation2 + $0x78] sm:$0xff] }
 0x51f   : > { %v7170_v41 = vadd.f32 %v7130_v0, %v6895_v14  ;;  %v7883_v33 = vadd.f32 %v7803_v30, %v7610_v5  ;;  %v6896_v3 = vld [vmem:[#allocation3 + $0xe0] sm:$0xff]  ;;  %v5485_v45 = vld [vmem:[%s10340_s19 + $0x11c] sm:$0xf]  ;;  %s10070_s19 = sshll.u32 %s13792_s12, 8 }
 0x520   : > { %6832 = vst.msk [vmem:[#allocation3 + $0xe8] sm:$0xff] %vm5731_vm4, %v6800_v1  ;;  %v7266_v8 = vld [vmem:[#allocation3 + $0xd0] sm:$0xff]  ;;  %10057 = vmatmul.msk.bf16.gmra.mxu0 %vm5915_vm3, %v10215_v59  ;;  %v3939_v1 = vrot.slane %v3697_v18, 5  ;;  %s13528_s24 = scalar_lea.vmem %s13772_s3, %s10070_s19 }
 0x521   : > { %7202 = vst.msk [vmem:[#allocation3 + $0xd8] sm:$0xff] %vm5731_vm4, %v7170_v41  ;;  %v7539_v12 = vadd.f32 %v7498_v57, %v7266_v8  ;;  %9802 = vmatmul.msk.bf16.gmra.mxu1 %vm7001_vm0, %v10166_v26  ;;  %v6542_v55 = vld [vmem:[#allocation3 + $0xf8] sm:$0xff]  ;;  %v7612_v57 = vld [vmem:[#allocation3 + $0x10] sm:$0xff] }
 0x522   : > { %7915 = vst.msk [vmem:[#allocation3] sm:$0xff] %vm5731_vm4, %v7883_v33  ;;  %9887 = vmatmul.msk.bf16.gmra.mxu2 %vm5915_vm3, %v10183_v17  ;;  %v10216_v33 = vld [vmem:[#allocation2 + $0x70] sm:$0xff]  ;;  %v4024_v26 = vpop.permute.xlu2 %4023  ;;  %v3940_v15 = vsel %vm11444_vm15, %v3938_v56, %v3939_v1  ;;  %v7615_v1 = vld [vmem:[#allocation3 + $0x28] sm:$0xff] }
 0x523   : > { %9972 = vmatmul.msk.bf16.gmra.mxu3 %vm5915_vm3, %v10199_v4  ;;  %7571 = vst.msk [vmem:[#allocation3 + $0xd0] sm:$0xff] %vm5731_vm4, %v7539_v12  ;;  %v10184_v8 = vld [vmem:[#allocation2 + $0x70] sm:$0xff]  ;;  %v4530_v4 = vpop.permute.xlu0 %4529 }
 0x524   : > { %v10200_v17 = vld [vmem:[#allocation2 + $0x70] sm:$0xff]  ;;  %4127 = vst.msk [vmem:[#allocation2 + $0xa4] sm:$0xf] %vm4085_vm11, %v4024_v26 }
 0x525   : > { %v6766_v6 = vpop.f32.mrf.mxu2  ;;  %v7500_v32 = vpop.f32.mrf.mxu0  ;;  %4634 = vst.msk [vmem:[#allocation2 + $0xa0] sm:$0xf] %vm4593_vm13, %v4530_v4 }
 0x526   : > { %v7133_v43 = vpop.f32.mrf.mxu3  ;;  %v6801_v7 = vadd.f32 %v6766_v6, %v6541_v44  ;;  %v7805_v10 = vpop.f32.mrf.mxu1  ;;  %4035 = vrot.lane.b32.xlu2 %v3940_v15, %s10291_s23  ;;  %v9274_v6 = vrot.slane %v5224_v42, 11  ;;  %v7616_v15 = vld [vmem:[#allocation3 + $0x30] sm:$0xff] }
 0x527   : > { %v7171_v58 = vadd.f32 %v7133_v43, %v6896_v3  ;;  %v7884_v22 = vadd.f32 %v7805_v10, %v7611_v40  ;;  %v6897_v14 = vld [vmem:[#allocation3 + $0xe8] sm:$0xff]  ;;  %v4532_v44 = vpop.permute.xlu1 %4531  ;;  %v5234_v3 = vor.u32 %v5232_v11, %v13446_v19 }
 0x528   : > { %6833 = vst.msk [vmem:[#allocation3 + $0xf0] sm:$0xff] %vm5731_vm4, %v6801_v7  ;;  %v7267_v20 = vld [vmem:[#allocation3 + $0xd8] sm:$0xff] }
 0x529   : > { %7203 = vst.msk [vmem:[#allocation3 + $0xe0] sm:$0xff] %vm5731_vm4, %v7171_v58  ;;  %v7540_v9 = vadd.f32 %v7500_v32, %v7267_v20  ;;  %v7980_v34 = vld [vmem:[#allocation3] sm:$0xff]  ;;  %v5235_v2 = vsel %vm11502_vm8, %v9274_v6, %v5234_v3  ;;  %v7617_v6 = vld [vmem:[#allocation3 + $0x38] sm:$0xff] }
 0x52a   : > { %7916 = vst.msk [vmem:[#allocation3 + $0x8] sm:$0xff] %vm5731_vm4, %v7884_v22  ;;  %v5326_v46 = vpop.permute.xlu2 %5325  ;;  %v7614_v22 = vld [vmem:[#allocation3 + $0x20] sm:$0xff] }
 0x52b   : > { %7572 = vst.msk [vmem:[#allocation3 + $0xd8] sm:$0xff] %vm5731_vm4, %v7540_v9 }
 0x52c   : > { %v5328_v52 = vpop.permute.xlu0 %5327  ;;  %5430 = vst.msk [vmem:[#allocation2 + $0xa0] sm:$0xf] %vm5389_vm14, %v5326_v46 }
 0x52d   : > { %v6768_v38 = vpop.f32.mrf.mxu2  ;;  %v7503_v41 = vpop.f32.mrf.mxu0  ;;  %4635 = vst.msk [vmem:[#allocation2 + $0xa4] sm:$0xf] %vm4593_vm13, %v4532_v44 }
 0x52e   : > { %v7135_v0 = vpop.f32.mrf.mxu3  ;;  %v6802_v28 = vadd.f32 %v6768_v38, %v6542_v55  ;;  %v7808_v5 = vpop.f32.mrf.mxu1  ;;  %5337 = vrot.lane.b32.xlu2 %v5235_v2, %s10294_s26  ;;  %5431 = vst.msk [vmem:[#allocation2 + $0xa4] sm:$0xf] %vm5389_vm14, %v5328_v52 }
 0x52f   : > { %v7172_v13 = vadd.f32 %v7135_v0, %v6897_v14  ;;  %v7885_v30 = vadd.f32 %v7808_v5, %v7612_v57  ;;  %v6898_v60 = vld [vmem:[#allocation3 + $0xf0] sm:$0xff]  ;;  %v5615_v9 = vpop.permute.xlu1 %5614 }
 0x530   : > { %6834 = vst.msk [vmem:[#allocation3 + $0xf8] sm:$0xff] %vm5731_vm4, %v6802_v28  ;;  %v7268_v59 = vld [vmem:[#allocation3 + $0xe0] sm:$0xff]  ;;  %10058 = vmatmul.msk.bf16.gmra.mxu0 %vm5915_vm3, %v10216_v33 }
 0x531   : > { %7204 = vst.msk [vmem:[#allocation3 + $0xe8] sm:$0xff] %vm5731_vm4, %v7172_v13  ;;  %v7541_v37 = vadd.f32 %v7503_v41, %v7268_v59  ;;  %9803 = vmatmul.msk.bf16.gmra.mxu1 %vm7001_vm0, %v10167_v36  ;;  %v7981_v58 = vld [vmem:[#allocation3 + $0x8] sm:$0xff] }
 0x532   : > { %7917 = vst.msk [vmem:[#allocation3 + $0x10] sm:$0xff] %vm5731_vm4, %v7885_v30  ;;  %9888 = vmatmul.msk.bf16.gmra.mxu2 %vm5915_vm3, %v10184_v8  ;;  %v5617_v20 = vpop.permute.xlu2 %5616 }
 0x533   : > { %9973 = vmatmul.msk.bf16.gmra.mxu3 %vm5915_vm3, %v10200_v17  ;;  %7573 = vst.msk [vmem:[#allocation3 + $0xe0] sm:$0xff] %vm5731_vm4, %v7541_v37 }
 0x534   : > { %5720 = vst.msk [vmem:[#allocation2 + $0xa4] sm:$0xf] %vm5678_vm1, %v5617_v20  ;;  %v2674_v39 = vpop.permute.xlu0 %2673 }
 0x535   : > { %v8160_v54 = vpop.f32.mrf.mxu2  ;;  %v7505_v48 = vpop.f32.mrf.mxu0  ;;  %5719 = vst.msk [vmem:[#allocation2 + $0xa0] sm:$0xf] %vm5678_vm1, %v5615_v9 }
 0x536   : > { %v7138_v12 = vpop.f32.mrf.mxu3  ;;  %v8240_v23 = vadd.f32 %v8160_v54, %v7980_v34  ;;  %v7810_v31 = vpop.f32.mrf.mxu1  ;;  %5628 = vrot.lane.b32.xlu2 %v5485_v45, %s10295_s27  ;;  %2776 = vst.msk [vmem:[#allocation2 + $0xa8] sm:$0xf] %vm2733_vm9, %v2674_v39  ;;  %v10169_v34 = vld [vmem:[#allocation2 + $0x80] sm:$0xff] }
 0x537   : > { %v7173_v53 = vadd.f32 %v7138_v12, %v6898_v60  ;;  %v7886_v63 = vadd.f32 %v7810_v31, %v7613_v51  ;;  %v6899_v25 = vld [vmem:[#allocation3 + $0xf8] sm:$0xff]  ;;  %v2676_v5 = vpop.permute.xlu1 %2675  ;;  %v10218_v54 = vld [vmem:[#allocation2 + $0x80] sm:$0xff] }
 0x538   : > { %v7269_v47 = vld [vmem:[#allocation3 + $0xe8] sm:$0xff]  ;;  %8272 = vst.msk [vmem:[#allocation3] sm:$0xff] %vm5731_vm4, %v8240_v23  ;;  %v10202_v51 = vld [vmem:[#allocation2 + $0x80] sm:$0xff] }
 0x539   : > { %7205 = vst.msk [vmem:[#allocation3 + $0xf0] sm:$0xff] %vm5731_vm4, %v7173_v53  ;;  %v7542_v43 = vadd.f32 %v7505_v48, %v7269_v47  ;;  %v7982_v16 = vld [vmem:[#allocation3 + $0x10] sm:$0xff]  ;;  %v10186_v48 = vld [vmem:[#allocation2 + $0x80] sm:$0xff] }
 0x53a   : > { %7918 = vst.msk [vmem:[#allocation3 + $0x18] sm:$0xff] %vm5731_vm4, %v7886_v63  ;;  %v3518_v57 = vpop.permute.xlu2 %3517 }
 0x53b   : > { %7574 = vst.msk [vmem:[#allocation3 + $0xe8] sm:$0xff] %vm5731_vm4, %v7542_v43 }
 0x53c   : > { %3620 = vst.msk [vmem:[#allocation2 + $0xa8] sm:$0xf] %vm3577_vm10, %v3518_v57  ;;  %v7619_v57 = vld [vmem:[#allocation3 + $0x48] sm:$0xff] }
 0x53d   : > { %v8162_v32 = vpop.f32.mrf.mxu2  ;;  %v7508_v10 = vpop.f32.mrf.mxu0  ;;  %2777 = vst.msk [vmem:[#allocation2 + $0xac] sm:$0xf] %vm2733_vm9, %v2676_v5 }
 0x53e   : > { %v7140_v7 = vpop.f32.mrf.mxu3  ;;  %v8241_v40 = vadd.f32 %v8162_v32, %v7981_v58  ;;  %v7813_v49 = vpop.f32.mrf.mxu1 }
 0x53f   : > { %v7174_v19 = vadd.f32 %v7140_v7, %v6899_v25  ;;  %v7887_v21 = vadd.f32 %v7813_v49, %v7614_v22  ;;  %v8337_v55 = vld [vmem:[#allocation3] sm:$0xff]  ;;  %v3520_v36 = vpop.permute.xlu0 %3519  ;;  %v4026_v53 = vpop.permute.xlu1 %4025 }
 0x540   : > { %v7270_v24 = vld [vmem:[#allocation3 + $0xf0] sm:$0xff]  ;;  %8273 = vst.msk [vmem:[#allocation3 + $0x8] sm:$0xff] %vm5731_vm4, %v8241_v40  ;;  %10059 = vmatmul.msk.bf16.gmra.mxu0 %vm5915_vm3, %v10217_v29 }
 0x541   : > { %7206 = vst.msk [vmem:[#allocation3 + $0xf8] sm:$0xff] %vm5731_vm4, %v7174_v19  ;;  %v7543_v50 = vadd.f32 %v7508_v10, %v7270_v24  ;;  %9804 = vmatmul.msk.bf16.gmra.mxu1 %vm7001_vm0, %v10168_v35  ;;  %v7983_v33 = vld [vmem:[#allocation3 + $0x18] sm:$0xff]  ;;  %v7618_v35 = vld [vmem:[#allocation3 + $0x40] sm:$0xff] }
 0x542   : > { %9889 = vmatmul.msk.bf16.gmra.mxu2 %vm5915_vm3, %v10185_v62  ;;  %7919 = vst.msk [vmem:[#allocation3 + $0x20] sm:$0xff] %vm5731_vm4, %v7887_v21  ;;  %v4028_v27 = vpop.permute.xlu2 %4027  ;;  %v10219_v62 = vld [vmem:[#allocation2 + $0x88] sm:$0xff] }
 0x543   : > { %7575 = vst.msk [vmem:[#allocation3 + $0xf0] sm:$0xff] %vm5731_vm4, %v7543_v50  ;;  %9974 = vmatmul.msk.bf16.gmra.mxu3 %vm5915_vm3, %v10201_v61  ;;  %v10170_v50 = vld [vmem:[#allocation2 + $0x88] sm:$0xff] }
 0x544   : > { %3621 = vst.msk [vmem:[#allocation2 + $0xac] sm:$0xf] %vm3577_vm10, %v3520_v36 }
 0x545   : > { %v8165_v18 = vpop.f32.mrf.mxu2  ;;  %v7510_v56 = vpop.f32.mrf.mxu0  ;;  %4129 = vst.msk [vmem:[#allocation2 + $0xac] sm:$0xf] %vm4085_vm11, %v4028_v27  ;;  %v7620_v27 = vld [vmem:[#allocation3 + $0x50] sm:$0xff] }
 0x546   : > { %v8517_v38 = vpop.f32.mrf.mxu3  ;;  %v8242_v14 = vadd.f32 %v8165_v18, %v7982_v16  ;;  %v7815_v28 = vpop.f32.mrf.mxu1  ;;  %4128 = vst.msk [vmem:[#allocation2 + $0xa8] sm:$0xf] %vm4085_vm11, %v4026_v53  ;;  %v10187_v16 = vld [vmem:[#allocation2 + $0x88] sm:$0xff] }
 0x547   : > { %v8597_v0 = vadd.f32 %v8517_v38, %v8337_v55  ;;  %v7888_v41 = vadd.f32 %v7815_v28, %v7615_v1  ;;  %v8338_v59 = vld [vmem:[#allocation3 + $0x8] sm:$0xff]  ;;  %v4534_v52 = vpop.permute.xlu0 %4533  ;;  %v4536_v58 = vpop.permute.xlu1 %4535 }
 0x548   : > { %v7271_v13 = vld [vmem:[#allocation3 + $0xf8] sm:$0xff]  ;;  %8274 = vst.msk [vmem:[#allocation3 + $0x10] sm:$0xff] %vm5731_vm4, %v8242_v14  ;;  %v10203_v18 = vld [vmem:[#allocation2 + $0x88] sm:$0xff] }
 0x549   : > { %v7544_v30 = vadd.f32 %v7510_v56, %v7271_v13  ;;  %8629 = vst.msk [vmem:[#allocation3] sm:$0xff] %vm5731_vm4, %v8597_v0  ;;  %v7984_v42 = vld [vmem:[#allocation3 + $0x20] sm:$0xff] }
 0x54a   : > { %7920 = vst.msk [vmem:[#allocation3 + $0x28] sm:$0xff] %vm5731_vm4, %v7888_v41  ;;  %v5330_v25 = vpop.permute.xlu2 %5329 }
 0x54b   : > { %7576 = vst.msk [vmem:[#allocation3 + $0xf8] sm:$0xff] %vm5731_vm4, %v7544_v30 }
 0x54c   : > { %4636 = vst.msk [vmem:[#allocation2 + $0xa8] sm:$0xf] %vm4593_vm13, %v4534_v52 }
 0x54d   : > { %v8167_v26 = vpop.f32.mrf.mxu2  ;;  %v8874_v60 = vpop.f32.mrf.mxu0  ;;  %5432 = vst.msk [vmem:[#allocation2 + $0xa8] sm:$0xf] %vm5389_vm14, %v5330_v25 }
 0x54e   : > { %v8519_v8 = vpop.f32.mrf.mxu3  ;;  %v8243_v17 = vadd.f32 %v8167_v26, %v7983_v33  ;;  %v7818_v4 = vpop.f32.mrf.mxu1  ;;  %4637 = vst.msk [vmem:[#allocation2 + $0xac] sm:$0xf] %vm4593_vm13, %v4536_v58 }
 0x54f   : > { %v8598_v37 = vadd.f32 %v8519_v8, %v8338_v59  ;;  %v7889_v12 = vadd.f32 %v7818_v4, %v7616_v15  ;;  %v8339_v63 = vld [vmem:[#allocation3 + $0x10] sm:$0xff]  ;;  %v5332_v61 = vpop.permute.xlu0 %5331  ;;  %v5619_v55 = vpop.permute.xlu1 %5618 }
 0x550   : > { %8275 = vst.msk [vmem:[#allocation3 + $0x18] sm:$0xff] %vm5731_vm4, %v8243_v17  ;;  %v8694_v23 = vld [vmem:[#allocation3] sm:$0xff]  ;;  %10060 = vmatmul.msk.bf16.gmra.mxu0 %vm5915_vm3, %v10218_v54 }
 0x551   : > { %8630 = vst.msk [vmem:[#allocation3 + $0x8] sm:$0xff] %vm5731_vm4, %v8598_v37  ;;  %v8954_v31 = vadd.f32 %v8874_v60, %v8694_v23  ;;  %9805 = vmatmul.msk.bf16.gmra.mxu1 %vm7001_vm0, %v10169_v34  ;;  %v7985_v40 = vld [vmem:[#allocation3 + $0x28] sm:$0xff] }
 0x552   : > { %7921 = vst.msk [vmem:[#allocation3 + $0x30] sm:$0xff] %vm5731_vm4, %v7889_v12  ;;  %9890 = vmatmul.msk.bf16.gmra.mxu2 %vm5915_vm3, %v10186_v48  ;;  %v5621_v45 = vpop.permute.xlu2 %5620 }
 0x553   : > { %9975 = vmatmul.msk.bf16.gmra.mxu3 %vm5915_vm3, %v10202_v51  ;;  %8986 = vst.msk [vmem:[#allocation3] sm:$0xff] %vm5731_vm4, %v8954_v31  ;;  %v10171_v51 = vld [vmem:[#allocation2 + $0x90] sm:$0xff] }
 0x554   : > { %5433 = vst.msk [vmem:[#allocation2 + $0xac] sm:$0xf] %vm5389_vm14, %v5332_v61  ;;  %v10220_v31 = vld [vmem:[#allocation2 + $0x90] sm:$0xff] }
 0x555   : > { %v8170_v11 = vpop.f32.mrf.mxu2  ;;  %v8876_v43 = vpop.f32.mrf.mxu0  ;;  %5722 = vst.msk [vmem:[#allocation2 + $0xac] sm:$0xf] %vm5678_vm1, %v5621_v45 }
 0x556   : > { %v8522_v46 = vpop.f32.mrf.mxu3  ;;  %v8244_v44 = vadd.f32 %v8170_v11, %v7984_v42  ;;  %v7820_v3 = vpop.f32.mrf.mxu1  ;;  %5721 = vst.msk [vmem:[#allocation2 + $0xa8] sm:$0xf] %vm5678_vm1, %v5619_v55 }
 0x557   : > { %v8599_v47 = vadd.f32 %v8522_v46, %v8339_v63  ;;  %v7890_v2 = vadd.f32 %v7820_v3, %v7617_v6  ;;  %v8340_v22 = vld [vmem:[#allocation3 + $0x18] sm:$0xff]  ;;  %v2678_v33 = vpop.permute.xlu0 %2677  ;;  %v2680_v8 = vpop.permute.xlu1 %2679  ;;  %v10188_v46 = vld [vmem:[#allocation2 + $0x90] sm:$0xff] }
 0x558   : > { %8276 = vst.msk [vmem:[#allocation3 + $0x20] sm:$0xff] %vm5731_vm4, %v8244_v44  ;;  %v8695_v7 = vld [vmem:[#allocation3 + $0x8] sm:$0xff]  ;;  %v10204_v44 = vld [vmem:[#allocation2 + $0x90] sm:$0xff] }
 0x559   : > { %8631 = vst.msk [vmem:[#allocation3 + $0x10] sm:$0xff] %vm5731_vm4, %v8599_v47  ;;  %v8955_v32 = vadd.f32 %v8876_v43, %v8695_v7  ;;  %v7986_v0 = vld [vmem:[#allocation3 + $0x30] sm:$0xff] }
 0x55a   : > { %v9018_v19 = vld [vmem:[#allocation3] sm:$0xff]  ;;  %7922 = vst.msk [vmem:[#allocation3 + $0x38] sm:$0xff] %vm5731_vm4, %v7890_v2  ;;  %v3522_v26 = vpop.permute.xlu2 %3521 }
 0x55b   : > { %9050 = vst.msk [vmem:[%s13528_s24] sm:$0xff] %vm5731_vm4, %v9018_v19 }
 0x55c   : > { %8987 = vst.msk [vmem:[#allocation3 + $0x8] sm:$0xff] %vm5731_vm4, %v8955_v32  ;;  %v7621_v32 = vld [vmem:[#allocation3 + $0x58] sm:$0xff] }
 0x55d   : > { %v8172_v10 = vpop.f32.mrf.mxu2  ;;  %v8879_v20 = vpop.f32.mrf.mxu0  ;;  %2778 = vst.msk [vmem:[#allocation2 + $0xb0] sm:$0xf] %vm2733_vm9, %v2678_v33 }
 0x55e   : > { %v8524_v49 = vpop.f32.mrf.mxu3  ;;  %v8245_v24 = vadd.f32 %v8172_v10, %v7985_v40  ;;  %v7823_v29 = vpop.f32.mrf.mxu1  ;;  %3622 = vst.msk [vmem:[#allocation2 + $0xb0] sm:$0xf] %vm3577_vm10, %v3522_v26 }
 0x55f   : > { %v8600_v21 = vadd.f32 %v8524_v49, %v8340_v22  ;;  %v7891_v9 = vadd.f32 %v7823_v29, %v7618_v35  ;;  %v8341_v1 = vld [vmem:[#allocation3 + $0x20] sm:$0xff]  ;;  %2779 = vst.msk [vmem:[#allocation2 + $0xb4] sm:$0xf] %vm2733_vm9, %v2680_v8  ;;  %v3524_v42 = vpop.permute.xlu0 %3523  ;;  %v4030_v47 = vpop.permute.xlu1 %4029 }
 0x560   : > { %8277 = vst.msk [vmem:[#allocation3 + $0x28] sm:$0xff] %vm5731_vm4, %v8245_v24  ;;  %v8696_v39 = vld [vmem:[#allocation3 + $0x10] sm:$0xff]  ;;  %10061 = vmatmul.msk.bf16.gmra.mxu0 %vm5915_vm3, %v10219_v62 }
 0x561   : > { %8632 = vst.msk [vmem:[#allocation3 + $0x18] sm:$0xff] %vm5731_vm4, %v8600_v21  ;;  %v8956_v38 = vadd.f32 %v8879_v20, %v8696_v39  ;;  %9806 = vmatmul.msk.bf16.gmra.mxu1 %vm7001_vm0, %v10170_v50  ;;  %v7987_v15 = vld [vmem:[#allocation3 + $0x38] sm:$0xff]  ;;  %v7622_v39 = vld [vmem:[#allocation3 + $0x60] sm:$0xff] }
 0x562   : > { %7923 = vst.msk [vmem:[#allocation3 + $0x40] sm:$0xff] %vm5731_vm4, %v7891_v9  ;;  %9891 = vmatmul.msk.bf16.gmra.mxu2 %vm5915_vm3, %v10187_v16  ;;  %v4032_v11 = vpop.permute.xlu2 %4031 }
 0x563   : > { %9976 = vmatmul.msk.bf16.gmra.mxu3 %vm5915_vm3, %v10203_v18  ;;  %v9019_v14 = vld [vmem:[#allocation3 + $0x8] sm:$0xff]  ;;  %8988 = vst.msk [vmem:[#allocation3 + $0x10] sm:$0xff] %vm5731_vm4, %v8956_v38  ;;  %v10172_v38 = vld [vmem:[#allocation2 + $0x98] sm:$0xff] }
 0x564   : > { %9051 = vst.msk [vmem:[%s13528_s24 + $0x8] sm:$0xff] %vm5731_vm4, %v9019_v14  ;;  %v10221_v14 = vld [vmem:[#allocation2 + $0x98] sm:$0xff] }
 0x565   : > { %v8175_v56 = vpop.f32.mrf.mxu2  ;;  %v8881_v30 = vpop.f32.mrf.mxu0  ;;  %3623 = vst.msk [vmem:[#allocation2 + $0xb4] sm:$0xf] %vm3577_vm10, %v3524_v42 }
 0x566   : > { %v8527_v28 = vpop.f32.mrf.mxu3  ;;  %v8246_v13 = vadd.f32 %v8175_v56, %v7986_v0  ;;  %v7825_v5 = vpop.f32.mrf.mxu1  ;;  %4131 = vst.msk [vmem:[#allocation2 + $0xb4] sm:$0xf] %vm4085_vm11, %v4032_v11 }
 0x567   : > { %v8601_v41 = vadd.f32 %v8527_v28, %v8341_v1  ;;  %v7892_v36 = vadd.f32 %v7825_v5, %v7619_v57  ;;  %v8342_v60 = vld [vmem:[#allocation3 + $0x28] sm:$0xff]  ;;  %4130 = vst.msk [vmem:[#allocation2 + $0xb0] sm:$0xf] %vm4085_vm11, %v4030_v47  ;;  %v4538_v22 = vpop.permute.xlu0 %4537  ;;  %v4540_v21 = vpop.permute.xlu1 %4539  ;;  %v10189_v28 = vld [vmem:[#allocation2 + $0x98] sm:$0xff] }
 0x568   : > { %8278 = vst.msk [vmem:[#allocation3 + $0x30] sm:$0xff] %vm5731_vm4, %v8246_v13  ;;  %v8697_v59 = vld [vmem:[#allocation3 + $0x18] sm:$0xff] }
 0x569   : > { %8633 = vst.msk [vmem:[#allocation3 + $0x20] sm:$0xff] %vm5731_vm4, %v8601_v41  ;;  %v8957_v17 = vadd.f32 %v8881_v30, %v8697_v59  ;;  %v7988_v43 = vld [vmem:[#allocation3 + $0x40] sm:$0xff]  ;;  %v10205_v13 = vld [vmem:[#allocation2 + $0x98] sm:$0xff] }
 0x56a   : > { %v9020_v37 = vld [vmem:[#allocation3 + $0x10] sm:$0xff]  ;;  %7924 = vst.msk [vmem:[#allocation3 + $0x48] sm:$0xff] %vm5731_vm4, %v7892_v36  ;;  %v5334_v49 = vpop.permute.xlu2 %5333 }
 0x56b   : > { %9052 = vst.msk [vmem:[%s13528_s24 + $0x10] sm:$0xff] %vm5731_vm4, %v9020_v37 }
 0x56c   : > { %8989 = vst.msk [vmem:[#allocation3 + $0x18] sm:$0xff] %vm5731_vm4, %v8957_v17  ;;  %v7623_v17 = vld [vmem:[#allocation3 + $0x68] sm:$0xff] }
 0x56d   : > { %v8177_v4 = vpop.f32.mrf.mxu2  ;;  %v8884_v23 = vpop.f32.mrf.mxu0  ;;  %4638 = vst.msk [vmem:[#allocation2 + $0xb0] sm:$0xf] %vm4593_vm13, %v4538_v22 }
 0x56e   : > { %v8529_v12 = vpop.f32.mrf.mxu3  ;;  %v8247_v34 = vadd.f32 %v8177_v4, %v7987_v15  ;;  %v7828_v53 = vpop.f32.mrf.mxu1  ;;  %5434 = vst.msk [vmem:[#allocation2 + $0xb0] sm:$0xf] %vm5389_vm14, %v5334_v49 }
 0x56f   : > { %v8602_v54 = vadd.f32 %v8529_v12, %v8342_v60  ;;  %v7893_v48 = vadd.f32 %v7828_v53, %v7620_v27  ;;  %v8343_v52 = vld [vmem:[#allocation3 + $0x30] sm:$0xff]  ;;  %4639 = vst.msk [vmem:[#allocation2 + $0xb4] sm:$0xf] %vm4593_vm13, %v4540_v21  ;;  %v5336_v0 = vpop.permute.xlu0 %5335  ;;  %v5623_v41 = vpop.permute.xlu1 %5622 }
 0x570   : > { %8279 = vst.msk [vmem:[#allocation3 + $0x38] sm:$0xff] %vm5731_vm4, %v8247_v34  ;;  %v8698_v63 = vld [vmem:[#allocation3 + $0x20] sm:$0xff]  ;;  %10062 = vmatmul.msk.bf16.gmra.mxu0 %vm5915_vm3, %v10220_v31 }
 0x571   : > { %8634 = vst.msk [vmem:[#allocation3 + $0x28] sm:$0xff] %vm5731_vm4, %v8602_v54  ;;  %v8958_v6 = vadd.f32 %v8884_v23, %v8698_v63  ;;  %9807 = vmatmul.msk.bf16.gmra.mxu1 %vm7001_vm0, %v10171_v51  ;;  %v7989_v20 = vld [vmem:[#allocation3 + $0x48] sm:$0xff]  ;;  %v7624_v63 = vld [vmem:[#allocation3 + $0x70] sm:$0xff] }
 0x572   : > { %7925 = vst.msk [vmem:[#allocation3 + $0x50] sm:$0xff] %vm5731_vm4, %v7893_v48  ;;  %9892 = vmatmul.msk.bf16.gmra.mxu2 %vm5915_vm3, %v10188_v46  ;;  %v5625_v56 = vpop.permute.xlu2 %5624 }
 0x573   : > { %9977 = vmatmul.msk.bf16.gmra.mxu3 %vm5915_vm3, %v10204_v44  ;;  %v9021_v3 = vld [vmem:[#allocation3 + $0x18] sm:$0xff]  ;;  %8990 = vst.msk [vmem:[#allocation3 + $0x20] sm:$0xff] %vm5731_vm4, %v8958_v6  ;;  %v10173_v6 = vld [vmem:[#allocation2 + $0xa0] sm:$0xff] }
 0x574   : > { %9053 = vst.msk [vmem:[%s13528_s24 + $0x18] sm:$0xff] %vm5731_vm4, %v9021_v3  ;;  %v10222_v3 = vld [vmem:[#allocation2 + $0xa0] sm:$0xff] }
 0x575   : > { %v8180_v2 = vpop.f32.mrf.mxu2  ;;  %v8886_v40 = vpop.f32.mrf.mxu0  ;;  %5435 = vst.msk [vmem:[#allocation2 + $0xb4] sm:$0xf] %vm5389_vm14, %v5336_v0 }
 0x576   : > { %v8532_v25 = vpop.f32.mrf.mxu3  ;;  %v8248_v7 = vadd.f32 %v8180_v2, %v7988_v43  ;;  %v7830_v19 = vpop.f32.mrf.mxu1  ;;  %5724 = vst.msk [vmem:[#allocation2 + $0xb4] sm:$0xf] %vm5678_vm1, %v5625_v56 }
 0x577   : > { %v8603_v58 = vadd.f32 %v8532_v25, %v8343_v52  ;;  %v7894_v10 = vadd.f32 %v7830_v19, %v7621_v32  ;;  %v8344_v50 = vld [vmem:[#allocation3 + $0x38] sm:$0xff]  ;;  %5723 = vst.msk [vmem:[#allocation2 + $0xb0] sm:$0xf] %vm5678_vm1, %v5623_v41  ;;  %v2682_v60 = vpop.permute.xlu0 %2681  ;;  %v2684_v54 = vpop.permute.xlu1 %2683  ;;  %v10190_v25 = vld [vmem:[#allocation2 + $0xa0] sm:$0xff] }
 0x578   : > { %8280 = vst.msk [vmem:[#allocation3 + $0x40] sm:$0xff] %vm5731_vm4, %v8248_v7  ;;  %v8699_v24 = vld [vmem:[#allocation3 + $0x28] sm:$0xff]  ;;  %v10206_v7 = vld [vmem:[#allocation2 + $0xa0] sm:$0xff] }
 0x579   : > { %8635 = vst.msk [vmem:[#allocation3 + $0x30] sm:$0xff] %vm5731_vm4, %v8603_v58  ;;  %v8959_v35 = vadd.f32 %v8886_v40, %v8699_v24  ;;  %v7990_v30 = vld [vmem:[#allocation3 + $0x50] sm:$0xff] }
 0x57a   : > { %v9022_v29 = vld [vmem:[#allocation3 + $0x20] sm:$0xff]  ;;  %7926 = vst.msk [vmem:[#allocation3 + $0x58] sm:$0xff] %vm5731_vm4, %v7894_v10  ;;  %v3526_v12 = vpop.permute.xlu2 %3525 }
 0x57b   : > { %9054 = vst.msk [vmem:[%s13528_s24 + $0x20] sm:$0xff] %vm5731_vm4, %v9022_v29 }
 0x57c   : > { %8991 = vst.msk [vmem:[#allocation3 + $0x28] sm:$0xff] %vm5731_vm4, %v8959_v35  ;;  %v7625_v35 = vld [vmem:[#allocation3 + $0x78] sm:$0xff] }
 0x57d   : > { %v8182_v9 = vpop.f32.mrf.mxu2  ;;  %v8889_v18 = vpop.f32.mrf.mxu0  ;;  %2780 = vst.msk [vmem:[#allocation2 + $0xb8] sm:$0xf] %vm2733_vm9, %v2682_v60 }
 0x57e   : > { %v8534_v62 = vpop.f32.mrf.mxu3  ;;  %v8249_v61 = vadd.f32 %v8182_v9, %v7989_v20  ;;  %v7833_v16 = vpop.f32.mrf.mxu1  ;;  %3624 = vst.msk [vmem:[#allocation2 + $0xb8] sm:$0xf] %vm3577_vm10, %v3526_v12 }
 0x57f   : > { %v8604_v45 = vadd.f32 %v8534_v62, %v8344_v50  ;;  %v7895_v55 = vadd.f32 %v7833_v16, %v7622_v39  ;;  %v8345_v33 = vld [vmem:[#allocation3 + $0x40] sm:$0xff]  ;;  %2781 = vst.msk [vmem:[#allocation2 + $0xbc] sm:$0xf] %vm2733_vm9, %v2684_v54  ;;  %v3528_v43 = vpop.permute.xlu0 %3527  ;;  %v4034_v58 = vpop.permute.xlu1 %4033  ;;  %v7627_v54 = vld [vmem:[#allocation3 + $0x88] sm:$0xff] }
 0x580   : > { %8281 = vst.msk [vmem:[#allocation3 + $0x48] sm:$0xff] %vm5731_vm4, %v8249_v61  ;;  %v8700_v1 = vld [vmem:[#allocation3 + $0x30] sm:$0xff]  ;;  %10063 = vmatmul.msk.bf16.gmra.mxu0 %vm5915_vm3, %v10221_v14 }
 0x581   : > { %8636 = vst.msk [vmem:[#allocation3 + $0x38] sm:$0xff] %vm5731_vm4, %v8604_v45  ;;  %v8960_v57 = vadd.f32 %v8889_v18, %v8700_v1  ;;  %9808 = vmatmul.msk.bf16.gmra.mxu1 %vm7001_vm0, %v10172_v38  ;;  %v7991_v23 = vld [vmem:[#allocation3 + $0x58] sm:$0xff]  ;;  %v7626_v1 = vld [vmem:[#allocation3 + $0x80] sm:$0xff] }
 0x582   : > { %7927 = vst.msk [vmem:[#allocation3 + $0x60] sm:$0xff] %vm5731_vm4, %v7895_v55  ;;  %9893 = vmatmul.msk.bf16.gmra.mxu2 %vm5915_vm3, %v10189_v28  ;;  %v4036_v2 = vpop.permute.xlu2 %4035 }
 0x583   : > { %9978 = vmatmul.msk.bf16.gmra.mxu3 %vm5915_vm3, %v10205_v13  ;;  %v9023_v5 = vld [vmem:[#allocation3 + $0x28] sm:$0xff]  ;;  %8992 = vst.msk [vmem:[#allocation3 + $0x30] sm:$0xff] %vm5731_vm4, %v8960_v57 }
 0x584   : > { %9055 = vst.msk [vmem:[%s13528_s24 + $0x28] sm:$0xff] %vm5731_vm4, %v9023_v5  ;;  %v10223_v57 = vld [vmem:[#allocation2 + $0xa8] sm:$0xff] }
 0x585   : > { %v8185_v36 = vpop.f32.mrf.mxu2  ;;  %v8891_v15 = vpop.f32.mrf.mxu0  ;;  %3625 = vst.msk [vmem:[#allocation2 + $0xbc] sm:$0xf] %vm3577_vm10, %v3528_v43 }
 0x586   : > { %v8537_v26 = vpop.f32.mrf.mxu3  ;;  %v8250_v59 = vadd.f32 %v8185_v36, %v7990_v30  ;;  %v7835_v37 = vpop.f32.mrf.mxu1  ;;  %4133 = vst.msk [vmem:[#allocation2 + $0xbc] sm:$0xf] %vm4085_vm11, %v4036_v2  ;;  %v10191_v30 = vld [vmem:[#allocation2 + $0xa8] sm:$0xff] }
 0x587   : > { %v8605_v8 = vadd.f32 %v8537_v26, %v8345_v33  ;;  %v7896_v4 = vadd.f32 %v7835_v37, %v7623_v17  ;;  %v8346_v51 = vld [vmem:[#allocation3 + $0x48] sm:$0xff]  ;;  %4132 = vst.msk [vmem:[#allocation2 + $0xb8] sm:$0xf] %vm4085_vm11, %v4034_v58  ;;  %v4542_v62 = vpop.permute.xlu0 %4541  ;;  %v4544_v16 = vpop.permute.xlu1 %4543 }
 0x588   : > { %8282 = vst.msk [vmem:[#allocation3 + $0x50] sm:$0xff] %vm5731_vm4, %v8250_v59  ;;  %v8701_v34 = vld [vmem:[#allocation3 + $0x38] sm:$0xff]  ;;  %v10207_v36 = vld [vmem:[#allocation2 + $0xa8] sm:$0xff] }
 0x589   : > { %8637 = vst.msk [vmem:[#allocation3 + $0x40] sm:$0xff] %vm5731_vm4, %v8605_v8  ;;  %v8961_v27 = vadd.f32 %v8891_v15, %v8701_v34  ;;  %v7992_v40 = vld [vmem:[#allocation3 + $0x60] sm:$0xff] }
 0x58a   : > { %v9024_v53 = vld [vmem:[#allocation3 + $0x30] sm:$0xff]  ;;  %7928 = vst.msk [vmem:[#allocation3 + $0x68] sm:$0xff] %vm5731_vm4, %v7896_v4  ;;  %v5338_v45 = vpop.permute.xlu2 %5337 }
 0x58b   : > { %9056 = vst.msk [vmem:[%s13528_s24 + $0x30] sm:$0xff] %vm5731_vm4, %v9024_v53 }
 0x58c   : > { %8993 = vst.msk [vmem:[#allocation3 + $0x38] sm:$0xff] %vm5731_vm4, %v8961_v27 }
 0x58d   : > { %v8187_v48 = vpop.f32.mrf.mxu2  ;;  %v8894_v44 = vpop.f32.mrf.mxu0  ;;  %4640 = vst.msk [vmem:[#allocation2 + $0xb8] sm:$0xf] %vm4593_vm13, %v4542_v62 }
 0x58e   : > { %v8539_v31 = vpop.f32.mrf.mxu3  ;;  %v8251_v42 = vadd.f32 %v8187_v48, %v7991_v23  ;;  %v7838_v46 = vpop.f32.mrf.mxu1  ;;  %5436 = vst.msk [vmem:[#allocation2 + $0xb8] sm:$0xf] %vm5389_vm14, %v5338_v45 }
 0x58f   : > { %v8606_v11 = vadd.f32 %v8539_v31, %v8346_v51  ;;  %v7897_v47 = vadd.f32 %v7838_v46, %v7624_v63  ;;  %v8347_v22 = vld [vmem:[#allocation3 + $0x50] sm:$0xff]  ;;  %4641 = vst.msk [vmem:[#allocation2 + $0xbc] sm:$0xf] %vm4593_vm13, %v4544_v16  ;;  %v5340_v26 = vpop.permute.xlu0 %5339  ;;  %v5627_v17 = vpop.permute.xlu1 %5626 }
 0x590   : > { %8283 = vst.msk [vmem:[#allocation3 + $0x58] sm:$0xff] %vm5731_vm4, %v8251_v42  ;;  %v8702_v52 = vld [vmem:[#allocation3 + $0x40] sm:$0xff]  ;;  %10064 = vmatmul.msk.bf16.gmra.mxu0 %vm5915_vm3, %v10222_v3 }
 0x591   : > { %8638 = vst.msk [vmem:[#allocation3 + $0x48] sm:$0xff] %vm5731_vm4, %v8606_v11  ;;  %v8962_v32 = vadd.f32 %v8894_v44, %v8702_v52  ;;  %9809 = vmatmul.msk.bf16.gmra.mxu1 %vm7001_vm0, %v10173_v6  ;;  %v7993_v18 = vld [vmem:[#allocation3 + $0x68] sm:$0xff]  ;;  %v7628_v6 = vld [vmem:[#allocation3 + $0x90] sm:$0xff] }
 0x592   : > { %7929 = vst.msk [vmem:[#allocation3 + $0x70] sm:$0xff] %vm5731_vm4, %v7897_v47  ;;  %9894 = vmatmul.msk.bf16.gmra.mxu2 %vm5915_vm3, %v10190_v25  ;;  %v5629_v8 = vpop.permute.xlu2 %5628  ;;  %v10224_v52 = vld [vmem:[#allocation2 + $0xb0] sm:$0xff] }
 0x593   : > { %9979 = vmatmul.msk.bf16.gmra.mxu3 %vm5915_vm3, %v10206_v7  ;;  %v9025_v19 = vld [vmem:[#allocation3 + $0x38] sm:$0xff]  ;;  %8994 = vst.msk [vmem:[#allocation3 + $0x40] sm:$0xff] %vm5731_vm4, %v8962_v32  ;;  %v10208_v7 = vld [vmem:[#allocation2 + $0xb0] sm:$0xff] }
 0x594   : > { %9057 = vst.msk [vmem:[%s13528_s24 + $0x38] sm:$0xff] %vm5731_vm4, %v9025_v19 }
 0x595   : > { %v8190_v10 = vpop.f32.mrf.mxu2  ;;  %v8896_v20 = vpop.f32.mrf.mxu0  ;;  %5437 = vst.msk [vmem:[#allocation2 + $0xbc] sm:$0xf] %vm5389_vm14, %v5340_v26 }
 0x596   : > { %v8542_v49 = vpop.f32.mrf.mxu3  ;;  %v8252_v24 = vadd.f32 %v8190_v10, %v7992_v40  ;;  %v7840_v29 = vpop.f32.mrf.mxu1  ;;  %5726 = vst.msk [vmem:[#allocation2 + $0xbc] sm:$0xf] %vm5678_vm1, %v5629_v8 }
 0x597   : > { %v8607_v21 = vadd.f32 %v8542_v49, %v8347_v22  ;;  %v7898_v9 = vadd.f32 %v7840_v29, %v7625_v35  ;;  %v8348_v38 = vld [vmem:[#allocation3 + $0x58] sm:$0xff]  ;;  %5725 = vst.msk [vmem:[#allocation2 + $0xb8] sm:$0xf] %vm5678_vm1, %v5627_v17 }
 0x598   : > { %8284 = vst.msk [vmem:[#allocation3 + $0x60] sm:$0xff] %vm5731_vm4, %v8252_v24  ;;  %v8703_v50 = vld [vmem:[#allocation3 + $0x48] sm:$0xff] }
 0x599   : > { %8639 = vst.msk [vmem:[#allocation3 + $0x50] sm:$0xff] %vm5731_vm4, %v8607_v21  ;;  %v8963_v61 = vadd.f32 %v8896_v20, %v8703_v50  ;;  %v7994_v37 = vld [vmem:[#allocation3 + $0x70] sm:$0xff]  ;;  %v7629_v21 = vld [vmem:[#allocation3 + $0x98] sm:$0xff] }
 0x59a   : > { %v9026_v39 = vld [vmem:[#allocation3 + $0x40] sm:$0xff]  ;;  %7930 = vst.msk [vmem:[#allocation3 + $0x78] sm:$0xff] %vm5731_vm4, %v7898_v9 }
 0x59b   : > { %9058 = vst.msk [vmem:[%s13528_s24 + $0x40] sm:$0xff] %vm5731_vm4, %v9026_v39 }
 0x59c   : > { %8995 = vst.msk [vmem:[#allocation3 + $0x48] sm:$0xff] %vm5731_vm4, %v8963_v61 }
 0x59d   : > { %v8192_v55 = vpop.f32.mrf.mxu2  ;;  %v8899_v13 = vpop.f32.mrf.mxu0 }
 0x59e   : > { %v8544_v14 = vpop.f32.mrf.mxu3  ;;  %v8253_v0 = vadd.f32 %v8192_v55, %v7993_v18  ;;  %v7843_v28 = vpop.f32.mrf.mxu1  ;;  %v10225_v18 = vld [vmem:[#allocation2 + $0xb8] sm:$0xff] }
 0x59f   : > { %v8608_v56 = vadd.f32 %v8544_v14, %v8348_v38  ;;  %v7899_v41 = vadd.f32 %v7843_v28, %v7626_v1  ;;  %v8349_v4 = vld [vmem:[#allocation3 + $0x60] sm:$0xff] }
 0x5a0   : > { %8285 = vst.msk [vmem:[#allocation3 + $0x68] sm:$0xff] %vm5731_vm4, %v8253_v0  ;;  %v8704_v5 = vld [vmem:[#allocation3 + $0x50] sm:$0xff]  ;;  %10065 = vmatmul.msk.bf16.gmra.mxu0 %vm5915_vm3, %v10223_v57  ;;  %v7630_v14 = vld [vmem:[#allocation3 + $0xa0] sm:$0xff] }
 0x5a1   : > { %8640 = vst.msk [vmem:[#allocation3 + $0x58] sm:$0xff] %vm5731_vm4, %v8608_v56  ;;  %v8964_v33 = vadd.f32 %v8899_v13, %v8704_v5  ;;  %v7995_v42 = vld [vmem:[#allocation3 + $0x78] sm:$0xff] }
 0x5a2   : > { %7931 = vst.msk [vmem:[#allocation3 + $0x80] sm:$0xff] %vm5731_vm4, %v7899_v41  ;;  %9895 = vmatmul.msk.bf16.gmra.mxu2 %vm5915_vm3, %v10191_v30 }
 0x5a3   : > { %9980 = vmatmul.msk.bf16.gmra.mxu3 %vm5915_vm3, %v10207_v36  ;;  %v9027_v59 = vld [vmem:[#allocation3 + $0x48] sm:$0xff]  ;;  %8996 = vst.msk [vmem:[#allocation3 + $0x50] sm:$0xff] %vm5731_vm4, %v8964_v33 }
 0x5a4   : > { %9059 = vst.msk [vmem:[%s13528_s24 + $0x48] sm:$0xff] %vm5731_vm4, %v9027_v59  ;;  %v7631_v59 = vld [vmem:[#allocation3 + $0xa8] sm:$0xff] }
 0x5a5   : > { %v8195_v15 = vpop.f32.mrf.mxu2  ;;  %v8901_v53 = vpop.f32.mrf.mxu0 }
 0x5a6   : > { %v8547_v60 = vpop.f32.mrf.mxu3  ;;  %v8254_v12 = vadd.f32 %v8195_v15, %v7994_v37  ;;  %v7845_v27 = vpop.f32.mrf.mxu1 }
 0x5a7   : > { %v8609_v34 = vadd.f32 %v8547_v60, %v8349_v4  ;;  %v7900_v23 = vadd.f32 %v7845_v27, %v7627_v54  ;;  %v8350_v63 = vld [vmem:[#allocation3 + $0x68] sm:$0xff] }
 0x5a8   : > { %8286 = vst.msk [vmem:[#allocation3 + $0x70] sm:$0xff] %vm5731_vm4, %v8254_v12  ;;  %v8705_v48 = vld [vmem:[#allocation3 + $0x58] sm:$0xff] }
 0x5a9   : > { %8641 = vst.msk [vmem:[#allocation3 + $0x60] sm:$0xff] %vm5731_vm4, %v8609_v34  ;;  %v8965_v51 = vadd.f32 %v8901_v53, %v8705_v48  ;;  %v7996_v19 = vld [vmem:[#allocation3 + $0x80] sm:$0xff]  ;;  %v7632_v48 = vld [vmem:[#allocation3 + $0xb0] sm:$0xff] }
 0x5aa   : > { %v9028_v31 = vld [vmem:[#allocation3 + $0x50] sm:$0xff]  ;;  %7932 = vst.msk [vmem:[#allocation3 + $0x88] sm:$0xff] %vm5731_vm4, %v7900_v23 }
 0x5ab   : > { %9060 = vst.msk [vmem:[%s13528_s24 + $0x50] sm:$0xff] %vm5731_vm4, %v9028_v31 }
 0x5ac   : > { %8997 = vst.msk [vmem:[#allocation3 + $0x58] sm:$0xff] %vm5731_vm4, %v8965_v51 }
 0x5ad   : > { %v8197_v11 = vpop.f32.mrf.mxu2  ;;  %v8904_v43 = vpop.f32.mrf.mxu0 }
 0x5ae   : > { %v8549_v46 = vpop.f32.mrf.mxu3  ;;  %v8255_v44 = vadd.f32 %v8197_v11, %v7995_v42  ;;  %v7848_v3 = vpop.f32.mrf.mxu1 }
 0x5af   : > { %v8610_v47 = vadd.f32 %v8549_v46, %v8350_v63  ;;  %v7901_v2 = vadd.f32 %v7848_v3, %v7628_v6  ;;  %v8351_v10 = vld [vmem:[#allocation3 + $0x70] sm:$0xff] }
 0x5b0   : > { %8287 = vst.msk [vmem:[#allocation3 + $0x78] sm:$0xff] %vm5731_vm4, %v8255_v44  ;;  %v8706_v25 = vld [vmem:[#allocation3 + $0x60] sm:$0xff]  ;;  %10066 = vmatmul.msk.bf16.gmra.mxu0 %vm5915_vm3, %v10224_v52  ;;  %v7633_v52 = vld [vmem:[#allocation3 + $0xb8] sm:$0xff] }
 0x5b1   : > { %8642 = vst.msk [vmem:[#allocation3 + $0x68] sm:$0xff] %vm5731_vm4, %v8610_v47  ;;  %v8966_v58 = vadd.f32 %v8904_v43, %v8706_v25  ;;  %v7997_v61 = vld [vmem:[#allocation3 + $0x88] sm:$0xff] }
 0x5b2   : > { %7933 = vst.msk [vmem:[#allocation3 + $0x90] sm:$0xff] %vm5731_vm4, %v7901_v2 }
 0x5b3   : > { %9981 = vmatmul.msk.bf16.gmra.mxu3 %vm5915_vm3, %v10208_v7  ;;  %v9029_v32 = vld [vmem:[#allocation3 + $0x58] sm:$0xff]  ;;  %8998 = vst.msk [vmem:[#allocation3 + $0x60] sm:$0xff] %vm5731_vm4, %v8966_v58 }
 0x5b4   : > { %9061 = vst.msk [vmem:[%s13528_s24 + $0x58] sm:$0xff] %vm5731_vm4, %v9029_v32 }
 0x5b5   : > { %v8200_v40 = vpop.f32.mrf.mxu2  ;;  %v8906_v29 = vpop.f32.mrf.mxu0 }
 0x5b6   : > { %v8552_v22 = vpop.f32.mrf.mxu3  ;;  %v8256_v49 = vadd.f32 %v8200_v40, %v7996_v19  ;;  %v7850_v35 = vpop.f32.mrf.mxu1 }
 0x5b7   : > { %v8611_v24 = vadd.f32 %v8552_v22, %v8351_v10  ;;  %v7902_v20 = vadd.f32 %v7850_v35, %v7629_v21  ;;  %v8352_v39 = vld [vmem:[#allocation3 + $0x78] sm:$0xff] }
 0x5b8   : > { %8288 = vst.msk [vmem:[#allocation3 + $0x80] sm:$0xff] %vm5731_vm4, %v8256_v49  ;;  %v8707_v9 = vld [vmem:[#allocation3 + $0x68] sm:$0xff] }
 0x5b9   : > { %8643 = vst.msk [vmem:[#allocation3 + $0x70] sm:$0xff] %vm5731_vm4, %v8611_v24  ;;  %v8967_v50 = vadd.f32 %v8906_v29, %v8707_v9  ;;  %v7998_v57 = vld [vmem:[#allocation3 + $0x90] sm:$0xff]  ;;  %v7634_v29 = vld [vmem:[#allocation3 + $0xc0] sm:$0xff] }
 0x5ba   : > { %v9030_v62 = vld [vmem:[#allocation3 + $0x60] sm:$0xff]  ;;  %7934 = vst.msk [vmem:[#allocation3 + $0x98] sm:$0xff] %vm5731_vm4, %v7902_v20 }
 0x5bb   : > { %9062 = vst.msk [vmem:[%s13528_s24 + $0x60] sm:$0xff] %vm5731_vm4, %v9030_v62 }
 0x5bc   : > { %8999 = vst.msk [vmem:[#allocation3 + $0x68] sm:$0xff] %vm5731_vm4, %v8967_v50 }
 0x5bd   : > { %v8202_v45 = vpop.f32.mrf.mxu2  ;;  %v8909_v56 = vpop.f32.mrf.mxu0 }
 0x5be   : > { %v8554_v16 = vpop.f32.mrf.mxu3  ;;  %v8257_v55 = vadd.f32 %v8202_v45, %v7997_v61  ;;  %v7853_v0 = vpop.f32.mrf.mxu1 }
 0x5bf   : > { %v8612_v38 = vadd.f32 %v8554_v16, %v8352_v39  ;;  %v7903_v1 = vadd.f32 %v7853_v0, %v7630_v14  ;;  %v8353_v30 = vld [vmem:[#allocation3 + $0x80] sm:$0xff]  ;;  %v7635_v0 = vld [vmem:[#allocation3 + $0xc8] sm:$0xff] }
 0x5c0   : > { %8289 = vst.msk [vmem:[#allocation3 + $0x88] sm:$0xff] %vm5731_vm4, %v8257_v55  ;;  %v8708_v28 = vld [vmem:[#allocation3 + $0x70] sm:$0xff]  ;;  %10067 = vmatmul.msk.bf16.gmra.mxu0 %vm5915_vm3, %v10225_v18 }
 0x5c1   : > { %8644 = vst.msk [vmem:[#allocation3 + $0x78] sm:$0xff] %vm5731_vm4, %v8612_v38  ;;  %v8968_v13 = vadd.f32 %v8909_v56, %v8708_v28  ;;  %v7999_v12 = vld [vmem:[#allocation3 + $0x98] sm:$0xff] }
 0x5c2   : > { %7935 = vst.msk [vmem:[#allocation3 + $0xa0] sm:$0xff] %vm5731_vm4, %v7903_v1 }
 0x5c3   : > { %v9031_v41 = vld [vmem:[#allocation3 + $0x68] sm:$0xff]  ;;  %9000 = vst.msk [vmem:[#allocation3 + $0x70] sm:$0xff] %vm5731_vm4, %v8968_v13 }
 0x5c4   : > { %9063 = vst.msk [vmem:[%s13528_s24 + $0x68] sm:$0xff] %vm5731_vm4, %v9031_v41 }
 0x5c5   : > { %v8205_v5 = vpop.f32.mrf.mxu2  ;;  %v8911_v17 = vpop.f32.mrf.mxu0 }
 0x5c6   : > { %v8557_v36 = vpop.f32.mrf.mxu3  ;;  %v8258_v33 = vadd.f32 %v8205_v5, %v7998_v57  ;;  %v7855_v8 = vpop.f32.mrf.mxu1 }
 0x5c7   : > { %v8613_v26 = vadd.f32 %v8557_v36, %v8353_v30  ;;  %v7904_v37 = vadd.f32 %v7855_v8, %v7631_v59  ;;  %v8354_v54 = vld [vmem:[#allocation3 + $0x88] sm:$0xff]  ;;  %v7636_v8 = vld [vmem:[#allocation3 + $0xd0] sm:$0xff] }
 0x5c8   : > { %8290 = vst.msk [vmem:[#allocation3 + $0x90] sm:$0xff] %vm5731_vm4, %v8258_v33  ;;  %v8709_v15 = vld [vmem:[#allocation3 + $0x78] sm:$0xff] }
 0x5c9   : > { %8645 = vst.msk [vmem:[#allocation3 + $0x80] sm:$0xff] %vm5731_vm4, %v8613_v26  ;;  %v8969_v4 = vadd.f32 %v8911_v17, %v8709_v15  ;;  %v8000_v44 = vld [vmem:[#allocation3 + $0xa0] sm:$0xff] }
 0x5ca   : > { %v9032_v60 = vld [vmem:[#allocation3 + $0x70] sm:$0xff]  ;;  %7936 = vst.msk [vmem:[#allocation3 + $0xa8] sm:$0xff] %vm5731_vm4, %v7904_v37 }
 0x5cb   : > { %9064 = vst.msk [vmem:[%s13528_s24 + $0x70] sm:$0xff] %vm5731_vm4, %v9032_v60 }
 0x5cc   : > { %9001 = vst.msk [vmem:[#allocation3 + $0x78] sm:$0xff] %vm5731_vm4, %v8969_v4 }
 0x5cd   : > { %v8207_v34 = vpop.f32.mrf.mxu2  ;;  %v8914_v31 = vpop.f32.mrf.mxu0 }
 0x5ce   : > { %v8559_v27 = vpop.f32.mrf.mxu3  ;;  %v8259_v53 = vadd.f32 %v8207_v34, %v7999_v12  ;;  %v7858_v51 = vpop.f32.mrf.mxu1 }
 0x5cf   : > { %v8614_v23 = vadd.f32 %v8559_v27, %v8354_v54  ;;  %v7905_v42 = vadd.f32 %v7858_v51, %v7632_v48  ;;  %v8355_v6 = vld [vmem:[#allocation3 + $0x90] sm:$0xff]  ;;  %v7637_v51 = vld [vmem:[#allocation3 + $0xd8] sm:$0xff] }
 0x5d0   : > { %8291 = vst.msk [vmem:[#allocation3 + $0x98] sm:$0xff] %vm5731_vm4, %v8259_v53  ;;  %v8710_v11 = vld [vmem:[#allocation3 + $0x80] sm:$0xff] }
 0x5d1   : > { %8646 = vst.msk [vmem:[#allocation3 + $0x88] sm:$0xff] %vm5731_vm4, %v8614_v23  ;;  %v8970_v63 = vadd.f32 %v8914_v31, %v8710_v11  ;;  %v8001_v10 = vld [vmem:[#allocation3 + $0xa8] sm:$0xff] }
 0x5d2   : > { %7937 = vst.msk [vmem:[#allocation3 + $0xb0] sm:$0xff] %vm5731_vm4, %v7905_v42 }
 0x5d3   : > { %v9033_v46 = vld [vmem:[#allocation3 + $0x78] sm:$0xff]  ;;  %9002 = vst.msk [vmem:[#allocation3 + $0x80] sm:$0xff] %vm5731_vm4, %v8970_v63 }
 0x5d4   : > { %9065 = vst.msk [vmem:[%s13528_s24 + $0x78] sm:$0xff] %vm5731_vm4, %v9033_v46 }
 0x5d5   : > { %v8210_v47 = vpop.f32.mrf.mxu2  ;;  %v8916_v7 = vpop.f32.mrf.mxu0 }
 0x5d6   : > { %v8562_v3 = vpop.f32.mrf.mxu3  ;;  %v8260_v43 = vadd.f32 %v8210_v47, %v8000_v44  ;;  %v7860_v25 = vpop.f32.mrf.mxu1 }
 0x5d7   : > { %v8615_v2 = vadd.f32 %v8562_v3, %v8355_v6  ;;  %v7906_v58 = vadd.f32 %v7860_v25, %v7633_v52  ;;  %v8356_v49 = vld [vmem:[#allocation3 + $0x98] sm:$0xff]  ;;  %v7638_v25 = vld [vmem:[#allocation3 + $0xe0] sm:$0xff] }
 0x5d8   : > { %8292 = vst.msk [vmem:[#allocation3 + $0xa0] sm:$0xff] %vm5731_vm4, %v8260_v43  ;;  %v8711_v32 = vld [vmem:[#allocation3 + $0x88] sm:$0xff] }
 0x5d9   : > { %8647 = vst.msk [vmem:[#allocation3 + $0x90] sm:$0xff] %vm5731_vm4, %v8615_v2  ;;  %v8971_v19 = vadd.f32 %v8916_v7, %v8711_v32  ;;  %v8002_v39 = vld [vmem:[#allocation3 + $0xb0] sm:$0xff] }
 0x5da   : > { %v9034_v40 = vld [vmem:[#allocation3 + $0x80] sm:$0xff]  ;;  %7938 = vst.msk [vmem:[#allocation3 + $0xb8] sm:$0xff] %vm5731_vm4, %v7906_v58 }
 0x5db   : > { %9066 = vst.msk [vmem:[%s13528_s24 + $0x80] sm:$0xff] %vm5731_vm4, %v9034_v40 }
 0x5dc   : > { %9003 = vst.msk [vmem:[#allocation3 + $0x88] sm:$0xff] %vm5731_vm4, %v8971_v19 }
 0x5dd   : > { %v8212_v22 = vpop.f32.mrf.mxu2  ;;  %v8919_v9 = vpop.f32.mrf.mxu0 }
 0x5de   : > { %v8564_v24 = vpop.f32.mrf.mxu3  ;;  %v8261_v21 = vadd.f32 %v8212_v22, %v8001_v10  ;;  %v7863_v20 = vpop.f32.mrf.mxu1 }
 0x5df   : > { %v8616_v35 = vadd.f32 %v8564_v24, %v8356_v49  ;;  %v7907_v50 = vadd.f32 %v7863_v20, %v7634_v29  ;;  %v8357_v18 = vld [vmem:[#allocation3 + $0xa0] sm:$0xff]  ;;  %v7639_v20 = vld [vmem:[#allocation3 + $0xe8] sm:$0xff] }
 0x5e0   : > { %8293 = vst.msk [vmem:[#allocation3 + $0xa8] sm:$0xff] %vm5731_vm4, %v8261_v21  ;;  %v8712_v62 = vld [vmem:[#allocation3 + $0x90] sm:$0xff] }
 0x5e1   : > { %8648 = vst.msk [vmem:[#allocation3 + $0x98] sm:$0xff] %vm5731_vm4, %v8616_v35  ;;  %v8972_v61 = vadd.f32 %v8919_v9, %v8712_v62  ;;  %v8003_v5 = vld [vmem:[#allocation3 + $0xb8] sm:$0xff] }
 0x5e2   : > { %7939 = vst.msk [vmem:[#allocation3 + $0xc0] sm:$0xff] %vm5731_vm4, %v7907_v50 }
 0x5e3   : > { %v9035_v45 = vld [vmem:[#allocation3 + $0x88] sm:$0xff]  ;;  %9004 = vst.msk [vmem:[#allocation3 + $0x90] sm:$0xff] %vm5731_vm4, %v8972_v61 }
 0x5e4   : > { %9067 = vst.msk [vmem:[%s13528_s24 + $0x88] sm:$0xff] %vm5731_vm4, %v9035_v45 }
 0x5e5   : > { %v8215_v16 = vpop.f32.mrf.mxu2  ;;  %v8921_v1 = vpop.f32.mrf.mxu0 }
 0x5e6   : > { %v8567_v55 = vpop.f32.mrf.mxu3  ;;  %v8262_v38 = vadd.f32 %v8215_v16, %v8002_v39  ;;  %v7865_v56 = vpop.f32.mrf.mxu1 }
 0x5e7   : > { %v8617_v14 = vadd.f32 %v8567_v55, %v8357_v18  ;;  %v7908_v28 = vadd.f32 %v7865_v56, %v7635_v0  ;;  %v8358_v36 = vld [vmem:[#allocation3 + $0xa8] sm:$0xff]  ;;  %v7640_v56 = vld [vmem:[#allocation3 + $0xf0] sm:$0xff] }
 0x5e8   : > { %8294 = vst.msk [vmem:[#allocation3 + $0xb0] sm:$0xff] %vm5731_vm4, %v8262_v38  ;;  %v8713_v13 = vld [vmem:[#allocation3 + $0x98] sm:$0xff] }
 0x5e9   : > { %8649 = vst.msk [vmem:[#allocation3 + $0xa0] sm:$0xff] %vm5731_vm4, %v8617_v14  ;;  %v8973_v41 = vadd.f32 %v8921_v1, %v8713_v13  ;;  %v8004_v34 = vld [vmem:[#allocation3 + $0xc0] sm:$0xff] }
 0x5ea   : > { %v9036_v57 = vld [vmem:[#allocation3 + $0x90] sm:$0xff]  ;;  %7940 = vst.msk [vmem:[#allocation3 + $0xc8] sm:$0xff] %vm5731_vm4, %v7908_v28 }
 0x5eb   : > { %9068 = vst.msk [vmem:[%s13528_s24 + $0x90] sm:$0xff] %vm5731_vm4, %v9036_v57 }
 0x5ec   : > { %9005 = vst.msk [vmem:[#allocation3 + $0x98] sm:$0xff] %vm5731_vm4, %v8973_v41 }
 0x5ed   : > { %v8217_v30 = vpop.f32.mrf.mxu2  ;;  %v8924_v37 = vpop.f32.mrf.mxu0 }
 0x5ee   : > { %v8569_v33 = vpop.f32.mrf.mxu3  ;;  %v8263_v26 = vadd.f32 %v8217_v30, %v8003_v5  ;;  %v7868_v17 = vpop.f32.mrf.mxu1 }
 0x5ef   : > { %v8618_v59 = vadd.f32 %v8569_v33, %v8358_v36  ;;  %v7909_v15 = vadd.f32 %v7868_v17, %v7636_v8  ;;  %v8359_v27 = vld [vmem:[#allocation3 + $0xb0] sm:$0xff]  ;;  %v7641_v17 = vld [vmem:[#allocation3 + $0xf8] sm:$0xff] }
 0x5f0   : > { %8295 = vst.msk [vmem:[#allocation3 + $0xb8] sm:$0xff] %vm5731_vm4, %v8263_v26  ;;  %v8714_v4 = vld [vmem:[#allocation3 + $0xa0] sm:$0xff] }
 0x5f1   : > { %8650 = vst.msk [vmem:[#allocation3 + $0xa8] sm:$0xff] %vm5731_vm4, %v8618_v59  ;;  %v8974_v60 = vadd.f32 %v8924_v37, %v8714_v4  ;;  %v8005_v47 = vld [vmem:[#allocation3 + $0xc8] sm:$0xff] }
 0x5f2   : > { %7941 = vst.msk [vmem:[#allocation3 + $0xd0] sm:$0xff] %vm5731_vm4, %v7909_v15 }
 0x5f3   : > { %v9037_v12 = vld [vmem:[#allocation3 + $0x98] sm:$0xff]  ;;  %9006 = vst.msk [vmem:[#allocation3 + $0xa0] sm:$0xff] %vm5731_vm4, %v8974_v60 }
 0x5f4   : > { %9069 = vst.msk [vmem:[%s13528_s24 + $0x98] sm:$0xff] %vm5731_vm4, %v9037_v12 }
 0x5f5   : > { %v8220_v54 = vpop.f32.mrf.mxu2  ;;  %v8926_v42 = vpop.f32.mrf.mxu0 }
 0x5f6   : > { %v8572_v53 = vpop.f32.mrf.mxu3  ;;  %v8264_v23 = vadd.f32 %v8220_v54, %v8004_v34  ;;  %v7870_v31 = vpop.f32.mrf.mxu1 }
 0x5f7   : > { %v8619_v48 = vadd.f32 %v8572_v53, %v8359_v27  ;;  %v7910_v11 = vadd.f32 %v7870_v31, %v7637_v51  ;;  %v8360_v3 = vld [vmem:[#allocation3 + $0xb8] sm:$0xff] }
 0x5f8   : > { %8296 = vst.msk [vmem:[#allocation3 + $0xc0] sm:$0xff] %vm5731_vm4, %v8264_v23  ;;  %v8715_v63 = vld [vmem:[#allocation3 + $0xa8] sm:$0xff] }
 0x5f9   : > { %8651 = vst.msk [vmem:[#allocation3 + $0xb0] sm:$0xff] %vm5731_vm4, %v8619_v48  ;;  %v8975_v46 = vadd.f32 %v8926_v42, %v8715_v63  ;;  %v8006_v22 = vld [vmem:[#allocation3 + $0xd0] sm:$0xff] }
 0x5fa   : > { %v9038_v44 = vld [vmem:[#allocation3 + $0xa0] sm:$0xff]  ;;  %7942 = vst.msk [vmem:[#allocation3 + $0xd8] sm:$0xff] %vm5731_vm4, %v7910_v11 }
 0x5fb   : > { %9070 = vst.msk [vmem:[%s13528_s24 + $0xa0] sm:$0xff] %vm5731_vm4, %v9038_v44 }
 0x5fc   : > { %9007 = vst.msk [vmem:[#allocation3 + $0xa8] sm:$0xff] %vm5731_vm4, %v8975_v46 }
 0x5fd   : > { %v8222_v6 = vpop.f32.mrf.mxu2  ;;  %v8929_v58 = vpop.f32.mrf.mxu0 }
 0x5fe   : > { %v8574_v43 = vpop.f32.mrf.mxu3  ;;  %v8265_v2 = vadd.f32 %v8222_v6, %v8005_v47  ;;  %v7873_v7 = vpop.f32.mrf.mxu1 }
 0x5ff   : > { %v8620_v52 = vadd.f32 %v8574_v43, %v8360_v3  ;;  %v7911_v32 = vadd.f32 %v7873_v7, %v7638_v25  ;;  %v8361_v24 = vld [vmem:[#allocation3 + $0xc0] sm:$0xff] }
 0x600   : > { %8297 = vst.msk [vmem:[#allocation3 + $0xc8] sm:$0xff] %vm5731_vm4, %v8265_v2  ;;  %v8716_v19 = vld [vmem:[#allocation3 + $0xb0] sm:$0xff] }
 0x601   : > { %8652 = vst.msk [vmem:[#allocation3 + $0xb8] sm:$0xff] %vm5731_vm4, %v8620_v52  ;;  %v8976_v40 = vadd.f32 %v8929_v58, %v8716_v19  ;;  %v8007_v16 = vld [vmem:[#allocation3 + $0xd8] sm:$0xff] }
 0x602   : > { %7943 = vst.msk [vmem:[#allocation3 + $0xe0] sm:$0xff] %vm5731_vm4, %v7911_v32 }
 0x603   : > { %v9039_v10 = vld [vmem:[#allocation3 + $0xa8] sm:$0xff]  ;;  %9008 = vst.msk [vmem:[#allocation3 + $0xb0] sm:$0xff] %vm5731_vm4, %v8976_v40 }
 0x604   : > { %9071 = vst.msk [vmem:[%s13528_s24 + $0xa8] sm:$0xff] %vm5731_vm4, %v9039_v10 }
 0x605   : > { %v8225_v49 = vpop.f32.mrf.mxu2  ;;  %v8931_v50 = vpop.f32.mrf.mxu0 }
 0x606   : > { %v8577_v21 = vpop.f32.mrf.mxu3  ;;  %v8266_v35 = vadd.f32 %v8225_v49, %v8006_v22  ;;  %v7875_v9 = vpop.f32.mrf.mxu1 }
 0x607   : > { %v8621_v29 = vadd.f32 %v8577_v21, %v8361_v24  ;;  %v7912_v62 = vadd.f32 %v7875_v9, %v7639_v20  ;;  %v8362_v55 = vld [vmem:[#allocation3 + $0xc8] sm:$0xff] }
 0x608   : > { %8298 = vst.msk [vmem:[#allocation3 + $0xd0] sm:$0xff] %vm5731_vm4, %v8266_v35  ;;  %v8717_v61 = vld [vmem:[#allocation3 + $0xb8] sm:$0xff] }
 0x609   : > { %8653 = vst.msk [vmem:[#allocation3 + $0xc0] sm:$0xff] %vm5731_vm4, %v8621_v29  ;;  %v8977_v45 = vadd.f32 %v8931_v50, %v8717_v61  ;;  %v8008_v30 = vld [vmem:[#allocation3 + $0xe0] sm:$0xff] }
 0x60a   : > { %v9040_v39 = vld [vmem:[#allocation3 + $0xb0] sm:$0xff]  ;;  %7944 = vst.msk [vmem:[#allocation3 + $0xe8] sm:$0xff] %vm5731_vm4, %v7912_v62 }
 0x60b   : > { %9072 = vst.msk [vmem:[%s13528_s24 + $0xb0] sm:$0xff] %vm5731_vm4, %v9040_v39 }
 0x60c   : > { %9009 = vst.msk [vmem:[#allocation3 + $0xb8] sm:$0xff] %vm5731_vm4, %v8977_v45 }
 0x60d   : > { %v8227_v18 = vpop.f32.mrf.mxu2  ;;  %v8934_v28 = vpop.f32.mrf.mxu0 }
 0x60e   : > { %v8579_v38 = vpop.f32.mrf.mxu3  ;;  %v8267_v14 = vadd.f32 %v8227_v18, %v8007_v16  ;;  %v7878_v1 = vpop.f32.mrf.mxu1 }
 0x60f   : > { %v8622_v0 = vadd.f32 %v8579_v38, %v8362_v55  ;;  %v7913_v13 = vadd.f32 %v7878_v1, %v7640_v56  ;;  %v8363_v33 = vld [vmem:[#allocation3 + $0xd0] sm:$0xff] }
 0x610   : > { %8299 = vst.msk [vmem:[#allocation3 + $0xd8] sm:$0xff] %vm5731_vm4, %v8267_v14  ;;  %v8718_v41 = vld [vmem:[#allocation3 + $0xc0] sm:$0xff] }
 0x611   : > { %8654 = vst.msk [vmem:[#allocation3 + $0xc8] sm:$0xff] %vm5731_vm4, %v8622_v0  ;;  %v8978_v57 = vadd.f32 %v8934_v28, %v8718_v41  ;;  %v8009_v54 = vld [vmem:[#allocation3 + $0xe8] sm:$0xff] }
 0x612   : > { %7945 = vst.msk [vmem:[#allocation3 + $0xf0] sm:$0xff] %vm5731_vm4, %v7913_v13 }
 0x613   : > { %v9041_v5 = vld [vmem:[#allocation3 + $0xb8] sm:$0xff]  ;;  %9010 = vst.msk [vmem:[#allocation3 + $0xc0] sm:$0xff] %vm5731_vm4, %v8978_v57 }
 0x614   : > { %9073 = vst.msk [vmem:[%s13528_s24 + $0xb8] sm:$0xff] %vm5731_vm4, %v9041_v5 }
 0x615   : > { %v8230_v36 = vpop.f32.mrf.mxu2  ;;  %v8936_v15 = vpop.f32.mrf.mxu0 }
 0x616   : > { %v8582_v26 = vpop.f32.mrf.mxu3  ;;  %v8268_v59 = vadd.f32 %v8230_v36, %v8008_v30  ;;  %v7880_v37 = vpop.f32.mrf.mxu1 }
 0x617   : > { %v8623_v8 = vadd.f32 %v8582_v26, %v8363_v33  ;;  %v7914_v4 = vadd.f32 %v7880_v37, %v7641_v17  ;;  %v8364_v53 = vld [vmem:[#allocation3 + $0xd8] sm:$0xff] }
 0x618   : > { %8300 = vst.msk [vmem:[#allocation3 + $0xe0] sm:$0xff] %vm5731_vm4, %v8268_v59  ;;  %v8719_v60 = vld [vmem:[#allocation3 + $0xc8] sm:$0xff] }
 0x619   : > { %8655 = vst.msk [vmem:[#allocation3 + $0xd0] sm:$0xff] %vm5731_vm4, %v8623_v8  ;;  %v8979_v12 = vadd.f32 %v8936_v15, %v8719_v60  ;;  %v8010_v46 = vld [vmem:[#allocation3 + $0xf0] sm:$0xff] }
 0x61a   : > { %v9042_v34 = vld [vmem:[#allocation3 + $0xc0] sm:$0xff]  ;;  %7946 = vst.msk [vmem:[#allocation3 + $0xf8] sm:$0xff] %vm5731_vm4, %v7914_v4 }
 0x61b   : > { %9074 = vst.msk [vmem:[%s13528_s24 + $0xc0] sm:$0xff] %vm5731_vm4, %v9042_v34 }
 0x61c   : > { %9011 = vst.msk [vmem:[#allocation3 + $0xc8] sm:$0xff] %vm5731_vm4, %v8979_v12 }
 0x61d   : > { %v8232_v27 = vpop.f32.mrf.mxu2  ;;  %v8939_v31 = vpop.f32.mrf.mxu0 }
 0x61e   : > { %v8584_v23 = vpop.f32.mrf.mxu3  ;;  %v8269_v48 = vadd.f32 %v8232_v27, %v8009_v54 }
 0x61f   : > { %v8624_v51 = vadd.f32 %v8584_v23, %v8364_v53  ;;  %v8365_v47 = vld [vmem:[#allocation3 + $0xe0] sm:$0xff] }
 0x620   : > { %8301 = vst.msk [vmem:[#allocation3 + $0xe8] sm:$0xff] %vm5731_vm4, %v8269_v48  ;;  %v8720_v42 = vld [vmem:[#allocation3 + $0xd0] sm:$0xff] }
 0x621   : > { %8656 = vst.msk [vmem:[#allocation3 + $0xd8] sm:$0xff] %vm5731_vm4, %v8624_v51  ;;  %v8980_v11 = vadd.f32 %v8939_v31, %v8720_v42  ;;  %v8011_v58 = vld [vmem:[#allocation3 + $0xf8] sm:$0xff] }
 0x623   : > { %v9043_v63 = vld [vmem:[#allocation3 + $0xc8] sm:$0xff]  ;;  %9012 = vst.msk [vmem:[#allocation3 + $0xd0] sm:$0xff] %vm5731_vm4, %v8980_v11 }
 0x624   : > { %9075 = vst.msk [vmem:[%s13528_s24 + $0xc8] sm:$0xff] %vm5731_vm4, %v9043_v63 }
 0x625   : > { %v8235_v44 = vpop.f32.mrf.mxu2  ;;  %v8941_v2 = vpop.f32.mrf.mxu0 }
 0x626   : > { %v8587_v6 = vpop.f32.mrf.mxu3  ;;  %v8270_v3 = vadd.f32 %v8235_v44, %v8010_v46 }
 0x627   : > { %v8625_v43 = vadd.f32 %v8587_v6, %v8365_v47  ;;  %v8366_v19 = vld [vmem:[#allocation3 + $0xe8] sm:$0xff] }
 0x628   : > { %8302 = vst.msk [vmem:[#allocation3 + $0xf0] sm:$0xff] %vm5731_vm4, %v8270_v3  ;;  %v8721_v52 = vld [vmem:[#allocation3 + $0xd8] sm:$0xff] }
 0x629   : > { %8657 = vst.msk [vmem:[#allocation3 + $0xe0] sm:$0xff] %vm5731_vm4, %v8625_v43  ;;  %v8981_v25 = vadd.f32 %v8941_v2, %v8721_v52 }
 0x62a   : > { %v9044_v7 = vld [vmem:[#allocation3 + $0xd0] sm:$0xff] }
 0x62b   : > { %9076 = vst.msk [vmem:[%s13528_s24 + $0xd0] sm:$0xff] %vm5731_vm4, %v9044_v7 }
 0x62c   : > { %9013 = vst.msk [vmem:[#allocation3 + $0xd8] sm:$0xff] %vm5731_vm4, %v8981_v25 }
 0x62d   : > { %v8237_v32 = vpop.f32.mrf.mxu2  ;;  %v8944_v49 = vpop.f32.mrf.mxu0 }
 0x62e   : > { %v8589_v40 = vpop.f32.mrf.mxu3  ;;  %v8271_v10 = vadd.f32 %v8237_v32, %v8011_v58 }
 0x62f   : > { %v8626_v22 = vadd.f32 %v8589_v40, %v8366_v19  ;;  %v8367_v29 = vld [vmem:[#allocation3 + $0xf0] sm:$0xff] }
 0x630   : > { %8303 = vst.msk [vmem:[#allocation3 + $0xf8] sm:$0xff] %vm5731_vm4, %v8271_v10  ;;  %v8722_v24 = vld [vmem:[#allocation3 + $0xe0] sm:$0xff] }
 0x631   : > { %8658 = vst.msk [vmem:[#allocation3 + $0xe8] sm:$0xff] %vm5731_vm4, %v8626_v22  ;;  %v8982_v21 = vadd.f32 %v8944_v49, %v8722_v24 }
 0x633   : > { %v9045_v35 = vld [vmem:[#allocation3 + $0xd8] sm:$0xff]  ;;  %9014 = vst.msk [vmem:[#allocation3 + $0xe0] sm:$0xff] %vm5731_vm4, %v8982_v21 }
 0x634   : > { %9077 = vst.msk [vmem:[%s13528_s24 + $0xd8] sm:$0xff] %vm5731_vm4, %v9045_v35 }
 0x635   : > { %v8946_v50 = vpop.f32.mrf.mxu0 }
 0x636   : > { %v8592_v20 = vpop.f32.mrf.mxu3 }
 0x637   : > { %v8627_v9 = vadd.f32 %v8592_v20, %v8367_v29  ;;  %v8368_v39 = vld [vmem:[#allocation3 + $0xf8] sm:$0xff] }
 0x638   : > { %v8723_v62 = vld [vmem:[#allocation3 + $0xe8] sm:$0xff] }
 0x639   : > { %8659 = vst.msk [vmem:[#allocation3 + $0xf0] sm:$0xff] %vm5731_vm4, %v8627_v9  ;;  %v8983_v61 = vadd.f32 %v8946_v50, %v8723_v62 }
 0x63a   : > { %v9046_v45 = vld [vmem:[#allocation3 + $0xe0] sm:$0xff] }
 0x63b   : > { %9078 = vst.msk [vmem:[%s13528_s24 + $0xe0] sm:$0xff] %vm5731_vm4, %v9046_v45 }
 0x63c   : > { %9015 = vst.msk [vmem:[#allocation3 + $0xe8] sm:$0xff] %vm5731_vm4, %v8983_v61 }
 0x63d   : > { %v8949_v55 = vpop.f32.mrf.mxu0 }
 0x63e   : > { %v8594_v16 = vpop.f32.mrf.mxu3 }
 0x63f   : > { %v8628_v18 = vadd.f32 %v8594_v16, %v8368_v39 }
 0x640   : > { %v8724_v38 = vld [vmem:[#allocation3 + $0xf0] sm:$0xff] }
 0x641   : > { %8660 = vst.msk [vmem:[#allocation3 + $0xf8] sm:$0xff] %vm5731_vm4, %v8628_v18  ;;  %v8984_v14 = vadd.f32 %v8949_v55, %v8724_v38 }
 0x643   : > { %9016 = vst.msk [vmem:[#allocation3 + $0xf0] sm:$0xff] %vm5731_vm4, %v8984_v14  ;;  %v9047_v0 = vld [vmem:[#allocation3 + $0xe8] sm:$0xff] }
 0x644   : > { %9079 = vst.msk [vmem:[%s13528_s24 + $0xe8] sm:$0xff] %vm5731_vm4, %v9047_v0 }
 0x645   : > { %v8951_v56 = vpop.f32.mrf.mxu0 }
 0x648   : > { %v8725_v1 = vld [vmem:[#allocation3 + $0xf8] sm:$0xff] }
 0x649   : > { %v8985_v28 = vadd.f32 %v8951_v56, %v8725_v1 }
 0x64a   : > { %v9048_v13 = vld [vmem:[#allocation3 + $0xf0] sm:$0xff] }
 0x64b   : > { %9080 = vst.msk [vmem:[%s13528_s24 + $0xf0] sm:$0xff] %vm5731_vm4, %v9048_v13 }
 0x64c   : > { %9017 = vst.msk [vmem:[#allocation3 + $0xf8] sm:$0xff] %vm5731_vm4, %v8985_v28 }
 0x653   : > { %v9049_v41 = vld [vmem:[#allocation3 + $0xf8] sm:$0xff] }
 0x654   : > { %9081 = vst.msk [vmem:[%s13528_s24 + $0xf8] sm:$0xff] %vm5731_vm4, %v9049_v41 }
 0x655 PF: > { %s13_s14 = sadd.s32 1, %s10286_s14   ;;  %s13787_s12 = smov %s10282_s13 }
 0x656   : > { %p10_p5 = scmp.ge.s32.totalorder %s13_s14, 4   ;;  %s13788_s13 = smov %s13790_s15 }
 0x658   :  { %12 = sbr.rel (!%p10_p5) target bundleno = 2 (0x2), region = 79 }

</bundles_post_ra>
